<compile_context>
chip_gen: v5e
topology: v5e:2x2
jax: 0.10.0
libtpu: 0.0.40
codegen_flags: <defaults>
</compile_context>

<pallas_src>
import functools

import jax
import jax.numpy as jnp
from jax.experimental import pallas as pl
from jax.experimental.pallas import tpu as pltpu

LANE = 128          # lane width / feature-dim padding quantum
TM = 256            # destination-row tile (256 fills v6e/v7x MXU; keep >=2 dst tiles for megacore)
TK = 256            # source-row tile (reduction axis); use 128 on v5e (native 128x128 MXU)
_NEG_BIG = -1e30    # finite "-inf" (avoids inf-inf NaNs in the online softmax)


# ---------------------------------------------------------------------------
# Fused GATConv + skip-Linear layer kernel (online softmax over source tiles)
# ---------------------------------------------------------------------------

def _gat_layer_kernel(mask_ref, hs_ref, asrc_ref, adst_ref, xd_ref, wl_ref, b_ref,
                      o_ref, m_scr, l_scr, acc_scr, *, relu, negative_slope=0.2):
    k = pl.program_id(1)

    @pl.when(k == 0)
    def _init():
        m_scr[...] = jnp.full_like(m_scr, _NEG_BIG)
        l_scr[...] = jnp.zeros_like(l_scr)
        acc_scr[...] = jnp.zeros_like(acc_scr)

    # raw logits: a_dst[row] + a_src[col]; LeakyReLU folded as max(s, slope*s)
    s = adst_ref[...] + asrc_ref[...]                          # [TM,TK] f32
    s = jnp.maximum(s, negative_slope * s)                     # LeakyReLU (0<slope<1)
    edge = mask_ref[...] != 0                                   # int8 compare, no f32 cast
    s = jnp.where(edge, s, _NEG_BIG)

    # --- online softmax over the source (reduction) axis ---
    m_prev = m_scr[...]
    m_new = jnp.maximum(m_prev, jnp.max(s, axis=-1, keepdims=True))
    scale = jnp.exp(m_prev - m_new)
    p = jnp.where(edge, jnp.exp(s - m_new), 0.0)               # zero off-edges (empty rows safe)
    l_scr[...] = scale * l_scr[...] + jnp.sum(p, axis=-1, keepdims=True)
    acc_scr[...] = scale * acc_scr[...] + jnp.dot(
        p.astype(jnp.bfloat16), hs_ref[...], preferred_element_type=jnp.float32)
    m_scr[...] = m_new

    @pl.when(k == pl.num_programs(1) - 1)
    def _finalize():
        skip = jnp.dot(xd_ref[...], wl_ref[...],
                       preferred_element_type=jnp.float32) + b_ref[...]     # [TM,C]
        l = l_scr[...]
        inv_l = jnp.where(l > 0.0, 1.0 / l, 0.0)      # exact; isolated dst rows -> skip only
        out = acc_scr[...] * inv_l + skip
        if relu:
            out = jnp.maximum(out, 0.0)
        o_ref[...] = out.astype(o_ref.dtype)


def gat_layer(x, mask, conv, lin, *, relu, out_dtype=jnp.bfloat16, tm=TM, tk=TK):
    """x: [N_pad, F_pad] bf16; mask: [N_pad, N_pad] int8 (0/1). Returns [N_pad, C_pad]."""
    n, f = x.shape
    c = conv['w_src'].shape[1]
    assert n % tm == 0 and n % tk == 0 and f % LANE == 0 and c % LANE == 0

    # --- one-shot precompute (plain XLA matmuls; removes in-kernel recompute) ---
    h_src_f32 = jnp.dot(x, conv['w_src'], preferred_element_type=jnp.float32)   # [N,C]
    a_src = jnp.sum(h_src_f32 * conv['att_src'].astype(jnp.float32),
                    axis=-1).reshape(1, n)                                       # [1,N] f32
    h_src = h_src_f32.astype(jnp.bfloat16)                                       # streamed operand
    w_att_dst = jnp.dot(conv['w_dst'].astype(jnp.float32),
                        conv['att_dst'].astype(jnp.float32).T)                   # [F,1]
    a_dst = jnp.dot(x, w_att_dst.astype(jnp.bfloat16),
                    preferred_element_type=jnp.float32)                          # [N,1] f32
    bias = (conv['bias'] + lin['b']).astype(jnp.float32)                         # [1,C]

    grid = (n // tm, n // tk)
    kernel = functools.partial(_gat_layer_kernel, relu=relu)

    out_bytes = jnp.dtype(out_dtype).itemsize
    cost = pl.CostEstimate(
        flops=int(2 * n * n * c + 2 * n * f * c),
        transcendentals=int(n * n),
        bytes_accessed=int(n * n                        # int8 adjacency mask
                           + (n // tm) * n * c * 2      # H_src re-streamed per dst tile
                           + (n // tm) * n * 4          # a_src re-streamed per dst tile
                           + n * (f * 2 + 4)            # x (dst rows) + a_dst
                           + f * c * 2 + c * 4          # resident W_lin + bias
                           + n * c * out_bytes),
    )

    return pl.pallas_call(
        kernel,
        out_shape=jax.ShapeDtypeStruct((n, c), out_dtype),
        grid_spec=pltpu.PrefetchScalarGridSpec(
            num_scalar_prefetch=0,
            grid=grid,
            in_specs=[
                pl.BlockSpec((tm, tk), lambda i, k: (i, k)),   # adjacency mask tile (int8)
                pl.BlockSpec((tk, c), lambda i, k: (k, 0)),    # H_src tile (bf16)
                pl.BlockSpec((1, tk), lambda i, k: (0, k)),    # a_src tile (f32)
                pl.BlockSpec((tm, 1), lambda i, k: (i, 0)),    # a_dst tile (f32)
                pl.BlockSpec((tm, f), lambda i, k: (i, 0)),    # x (dst rows, skip path)
                pl.BlockSpec((f, c), lambda i, k: (0, 0)),     # W_lin (VMEM resident)
                pl.BlockSpec((1, c), lambda i, k: (0, 0)),     # bias  (VMEM resident)
            ],
            out_specs=pl.BlockSpec((tm, c), lambda i, k: (i, 0)),
            scratch_shapes=[
                pltpu.VMEM((tm, 1), jnp.float32),              # running max m
                pltpu.VMEM((tm, 1), jnp.float32),              # running denom l
                pltpu.VMEM((tm, c), jnp.float32),              # output accumulator
            ]),
        compiler_params=pltpu.CompilerParams(
            dimension_semantics=("parallel", "arbitrary"),
            vmem_limit_bytes=32 * 1024 * 1024),
        cost_estimate=cost,
    )(mask, h_src, a_src, a_dst, x, lin['w'], bias)


# ---------------------------------------------------------------------------
# Glue: padding, dense mask construction, parameter init, model forward
# ---------------------------------------------------------------------------

def _round_up(n, m):
    return (n + m - 1) // m * m


def _pad2(a, rows, cols):
    return jnp.pad(a, ((0, rows - a.shape[0]), (0, cols - a.shape[1])))


def _pad_conv(conv, f_pad, c_pad):
    return dict(
        w_src=_pad2(conv['w_src'], f_pad, c_pad).astype(jnp.bfloat16),
        w_dst=_pad2(conv['w_dst'], f_pad, c_pad).astype(jnp.bfloat16),
        att_src=_pad2(conv['att_src'], 1, c_pad).astype(jnp.bfloat16),
        att_dst=_pad2(conv['att_dst'], 1, c_pad).astype(jnp.bfloat16),
        bias=_pad2(conv['bias'], 1, c_pad).astype(jnp.float32),
    )


def _pad_lin(lin, f_pad, c_pad):
    return dict(w=_pad2(lin['w'], f_pad, c_pad).astype(jnp.bfloat16),
                b=_pad2(lin['b'], 1, c_pad).astype(jnp.float32))


def init_params(key, in_ch, hidden, out_ch):
    ks = jax.random.split(key, 12)

    def u(k, shape, fan_in):
        s = 1.0 / jnp.sqrt(jnp.float32(fan_in))
        return jax.random.uniform(k, shape, jnp.float32, -s, s)

    def conv_params(k0, k1, k2, k3, fin, fout):
        return dict(w_src=u(k0, (fin, fout), fin),
                    w_dst=u(k1, (fin, fout), fin),
                    att_src=u(k2, (1, fout), fout),
                    att_dst=u(k3, (1, fout), fout),
                    bias=jnp.zeros((1, fout), jnp.float32))

    def lin_params(k0, k1, fin, fout):
        return dict(w=u(k0, (fin, fout), fin), b=u(k1, (1, fout), fin))

    return dict(
        conv1=conv_params(ks[0], ks[1], ks[2], ks[3], in_ch, hidden),
        lin1=lin_params(ks[4], ks[5], in_ch, hidden),
        conv2=conv_params(ks[6], ks[7], ks[8], ks[9], hidden, out_ch),
        lin2=lin_params(ks[10], ks[11], hidden, out_ch),
    )


def gat_forward(params, x, edge_index, hidden, out_ch):
    """x: [N, F] f32, edge_index: [2, E] int (row 0 = src, row 1 = dst)."""
    n, f_in = x.shape
    n_pad = _round_up(n, max(TM, TK))
    f_pad = _round_up(f_in, LANE)
    h_pad = _round_up(hidden, LANE)
    o_pad = _round_up(out_ch, LANE)

    x_p = _pad2(x, n_pad, f_pad).astype(jnp.bfloat16)
    src, dst = edge_index[0], edge_index[1]
    # dense 0/1 incidence mask [dst, src], built directly as int8
    # (duplicate/parallel edges collapse; see TODO at top)
    mask = jnp.zeros((n_pad, n_pad), jnp.int8).at[dst, src].set(1)

    # layer 1: conv1(x) + lin1(x), ReLU fused in-kernel, bf16 slab out
    h = gat_layer(x_p, mask,
                  _pad_conv(params['conv1'], f_pad, h_pad),
                  _pad_lin(params['lin1'], f_pad, h_pad),
                  relu=True, out_dtype=jnp.bfloat16)
    # layer 2: conv2(h) + lin2(h), f32 out
    out = gat_layer(h, mask,
                    _pad_conv(params['conv2'], h_pad, o_pad),
                    _pad_lin(params['lin2'], h_pad, o_pad),
                    relu=False, out_dtype=jnp.float32)
    return out[:n, :out_ch]


# ---------------------------------------------------------------------------
# Example run
# ---------------------------------------------------------------------------

if __name__ == "__main__":
    IN_CH = 32
    HIDDEN = 64
    OUT_CH = 32
    N_NODES = 300          # pads to 512 -> 2x2 grid of 256-row tiles (exercises the k-reduction)
    N_EDGES = 1200

    key = jax.random.PRNGKey(0)
    kx, ksrc, kdst, kpar = jax.random.split(key, 4)

    x = jax.random.normal(kx, (N_NODES, IN_CH), jnp.float32)
    edge_index = jnp.stack([
        jax.random.randint(ksrc, (N_EDGES,), 0, N_NODES),
        jax.random.randint(kdst, (N_EDGES,), 0, N_NODES),
    ])
    params = init_params(kpar, IN_CH, HIDDEN, OUT_CH)

    fwd = jax.jit(gat_forward, static_argnames=("hidden", "out_ch"))
    out = fwd(params, x, edge_index, hidden=HIDDEN, out_ch=OUT_CH)
    jax.block_until_ready(out)

    assert out.shape == (N_NODES, OUT_CH), out.shape
    assert bool(jnp.all(jnp.isfinite(out)))
    print("KERNEL_OK")
</pallas_src>

<mosaic_0001>
module attributes {stable_mosaic.version = 11 : i64} {
  func.func @_gat_layer_kernel(%arg0: i32, %arg1: i32, %arg2: memref<256x256xi8, #tpu.memory_space<vmem>>, %arg3: memref<256x128xbf16, #tpu.memory_space<vmem>>, %arg4: memref<1x256xf32, #tpu.memory_space<vmem>>, %arg5: memref<256x1xf32, #tpu.memory_space<vmem>>, %arg6: memref<256x128xbf16, #tpu.memory_space<vmem>>, %arg7: memref<128x128xbf16, #tpu.memory_space<vmem>>, %arg8: memref<1x128xf32, #tpu.memory_space<vmem>>, %arg9: memref<256x128xbf16, #tpu.memory_space<vmem>>, %arg10: memref<256x1xf32, #tpu.memory_space<vmem>>, %arg11: memref<256x1xf32, #tpu.memory_space<vmem>>, %arg12: memref<256x128xf32, #tpu.memory_space<vmem>>) attributes {dimension_semantics = [#tpu.dimension_semantics<parallel>, #tpu.dimension_semantics<arbitrary>], iteration_bounds = array<i64: 2, 2>, scalar_prefetch = 0 : i64, scratch_operands = 3 : i64, tpu.core_type = #tpu.core_type<tc>, window_params = [{transform_indices = @transform_0, window_bounds = array<i64: 256, 256>}, {transform_indices = @transform_1, window_bounds = array<i64: 256, 128>}, {transform_indices = @transform_2, window_bounds = array<i64: 1, 256>}, {transform_indices = @transform_3, window_bounds = array<i64: 256, 1>}, {transform_indices = @transform_4, window_bounds = array<i64: 256, 128>}, {pipeline_mode = #tpu.pipeline_mode<synchronous>, transform_indices = @transform_5, window_bounds = array<i64: 128, 128>}, {pipeline_mode = #tpu.pipeline_mode<synchronous>, transform_indices = @transform_6, window_bounds = array<i64: 1, 128>}, {transform_indices = @transform_7, window_bounds = array<i64: 256, 128>}]} {
    %c0_i32 = arith.constant 0 : i32
    %0 = arith.cmpi eq, %arg1, %c0_i32 : i32
    %1 = arith.extui %0 : i1 to i32
    %c0_i32_0 = arith.constant 0 : i32
    %2 = arith.cmpi ne, %1, %c0_i32_0 : i32
    scf.if %2 {
      %cst_26 = arith.constant -1.000000e+30 : f32
      %45 = vector.broadcast %cst_26 : f32 to vector<256x1xf32>
      %c0_27 = arith.constant 0 : index
      %c0_28 = arith.constant 0 : index
      %46 = vector.load %arg10[%c0_27, %c0_28] : memref<256x1xf32, #tpu.memory_space<vmem>>, vector<256x1xf32>
      tpu.vector_store %arg10[%c0_27, %c0_28], %45 {strides = array<i32>} : memref<256x1xf32, #tpu.memory_space<vmem>>, vector<256x1xf32>,
      %cst_29 = arith.constant 0.000000e+00 : f32
      %47 = vector.broadcast %cst_29 : f32 to vector<256x1xf32>
      %c0_30 = arith.constant 0 : index
      %c0_31 = arith.constant 0 : index
      %48 = vector.load %arg11[%c0_30, %c0_31] : memref<256x1xf32, #tpu.memory_space<vmem>>, vector<256x1xf32>
      tpu.vector_store %arg11[%c0_30, %c0_31], %47 {strides = array<i32>} : memref<256x1xf32, #tpu.memory_space<vmem>>, vector<256x1xf32>,
      %cst_32 = arith.constant 0.000000e+00 : f32
      %49 = vector.broadcast %cst_32 : f32 to vector<256x128xf32>
      %c0_33 = arith.constant 0 : index
      %c0_34 = arith.constant 0 : index
      %50 = vector.load %arg12[%c0_33, %c0_34] : memref<256x128xf32, #tpu.memory_space<vmem>>, vector<256x128xf32>
      tpu.vector_store %arg12[%c0_33, %c0_34], %49 {strides = array<i32>} : memref<256x128xf32, #tpu.memory_space<vmem>>, vector<256x128xf32>,
    } else {
    }
    %c0 = arith.constant 0 : index
    %c0_1 = arith.constant 0 : index
    %3 = vector.load %arg5[%c0, %c0_1] : memref<256x1xf32, #tpu.memory_space<vmem>>, vector<256x1xf32>
    %c0_2 = arith.constant 0 : index
    %c0_3 = arith.constant 0 : index
    %4 = vector.load %arg4[%c0_2, %c0_3] : memref<1x256xf32, #tpu.memory_space<vmem>>, vector<1x256xf32>
    %5 = vector.broadcast %3 : vector<256x1xf32> to vector<256x256xf32>
    %6 = vector.broadcast %4 : vector<1x256xf32> to vector<256x256xf32>
    %7 = arith.addf %5, %6 : vector<256x256xf32>
    %cst = arith.constant 2.000000e-01 : f32
    %8 = vector.broadcast %cst : f32 to vector<256x256xf32>
    %9 = arith.mulf %8, %7 : vector<256x256xf32>
    %10 = arith.maximumf %7, %9 : vector<256x256xf32>
    %c0_4 = arith.constant 0 : index
    %c0_5 = arith.constant 0 : index
    %11 = vector.load %arg2[%c0_4, %c0_5] : memref<256x256xi8, #tpu.memory_space<vmem>>, vector<256x256xi8>
    %c0_i8 = arith.constant 0 : i8
    %12 = vector.broadcast %c0_i8 : i8 to vector<256x256xi8>
    %13 = arith.cmpi ne, %11, %12 : vector<256x256xi8>
    %cst_6 = arith.constant -1.000000e+30 : f32
    %14 = vector.broadcast %cst_6 : f32 to vector<256x256xf32>
    %15 = arith.select %13, %10, %14 : vector<256x256xi1>, vector<256x256xf32>
    %c0_7 = arith.constant 0 : index
    %c0_8 = arith.constant 0 : index
    %16 = vector.load %arg10[%c0_7, %c0_8] : memref<256x1xf32, #tpu.memory_space<vmem>>, vector<256x1xf32>
    %cst_9 = arith.constant dense<0xFF800000> : vector<256xf32>
    %17 = vector.multi_reduction <maximumf>, %15, %cst_9 [1] : vector<256x256xf32> to vector<256xf32>
    %18 = vector.shape_cast %17 : vector<256xf32> to vector<256x1xf32>
    %19 = arith.maximumf %16, %18 : vector<256x1xf32>
    %20 = arith.subf %16, %19 : vector<256x1xf32>
    %21 = math.exp %20 : vector<256x1xf32>
    %22 = vector.broadcast %19 : vector<256x1xf32> to vector<256x256xf32>
    %23 = arith.subf %15, %22 : vector<256x256xf32>
    %24 = math.exp %23 : vector<256x256xf32>
    %cst_10 = arith.constant 0.000000e+00 : f32
    %25 = vector.broadcast %cst_10 : f32 to vector<256x256xf32>
    %26 = arith.select %13, %24, %25 : vector<256x256xi1>, vector<256x256xf32>
    %c0_11 = arith.constant 0 : index
    %c0_12 = arith.constant 0 : index
    %27 = vector.load %arg11[%c0_11, %c0_12] : memref<256x1xf32, #tpu.memory_space<vmem>>, vector<256x1xf32>
    %28 = arith.mulf %21, %27 : vector<256x1xf32>
    %cst_13 = arith.constant dense<0.000000e+00> : vector<256xf32>
    %29 = vector.multi_reduction <add>, %26, %cst_13 [1] : vector<256x256xf32> to vector<256xf32>
    %30 = vector.shape_cast %29 : vector<256xf32> to vector<256x1xf32>
    %31 = arith.addf %28, %30 : vector<256x1xf32>
    %c0_14 = arith.constant 0 : index
    %c0_15 = arith.constant 0 : index
    %32 = vector.load %arg11[%c0_14, %c0_15] : memref<256x1xf32, #tpu.memory_space<vmem>>, vector<256x1xf32>
    tpu.vector_store %arg11[%c0_14, %c0_15], %31 {strides = array<i32>} : memref<256x1xf32, #tpu.memory_space<vmem>>, vector<256x1xf32>,
    %c0_16 = arith.constant 0 : index
    %c0_17 = arith.constant 0 : index
    %33 = vector.load %arg12[%c0_16, %c0_17] : memref<256x128xf32, #tpu.memory_space<vmem>>, vector<256x128xf32>
    %34 = vector.broadcast %21 : vector<256x1xf32> to vector<256x128xf32>
    %35 = arith.mulf %34, %33 : vector<256x128xf32>
    %36 = arith.truncf %26 : vector<256x256xf32> to vector<256x256xbf16>
    %c0_18 = arith.constant 0 : index
    %c0_19 = arith.constant 0 : index
    %37 = vector.load %arg3[%c0_18, %c0_19] : memref<256x128xbf16, #tpu.memory_space<vmem>>, vector<256x128xbf16>
    %cst_20 = arith.constant dense<0.000000e+00> : vector<256x128xf32>
    %38 = tpu.matmul %36, %37, %cst_20 {dimension_numbers = #tpu.dot_dimension_numbers<[1], [0], [0], [1], [0, 0, 1, 1], [], []>} : vector<256x256xbf16>, vector<256x128xbf16>, vector<256x128xf32> -> vector<256x128xf32>
    %39 = arith.addf %35, %38 : vector<256x128xf32>
    %c0_21 = arith.constant 0 : index
    %c0_22 = arith.constant 0 : index
    %40 = vector.load %arg12[%c0_21, %c0_22] : memref<256x128xf32, #tpu.memory_space<vmem>>, vector<256x128xf32>
    tpu.vector_store %arg12[%c0_21, %c0_22], %39 {strides = array<i32>} : memref<256x128xf32, #tpu.memory_space<vmem>>, vector<256x128xf32>,
    %c0_23 = arith.constant 0 : index
    %c0_24 = arith.constant 0 : index
    %41 = vector.load %arg10[%c0_23, %c0_24] : memref<256x1xf32, #tpu.memory_space<vmem>>, vector<256x1xf32>
    tpu.vector_store %arg10[%c0_23, %c0_24], %19 {strides = array<i32>} : memref<256x1xf32, #tpu.memory_space<vmem>>, vector<256x1xf32>,
    %c1_i32 = arith.constant 1 : i32
    %42 = arith.cmpi eq, %arg1, %c1_i32 : i32
    %43 = arith.extui %42 : i1 to i32
    %c0_i32_25 = arith.constant 0 : i32
    %44 = arith.cmpi ne, %43, %c0_i32_25 : i32
    scf.if %44 {
      %c0_26 = arith.constant 0 : index
      %c0_27 = arith.constant 0 : index
      %45 = vector.load %arg6[%c0_26, %c0_27] : memref<256x128xbf16, #tpu.memory_space<vmem>>, vector<256x128xbf16>
      %c0_28 = arith.constant 0 : index
      %c0_29 = arith.constant 0 : index
      %46 = vector.load %arg7[%c0_28, %c0_29] : memref<128x128xbf16, #tpu.memory_space<vmem>>, vector<128x128xbf16>
      %cst_30 = arith.constant dense<0.000000e+00> : vector<256x128xf32>
      %47 = tpu.matmul %45, %46, %cst_30 {dimension_numbers = #tpu.dot_dimension_numbers<[1], [0], [0], [1], [0, 0, 1, 1], [], []>} : vector<256x128xbf16>, vector<128x128xbf16>, vector<256x128xf32> -> vector<256x128xf32>
      %c0_31 = arith.constant 0 : index
      %c0_32 = arith.constant 0 : index
      %48 = vector.load %arg8[%c0_31, %c0_32] : memref<1x128xf32, #tpu.memory_space<vmem>>, vector<1x128xf32>
      %49 = vector.broadcast %48 : vector<1x128xf32> to vector<256x128xf32>
      %50 = arith.addf %47, %49 : vector<256x128xf32>
      %c0_33 = arith.constant 0 : index
      %c0_34 = arith.constant 0 : index
      %51 = vector.load %arg11[%c0_33, %c0_34] : memref<256x1xf32, #tpu.memory_space<vmem>>, vector<256x1xf32>
      %cst_35 = arith.constant 0.000000e+00 : f32
      %52 = vector.broadcast %cst_35 : f32 to vector<256x1xf32>
      %53 = arith.cmpf ogt, %51, %52 : vector<256x1xf32>
      %cst_36 = arith.constant 1.000000e+00 : f32
      %54 = vector.broadcast %cst_36 : f32 to vector<256x1xf32>
      %55 = arith.divf %54, %51 : vector<256x1xf32>
      %cst_37 = arith.constant 0.000000e+00 : f32
      %56 = vector.broadcast %cst_37 : f32 to vector<256x1xf32>
      %57 = arith.select %53, %55, %56 : vector<256x1xi1>, vector<256x1xf32>
      %c0_38 = arith.constant 0 : index
      %c0_39 = arith.constant 0 : index
      %58 = vector.load %arg12[%c0_38, %c0_39] : memref<256x128xf32, #tpu.memory_space<vmem>>, vector<256x128xf32>
      %59 = vector.broadcast %57 : vector<256x1xf32> to vector<256x128xf32>
      %60 = arith.mulf %58, %59 : vector<256x128xf32>
      %61 = arith.addf %60, %50 : vector<256x128xf32>
      %cst_40 = arith.constant 0.000000e+00 : f32
      %62 = vector.broadcast %cst_40 : f32 to vector<256x128xf32>
      %63 = arith.maximumf %61, %62 : vector<256x128xf32>
      %64 = arith.truncf %63 : vector<256x128xf32> to vector<256x128xbf16>
      %c0_41 = arith.constant 0 : index
      %c0_42 = arith.constant 0 : index
      %65 = vector.load %arg9[%c0_41, %c0_42] : memref<256x128xbf16, #tpu.memory_space<vmem>>, vector<256x128xbf16>
      tpu.vector_store %arg9[%c0_41, %c0_42], %64 {strides = array<i32>} : memref<256x128xbf16, #tpu.memory_space<vmem>>, vector<256x128xbf16>,
    } else {
    }
    return
  }
  func.func @transform_0(%arg0: i32, %arg1: i32) -> (i32, i32) {
    %c0_i32 = arith.constant 0 : i32
    return %arg0, %arg1 : i32, i32
  }
  func.func @transform_1(%arg0: i32, %arg1: i32) -> (i32, i32) {
    %c0_i32 = arith.constant 0 : i32
    %c0_i32_0 = arith.constant 0 : i32
    return %arg1, %c0_i32 : i32, i32
  }
  func.func @transform_2(%arg0: i32, %arg1: i32) -> (i32, i32) {
    %c0_i32 = arith.constant 0 : i32
    %c0_i32_0 = arith.constant 0 : i32
    return %c0_i32, %arg1 : i32, i32
  }
  func.func @transform_3(%arg0: i32, %arg1: i32) -> (i32, i32) {
    %c0_i32 = arith.constant 0 : i32
    %c0_i32_0 = arith.constant 0 : i32
    return %arg0, %c0_i32 : i32, i32
  }
  func.func @transform_4(%arg0: i32, %arg1: i32) -> (i32, i32) {
    %c0_i32 = arith.constant 0 : i32
    %c0_i32_0 = arith.constant 0 : i32
    return %arg0, %c0_i32 : i32, i32
  }
  func.func @transform_5(%arg0: i32, %arg1: i32) -> (i32, i32) {
    %c0_i32 = arith.constant 0 : i32
    %c0_i32_0 = arith.constant 0 : i32
    %c0_i32_1 = arith.constant 0 : i32
    return %c0_i32, %c0_i32_0 : i32, i32
  }
  func.func @transform_6(%arg0: i32, %arg1: i32) -> (i32, i32) {
    %c0_i32 = arith.constant 0 : i32
    %c0_i32_0 = arith.constant 0 : i32
    %c0_i32_1 = arith.constant 0 : i32
    return %c0_i32, %c0_i32_0 : i32, i32
  }
  func.func @transform_7(%arg0: i32, %arg1: i32) -> (i32, i32) {
    %c0_i32 = arith.constant 0 : i32
    %c0_i32_0 = arith.constant 0 : i32
    return %arg0, %c0_i32 : i32, i32
  }
}

module attributes {stable_mosaic.version = 11 : i64} {
  func.func @_gat_layer_kernel(%arg0: i32, %arg1: i32, %arg2: memref<256x256xi8, #tpu.memory_space<vmem>>, %arg3: memref<256x128xbf16, #tpu.memory_space<vmem>>, %arg4: memref<1x256xf32, #tpu.memory_space<vmem>>, %arg5: memref<256x1xf32, #tpu.memory_space<vmem>>, %arg6: memref<256x128xbf16, #tpu.memory_space<vmem>>, %arg7: memref<128x128xbf16, #tpu.memory_space<vmem>>, %arg8: memref<1x128xf32, #tpu.memory_space<vmem>>, %arg9: memref<256x128xf32, #tpu.memory_space<vmem>>, %arg10: memref<256x1xf32, #tpu.memory_space<vmem>>, %arg11: memref<256x1xf32, #tpu.memory_space<vmem>>, %arg12: memref<256x128xf32, #tpu.memory_space<vmem>>) attributes {dimension_semantics = [#tpu.dimension_semantics<parallel>, #tpu.dimension_semantics<arbitrary>], iteration_bounds = array<i64: 2, 2>, scalar_prefetch = 0 : i64, scratch_operands = 3 : i64, tpu.core_type = #tpu.core_type<tc>, window_params = [{transform_indices = @transform_0, window_bounds = array<i64: 256, 256>}, {transform_indices = @transform_1, window_bounds = array<i64: 256, 128>}, {transform_indices = @transform_2, window_bounds = array<i64: 1, 256>}, {transform_indices = @transform_3, window_bounds = array<i64: 256, 1>}, {transform_indices = @transform_4, window_bounds = array<i64: 256, 128>}, {pipeline_mode = #tpu.pipeline_mode<synchronous>, transform_indices = @transform_5, window_bounds = array<i64: 128, 128>}, {pipeline_mode = #tpu.pipeline_mode<synchronous>, transform_indices = @transform_6, window_bounds = array<i64: 1, 128>}, {transform_indices = @transform_7, window_bounds = array<i64: 256, 128>}]} {
    %c0_i32 = arith.constant 0 : i32
    %0 = arith.cmpi eq, %arg1, %c0_i32 : i32
    %1 = arith.extui %0 : i1 to i32
    %c0_i32_0 = arith.constant 0 : i32
    %2 = arith.cmpi ne, %1, %c0_i32_0 : i32
    scf.if %2 {
      %cst_26 = arith.constant -1.000000e+30 : f32
      %45 = vector.broadcast %cst_26 : f32 to vector<256x1xf32>
      %c0_27 = arith.constant 0 : index
      %c0_28 = arith.constant 0 : index
      %46 = vector.load %arg10[%c0_27, %c0_28] : memref<256x1xf32, #tpu.memory_space<vmem>>, vector<256x1xf32>
      tpu.vector_store %arg10[%c0_27, %c0_28], %45 {strides = array<i32>} : memref<256x1xf32, #tpu.memory_space<vmem>>, vector<256x1xf32>,
      %cst_29 = arith.constant 0.000000e+00 : f32
      %47 = vector.broadcast %cst_29 : f32 to vector<256x1xf32>
      %c0_30 = arith.constant 0 : index
      %c0_31 = arith.constant 0 : index
      %48 = vector.load %arg11[%c0_30, %c0_31] : memref<256x1xf32, #tpu.memory_space<vmem>>, vector<256x1xf32>
      tpu.vector_store %arg11[%c0_30, %c0_31], %47 {strides = array<i32>} : memref<256x1xf32, #tpu.memory_space<vmem>>, vector<256x1xf32>,
      %cst_32 = arith.constant 0.000000e+00 : f32
      %49 = vector.broadcast %cst_32 : f32 to vector<256x128xf32>
      %c0_33 = arith.constant 0 : index
      %c0_34 = arith.constant 0 : index
      %50 = vector.load %arg12[%c0_33, %c0_34] : memref<256x128xf32, #tpu.memory_space<vmem>>, vector<256x128xf32>
      tpu.vector_store %arg12[%c0_33, %c0_34], %49 {strides = array<i32>} : memref<256x128xf32, #tpu.memory_space<vmem>>, vector<256x128xf32>,
    } else {
    }
    %c0 = arith.constant 0 : index
    %c0_1 = arith.constant 0 : index
    %3 = vector.load %arg5[%c0, %c0_1] : memref<256x1xf32, #tpu.memory_space<vmem>>, vector<256x1xf32>
    %c0_2 = arith.constant 0 : index
    %c0_3 = arith.constant 0 : index
    %4 = vector.load %arg4[%c0_2, %c0_3] : memref<1x256xf32, #tpu.memory_space<vmem>>, vector<1x256xf32>
    %5 = vector.broadcast %3 : vector<256x1xf32> to vector<256x256xf32>
    %6 = vector.broadcast %4 : vector<1x256xf32> to vector<256x256xf32>
    %7 = arith.addf %5, %6 : vector<256x256xf32>
    %cst = arith.constant 2.000000e-01 : f32
    %8 = vector.broadcast %cst : f32 to vector<256x256xf32>
    %9 = arith.mulf %8, %7 : vector<256x256xf32>
    %10 = arith.maximumf %7, %9 : vector<256x256xf32>
    %c0_4 = arith.constant 0 : index
    %c0_5 = arith.constant 0 : index
    %11 = vector.load %arg2[%c0_4, %c0_5] : memref<256x256xi8, #tpu.memory_space<vmem>>, vector<256x256xi8>
    %c0_i8 = arith.constant 0 : i8
    %12 = vector.broadcast %c0_i8 : i8 to vector<256x256xi8>
    %13 = arith.cmpi ne, %11, %12 : vector<256x256xi8>
    %cst_6 = arith.constant -1.000000e+30 : f32
    %14 = vector.broadcast %cst_6 : f32 to vector<256x256xf32>
    %15 = arith.select %13, %10, %14 : vector<256x256xi1>, vector<256x256xf32>
    %c0_7 = arith.constant 0 : index
    %c0_8 = arith.constant 0 : index
    %16 = vector.load %arg10[%c0_7, %c0_8] : memref<256x1xf32, #tpu.memory_space<vmem>>, vector<256x1xf32>
    %cst_9 = arith.constant dense<0xFF800000> : vector<256xf32>
    %17 = vector.multi_reduction <maximumf>, %15, %cst_9 [1] : vector<256x256xf32> to vector<256xf32>
    %18 = vector.shape_cast %17 : vector<256xf32> to vector<256x1xf32>
    %19 = arith.maximumf %16, %18 : vector<256x1xf32>
    %20 = arith.subf %16, %19 : vector<256x1xf32>
    %21 = math.exp %20 : vector<256x1xf32>
    %22 = vector.broadcast %19 : vector<256x1xf32> to vector<256x256xf32>
    %23 = arith.subf %15, %22 : vector<256x256xf32>
    %24 = math.exp %23 : vector<256x256xf32>
    %cst_10 = arith.constant 0.000000e+00 : f32
    %25 = vector.broadcast %cst_10 : f32 to vector<256x256xf32>
    %26 = arith.select %13, %24, %25 : vector<256x256xi1>, vector<256x256xf32>
    %c0_11 = arith.constant 0 : index
    %c0_12 = arith.constant 0 : index
    %27 = vector.load %arg11[%c0_11, %c0_12] : memref<256x1xf32, #tpu.memory_space<vmem>>, vector<256x1xf32>
    %28 = arith.mulf %21, %27 : vector<256x1xf32>
    %cst_13 = arith.constant dense<0.000000e+00> : vector<256xf32>
    %29 = vector.multi_reduction <add>, %26, %cst_13 [1] : vector<256x256xf32> to vector<256xf32>
    %30 = vector.shape_cast %29 : vector<256xf32> to vector<256x1xf32>
    %31 = arith.addf %28, %30 : vector<256x1xf32>
    %c0_14 = arith.constant 0 : index
    %c0_15 = arith.constant 0 : index
    %32 = vector.load %arg11[%c0_14, %c0_15] : memref<256x1xf32, #tpu.memory_space<vmem>>, vector<256x1xf32>
    tpu.vector_store %arg11[%c0_14, %c0_15], %31 {strides = array<i32>} : memref<256x1xf32, #tpu.memory_space<vmem>>, vector<256x1xf32>,
    %c0_16 = arith.constant 0 : index
    %c0_17 = arith.constant 0 : index
    %33 = vector.load %arg12[%c0_16, %c0_17] : memref<256x128xf32, #tpu.memory_space<vmem>>, vector<256x128xf32>
    %34 = vector.broadcast %21 : vector<256x1xf32> to vector<256x128xf32>
    %35 = arith.mulf %34, %33 : vector<256x128xf32>
    %36 = arith.truncf %26 : vector<256x256xf32> to vector<256x256xbf16>
    %c0_18 = arith.constant 0 : index
    %c0_19 = arith.constant 0 : index
    %37 = vector.load %arg3[%c0_18, %c0_19] : memref<256x128xbf16, #tpu.memory_space<vmem>>, vector<256x128xbf16>
    %cst_20 = arith.constant dense<0.000000e+00> : vector<256x128xf32>
    %38 = tpu.matmul %36, %37, %cst_20 {dimension_numbers = #tpu.dot_dimension_numbers<[1], [0], [0], [1], [0, 0, 1, 1], [], []>} : vector<256x256xbf16>, vector<256x128xbf16>, vector<256x128xf32> -> vector<256x128xf32>
    %39 = arith.addf %35, %38 : vector<256x128xf32>
    %c0_21 = arith.constant 0 : index
    %c0_22 = arith.constant 0 : index
    %40 = vector.load %arg12[%c0_21, %c0_22] : memref<256x128xf32, #tpu.memory_space<vmem>>, vector<256x128xf32>
    tpu.vector_store %arg12[%c0_21, %c0_22], %39 {strides = array<i32>} : memref<256x128xf32, #tpu.memory_space<vmem>>, vector<256x128xf32>,
    %c0_23 = arith.constant 0 : index
    %c0_24 = arith.constant 0 : index
    %41 = vector.load %arg10[%c0_23, %c0_24] : memref<256x1xf32, #tpu.memory_space<vmem>>, vector<256x1xf32>
    tpu.vector_store %arg10[%c0_23, %c0_24], %19 {strides = array<i32>} : memref<256x1xf32, #tpu.memory_space<vmem>>, vector<256x1xf32>,
    %c1_i32 = arith.constant 1 : i32
    %42 = arith.cmpi eq, %arg1, %c1_i32 : i32
    %43 = arith.extui %42 : i1 to i32
    %c0_i32_25 = arith.constant 0 : i32
    %44 = arith.cmpi ne, %43, %c0_i32_25 : i32
    scf.if %44 {
      %c0_26 = arith.constant 0 : index
      %c0_27 = arith.constant 0 : index
      %45 = vector.load %arg6[%c0_26, %c0_27] : memref<256x128xbf16, #tpu.memory_space<vmem>>, vector<256x128xbf16>
      %c0_28 = arith.constant 0 : index
      %c0_29 = arith.constant 0 : index
      %46 = vector.load %arg7[%c0_28, %c0_29] : memref<128x128xbf16, #tpu.memory_space<vmem>>, vector<128x128xbf16>
      %cst_30 = arith.constant dense<0.000000e+00> : vector<256x128xf32>
      %47 = tpu.matmul %45, %46, %cst_30 {dimension_numbers = #tpu.dot_dimension_numbers<[1], [0], [0], [1], [0, 0, 1, 1], [], []>} : vector<256x128xbf16>, vector<128x128xbf16>, vector<256x128xf32> -> vector<256x128xf32>
      %c0_31 = arith.constant 0 : index
      %c0_32 = arith.constant 0 : index
      %48 = vector.load %arg8[%c0_31, %c0_32] : memref<1x128xf32, #tpu.memory_space<vmem>>, vector<1x128xf32>
      %49 = vector.broadcast %48 : vector<1x128xf32> to vector<256x128xf32>
      %50 = arith.addf %47, %49 : vector<256x128xf32>
      %c0_33 = arith.constant 0 : index
      %c0_34 = arith.constant 0 : index
      %51 = vector.load %arg11[%c0_33, %c0_34] : memref<256x1xf32, #tpu.memory_space<vmem>>, vector<256x1xf32>
      %cst_35 = arith.constant 0.000000e+00 : f32
      %52 = vector.broadcast %cst_35 : f32 to vector<256x1xf32>
      %53 = arith.cmpf ogt, %51, %52 : vector<256x1xf32>
      %cst_36 = arith.constant 1.000000e+00 : f32
      %54 = vector.broadcast %cst_36 : f32 to vector<256x1xf32>
      %55 = arith.divf %54, %51 : vector<256x1xf32>
      %cst_37 = arith.constant 0.000000e+00 : f32
      %56 = vector.broadcast %cst_37 : f32 to vector<256x1xf32>
      %57 = arith.select %53, %55, %56 : vector<256x1xi1>, vector<256x1xf32>
      %c0_38 = arith.constant 0 : index
      %c0_39 = arith.constant 0 : index
      %58 = vector.load %arg12[%c0_38, %c0_39] : memref<256x128xf32, #tpu.memory_space<vmem>>, vector<256x128xf32>
      %59 = vector.broadcast %57 : vector<256x1xf32> to vector<256x128xf32>
      %60 = arith.mulf %58, %59 : vector<256x128xf32>
      %61 = arith.addf %60, %50 : vector<256x128xf32>
      %c0_40 = arith.constant 0 : index
      %c0_41 = arith.constant 0 : index
      %62 = vector.load %arg9[%c0_40, %c0_41] : memref<256x128xf32, #tpu.memory_space<vmem>>, vector<256x128xf32>
      tpu.vector_store %arg9[%c0_40, %c0_41], %61 {strides = array<i32>} : memref<256x128xf32, #tpu.memory_space<vmem>>, vector<256x128xf32>,
    } else {
    }
    return
  }
  func.func @transform_0(%arg0: i32, %arg1: i32) -> (i32, i32) {
    %c0_i32 = arith.constant 0 : i32
    return %arg0, %arg1 : i32, i32
  }
  func.func @transform_1(%arg0: i32, %arg1: i32) -> (i32, i32) {
    %c0_i32 = arith.constant 0 : i32
    %c0_i32_0 = arith.constant 0 : i32
    return %arg1, %c0_i32 : i32, i32
  }
  func.func @transform_2(%arg0: i32, %arg1: i32) -> (i32, i32) {
    %c0_i32 = arith.constant 0 : i32
    %c0_i32_0 = arith.constant 0 : i32
    return %c0_i32, %arg1 : i32, i32
  }
  func.func @transform_3(%arg0: i32, %arg1: i32) -> (i32, i32) {
    %c0_i32 = arith.constant 0 : i32
    %c0_i32_0 = arith.constant 0 : i32
    return %arg0, %c0_i32 : i32, i32
  }
  func.func @transform_4(%arg0: i32, %arg1: i32) -> (i32, i32) {
    %c0_i32 = arith.constant 0 : i32
    %c0_i32_0 = arith.constant 0 : i32
    return %arg0, %c0_i32 : i32, i32
  }
  func.func @transform_5(%arg0: i32, %arg1: i32) -> (i32, i32) {
    %c0_i32 = arith.constant 0 : i32
    %c0_i32_0 = arith.constant 0 : i32
    %c0_i32_1 = arith.constant 0 : i32
    return %c0_i32, %c0_i32_0 : i32, i32
  }
  func.func @transform_6(%arg0: i32, %arg1: i32) -> (i32, i32) {
    %c0_i32 = arith.constant 0 : i32
    %c0_i32_0 = arith.constant 0 : i32
    %c0_i32_1 = arith.constant 0 : i32
    return %c0_i32, %c0_i32_0 : i32, i32
  }
  func.func @transform_7(%arg0: i32, %arg1: i32) -> (i32, i32) {
    %c0_i32 = arith.constant 0 : i32
    %c0_i32_0 = arith.constant 0 : i32
    return %arg0, %c0_i32 : i32, i32
  }
}

</mosaic_0001>

<bundles_post_ra>
// kernel: gat_forward.2
= control target key start
LH: loop header
LB: loop body
LE: loop exit
PB: predicated region body
PF: predicated region fallthrough
CT: control target
= control target key end

     0   :  { %s8514_s0 = inlined_call_operand.vmem [shape: s8[512,512], index: 0, kind: input, shape index: {}]   ;;  %s8515_s1 = inlined_call_operand.vmem [shape: bf16[512,128], index: 1, kind: input, shape index: {}]   ;;  %s8516_s2 = inlined_call_operand.vmem [shape: f32[1,512], index: 2, kind: input, shape index: {}]   ;;  %s8517_s3 = inlined_call_operand.vmem [shape: f32[512,1], index: 3, kind: input, shape index: {}]   ;;  %s8518_s4 = inlined_call_operand.vmem [shape: bf16[512,128], index: 4, kind: input, shape index: {}]   ;;  %s8519_s5 = inlined_call_operand.vmem [shape: bf16[128,128], index: 5, kind: input, shape index: {}]   ;;  %s8520_s6 = inlined_call_operand.vmem [shape: f32[1,128], index: 6, kind: input, shape index: {}]   ;;  %s8521_s7 = inlined_call_operand.vmem [shape: bf16[512,128], index: 7, kind: output, shape index: {}]  }
   0x1   :  { %8845 = sst [smem:[#allocation167_spill]] %s8514_s0 }
   0x2   :  { %8846 = sst [smem:[#allocation168_spill]] %s8515_s1 }
   0x3   :  { %s5132_s24 = smov 0   ;;  %s5134_s25 = smov 0  }
   0x4   :  { %s5136_s26 = smov 0   ;;  %s5138_s27 = smov 0  }
   0x5   :  { %s5140_s28 = smov 0   ;;  %s5142_s29 = smov 0  }
   0x6   :  { %s5144_s30 = smov 0  }
   0x7 LB: > { %s26_s8 = sadd.s32 1, %s5078_s28  ;;  %s29_s9 = sadd.s32 1, %s5082_s29  ;;  %s5086_s30 = sphi %s5144_s30, %s17_s30   ;;  %s5082_s29 = sphi %s5142_s29, %s9565_s29   ;;  %s5078_s28 = sphi %s5140_s28, %s9564_s28   ;;  %s5074_s27 = sphi %s5138_s27, %s9563_s27   ;;  %s5070_s26 = sphi %s5136_s26, %s9562_s26   ;;  %s5066_s25 = sphi %s5134_s25, %s9561_s25   ;;  %s5062_s24 = sphi %s5132_s24, %s9560_s24  }
   0x8   : > { %p27_p0 = scmp.ge.s32.totalorder %s26_s8, 2  ;;  %p45_p1 = scmp.ne.s32.totalorder %s5066_s25, %s5062_s24 }
   0x9   : > { %p46_p2 = scmp.eq.s32.totalorder %s5086_s30, 0  ;;  %s38_s13 = sadd.s32 1, %s5066_s25 }
   0xa   : > { %s9567_s8 = smov (%p27_p0, %s26_s8), 0  ;;  %s9569_s9 = smov (!%p27_p0, %s29_s9), %s5082_s29 }
   0xb   : > { %8847 = sst [smem:[#allocation6_spill]] %s9567_s8  ;;  %p47_p3 = por %p46_p2, %p45_p1 }
   0xc   : > { %p31_p4 = scmp.ge.s32.totalorder %s9569_s9, 2  ;;  %s34_s10 = ssub.s32 %s5078_s28, %s9567_s8 }
   0xd   : > { %p4256_p6 = scmp.ge.s32.totalorder %s5086_s30, 4 }
   0xe   : > { %s9571_s9 = smov (%p31_p4, %s9569_s9), 0 }
   0xf   : > { %8848 = sst [smem:[#allocation7_spill]] %s9571_s9  ;;  %s33_s11 = ssub.s32 %s5082_s29, %s9571_s9 }
  0x10   : > { %s35_s12 = sor.u32 %s34_s10, %s33_s11  ;;  %249 = sbr.rel (%p4256_p6) target bundleno = 47 (0x2f), region = 24 }
  0x11   : > { %p36_p5 = scmp.eq.s32.totalorder %s35_s12, 0 }
  0x13   : > { %s5183_s14 = scalar_select %p36_p5, %s5066_s25, %s38_s13  }
  0x15   : > { %252 = sbr.rel (!%p47_p3) target bundleno = 47 (0x2f), region = 28  ;;  %s254_s15 = sand.u32 (%p47_p3), 1, %s5066_s25  }
  0x16   : > { %s4259_s16 = sshll.u32 (%p47_p3), %s5078_s28, 1  ;;  %s4257_s17 = sshll.u32 (%p47_p3), %s254_s15, 7 }
  0x17   : > { %s4533_s18 = sshll.u32 (%p47_p3), %s5082_s29, 5  ;;  %s8849_s0 = sld [smem:[#allocation167_spill]] (%p47_p3) }
  0x18   : > { %s260_s19 = sadd.s32 (%p47_p3), %s4533_s18, %s4259_s16  ;;  %s256_s10 = scalar_lea.vmem (%p47_p3), [#allocation5], %s4257_s17 }
  0x19   : > { %s4261_s20 = sshll.u32 (%p47_p3), %s260_s19, 3 }
  0x1d   : > { %s5192_s23 = scalar_lea.vmem %s8849_s0, %s4261_s20 }
  0x1e   : > { %v275_v0 = vld [vmem:[%s5192_s23] sm:$0xff]  ;;  %v277_v1 = vld [vmem:[%s5192_s23 + $0x8] sm:$0xff] }
  0x1f   : > { %v279_v2 = vld [vmem:[%s5192_s23 + $0x20] sm:$0xff]  ;;  %276 = vst [vmem:[%s256_s10] sm:$0xff] %v275_v0  ;;  %v281_v3 = vld [vmem:[%s5192_s23 + $0x28] sm:$0xff] }
  0x20   : > { %278 = vst [vmem:[%s256_s10 + $0x8] sm:$0xff] %v277_v1  ;;  %v283_v4 = vld [vmem:[%s5192_s23 + $0x40] sm:$0xff]  ;;  %v285_v5 = vld [vmem:[%s5192_s23 + $0x48] sm:$0xff] }
  0x21   : > { %280 = vst [vmem:[%s256_s10 + $0x10] sm:$0xff] %v279_v2  ;;  %v287_v6 = vld [vmem:[%s5192_s23 + $0x60] sm:$0xff]  ;;  %v289_v7 = vld [vmem:[%s5192_s23 + $0x68] sm:$0xff] }
  0x22   : > { %282 = vst [vmem:[%s256_s10 + $0x18] sm:$0xff] %v281_v3  ;;  %v291_v8 = vld [vmem:[%s5192_s23 + $0x80] sm:$0xff]  ;;  %v293_v9 = vld [vmem:[%s5192_s23 + $0x88] sm:$0xff] }
  0x23   : > { %284 = vst [vmem:[%s256_s10 + $0x20] sm:$0xff] %v283_v4  ;;  %v295_v10 = vld [vmem:[%s5192_s23 + $0xa0] sm:$0xff]  ;;  %v297_v11 = vld [vmem:[%s5192_s23 + $0xa8] sm:$0xff] }
  0x24   : > { %286 = vst [vmem:[%s256_s10 + $0x28] sm:$0xff] %v285_v5  ;;  %v299_v12 = vld [vmem:[%s5192_s23 + $0xc0] sm:$0xff]  ;;  %v301_v13 = vld [vmem:[%s5192_s23 + $0xc8] sm:$0xff] }
  0x25   : > { %288 = vst [vmem:[%s256_s10 + $0x30] sm:$0xff] %v287_v6  ;;  %v303_v14 = vld [vmem:[%s5192_s23 + $0xe0] sm:$0xff]  ;;  %v305_v15 = vld [vmem:[%s5192_s23 + $0xe8] sm:$0xff] }
  0x26   : > { %290 = vst [vmem:[%s256_s10 + $0x38] sm:$0xff] %v289_v7 }
  0x27   : > { %292 = vst [vmem:[%s256_s10 + $0x40] sm:$0xff] %v291_v8 }
  0x28   : > { %294 = vst [vmem:[%s256_s10 + $0x48] sm:$0xff] %v293_v9 }
  0x29   : > { %296 = vst [vmem:[%s256_s10 + $0x50] sm:$0xff] %v295_v10 }
  0x2a   : > { %298 = vst [vmem:[%s256_s10 + $0x58] sm:$0xff] %v297_v11 }
  0x2b   : > { %300 = vst [vmem:[%s256_s10 + $0x60] sm:$0xff] %v299_v12 }
  0x2c   : > { %302 = vst [vmem:[%s256_s10 + $0x68] sm:$0xff] %v301_v13 }
  0x2d   : > { %304 = vst [vmem:[%s256_s10 + $0x70] sm:$0xff] %v303_v14 }
  0x2e   : > { %306 = vst [vmem:[%s256_s10 + $0x78] sm:$0xff] %v305_v15 }
  0x2f PF: > { %p4262_p7 = scmp.ge.s32.totalorder %s5086_s30, 1  ;;  %p346_p8 = scmp.lt.s32.totalorder %s5086_s30, 5 }
  0x31   : > { %p347_p9 = pnand %p4262_p7, %p346_p8 }
  0x33   : > { %350 = sbr.rel (%p347_p9) target bundleno = 1394 (0x572), region = 67 }
  0x38   : > { %s353_s11 = sand.u32 1, %s5062_s24   ;;  %s4264_s12 = sshll.u32 %s5070_s26, 5 }
  0x39   : > { %s4263_s13 = sshll.u32 %s353_s11, 7  ;;  %p406_p10 = scmp.lt.s32.totalorder %s4264_s12, 63 }
  0x3a   : > { %s4266_s15 = sshll.u32 %s5070_s26, 1  ;;  %s4267_s16 = sshll.u32 %s5074_s27, 5 }
  0x3b   : > { %s9573_s12 = smov (!%p406_p10, %s4264_s12), 63  ;;  %p412_p11 = scmp.lt.s32.totalorder %s4266_s15, 3 }
  0x3c   : > { %s4265_s17 = sshll.u32 %s9573_s12, 2  ;;  %p417_p12 = scmp.lt.s32.totalorder %s4267_s16, 63 }
  0x3d   : > { %s8850_s1 = sld [smem:[#allocation168_spill]]  ;;  %s9575_s15 = smov (!%p412_p11, %s4266_s15), 3 }
  0x3e   : > { %s9577_s16 = smov (!%p417_p12, %s4267_s16), 63  ;;  %s414_s22 = scalar_lea.vmem %s8516_s2, %s9575_s15 }
  0x3f   : > { %s4268_s23 = sshll.u32 %s9577_s16, 3  ;;  %s4270_s10 = sshll.u32 %s9577_s16, 2 }
  0x40   : > { %s5230_s27 = scalar_lea.vmem %s8517_s3, %s4268_s23  ;;  %s5242_s8 = scalar_lea.vmem [#allocation5], %s4263_s13 }
  0x41   : > { %p4273_p13 = scmp.ne.s32.totalorder %s5070_s26, 0 }
  0x43   : > { %s5219_s20 = scalar_lea.vmem %s8850_s1, %s4265_s17  ;;  %s5235_s17 = scalar_lea.vmem %s8518_s4, %s4270_s10 }
  0x44   : > { %s5240_s1 = scalar_lea.vmem %s8521_s7, %s4270_s10  ;;  %439 = sbr.rel (%p4273_p13) target bundleno = 170 (0xaa), region = 75 }
  0x49   : > { %vm440_vm0 = vcmask 7168   ;;  %v5088_v16 = vmov -1e+30   ;;  %v5089_v17 = vmov 0.0  }
  0x4a   : > { %441 = vst.msk [vmem:[#allocation2] sm:$0xff] %vm440_vm0, %v5088_v16 }
  0x4b   : > { %442 = vst.msk [vmem:[#allocation2 + $0x8] sm:$0xff] %vm440_vm0, %v5088_v16 }
  0x4c   : > { %443 = vst.msk [vmem:[#allocation2 + $0x10] sm:$0xff] %vm440_vm0, %v5088_v16 }
  0x4d   : > { %444 = vst.msk [vmem:[#allocation2 + $0x18] sm:$0xff] %vm440_vm0, %v5088_v16 }
  0x4e   : > { %445 = vst.msk [vmem:[#allocation2 + $0x20] sm:$0xff] %vm440_vm0, %v5088_v16 }
  0x4f   : > { %446 = vst.msk [vmem:[#allocation2 + $0x28] sm:$0xff] %vm440_vm0, %v5088_v16 }
  0x50   : > { %447 = vst.msk [vmem:[#allocation2 + $0x30] sm:$0xff] %vm440_vm0, %v5088_v16 }
  0x51   : > { %448 = vst.msk [vmem:[#allocation2 + $0x38] sm:$0xff] %vm440_vm0, %v5088_v16 }
  0x52   : > { %449 = vst.msk [vmem:[#allocation2 + $0x40] sm:$0xff] %vm440_vm0, %v5088_v16 }
  0x53   : > { %450 = vst.msk [vmem:[#allocation2 + $0x48] sm:$0xff] %vm440_vm0, %v5088_v16 }
  0x54   : > { %451 = vst.msk [vmem:[#allocation2 + $0x50] sm:$0xff] %vm440_vm0, %v5088_v16 }
  0x55   : > { %452 = vst.msk [vmem:[#allocation2 + $0x58] sm:$0xff] %vm440_vm0, %v5088_v16 }
  0x56   : > { %453 = vst.msk [vmem:[#allocation2 + $0x60] sm:$0xff] %vm440_vm0, %v5088_v16 }
  0x57   : > { %454 = vst.msk [vmem:[#allocation2 + $0x68] sm:$0xff] %vm440_vm0, %v5088_v16 }
  0x58   : > { %455 = vst.msk [vmem:[#allocation2 + $0x70] sm:$0xff] %vm440_vm0, %v5088_v16 }
  0x59   : > { %456 = vst.msk [vmem:[#allocation2 + $0x78] sm:$0xff] %vm440_vm0, %v5088_v16 }
  0x5a   : > { %457 = vst.msk [vmem:[#allocation2 + $0x80] sm:$0xff] %vm440_vm0, %v5088_v16 }
  0x5b   : > { %458 = vst.msk [vmem:[#allocation2 + $0x88] sm:$0xff] %vm440_vm0, %v5088_v16 }
  0x5c   : > { %459 = vst.msk [vmem:[#allocation2 + $0x90] sm:$0xff] %vm440_vm0, %v5088_v16 }
  0x5d   : > { %460 = vst.msk [vmem:[#allocation2 + $0x98] sm:$0xff] %vm440_vm0, %v5088_v16 }
  0x5e   : > { %461 = vst.msk [vmem:[#allocation2 + $0xa0] sm:$0xff] %vm440_vm0, %v5088_v16 }
  0x5f   : > { %462 = vst.msk [vmem:[#allocation2 + $0xa8] sm:$0xff] %vm440_vm0, %v5088_v16 }
  0x60   : > { %463 = vst.msk [vmem:[#allocation2 + $0xb0] sm:$0xff] %vm440_vm0, %v5088_v16 }
  0x61   : > { %464 = vst.msk [vmem:[#allocation2 + $0xb8] sm:$0xff] %vm440_vm0, %v5088_v16 }
  0x62   : > { %465 = vst.msk [vmem:[#allocation2 + $0xc0] sm:$0xff] %vm440_vm0, %v5088_v16 }
  0x63   : > { %466 = vst.msk [vmem:[#allocation2 + $0xc8] sm:$0xff] %vm440_vm0, %v5088_v16 }
  0x64   : > { %467 = vst.msk [vmem:[#allocation2 + $0xd0] sm:$0xff] %vm440_vm0, %v5088_v16 }
  0x65   : > { %468 = vst.msk [vmem:[#allocation2 + $0xd8] sm:$0xff] %vm440_vm0, %v5088_v16 }
  0x66   : > { %469 = vst.msk [vmem:[#allocation2 + $0xe0] sm:$0xff] %vm440_vm0, %v5088_v16 }
  0x67   : > { %470 = vst.msk [vmem:[#allocation2 + $0xe8] sm:$0xff] %vm440_vm0, %v5088_v16 }
  0x68   : > { %471 = vst.msk [vmem:[#allocation2 + $0xf0] sm:$0xff] %vm440_vm0, %v5088_v16 }
  0x69   : > { %472 = vst.msk [vmem:[#allocation2 + $0xf8] sm:$0xff] %vm440_vm0, %v5088_v16 }
  0x6a   : > { %473 = vst.msk [vmem:[#allocation3] sm:$0xff] %vm440_vm0, %v5089_v17 }
  0x6b   : > { %474 = vst.msk [vmem:[#allocation3 + $0x8] sm:$0xff] %vm440_vm0, %v5089_v17 }
  0x6c   : > { %475 = vst.msk [vmem:[#allocation3 + $0x10] sm:$0xff] %vm440_vm0, %v5089_v17 }
  0x6d   : > { %476 = vst.msk [vmem:[#allocation3 + $0x18] sm:$0xff] %vm440_vm0, %v5089_v17 }
  0x6e   : > { %477 = vst.msk [vmem:[#allocation3 + $0x20] sm:$0xff] %vm440_vm0, %v5089_v17 }
  0x6f   : > { %478 = vst.msk [vmem:[#allocation3 + $0x28] sm:$0xff] %vm440_vm0, %v5089_v17 }
  0x70   : > { %479 = vst.msk [vmem:[#allocation3 + $0x30] sm:$0xff] %vm440_vm0, %v5089_v17 }
  0x71   : > { %480 = vst.msk [vmem:[#allocation3 + $0x38] sm:$0xff] %vm440_vm0, %v5089_v17 }
  0x72   : > { %481 = vst.msk [vmem:[#allocation3 + $0x40] sm:$0xff] %vm440_vm0, %v5089_v17 }
  0x73   : > { %482 = vst.msk [vmem:[#allocation3 + $0x48] sm:$0xff] %vm440_vm0, %v5089_v17 }
  0x74   : > { %483 = vst.msk [vmem:[#allocation3 + $0x50] sm:$0xff] %vm440_vm0, %v5089_v17 }
  0x75   : > { %484 = vst.msk [vmem:[#allocation3 + $0x58] sm:$0xff] %vm440_vm0, %v5089_v17 }
  0x76   : > { %485 = vst.msk [vmem:[#allocation3 + $0x60] sm:$0xff] %vm440_vm0, %v5089_v17 }
  0x77   : > { %486 = vst.msk [vmem:[#allocation3 + $0x68] sm:$0xff] %vm440_vm0, %v5089_v17 }
  0x78   : > { %487 = vst.msk [vmem:[#allocation3 + $0x70] sm:$0xff] %vm440_vm0, %v5089_v17 }
  0x79   : > { %488 = vst.msk [vmem:[#allocation3 + $0x78] sm:$0xff] %vm440_vm0, %v5089_v17 }
  0x7a   : > { %489 = vst.msk [vmem:[#allocation3 + $0x80] sm:$0xff] %vm440_vm0, %v5089_v17 }
  0x7b   : > { %490 = vst.msk [vmem:[#allocation3 + $0x88] sm:$0xff] %vm440_vm0, %v5089_v17 }
  0x7c   : > { %491 = vst.msk [vmem:[#allocation3 + $0x90] sm:$0xff] %vm440_vm0, %v5089_v17 }
  0x7d   : > { %492 = vst.msk [vmem:[#allocation3 + $0x98] sm:$0xff] %vm440_vm0, %v5089_v17 }
  0x7e   : > { %493 = vst.msk [vmem:[#allocation3 + $0xa0] sm:$0xff] %vm440_vm0, %v5089_v17 }
  0x7f   : > { %494 = vst.msk [vmem:[#allocation3 + $0xa8] sm:$0xff] %vm440_vm0, %v5089_v17 }
  0x80   : > { %495 = vst.msk [vmem:[#allocation3 + $0xb0] sm:$0xff] %vm440_vm0, %v5089_v17 }
  0x81   : > { %496 = vst.msk [vmem:[#allocation3 + $0xb8] sm:$0xff] %vm440_vm0, %v5089_v17 }
  0x82   : > { %497 = vst.msk [vmem:[#allocation3 + $0xc0] sm:$0xff] %vm440_vm0, %v5089_v17 }
  0x83   : > { %498 = vst.msk [vmem:[#allocation3 + $0xc8] sm:$0xff] %vm440_vm0, %v5089_v17 }
  0x84   : > { %499 = vst.msk [vmem:[#allocation3 + $0xd0] sm:$0xff] %vm440_vm0, %v5089_v17 }
  0x85   : > { %500 = vst.msk [vmem:[#allocation3 + $0xd8] sm:$0xff] %vm440_vm0, %v5089_v17 }
  0x86   : > { %501 = vst.msk [vmem:[#allocation3 + $0xe0] sm:$0xff] %vm440_vm0, %v5089_v17 }
  0x87   : > { %502 = vst.msk [vmem:[#allocation3 + $0xe8] sm:$0xff] %vm440_vm0, %v5089_v17 }
  0x88   : > { %503 = vst.msk [vmem:[#allocation3 + $0xf0] sm:$0xff] %vm440_vm0, %v5089_v17 }
  0x89   : > { %504 = vst.msk [vmem:[#allocation3 + $0xf8] sm:$0xff] %vm440_vm0, %v5089_v17 }
  0x8a   : > { %505 = vst [vmem:[#allocation4 + $0xb0] sm:$0xff] %v5089_v17 }
  0x8b   : > { %506 = vst [vmem:[#allocation4] sm:$0xff] %v5089_v17 }
  0x8c   : > { %507 = vst [vmem:[#allocation4 + $0xd8] sm:$0xff] %v5089_v17 }
  0x8d   : > { %508 = vst [vmem:[#allocation4 + $0x18] sm:$0xff] %v5089_v17 }
  0x8e   : > { %509 = vst [vmem:[#allocation4 + $0x50] sm:$0xff] %v5089_v17 }
  0x8f   : > { %510 = vst [vmem:[#allocation4 + $0x68] sm:$0xff] %v5089_v17 }
  0x90   : > { %511 = vst [vmem:[#allocation4 + $0x30] sm:$0xff] %v5089_v17 }
  0x91   : > { %512 = vst [vmem:[#allocation4 + $0x48] sm:$0xff] %v5089_v17 }
  0x92   : > { %513 = vst [vmem:[#allocation4 + $0x80] sm:$0xff] %v5089_v17 }
  0x93   : > { %514 = vst [vmem:[#allocation4 + $0x88] sm:$0xff] %v5089_v17 }
  0x94   : > { %515 = vst [vmem:[#allocation4 + $0xe8] sm:$0xff] %v5089_v17 }
  0x95   : > { %516 = vst [vmem:[#allocation4 + $0xb8] sm:$0xff] %v5089_v17 }
  0x96   : > { %517 = vst [vmem:[#allocation4 + $0x60] sm:$0xff] %v5089_v17 }
  0x97   : > { %518 = vst [vmem:[#allocation4 + $0xf0] sm:$0xff] %v5089_v17 }
  0x98   : > { %519 = vst [vmem:[#allocation4 + $0x8] sm:$0xff] %v5089_v17 }
  0x99   : > { %520 = vst [vmem:[#allocation4 + $0x78] sm:$0xff] %v5089_v17 }
  0x9a   : > { %521 = vst [vmem:[#allocation4 + $0x38] sm:$0xff] %v5089_v17 }
  0x9b   : > { %522 = vst [vmem:[#allocation4 + $0x58] sm:$0xff] %v5089_v17 }
  0x9c   : > { %523 = vst [vmem:[#allocation4 + $0x40] sm:$0xff] %v5089_v17 }
  0x9d   : > { %524 = vst [vmem:[#allocation4 + $0xc8] sm:$0xff] %v5089_v17 }
  0x9e   : > { %525 = vst [vmem:[#allocation4 + $0xe0] sm:$0xff] %v5089_v17 }
  0x9f   : > { %526 = vst [vmem:[#allocation4 + $0x90] sm:$0xff] %v5089_v17 }
  0xa0   : > { %527 = vst [vmem:[#allocation4 + $0x70] sm:$0xff] %v5089_v17 }
  0xa1   : > { %528 = vst [vmem:[#allocation4 + $0xc0] sm:$0xff] %v5089_v17 }
  0xa2   : > { %529 = vst [vmem:[#allocation4 + $0xa8] sm:$0xff] %v5089_v17 }
  0xa3   : > { %530 = vst [vmem:[#allocation4 + $0xd0] sm:$0xff] %v5089_v17 }
  0xa4   : > { %531 = vst [vmem:[#allocation4 + $0x10] sm:$0xff] %v5089_v17 }
  0xa5   : > { %532 = vst [vmem:[#allocation4 + $0x28] sm:$0xff] %v5089_v17 }
  0xa6   : > { %533 = vst [vmem:[#allocation4 + $0xa0] sm:$0xff] %v5089_v17 }
  0xa7   : > { %534 = vst [vmem:[#allocation4 + $0xf8] sm:$0xff] %v5089_v17 }
  0xa8   : > { %535 = vst [vmem:[#allocation4 + $0x20] sm:$0xff] %v5089_v17 }
  0xa9   : > { %536 = vst [vmem:[#allocation4 + $0x98] sm:$0xff] %v5089_v17 }
  0xaa PF: > { %v541_v18 = vld [vmem:[%s5230_s27 + $0x20] sm:$0xff]  ;;  %v539_v19 = vld [vmem:[%s5230_s27 + $0x10] sm:$0xff]  ;;  %v8528_v21 = vmov 0   ;;  %v542_v22 = vld [vmem:[%s5230_s27 + $0x28] sm:$0xff]  ;;  %p4434_p0 = scmp.ne.s32.totalorder %s5070_s26, 1 }
  0xab   : > { %v537_v20 = vld [vmem:[%s5230_s27] sm:$0xff]  ;;  %4771 = vset.pattern.permute.xlu2 %v8528_v21  ;;  %4770 = vset.pattern.permute.xlu1 %v8528_v21  ;;  %v540_v23 = vld [vmem:[%s5230_s27 + $0x18] sm:$0xff]  ;;  %v538_v24 = vld [vmem:[%s5230_s27 + $0x8] sm:$0xff] }
  0xac   : > { %4769 = vset.pattern.permute.xlu0 %v8528_v21  ;;  %592 = vperm.xlu2 %4771, %v541_v18   ;;  %v545_v25 = vld [vmem:[%s5230_s27 + $0x40] sm:$0xff]  ;;  %v543_v26 = vld [vmem:[%s5230_s27 + $0x30] sm:$0xff]  ;;  %v544_v27 = vld [vmem:[%s5230_s27 + $0x38] sm:$0xff] }
  0xad   : > { %582 = vperm.xlu1 %4770, %v539_v19   ;;  %572 = vperm.xlu0 %4769, %v537_v20   ;;  %v548_v28 = vld [vmem:[%s5230_s27 + $0x58] sm:$0xff]  ;;  %v546_v29 = vld [vmem:[%s5230_s27 + $0x48] sm:$0xff]  ;;  %v547_v30 = vld [vmem:[%s5230_s27 + $0x50] sm:$0xff] }
  0xae   : > { %v551_v31 = vld [vmem:[%s5230_s27 + $0x70] sm:$0xff]  ;;  %v549_v32 = vld [vmem:[%s5230_s27 + $0x60] sm:$0xff]  ;;  %v550_v33 = vld [vmem:[%s5230_s27 + $0x68] sm:$0xff] }
  0xaf   : > { %v554_v34 = vld [vmem:[%s5230_s27 + $0x88] sm:$0xff]  ;;  %v552_v35 = vld [vmem:[%s5230_s27 + $0x78] sm:$0xff]  ;;  %v553_v36 = vld [vmem:[%s5230_s27 + $0x80] sm:$0xff] }
  0xb0   : > { %v557_v37 = vld [vmem:[%s5230_s27 + $0xa0] sm:$0xff]  ;;  %v555_v38 = vld [vmem:[%s5230_s27 + $0x90] sm:$0xff]  ;;  %v556_v39 = vld [vmem:[%s5230_s27 + $0x98] sm:$0xff] }
  0xb1   : > { %v560_v40 = vld [vmem:[%s5230_s27 + $0xb8] sm:$0xff]  ;;  %v558_v41 = vld [vmem:[%s5230_s27 + $0xa8] sm:$0xff]  ;;  %v559_v42 = vld [vmem:[%s5230_s27 + $0xb0] sm:$0xff] }
  0xb2   : > { %v563_v43 = vld [vmem:[%s5230_s27 + $0xd0] sm:$0xff]  ;;  %v561_v44 = vld [vmem:[%s5230_s27 + $0xc0] sm:$0xff]  ;;  %v562_v45 = vld [vmem:[%s5230_s27 + $0xc8] sm:$0xff] }
  0xb3   : > { %v566_v46 = vld [vmem:[%s5230_s27 + $0xe8] sm:$0xff]  ;;  %v564_v47 = vld [vmem:[%s5230_s27 + $0xd8] sm:$0xff]  ;;  %v565_v48 = vld [vmem:[%s5230_s27 + $0xe0] sm:$0xff] }
  0xb4   : > { %597 = vperm.xlu2 %4771, %v542_v22   ;;  %v927_v49 = vld [vmem:[%s5242_s8] sm:$0xff]  ;;  %v928_v50 = vld [vmem:[%s5242_s8 + $0x8] sm:$0xff]  ;;  %v929_v55 = vld [vmem:[%s5242_s8 + $0x10] sm:$0xff] }
  0xb5   : > { %587 = vperm.xlu1 %4770, %v540_v23   ;;  %577 = vperm.xlu0 %4769, %v538_v24   ;;  %vm943_vm1 = vnez %v927_v49  ;;  %vm944_vm2 = vnez %v928_v50  ;;  %v930_v56 = vld [vmem:[%s5242_s8 + $0x18] sm:$0xff]  ;;  %vm945_vm3 = vnez %v929_v55  ;;  %v569_v4 = vld [vmem:[%s414_s22] sm:$0x3]  ;;  %v931_v9 = vld [vmem:[%s5242_s8 + $0x20] sm:$0xff] }
  0xb6   : > { %v959_v51 = vsel %vm943_vm1, 16843009, %v8528_v21  ;;  %v960_v52 = vsel %vm944_vm2, 16843009, %v8528_v21  ;;  %vm946_vm4 = vnez %v930_v56  ;;  %v5413_v57 = vsel %vm945_vm3, 16843009, %v8528_v21 }
  0xb7   : > { %v975_v53 = vunpack.c.0.s8 %v959_v51  ;;  %v976_v54 = vunpack.c.0.s8 %v960_v52  ;;  %v5416_v58 = vsel %vm946_vm4, 16843009, %v8528_v21  ;;  %v983_v60 = vunpack.c.0.s8 %v5413_v57  ;;  %v932_v14 = vld [vmem:[%s5242_s8 + $0x28] sm:$0xff] }
  0xb8   : > { %v984_v61 = vunpack.c.0.s8 %v5416_v58  ;;  %v985_v62 = vunpack.c.1.s8 %v5413_v57  ;;  %v986_v63 = vunpack.c.1.s8 %v5416_v58  ;;  %v979_v0 = vunpack.c.2.s8 %v959_v51 }
  0xb9   : > { %v1039_v59 = vpack.c.b16 %v976_v54, %v975_v53  ;;  %v980_v1 = vunpack.c.2.s8 %v960_v52  ;;  %v981_v2 = vunpack.c.3.s8 %v959_v51  ;;  %v982_v3 = vunpack.c.3.s8 %v960_v52 }
  0xba   : > { %v977_v8 = vunpack.c.1.s8 %v959_v51  ;;  %v978_v11 = vunpack.c.1.s8 %v960_v52  ;;  %v1047_v12 = vpack.c.b16 %v984_v61, %v983_v60  ;;  %v1049_v13 = vpack.c.b16 %v986_v63, %v985_v62 }
  0xbb   : > { %v1040_v6 = vpack.c.b8 %v1039_v59, %v1039_v59  ;;  %v1043_v7 = vpack.c.b16 %v980_v1, %v979_v0  ;;  %v1045_v10 = vpack.c.b16 %v982_v3, %v981_v2  ;;  %v5429_v15 = vperm.slane %v569_v4, 0 }
  0xbc   : > { %612 = vperm.xlu2 %4771, %v545_v25   ;;  %v1048_v16 = vpack.c.b8 %v1047_v12, %v1047_v12  ;;  %vm947_vm5 = vnez %v931_v9  ;;  %v5431_v17 = vperm.slane %v569_v4, 1  ;;  %vm948_vm6 = vnez %v932_v14 }
  0xbd   : > { %602 = vperm.xlu0 %4769, %v543_v26   ;;  %607 = vperm.xlu1 %4770, %v544_v27   ;;  %v1044_v19 = vpack.c.b8 %v1043_v7, %v1043_v7  ;;  %vm1103_vm7 = vnez %v1040_v6  ;;  %v1046_v20 = vpack.c.b8 %v1045_v10, %v1045_v10  ;;  %v1041_v22 = vpack.c.b16 %v978_v11, %v977_v8 }
  0xbe   : > { %v1050_v23 = vpack.c.b8 %v1049_v13, %v1049_v13  ;;  %v5435_v24 = vsel %vm947_vm5, 16843009, %v8528_v21  ;;  %vm1107_vm8 = vnez %v1048_v16  ;;  %v5439_v27 = vsel %vm948_vm6, 16843009, %v8528_v21 }
  0xbf   : > { %vm1105_vm9 = vnez %v1044_v19  ;;  %vm5442_vm10 = vnez %v1046_v20  ;;  %v8855_v61 = vmov 0  ;;  %v8858_v62 = vmov 0 }
  0xc0   : > { %vm1108_vm11 = vnez %v1050_v23  ;;  %v8861_v11 = vmov 0  ;;  %v8866_v13 = vmov 0  ;;  %v993_v16 = vunpack.c.1.s8 %v5435_v24 }
  0xc1   : > { %v8873_v20 = vmov 0 }
  0xc4   : > { %627 = vperm.xlu2 %4771, %v548_v28  }
  0xc5   : > { %617 = vperm.xlu0 %4769, %v546_v29   ;;  %622 = vperm.xlu1 %4770, %v547_v30   ;;  %v1135_v29 = vsel %vm1103_vm7, 16843009, %v8528_v21 }
  0xcc   : > { %642 = vperm.xlu2 %4771, %v551_v31   ;;  %v1042_v31 = vpack.c.b8 %v1041_v22, %v1041_v22  ;;  %v8876_v22 = vmov 0 }
  0xcd   : > { %632 = vperm.xlu0 %4769, %v549_v32   ;;  %637 = vperm.xlu1 %4770, %v550_v33   ;;  %v991_v32 = vunpack.c.0.s8 %v5435_v24 }
  0xce   : > { %vm5460_vm12 = vnez %v1042_v31 }
  0xcf   : > { %v1136_v6 = vsel %vm5460_vm12, 16843009, %v8528_v21 }
  0xd0   : > { %v1169_v23 = vunpack.c.0.s8 %v1136_v6  ;;  %v1170_v30 = vunpack.c.1.s8 %v1136_v6 }
  0xd2   : > { %vm5561_vm12 = vcmp.ne.s32.totalorder %v1170_v30, 0 }
  0xd4   : > { %657 = vperm.xlu2 %4771, %v554_v34   ;;  %v1139_v34 = vsel %vm1107_vm8, 16843009, %v8528_v21 }
  0xd5   : > { %647 = vperm.xlu0 %4769, %v552_v35   ;;  %652 = vperm.xlu1 %4770, %v553_v36   ;;  %v987_v35 = vunpack.c.2.s8 %v5413_v57  ;;  %v992_v36 = vunpack.c.0.s8 %v5439_v27 }
  0xd7   : > { %v1055_v52 = vpack.c.b16 %v992_v36, %v991_v32  ;;  %v998_v36 = vunpack.c.3.s8 %v5439_v27 }
  0xd9   : > { %v1056_v3 = vpack.c.b8 %v1055_v52, %v1055_v52 }
  0xdb   : > { %vm5504_vm2 = vnez %v1056_v3 }
  0xdc   : > { %672 = vperm.xlu2 %4771, %v557_v37  }
  0xdd   : > { %662 = vperm.xlu0 %4769, %v555_v38   ;;  %667 = vperm.xlu1 %4770, %v556_v39   ;;  %v1167_v39 = vunpack.c.0.s8 %v1135_v29 }
  0xdf   : > { %vm5496_vm0 = vcmp.ne.s32.totalorder %v1167_v39, 0 }
  0xe4   : > { %687 = vperm.xlu2 %4771, %v560_v40   ;;  %v1137_v40 = vsel %vm1105_vm9, 16843009, %v8528_v21 }
  0xe5   : > { %677 = vperm.xlu0 %4769, %v558_v41   ;;  %682 = vperm.xlu1 %4770, %v559_v42   ;;  %v1175_v41 = vunpack.c.0.s8 %v1139_v34  ;;  %v1176_v42 = vunpack.c.1.s8 %v1139_v34  ;;  %v1171_v55 = vunpack.c.0.s8 %v1137_v40  ;;  %v1172_v60 = vunpack.c.1.s8 %v1137_v40 }
  0xe7   : > { %vm5465_vm13 = vcmp.ne.s32.totalorder %v1175_v41, 0  ;;  %vm5469_vm14 = vcmp.ne.s32.totalorder %v1176_v42, 0  ;;  %vm5514_vm4 = vcmp.ne.s32.totalorder %v1171_v55, 0  ;;  %vm5518_vm5 = vcmp.ne.s32.totalorder %v1172_v60, 0 }
  0xe8   : > { %v8856_v61 = vsel %vm5465_vm13, 4294967295, %v8855_v61  ;;  %v8859_v62 = vsel %vm5469_vm14, 4294967295, %v8858_v62  ;;  %v8874_v20 = vsel %vm5514_vm4, 4294967295, %v8873_v20  ;;  %v8877_v22 = vsel %vm5518_vm5, 4294967295, %v8876_v22 }
  0xe9   : > { %8857 = vst [vmem:[#allocation8_spill] sm:$0xff] %v8856_v61 }
  0xea   : > { %8860 = vst [vmem:[#allocation9_spill] sm:$0xff] %v8859_v62 }
  0xeb   : > { %8875 = vst [vmem:[#allocation12_spill] sm:$0xff] %v8874_v20  ;;  %v8933_v20 = vmov 0 }
  0xec   : > { %702 = vperm.xlu2 %4771, %v563_v43   ;;  %v1140_v43 = vsel %vm1108_vm11, 16843009, %v8528_v21  ;;  %8878 = vst [vmem:[#allocation13_spill] sm:$0xff] %v8877_v22  ;;  %vm5555_vm11 = vcmp.ne.s32.totalorder %v1169_v23, 0 }
  0xed   : > { %692 = vperm.xlu0 %4769, %v561_v44   ;;  %697 = vperm.xlu1 %4770, %v562_v45   ;;  %v988_v44 = vunpack.c.2.s8 %v5416_v58  ;;  %v1168_v45 = vunpack.c.1.s8 %v1135_v29  ;;  %v1177_v59 = vunpack.c.0.s8 %v1140_v43  ;;  %v1178_v63 = vunpack.c.1.s8 %v1140_v43 }
  0xef   : > { %v1051_v51 = vpack.c.b16 %v988_v44, %v987_v35  ;;  %vm5492_vm15 = vcmp.ne.s32.totalorder %v1177_v59, 0  ;;  %vm5500_vm1 = vcmp.ne.s32.totalorder %v1178_v63, 0  ;;  %vm5510_vm3 = vcmp.ne.s32.totalorder %v1168_v45, 0 }
  0xf0   : > { %v8862_v11 = vsel %vm5492_vm15, 4294967295, %v8861_v11  ;;  %v8867_v13 = vsel %vm5500_vm1, 4294967295, %v8866_v13  ;;  %v1143_v35 = vsel %vm5504_vm2, 16843009, %v8528_v21 }
  0xf1   : > { %v1052_v2 = vpack.c.b8 %v1051_v51, %v1051_v51  ;;  %8863 = vst [vmem:[#allocation10_spill] sm:$0xff] %v8862_v11  ;;  %v8918_v11 = vmov 0 }
  0xf2   : > { %8868 = vst [vmem:[#allocation11_spill] sm:$0xff] %v8867_v13 }
  0xf3   : > { %vm1109_vm6 = vnez %v1052_v2 }
  0xf4   : > { %717 = vperm.xlu2 %4771, %v566_v46   ;;  %v5458_v46 = vsel %vm5442_vm10, 16843009, %v8528_v21  ;;  %v1141_v39 = vsel %vm1109_vm6, 16843009, %v8528_v21 }
  0xf5   : > { %707 = vperm.xlu0 %4769, %v564_v47   ;;  %712 = vperm.xlu1 %4770, %v565_v48   ;;  %v997_v48 = vunpack.c.3.s8 %v5435_v24  ;;  %v1173_v0 = vunpack.c.0.s8 %v5458_v46  ;;  %v1174_v1 = vunpack.c.1.s8 %v5458_v46  ;;  %v1183_v47 = vunpack.c.0.s8 %v1143_v35 }
  0xf6   : > { %v1180_v60 = vunpack.c.1.s8 %v1141_v39 }
  0xf7   : > { %vm5547_vm9 = vcmp.ne.s32.totalorder %v1173_v0, 0  ;;  %vm5551_vm10 = vcmp.ne.s32.totalorder %v1174_v1, 0  ;;  %v1061_v2 = vpack.c.b16 %v998_v36, %v997_v48  ;;  %vm5569_vm2 = vcmp.ne.s32.totalorder %v1183_v47, 0 }
 0x106   : > { %v593_v5 = vpop.permute.xlu2 %592 }
 0x107   : > { %v743_v18 = vadd.f32 %v5429_v15, %v593_v5  ;;  %v744_v25 = vadd.f32 %v5431_v17, %v593_v5 }
 0x109   : > { %v807_v28 = vmul.f32 0.2, %v743_v18  ;;  %v808_v37 = vmul.f32 0.2, %v744_v25 }
 0x10b   : > { %v871_v50 = vmax.f32 %v743_v18, %v807_v28  ;;  %v872_v56 = vmax.f32 %v744_v25, %v808_v37  ;;  %v994_v18 = vunpack.c.1.s8 %v5439_v27  ;;  %v933_v25 = vld [vmem:[%s5242_s8 + $0x30] sm:$0xff] }
 0x10c   : > { %vm949_vm7 = vnez %v933_v25 }
 0x10d   : > { %v5486_v8 = vsel %vm5465_vm13, %v871_v50, -1e+30  ;;  %v5490_v9 = vsel %vm5469_vm14, %v872_v56, -1e+30  ;;  %v1057_v40 = vpack.c.b16 %v994_v18, %v993_v16  ;;  %v5567_v1 = vsel %vm949_vm7, 16843009, %v8528_v21 }
 0x10e   : > { %v598_v26 = vpop.permute.xlu2 %597 }
 0x10f   : > { %v745_v33 = vadd.f32 %v5429_v15, %v598_v26  ;;  %v746_v38 = vadd.f32 %v5431_v17, %v598_v26  ;;  %v934_v26 = vld [vmem:[%s5242_s8 + $0x38] sm:$0xff]  ;;  %v1058_v63 = vpack.c.b8 %v1057_v40, %v1057_v40 }
 0x110   : > { %vm950_vm8 = vnez %v934_v26 }
 0x111   : > { %v809_v49 = vmul.f32 0.2, %v745_v33  ;;  %v810_v53 = vmul.f32 0.2, %v746_v38  ;;  %v5579_v48 = vsel %vm950_vm8, 16843009, %v8528_v21  ;;  %vm5605_vm7 = vnez %v1058_v63 }
 0x112   : > { %v1000_v63 = vunpack.c.0.s8 %v5579_v48  ;;  %v1004_v31 = vunpack.c.2.s8 %v5579_v48 }
 0x113   : > { %v873_v7 = vmax.f32 %v745_v33, %v809_v49  ;;  %v874_v10 = vmax.f32 %v746_v38, %v810_v53  ;;  %v1184_v49 = vunpack.c.1.s8 %v1143_v35  ;;  %v1179_v53 = vunpack.c.0.s8 %v1141_v39 }
 0x115   : > { %v5530_v33 = vsel %vm5492_vm15, %v873_v7, -1e+30  ;;  %v5534_v34 = vsel %vm5500_vm1, %v874_v10, -1e+30  ;;  %v8887_v7 = vmov 0  ;;  %vm5573_vm6 = vcmp.ne.s32.totalorder %v1184_v49, 0 }
 0x116   : > { %v613_v54 = vpop.permute.xlu2 %612  ;;  %v8888_v7 = vsel %vm5569_vm2, 4294967295, %v8887_v7  ;;  %v8890_v10 = vmov 0  ;;  %vm5625_vm8 = vcmp.ne.s32.totalorder %v1179_v53, 0  ;;  %vm5629_vm1 = vcmp.ne.s32.totalorder %v1180_v60, 0 }
 0x117   : > { %v5476_v4 = vadd.f32 %v5429_v15, %v613_v54  ;;  %v5479_v5 = vadd.f32 %v5431_v17, %v613_v54  ;;  %8889 = vst [vmem:[#allocation14_spill] sm:$0xff] %v8888_v7  ;;  %v8891_v10 = vsel %vm5573_vm6, 4294967295, %v8890_v10  ;;  %v935_v7 = vld [vmem:[%s5242_s8 + $0x40] sm:$0xff] }
 0x118   : > { %8892 = vst [vmem:[#allocation15_spill] sm:$0xff] %v8891_v10  ;;  %vm8924_vm13 = vnez %v935_v7 }
 0x119   : > { %v815_v28 = vmul.f32 0.2, %v5476_v4  ;;  %v816_v29 = vmul.f32 0.2, %v5479_v5 }
 0x11b   : > { %v879_v45 = vmax.f32 %v5476_v4, %v815_v28  ;;  %v880_v46 = vmax.f32 %v5479_v5, %v816_v29 }
 0x11e   : > { %v628_v32 = vpop.permute.xlu2 %627 }
 0x11f   : > { %v583_v37 = vpop.permute.xlu1 %582  ;;  %v573_v38 = vpop.permute.xlu0 %572  ;;  %v5582_v14 = vadd.f32 %v5429_v15, %v628_v32  ;;  %v5597_v26 = vadd.f32 %v5431_v17, %v628_v32 }
 0x120   : > { %v739_v41 = vadd.f32 %v5429_v15, %v583_v37  ;;  %v740_v42 = vadd.f32 %v5431_v17, %v583_v37  ;;  %v735_v43 = vadd.f32 %v5429_v15, %v573_v38  ;;  %v736_v44 = vadd.f32 %v5431_v17, %v573_v38 }
 0x121   : > { %v5644_v60 = vmul.f32 0.2, %v5582_v14 }
 0x122   : > { %v803_v50 = vmul.f32 0.2, %v739_v41  ;;  %v804_v51 = vmul.f32 0.2, %v740_v42  ;;  %v799_v52 = vmul.f32 0.2, %v735_v43 }
 0x123   : > { %v800_v54 = vmul.f32 0.2, %v736_v44 }
 0x124   : > { %v863_v3 = vmax.f32 %v735_v43, %v799_v52  ;;  %v867_v4 = vmax.f32 %v739_v41, %v803_v50  ;;  %v868_v5 = vmax.f32 %v740_v42, %v804_v51  ;;  %v5617_v41 = vsel %vm5569_vm2, %v879_v45, -1e+30 }
 0x125   : > { %v864_v6 = vmax.f32 %v736_v44, %v800_v54  ;;  %8897 = vst [vmem:[#allocation18_spill] sm:$0xff] %v5617_v41  ;;  %v5621_v42 = vsel %vm5573_vm6, %v880_v46, -1e+30  ;;  %v1062_v43 = vpack.c.b8 %v1061_v2, %v1061_v2  ;;  %v8899_v52 = vmov 0 }
 0x126   : > { %v643_v16 = vpop.permute.xlu2 %642  ;;  %v5586_v18 = vsel %vm5496_vm0, %v863_v3, -1e+30  ;;  %v5590_v23 = vsel %vm5514_vm4, %v867_v4, -1e+30  ;;  %v5594_v25 = vsel %vm5518_vm5, %v868_v5, -1e+30  ;;  %v999_v54 = vunpack.c.0.s8 %v5567_v1 }
 0x127   : > { %8893 = vst [vmem:[#allocation16_spill] sm:$0xff] %v5590_v23  ;;  %v588_v28 = vpop.permute.xlu1 %587  ;;  %v578_v29 = vpop.permute.xlu0 %577  ;;  %v5601_v30 = vsel %vm5510_vm3, %v864_v6, -1e+30  ;;  %v1397_v35 = vmax.f32 %v5590_v23, %v5594_v25  ;;  %v8900_v52 = vsel %vm5625_vm8, 4294967295, %v8899_v52  ;;  %v8902_v45 = vmov 0 }
 0x128   : > { %8894 = vst [vmem:[#allocation17_spill] sm:$0xff] %v5594_v25  ;;  %v741_v37 = vadd.f32 %v5429_v15, %v588_v28  ;;  %v742_v38 = vadd.f32 %v5431_v17, %v588_v28  ;;  %v737_v32 = vadd.f32 %v5429_v15, %v578_v29  ;;  %v738_v39 = vadd.f32 %v5431_v17, %v578_v29 }
 0x129   : > { %v1391_v40 = vmax.f32 %v5586_v18, %v5601_v30  ;;  %1398 = vmax.xlane.f32.xlu1 %v1397_v35  ;;  %8898 = vst [vmem:[#allocation19_spill] sm:$0xff] %v5621_v42  ;;  %v8903_v45 = vsel %vm5629_vm1, 4294967295, %v8902_v45  ;;  %v5636_v46 = vsel %vm5605_vm7, 16843009, %v8528_v21  ;;  %v5641_v2 = vadd.f32 %v5429_v15, %v643_v16 }
 0x12a   : > { %v805_v44 = vmul.f32 0.2, %v741_v37  ;;  %v806_v47 = vmul.f32 0.2, %v742_v38  ;;  %v801_v49 = vmul.f32 0.2, %v737_v32  ;;  %vm5649_vm6 = vnez %v1062_v43 }
 0x12b   : > { %v802_v51 = vmul.f32 0.2, %v738_v39  ;;  %1392 = vmax.xlane.f32.xlu2 %v1391_v40  ;;  %8901 = vst [vmem:[#allocation20_spill] sm:$0xff] %v8900_v52  ;;  %v5647_v5 = vmul.f32 0.2, %v5597_v26  ;;  %v5654_v29 = vadd.f32 %v5431_v17, %v643_v16  ;;  %v1185_v40 = vunpack.c.0.s8 %v5636_v46 }
 0x12c   : > { %8904 = vst [vmem:[#allocation21_spill] sm:$0xff] %v8903_v45  ;;  %v869_v53 = vmax.f32 %v741_v37, %v805_v44  ;;  %v870_v3 = vmax.f32 %v742_v38, %v806_v47  ;;  %v865_v4 = vmax.f32 %v737_v32, %v801_v49  ;;  %v1063_v43 = vpack.c.b16 %v1000_v63, %v999_v54 }
 0x12d   : > { %v866_v6 = vmax.f32 %v738_v39, %v802_v51  ;;  %v5676_v44 = vmul.f32 0.2, %v5641_v2  ;;  %v1146_v54 = vsel %vm5649_vm6, 16843009, %v8528_v21  ;;  %v1003_v63 = vunpack.c.2.s8 %v5567_v1 }
 0x12e   : > { %v658_v35 = vpop.permute.xlu2 %657  ;;  %v5658_v36 = vsel %vm5547_vm9, %v869_v53, -1e+30  ;;  %v5662_v37 = vsel %vm5551_vm10, %v870_v3, -1e+30  ;;  %v5666_v38 = vsel %vm5555_vm11, %v865_v4, -1e+30  ;;  %v885_v3 = vmax.f32 %v5582_v14, %v5644_v60 }
 0x12f   : > { %v603_v32 = vpop.permute.xlu0 %602  ;;  %v1400_v39 = vmax.f32 %v5658_v36, %v5662_v37  ;;  %v5672_v16 = vsel %vm5561_vm12, %v866_v6, -1e+30  ;;  %v5691_v4 = vmul.f32 0.2, %v5654_v29  ;;  %v1186_v53 = vunpack.c.1.s8 %v5636_v46 }
 0x130   : > { %v747_v47 = vadd.f32 %v5429_v15, %v603_v32  ;;  %v748_v49 = vadd.f32 %v5431_v17, %v603_v32  ;;  %v1394_v51 = vmax.f32 %v5666_v38, %v5672_v16  ;;  %vm5695_vm7 = vcmp.ne.s32.totalorder %v1185_v40, 0 }
 0x131   : > { %v8907_v14 = vmov 0  ;;  %v886_v60 = vmax.f32 %v5597_v26, %v5647_v5  ;;  %v1064_v28 = vpack.c.b8 %v1063_v43, %v1063_v43  ;;  %v1190_v13 = vunpack.c.1.s8 %v1146_v54  ;;  %v936_v43 = vld [vmem:[%s5242_s8 + $0x48] sm:$0xff] }
 0x132   : > { %v811_v6 = vmul.f32 0.2, %v747_v47  ;;  %v812_v32 = vmul.f32 0.2, %v748_v49  ;;  %1395 = vmax.xlane.f32.xlu0 %v1394_v51  ;;  %v8908_v14 = vsel %vm5695_vm7, 4294967295, %v8907_v14  ;;  %v1189_v51 = vunpack.c.0.s8 %v1146_v54 }
 0x133   : > { %1401 = vmax.xlane.f32.xlu2 %v1400_v39  ;;  %8909 = vst [vmem:[#allocation22_spill] sm:$0xff] %v8908_v14  ;;  %v1067_v39 = vpack.c.b16 %v1004_v31, %v1003_v63  ;;  %v1005_v46 = vunpack.c.3.s8 %v5567_v1  ;;  %v1006_v40 = vunpack.c.3.s8 %v5579_v48  ;;  %v5709_v62 = vadd.f32 %v5429_v15, %v658_v35 }
 0x134   : > { %v875_v50 = vmax.f32 %v747_v47, %v811_v6  ;;  %v876_v10 = vmax.f32 %v748_v49, %v812_v32  ;;  %v5721_v31 = vadd.f32 %v5431_v17, %v658_v35  ;;  %vm1115_vm6 = vnez %v1064_v28 }
 0x135   : > { %v1068_v6 = vpack.c.b8 %v1067_v39, %v1067_v39  ;;  %v1069_v32 = vpack.c.b16 %v1006_v40, %v1005_v46  ;;  %vm5727_vm15 = vcmp.ne.s32.totalorder %v1186_v53, 0  ;;  %v8915_v35 = vmov 0 }
 0x136   : > { %v5713_v26 = vsel %vm5625_vm8, %v875_v50, -1e+30  ;;  %v5717_v5 = vsel %vm5629_vm1, %v876_v10, -1e+30  ;;  %v673_v54 = vpop.permute.xlu2 %672  ;;  %v8912_v10 = vmov 0  ;;  %vm5731_vm1 = vcmp.ne.s32.totalorder %v1189_v51, 0 }
 0x137   : > { %8910 = vst [vmem:[#allocation23_spill] sm:$0xff] %v5713_v26  ;;  %v618_v47 = vpop.permute.xlu0 %617  ;;  %v1409_v49 = vmax.f32 %v5713_v26, %v5717_v5  ;;  %v8913_v10 = vsel %vm5727_vm15, 4294967295, %v8912_v10  ;;  %v8916_v35 = vsel %vm5731_vm1, 4294967295, %v8915_v35  ;;  %vm5735_vm8 = vcmp.ne.s32.totalorder %v1190_v13, 0  ;;  %v937_v26 = vld [vmem:[%s5242_s8 + $0x50] sm:$0xff] }
 0x138   : > { %8911 = vst [vmem:[#allocation24_spill] sm:$0xff] %v5717_v5  ;;  %v753_v63 = vadd.f32 %v5429_v15, %v618_v47  ;;  %v754_v50 = vadd.f32 %v5431_v17, %v618_v47  ;;  %v8919_v11 = vsel %vm5735_vm8, 4294967295, %v8918_v11  ;;  %vm952_vm2 = vnez %v936_v43 }
 0x139   : > { %1410 = vmax.xlane.f32.xlu1 %v1409_v49  ;;  %8914 = vst [vmem:[#allocation25_spill] sm:$0xff] %v8913_v10  ;;  %v8921_v39 = vmax.f32 %v5530_v33, %v5534_v34  ;;  %v8922_v46 = vmov 0   ;;  %vm1117_vm14 = vnez %v1068_v6  ;;  %v5744_v40 = vmul.f32 0.2, %v5709_v62 }
 0x13a   : > { %8917 = vst [vmem:[#allocation26_spill] sm:$0xff] %v8916_v35  ;;  %v817_v28 = vmul.f32 0.2, %v753_v63  ;;  %v818_v21 = vmul.f32 0.2, %v754_v50  ;;  %v8923_v51 = vmax.f32 %v5486_v8, %v5490_v9  ;;  %v1070_v13 = vpack.c.b8 %v1069_v32, %v1069_v32 }
 0x13b   : > { %8920 = vst [vmem:[#allocation27_spill] sm:$0xff] %v8919_v11  ;;  %1407 = vmax.xlane.f32.xlu0 %v8921_v39  ;;  %v1147_v53 = vsel %vm1115_vm6, 16843009, %v8922_v46  ;;  %v5751_v43 = vsel %vm8924_vm13, 16843009, %v8922_v46  ;;  %v8929_v10 = vmov 0 }
 0x13c   : > { %1404 = vmax.xlane.f32.xlu2 %v8923_v51  ;;  %v5754_v47 = vsel %vm952_vm2, 16843009, %v8922_v46  ;;  %v5757_v49 = vmul.f32 0.2, %v5721_v31  ;;  %v881_v39 = vmax.f32 %v753_v63, %v817_v28  ;;  %v882_v6 = vmax.f32 %v754_v50, %v818_v21 }
 0x13d   : > { %v5761_v45 = vsel %vm5731_vm1, %v885_v3, -1e+30  ;;  %v5765_v51 = vsel %vm5735_vm8, %v886_v60, -1e+30  ;;  %v1191_v32 = vunpack.c.0.s8 %v1147_v53  ;;  %v1192_v7 = vunpack.c.1.s8 %v1147_v53 }
 0x13e   : > { %8925 = vst [vmem:[#allocation28_spill] sm:$0xff] %v5761_v45  ;;  %v1149_v52 = vsel %vm1117_vm14, 16843009, %v8922_v46  ;;  %v5770_v61 = vsel %vm5695_vm7, %v881_v39, -1e+30  ;;  %v1009_v21 = vunpack.c.1.s8 %v5751_v43  ;;  %v1010_v3 = vunpack.c.1.s8 %v5754_v47  ;;  %v688_v39 = vpop.permute.xlu2 %687 }
 0x13f   : > { %8926 = vst [vmem:[#allocation29_spill] sm:$0xff] %v5765_v51  ;;  %v5774_v63 = vsel %vm5727_vm15, %v882_v6, -1e+30  ;;  %v5779_v50 = vadd.f32 %v5429_v15, %v673_v54  ;;  %v5782_v60 = vadd.f32 %v5431_v17, %v673_v54  ;;  %v633_v28 = vpop.permute.xlu0 %632  ;;  %vm1118_vm13 = vnez %v1070_v13 }
 0x140   : > { %8927 = vst [vmem:[#allocation30_spill] sm:$0xff] %v5770_v61  ;;  %v1418_v53 = vmax.f32 %v5770_v61, %v5774_v63  ;;  %v759_v11 = vadd.f32 %v5429_v15, %v633_v28  ;;  %v760_v35 = vadd.f32 %v5431_v17, %v633_v28  ;;  %v1424_v54 = vmax.f32 %v5761_v45, %v5765_v51 }
 0x141   : > { %8928 = vst [vmem:[#allocation31_spill] sm:$0xff] %v5774_v63  ;;  %vm5794_vm14 = vcmp.ne.s32.totalorder %v1191_v32, 0  ;;  %v1195_v13 = vunpack.c.0.s8 %v1149_v52  ;;  %v1011_v14 = vunpack.c.2.s8 %v5751_v43  ;;  %v8932_v61 = vmax.f32 %v5617_v41, %v5621_v42  ;;  %v938_v41 = vld [vmem:[%s5242_s8 + $0x58] sm:$0xff] }
 0x142   : > { %1419 = vmax.xlane.f32.xlu1 %v1418_v53  ;;  %v8930_v10 = vsel %vm5794_vm14, 4294967295, %v8929_v10  ;;  %v823_v63 = vmul.f32 0.2, %v759_v11  ;;  %v824_v6 = vmul.f32 0.2, %v760_v35  ;;  %v1073_v53 = vpack.c.b16 %v1010_v3, %v1009_v21 }
 0x143   : > { %8931 = vst [vmem:[#allocation32_spill] sm:$0xff] %v8930_v10  ;;  %1416 = vmax.xlane.f32.xlu0 %v8932_v61  ;;  %v1150_v28 = vsel %vm1118_vm13, 16843009, %v8922_v46  ;;  %v5804_v22 = vmul.f32 0.2, %v5779_v50  ;;  %vm5809_vm2 = vcmp.ne.s32.totalorder %v1192_v7, 0  ;;  %v1012_v5 = vunpack.c.2.s8 %v5754_v47 }
 0x144   : > { %v5807_v32 = vmul.f32 0.2, %v5782_v60  ;;  %v8934_v20 = vsel %vm5809_vm2, 4294967295, %v8933_v20  ;;  %v887_v25 = vmax.f32 %v759_v11, %v823_v63  ;;  %v888_v23 = vmax.f32 %v760_v35, %v824_v6 }
 0x145   : > { %8935 = vst [vmem:[#allocation33_spill] sm:$0xff] %v8934_v20  ;;  %v1196_v42 = vunpack.c.1.s8 %v1149_v52  ;;  %v1074_v61 = vpack.c.b8 %v1073_v53, %v1073_v53  ;;  %v5817_v21 = vadd.f32 %v5429_v15, %v688_v39  ;;  %vm5819_vm6 = vcmp.ne.s32.totalorder %v1195_v13, 0  ;;  %v5879_v20 = vpop.permute.xlu1 %607  ;;  %v9164_v59 = vld [vmem:[#allocation28_spill] sm:$0xff] }
 0x146   : > { %v8936_v3 = vmov 0  ;;  %v1197_v51 = vunpack.c.0.s8 %v1150_v28  ;;  %v1075_v7 = vpack.c.b16 %v1012_v5, %v1011_v14  ;;  %v5825_v45 = vsel %vm5794_vm14, %v887_v25, -1e+30  ;;  %v9165_v0 = vld [vmem:[#allocation29_spill] sm:$0xff] }
 0x147   : > { %v8937_v3 = vsel %vm5819_vm6, 4294967295, %v8936_v3  ;;  %8939 = vst [vmem:[#allocation35_spill] sm:$0xff] %v5825_v45  ;;  %v5829_v11 = vsel %vm5809_vm2, %v888_v23, -1e+30  ;;  %vm1120_vm13 = vnez %v1074_v61  ;;  %vm953_vm8 = vnez %v937_v26  ;;  %v648_v52 = vpop.permute.xlu0 %647 }
 0x148   : > { %8938 = vst [vmem:[#allocation34_spill] sm:$0xff] %v8937_v3  ;;  %v1427_v35 = vmax.f32 %v5825_v45, %v5829_v11  ;;  %v1198_v63 = vunpack.c.1.s8 %v1150_v28  ;;  %v1152_v6 = vsel %vm1120_vm13, 16843009, %v8922_v46  ;;  %vm954_vm1 = vnez %v938_v41  ;;  %v9178_v56 = vld [vmem:[#allocation31_spill] sm:$0xff] }
 0x149   : > { %8940 = vst [vmem:[#allocation36_spill] sm:$0xff] %v5829_v11  ;;  %v5835_v14 = vadd.f32 %v5431_v17, %v688_v39  ;;  %v765_v25 = vadd.f32 %v5429_v15, %v648_v52  ;;  %v766_v5 = vadd.f32 %v5431_v17, %v648_v52  ;;  %vm5839_vm14 = vcmp.ne.s32.totalorder %v1196_v42, 0 }
 0x14a   : > { %v8941_v23 = vmov 0  ;;  %1428 = vmax.xlane.f32.xlu1 %v1427_v35  ;;  %v8944_v13 = vmax.f32 %v5641_v2, %v5676_v44  ;;  %v1076_v39 = vpack.c.b8 %v1075_v7, %v1075_v7  ;;  %v5853_v28 = vsel %vm953_vm8, 16843009, %v8922_v46 }
 0x14b   : > { %v8942_v23 = vsel %vm5839_vm14, 4294967295, %v8941_v23  ;;  %v829_v53 = vmul.f32 0.2, %v765_v25  ;;  %v830_v42 = vmul.f32 0.2, %v766_v5  ;;  %1425 = vmax.xlane.f32.xlu0 %v1424_v54  ;;  %v1201_v61 = vunpack.c.0.s8 %v1152_v6 }
 0x14c   : > { %8943 = vst [vmem:[#allocation37_spill] sm:$0xff] %v8942_v23  ;;  %v5850_v41 = vsel %vm5819_vm6, %v8944_v13, -1e+30  ;;  %v5856_v52 = vsel %vm954_vm1, 16843009, %v8922_v46  ;;  %v8946_v2 = vmax.f32 %v5654_v29, %v5691_v4  ;;  %vm5868_vm13 = vcmp.ne.s32.totalorder %v1197_v51, 0 }
 0x14d   : > { %8945 = vst [vmem:[#allocation38_spill] sm:$0xff] %v5850_v41  ;;  %v5859_v35 = vmul.f32 0.2, %v5817_v21  ;;  %v8948_v7 = vmov 0  ;;  %vm5872_vm8 = vcmp.ne.s32.totalorder %v1198_v63, 0  ;;  %v8951_v54 = vmov 0 }
 0x14e   : > { %v5866_v44 = vsel %vm5839_vm14, %v8946_v2, -1e+30  ;;  %v8949_v7 = vsel %vm5868_vm13, 4294967295, %v8948_v7  ;;  %v8952_v54 = vsel %vm5872_vm8, 4294967295, %v8951_v54  ;;  %v5877_v13 = vmul.f32 0.2, %v5835_v14 }
 0x14f   : > { %8947 = vst [vmem:[#allocation39_spill] sm:$0xff] %v5866_v44  ;;  %v893_v26 = vmax.f32 %v765_v25, %v829_v53  ;;  %v894_v3 = vmax.f32 %v766_v5, %v830_v42  ;;  %vm1121_vm1 = vnez %v1076_v39  ;;  %v1202_v29 = vunpack.c.1.s8 %v1152_v6  ;;  %v663_v5 = vpop.permute.xlu0 %662 }
 0x150   : > { %8950 = vst [vmem:[#allocation40_spill] sm:$0xff] %v8949_v7  ;;  %v1153_v4 = vsel %vm1121_vm1, 16843009, %v8922_v46  ;;  %v1015_v51 = vunpack.c.0.s8 %v5853_v28  ;;  %v1016_v2 = vunpack.c.0.s8 %v5856_v52  ;;  %vm5892_vm14 = vcmp.ne.s32.totalorder %v1201_v61, 0 }
 0x151   : > { %8953 = vst [vmem:[#allocation41_spill] sm:$0xff] %v8952_v54  ;;  %v5886_v63 = vsel %vm5868_vm13, %v893_v26, -1e+30  ;;  %v5890_v23 = vsel %vm5872_vm8, %v894_v3, -1e+30  ;;  %v1017_v6 = vunpack.c.1.s8 %v5853_v28  ;;  %v1203_v53 = vunpack.c.0.s8 %v1153_v4 }
 0x152   : > { %8954 = vst [vmem:[#allocation42_spill] sm:$0xff] %v5886_v63  ;;  %v1436_v39 = vmax.f32 %v5886_v63, %v5890_v23  ;;  %v1204_v42 = vunpack.c.1.s8 %v1153_v4  ;;  %v1079_v10 = vpack.c.b16 %v1016_v2, %v1015_v51  ;;  %v904_v26 = vmax.f32 %v5782_v60, %v5807_v32 }
 0x153   : > { %8955 = vst [vmem:[#allocation43_spill] sm:$0xff] %v5890_v23  ;;  %v771_v54 = vadd.f32 %v5429_v15, %v663_v5  ;;  %v772_v3 = vadd.f32 %v5431_v17, %v663_v5  ;;  %v1433_v61 = vmax.f32 %v5850_v41, %v5866_v44  ;;  %vm5907_vm1 = vcmp.ne.s32.totalorder %v1202_v29, 0  ;;  %v703_v29 = vpop.permute.xlu2 %702  ;;  %v939_v41 = vld [vmem:[%s5242_s8 + $0x60] sm:$0xff] }
 0x154   : > { %1437 = vmax.xlane.f32.xlu1 %v1436_v39  ;;  %v8958_v11 = vmov 0  ;;  %v1080_v4 = vpack.c.b8 %v1079_v10, %v1079_v10  ;;  %v1018_v51 = vunpack.c.1.s8 %v5856_v52  ;;  %v8961_v5 = vmax.f32 %v5709_v62, %v5744_v40 }
 0x155   : > { %v8959_v11 = vsel %vm5907_vm1, 4294967295, %v8958_v11  ;;  %v835_v32 = vmul.f32 0.2, %v771_v54  ;;  %v836_v2 = vmul.f32 0.2, %v772_v3  ;;  %1434 = vmax.xlane.f32.xlu0 %v1433_v61  ;;  %vm5921_vm6 = vcmp.ne.s32.totalorder %v1203_v53, 0 }
 0x156   : > { %8960 = vst [vmem:[#allocation44_spill] sm:$0xff] %v8959_v11  ;;  %v5919_v39 = vsel %vm5892_vm14, %v8961_v5, -1e+30  ;;  %v8962_v7 = vmov 0  ;;  %vm5925_vm8 = vcmp.ne.s32.totalorder %v1204_v42, 0  ;;  %v8965_v10 = vmov 0 }
 0x157   : > { %v8963_v7 = vsel %vm5921_vm6, 4294967295, %v8962_v7  ;;  %v8966_v10 = vsel %vm5925_vm8, 4294967295, %v8965_v10  ;;  %vm1123_vm13 = vnez %v1080_v4  ;;  %v1081_v60 = vpack.c.b16 %v1018_v51, %v1017_v6  ;;  %v940_v6 = vld [vmem:[%s5242_s8 + $0x68] sm:$0xff] }
 0x158   : > { %8964 = vst [vmem:[#allocation45_spill] sm:$0xff] %v8963_v7  ;;  %v899_v61 = vmax.f32 %v771_v54, %v835_v32  ;;  %v900_v23 = vmax.f32 %v772_v3, %v836_v2  ;;  %v8968_v62 = vmax.f32 %v5721_v31, %v5757_v49  ;;  %v1155_v53 = vsel %vm1123_vm13, 16843009, %v8922_v46  ;;  %v5952_v3 = vpop.permute.xlu1 %622 }
 0x159   : > { %8967 = vst [vmem:[#allocation46_spill] sm:$0xff] %v8966_v10  ;;  %v1207_v5 = vunpack.c.0.s8 %v1155_v53  ;;  %v1208_v63 = vunpack.c.1.s8 %v1155_v53  ;;  %v1082_v42 = vpack.c.b8 %v1081_v60, %v1081_v60  ;;  %v1021_v44 = vunpack.c.3.s8 %v5853_v28  ;;  %v678_v60 = vpop.permute.xlu0 %677 }
 0x15a   : > { %v5934_v40 = vsel %vm5907_vm1, %v8968_v62, -1e+30  ;;  %v5940_v4 = vadd.f32 %v5429_v15, %v703_v29  ;;  %v5944_v54 = vsel %vm5921_vm6, %v899_v61, -1e+30  ;;  %v5948_v31 = vsel %vm5925_vm8, %v900_v23, -1e+30 }
 0x15b   : > { %8969 = vst [vmem:[#allocation47_spill] sm:$0xff] %v5944_v54  ;;  %v1022_v49 = vunpack.c.3.s8 %v5856_v52  ;;  %v5955_v51 = vadd.f32 %v5431_v17, %v703_v29  ;;  %v1442_v32 = vmax.f32 %v5919_v39, %v5934_v40  ;;  %v1445_v2 = vmax.f32 %v5944_v54, %v5948_v31 }
 0x15c   : > { %8970 = vst [vmem:[#allocation48_spill] sm:$0xff] %v5948_v31  ;;  %vm1124_vm13 = vnez %v1082_v42  ;;  %v777_v61 = vadd.f32 %v5429_v15, %v678_v60  ;;  %v778_v23 = vadd.f32 %v5431_v17, %v678_v60  ;;  %vm5963_vm8 = vcmp.ne.s32.totalorder %v1207_v5, 0 }
 0x15d   : > { %v8971_v62 = vmov 0  ;;  %vm955_vm6 = vnez %v939_v41  ;;  %1446 = vmax.xlane.f32.xlu1 %v1445_v2  ;;  %vm5967_vm2 = vcmp.ne.s32.totalorder %v1208_v63, 0  ;;  %v8974_v29 = vmov 0  ;;  %1443 = vmax.xlane.f32.xlu0 %v1442_v32 }
 0x15e   : > { %v8972_v62 = vsel %vm5963_vm8, 4294967295, %v8971_v62  ;;  %v8975_v29 = vsel %vm5967_vm2, 4294967295, %v8974_v29  ;;  %v1156_v53 = vsel %vm1124_vm13, 16843009, %v8922_v46  ;;  %v1085_v10 = vpack.c.b16 %v1022_v49, %v1021_v44 }
 0x15f   : > { %8973 = vst [vmem:[#allocation49_spill] sm:$0xff] %v8972_v62  ;;  %vm956_vm15 = vnez %v940_v6  ;;  %v841_v7 = vmul.f32 0.2, %v777_v61  ;;  %v842_v42 = vmul.f32 0.2, %v778_v23  ;;  %v1209_v31 = vunpack.c.0.s8 %v1156_v53 }
 0x160   : > { %8976 = vst [vmem:[#allocation50_spill] sm:$0xff] %v8975_v29  ;;  %v1210_v54 = vunpack.c.1.s8 %v1156_v53  ;;  %v8977_v5 = vmax.f32 %v5779_v50, %v5804_v22  ;;  %v1086_v63 = vpack.c.b8 %v1085_v10, %v1085_v10  ;;  %v5980_v60 = vsel %vm955_vm6, 16843009, %v8922_v46  ;;  %v6016_v62 = vpop.permute.xlu1 %637 }
 0x161   : > { %v5983_v2 = vsel %vm956_vm15, 16843009, %v8922_v46  ;;  %v905_v44 = vmax.f32 %v777_v61, %v841_v7  ;;  %v906_v49 = vmax.f32 %v778_v23, %v842_v42  ;;  %vm5985_vm13 = vcmp.ne.s32.totalorder %v1209_v31, 0  ;;  %v693_v23 = vpop.permute.xlu0 %692 }
 0x162   : > { %v5977_v41 = vsel %vm5963_vm8, %v8977_v5, -1e+30  ;;  %v8979_v6 = vmov 0  ;;  %vm5989_vm7 = vcmp.ne.s32.totalorder %v1210_v54, 0  ;;  %v8982_v32 = vmov 0 }
 0x163   : > { %8978 = vst [vmem:[#allocation51_spill] sm:$0xff] %v5977_v41  ;;  %v8980_v6 = vsel %vm5985_vm13, 4294967295, %v8979_v6  ;;  %v8983_v32 = vsel %vm5989_vm7, 4294967295, %v8982_v32  ;;  %v5995_v22 = vsel %vm5967_vm2, %v904_v26, -1e+30  ;;  %vm1126_vm8 = vnez %v1086_v63 }
 0x164   : > { %8981 = vst [vmem:[#allocation52_spill] sm:$0xff] %v8980_v6  ;;  %v1023_v50 = vunpack.c.0.s8 %v5980_v60  ;;  %v1024_v10 = vunpack.c.0.s8 %v5983_v2  ;;  %v6001_v7 = vsel %vm5985_vm13, %v905_v44, -1e+30  ;;  %v6005_v31 = vsel %vm5989_vm7, %v906_v49, -1e+30 }
 0x165   : > { %8984 = vst [vmem:[#allocation53_spill] sm:$0xff] %v8983_v32  ;;  %v1158_v54 = vsel %vm1126_vm8, 16843009, %v8922_v46  ;;  %v1027_v61 = vunpack.c.2.s8 %v5980_v60  ;;  %v1454_v26 = vmax.f32 %v6001_v7, %v6005_v31  ;;  %v851_v63 = vmul.f32 0.2, %v5940_v4 }
 0x166   : > { %8985 = vst [vmem:[#allocation54_spill] sm:$0xff] %v5995_v22  ;;  %v1213_v53 = vunpack.c.0.s8 %v1158_v54  ;;  %v1214_v42 = vunpack.c.1.s8 %v1158_v54  ;;  %v1087_v5 = vpack.c.b16 %v1024_v10, %v1023_v50  ;;  %v783_v44 = vadd.f32 %v5429_v15, %v693_v23 }
 0x167   : > { %8986 = vst [vmem:[#allocation55_spill] sm:$0xff] %v6001_v7  ;;  %v784_v29 = vadd.f32 %v5431_v17, %v693_v23  ;;  %v1451_v49 = vmax.f32 %v5977_v41, %v5995_v22  ;;  %1455 = vmax.xlane.f32.xlu1 %v1454_v26  ;;  %v8988_v32 = vmov 0  ;;  %v8991_v54 = vmov 0 }
 0x168   : > { %8987 = vst [vmem:[#allocation56_spill] sm:$0xff] %v6005_v31  ;;  %vm6018_vm15 = vcmp.ne.s32.totalorder %v1213_v53, 0  ;;  %vm6022_vm6 = vcmp.ne.s32.totalorder %v1214_v42, 0  ;;  %v1088_v50 = vpack.c.b8 %v1087_v5, %v1087_v5  ;;  %v1028_v10 = vunpack.c.2.s8 %v5983_v2  ;;  %v941_v31 = vld [vmem:[%s5242_s8 + $0x70] sm:$0xff] }
 0x169   : > { %v8989_v32 = vsel %vm6018_vm15, 4294967295, %v8988_v32  ;;  %v8992_v54 = vsel %vm6022_vm6, 4294967295, %v8991_v54  ;;  %v847_v6 = vmul.f32 0.2, %v783_v44  ;;  %v848_v23 = vmul.f32 0.2, %v784_v29  ;;  %1452 = vmax.xlane.f32.xlu0 %v1451_v49 }
 0x16a   : > { %8990 = vst [vmem:[#allocation57_spill] sm:$0xff] %v8989_v32  ;;  %v8994_v22 = vmax.f32 %v5817_v21, %v5859_v35  ;;  %v1029_v53 = vunpack.c.3.s8 %v5980_v60  ;;  %v8996_v42 = vmax.f32 %v5835_v14, %v5877_v13  ;;  %vm1127_vm8 = vnez %v1088_v50 }
 0x16b   : > { %8993 = vst [vmem:[#allocation58_spill] sm:$0xff] %v8992_v54  ;;  %v1091_v41 = vpack.c.b16 %v1028_v10, %v1027_v61  ;;  %v1030_v49 = vunpack.c.3.s8 %v5983_v2  ;;  %v852_v21 = vmul.f32 0.2, %v5955_v51  ;;  %v911_v35 = vmax.f32 %v783_v44, %v847_v6  ;;  %v708_v61 = vpop.permute.xlu0 %707 }
 0x16c   : > { %v6032_v26 = vsel %vm6018_vm15, %v8994_v22, -1e+30  ;;  %v6040_v5 = vsel %vm6022_vm6, %v8996_v42, -1e+30  ;;  %v912_v32 = vmax.f32 %v784_v29, %v848_v23  ;;  %v1159_v22 = vsel %vm1127_vm8, 16843009, %v8922_v46 }
 0x16d   : > { %8995 = vst [vmem:[#allocation59_spill] sm:$0xff] %v6032_v26  ;;  %v1215_v7 = vunpack.c.0.s8 %v1159_v22  ;;  %v1216_v45 = vunpack.c.1.s8 %v1159_v22  ;;  %v1092_v11 = vpack.c.b8 %v1091_v41, %v1091_v41  ;;  %v1093_v14 = vpack.c.b16 %v1030_v49, %v1029_v53 }
 0x16e   : > { %8997 = vst [vmem:[#allocation60_spill] sm:$0xff] %v6040_v5  ;;  %v915_v13 = vmax.f32 %v5940_v4, %v851_v63  ;;  %v1460_v50 = vmax.f32 %v6032_v26, %v6040_v5  ;;  %v8998_v10 = vmov 0  ;;  %v9001_v29 = vmov 0  ;;  %v942_v63 = vld [vmem:[%s5242_s8 + $0x78] sm:$0xff] }
 0x16f   : > { %vm6049_vm15 = vcmp.ne.s32.totalorder %v1215_v7, 0  ;;  %vm6053_vm2 = vcmp.ne.s32.totalorder %v1216_v45, 0  ;;  %vm1129_vm8 = vnez %v1092_v11  ;;  %v1094_v6 = vpack.c.b8 %v1093_v14, %v1093_v14  ;;  %v718_v14 = vpop.permute.xlu2 %717 }
 0x170   : > { %v8999_v10 = vsel %vm6049_vm15, 4294967295, %v8998_v10  ;;  %v9002_v29 = vsel %vm6053_vm2, 4294967295, %v9001_v29  ;;  %v789_v41 = vadd.f32 %v5429_v15, %v708_v61  ;;  %v790_v44 = vadd.f32 %v5431_v17, %v708_v61 }
 0x171   : > { %9000 = vst [vmem:[#allocation61_spill] sm:$0xff] %v8999_v10  ;;  %v6061_v4 = vsel %vm6049_vm15, %v911_v35, -1e+30  ;;  %v6065_v7 = vsel %vm6053_vm2, %v912_v32, -1e+30  ;;  %v916_v45 = vmax.f32 %v5955_v51, %v852_v21  ;;  %vm1130_vm6 = vnez %v1094_v6  ;;  %1461 = vmax.xlane.f32.xlu0 %v1460_v50  ;;  %v6072_v35 = vpop.permute.xlu1 %652 }
 0x172   : > { %9003 = vst [vmem:[#allocation62_spill] sm:$0xff] %v9002_v29  ;;  %v1463_v23 = vmax.f32 %v6061_v4, %v6065_v7  ;;  %v1161_v11 = vsel %vm1129_vm8, 16843009, %v8922_v46  ;;  %v853_v53 = vmul.f32 0.2, %v789_v41  ;;  %vm958_vm2 = vnez %v942_v63 }
 0x173   : > { %9004 = vst [vmem:[#allocation63_spill] sm:$0xff] %v6061_v4  ;;  %v854_v42 = vmul.f32 0.2, %v790_v44  ;;  %v1219_v49 = vunpack.c.0.s8 %v1161_v11  ;;  %v1220_v22 = vunpack.c.1.s8 %v1161_v11  ;;  %v1162_v32 = vsel %vm1130_vm6, 16843009, %v8922_v46  ;;  %v6271_v4 = vld [vmem:[#allocation2 + $0x10] sm:$0xff] }
 0x174   : > { %9005 = vst [vmem:[#allocation64_spill] sm:$0xff] %v6065_v7  ;;  %1464 = vmax.xlane.f32.xlu1 %v1463_v23  ;;  %vm9006_vm15 = vnez %v941_v31  ;;  %v917_v21 = vmax.f32 %v789_v41, %v853_v53  ;;  %v9007_v6 = vmov 0  ;;  %v9010_v50 = vmov 0 }
 0x175   : > { %v6077_v51 = vsel %vm9006_vm15, 16843009, %v8922_v46  ;;  %v918_v61 = vmax.f32 %v790_v44, %v854_v42  ;;  %vm6079_vm8 = vcmp.ne.s32.totalorder %v1219_v49, 0  ;;  %vm6083_vm7 = vcmp.ne.s32.totalorder %v1220_v22, 0  ;;  %9060 = vst [vmem:[#allocation86_spill] sm:$0xff] %v6271_v4 }
 0x176   : > { %v9008_v6 = vsel %vm6079_vm8, 4294967295, %v9007_v6  ;;  %v9011_v50 = vsel %vm6083_vm7, 4294967295, %v9010_v50  ;;  %v6089_v23 = vsel %vm6079_vm8, %v915_v13, -1e+30  ;;  %v6093_v63 = vsel %vm6083_vm7, %v916_v45, -1e+30 }
 0x177   : > { %9009 = vst [vmem:[#allocation65_spill] sm:$0xff] %v9008_v6  ;;  %v1221_v31 = vunpack.c.0.s8 %v1162_v32  ;;  %v1222_v11 = vunpack.c.1.s8 %v1162_v32  ;;  %v793_v41 = vadd.f32 %v5429_v15, %v718_v14  ;;  %v794_v44 = vadd.f32 %v5431_v17, %v718_v14 }
 0x178   : > { %9012 = vst [vmem:[#allocation66_spill] sm:$0xff] %v9011_v50  ;;  %v6098_v53 = vsel %vm958_vm2, 16843009, %v8922_v46  ;;  %v1033_v42 = vunpack.c.1.s8 %v6077_v51  ;;  %v9015_v49 = vmov 0  ;;  %v9018_v13 = vmov 0 }
 0x179   : > { %9013 = vst [vmem:[#allocation67_spill] sm:$0xff] %v6089_v23  ;;  %vm6101_vm15 = vcmp.ne.s32.totalorder %v1221_v31, 0  ;;  %vm6105_vm6 = vcmp.ne.s32.totalorder %v1222_v11, 0  ;;  %v1034_v45 = vunpack.c.1.s8 %v6098_v53  ;;  %v1469_v22 = vmax.f32 %v6089_v23, %v6093_v63 }
 0x17a   : > { %9014 = vst [vmem:[#allocation68_spill] sm:$0xff] %v6093_v63  ;;  %v9016_v49 = vsel %vm6101_vm15, 4294967295, %v9015_v49  ;;  %v9019_v13 = vsel %vm6105_vm6, 4294967295, %v9018_v13  ;;  %v6114_v14 = vsel %vm6101_vm15, %v917_v21, -1e+30  ;;  %v749_v31 = vadd.f32 %v5429_v15, %v5879_v20 }
 0x17b   : > { %9017 = vst [vmem:[#allocation69_spill] sm:$0xff] %v9016_v49  ;;  %v6118_v32 = vsel %vm6105_vm6, %v918_v61, -1e+30  ;;  %v1097_v50 = vpack.c.b16 %v1034_v45, %v1033_v42  ;;  %v857_v6 = vmul.f32 0.2, %v793_v41  ;;  %1470 = vmax.xlane.f32.xlu0 %v1469_v22  ;;  %v750_v63 = vadd.f32 %v5431_v17, %v5879_v20 }
 0x17c   : > { %9020 = vst [vmem:[#allocation70_spill] sm:$0xff] %v9019_v13  ;;  %v1472_v11 = vmax.f32 %v6114_v14, %v6118_v32  ;;  %v858_v54 = vmul.f32 0.2, %v794_v44  ;;  %v989_v23 = vunpack.c.3.s8 %v5413_v57  ;;  %v6127_v13 = vpop.permute.xlu1 %667  ;;  %v990_v61 = vunpack.c.3.s8 %v5416_v58 }
 0x17d   : > { %9021 = vst [vmem:[#allocation71_spill] sm:$0xff] %v6114_v14  ;;  %v1098_v21 = vpack.c.b8 %v1097_v50, %v1097_v50  ;;  %v813_v49 = vmul.f32 0.2, %v749_v31  ;;  %v755_v29 = vadd.f32 %v5429_v15, %v5952_v3  ;;  %v756_v42 = vadd.f32 %v5431_v17, %v5952_v3 }
 0x17e   : > { %9022 = vst [vmem:[#allocation72_spill] sm:$0xff] %v6118_v32  ;;  %1473 = vmax.xlane.f32.xlu1 %v1472_v11  ;;  %v921_v45 = vmax.f32 %v793_v41, %v857_v6  ;;  %v922_v22 = vmax.f32 %v794_v44, %v858_v54  ;;  %v1053_v11 = vpack.c.b16 %v990_v61, %v989_v23  ;;  %v814_v50 = vmul.f32 0.2, %v750_v63 }
 0x17f   : > { %vm1132_vm2 = vnez %v1098_v21  ;;  %v995_v5 = vunpack.c.2.s8 %v5435_v24  ;;  %v996_v58 = vunpack.c.2.s8 %v5439_v27  ;;  %v819_v32 = vmul.f32 0.2, %v755_v29 }
 0x180   : > { %v1164_v20 = vsel %vm1132_vm2, 16843009, %v8922_v46  ;;  %v1054_v26 = vpack.c.b8 %v1053_v11, %v1053_v11  ;;  %v820_v14 = vmul.f32 0.2, %v756_v42  ;;  %v9023_v7 = vmov 0 }
 0x181   : > { %v1225_v10 = vunpack.c.0.s8 %v1164_v20  ;;  %v1226_v57 = vunpack.c.1.s8 %v1164_v20  ;;  %v9026_v3 = vmov 0  ;;  %v1059_v27 = vpack.c.b16 %v996_v58, %v995_v5 }
 0x182   : > { %vm1110_vm2 = vnez %v1054_v26  ;;  %v877_v6 = vmax.f32 %v749_v31, %v813_v49  ;;  %v878_v23 = vmax.f32 %v750_v63, %v814_v50  ;;  %v1001_v20 = vunpack.c.1.s8 %v5567_v1 }
 0x183   : > { %vm6137_vm7 = vcmp.ne.s32.totalorder %v1225_v10, 0  ;;  %vm6141_vm8 = vcmp.ne.s32.totalorder %v1226_v57, 0  ;;  %v1142_v41 = vsel %vm1110_vm2, 16843009, %v8922_v46  ;;  %v1060_v61 = vpack.c.b8 %v1059_v27, %v1059_v27 }
 0x184   : > { %v9024_v7 = vsel %vm6137_vm7, 4294967295, %v9023_v7  ;;  %v9027_v3 = vsel %vm6141_vm8, 4294967295, %v9026_v3  ;;  %v6147_v54 = vsel %vm6137_vm7, %v921_v45, -1e+30  ;;  %v6151_v24 = vsel %vm6141_vm8, %v922_v22, -1e+30  ;;  %v6170_v31 = vpop.permute.xlu1 %682 }
 0x185   : > { %9025 = vst [vmem:[#allocation73_spill] sm:$0xff] %v9024_v7  ;;  %v1478_v10 = vmax.f32 %v6147_v54, %v6151_v24  ;;  %v1181_v44 = vunpack.c.0.s8 %v1142_v41  ;;  %v1182_v21 = vunpack.c.1.s8 %v1142_v41  ;;  %v761_v45 = vadd.f32 %v5429_v15, %v6016_v62 }
 0x186   : > { %9028 = vst [vmem:[#allocation74_spill] sm:$0xff] %v9027_v3  ;;  %v762_v22 = vadd.f32 %v5431_v17, %v6016_v62  ;;  %v883_v26 = vmax.f32 %v755_v29, %v819_v32  ;;  %v1002_v5 = vunpack.c.1.s8 %v5579_v48  ;;  %v9031_v49 = vmov 0 }
 0x187   : > { %9029 = vst [vmem:[#allocation75_spill] sm:$0xff] %v6147_v54  ;;  %1479 = vmax.xlane.f32.xlu0 %v1478_v10  ;;  %vm6162_vm8 = vcmp.ne.s32.totalorder %v1181_v44, 0  ;;  %vm6166_vm2 = vcmp.ne.s32.totalorder %v1182_v21, 0  ;;  %v9034_v63 = vmov 0  ;;  %v884_v1 = vmax.f32 %v756_v42, %v820_v14 }
 0x188   : > { %9030 = vst [vmem:[#allocation76_spill] sm:$0xff] %v6151_v24  ;;  %v9032_v49 = vsel %vm6162_vm8, 4294967295, %v9031_v49  ;;  %v9035_v63 = vsel %vm6166_vm2, 4294967295, %v9034_v63  ;;  %vm1113_vm7 = vnez %v1060_v61  ;;  %v6174_v11 = vsel %vm6162_vm8, %v877_v6, -1e+30  ;;  %v6823_v24 = vld [vmem:[#allocation2 + $0xf8] sm:$0xff] }
 0x189   : > { %9033 = vst [vmem:[#allocation77_spill] sm:$0xff] %v9032_v49  ;;  %v6178_v62 = vsel %vm6166_vm2, %v878_v23, -1e+30  ;;  %v1145_v48 = vsel %vm1113_vm7, 16843009, %v8922_v46  ;;  %v1065_v29 = vpack.c.b16 %v1002_v5, %v1001_v20  ;;  %v9037_v14 = vmov 0 }
 0x18a   : > { %9036 = vst [vmem:[#allocation78_spill] sm:$0xff] %v9035_v63  ;;  %v1412_v32 = vmax.f32 %v6174_v11, %v6178_v62  ;;  %v1187_v50 = vunpack.c.0.s8 %v1145_v48  ;;  %v1188_v57 = vunpack.c.1.s8 %v1145_v48  ;;  %v825_v27 = vmul.f32 0.2, %v761_v45 }
 0x18b   : > { %v1066_v58 = vpack.c.b8 %v1065_v29, %v1065_v29  ;;  %v9040_v42 = vmov 0  ;;  %v826_v10 = vmul.f32 0.2, %v762_v22  ;;  %v1007_v61 = vunpack.c.0.s8 %v5751_v43  ;;  %9167 = vst [vmem:[#allocation28_spill] sm:$0xff] %v6823_v24 }
 0x18c   : > { %1413 = vmax.xlane.f32.xlu2 %v1412_v32  ;;  %vm6183_vm6 = vcmp.ne.s32.totalorder %v1187_v50, 0  ;;  %vm6187_vm15 = vcmp.ne.s32.totalorder %v1188_v57, 0  ;;  %v1008_v20 = vunpack.c.0.s8 %v5754_v47  ;;  %v767_v5 = vadd.f32 %v5429_v15, %v6072_v35  ;;  %v6208_v50 = vpop.permute.xlu1 %697 }
 0x18d   : > { %v9038_v14 = vsel %vm6183_vm6, 4294967295, %v9037_v14  ;;  %v9041_v42 = vsel %vm6187_vm15, 4294967295, %v9040_v42  ;;  %v6193_v6 = vsel %vm6183_vm6, %v883_v26, -1e+30  ;;  %v6197_v23 = vsel %vm6187_vm15, %v884_v1, -1e+30 }
 0x18e   : > { %9039 = vst [vmem:[#allocation79_spill] sm:$0xff] %v9038_v14  ;;  %vm1116_vm7 = vnez %v1066_v58  ;;  %v1421_v26 = vmax.f32 %v6193_v6, %v6197_v23  ;;  %v889_v48 = vmax.f32 %v761_v45, %v825_v27  ;;  %v890_v29 = vmax.f32 %v762_v22, %v826_v10 }
 0x18f   : > { %9042 = vst [vmem:[#allocation80_spill] sm:$0xff] %v9041_v42  ;;  %v1148_v41 = vsel %vm1116_vm7, 16843009, %v8922_v46  ;;  %v768_v1 = vadd.f32 %v5431_v17, %v6072_v35  ;;  %v1071_v32 = vpack.c.b16 %v1008_v20, %v1007_v61  ;;  %v9043_v57 = vmov 0 }
 0x190   : > { %v1193_v44 = vunpack.c.0.s8 %v1148_v41  ;;  %v1194_v21 = vunpack.c.1.s8 %v1148_v41  ;;  %v9046_v58 = vmov 0  ;;  %v831_v3 = vmul.f32 0.2, %v767_v5 }
 0x191   : > { %v1072_v41 = vpack.c.b8 %v1071_v32, %v1071_v32  ;;  %v832_v45 = vmul.f32 0.2, %v768_v1  ;;  %v1014_v61 = vunpack.c.3.s8 %v5754_v47  ;;  %v773_v20 = vadd.f32 %v5429_v15, %v6127_v13 }
 0x192   : > { %vm6210_vm7 = vcmp.ne.s32.totalorder %v1193_v44, 0  ;;  %vm6214_vm13 = vcmp.ne.s32.totalorder %v1194_v21, 0  ;;  %v1013_v21 = vunpack.c.3.s8 %v5751_v43  ;;  %v895_v32 = vmax.f32 %v767_v5, %v831_v3 }
 0x193   : > { %v9044_v57 = vsel %vm6210_vm7, 4294967295, %v9043_v57  ;;  %v9047_v58 = vsel %vm6214_vm13, 4294967295, %v9046_v58  ;;  %v6220_v22 = vsel %vm6210_vm7, %v889_v48, -1e+30  ;;  %v6224_v35 = vsel %vm6214_vm13, %v890_v29, -1e+30 }
 0x194   : > { %9045 = vst [vmem:[#allocation81_spill] sm:$0xff] %v9044_v57  ;;  %1422 = vmax.xlane.f32.xlu2 %v1421_v26  ;;  %vm1119_vm15 = vnez %v1072_v41  ;;  %v567_v26 = vld [vmem:[%s5230_s27 + $0xf0] sm:$0xff]  ;;  %v1430_v48 = vmax.f32 %v6220_v22, %v6224_v35  ;;  %v896_v7 = vmax.f32 %v768_v1, %v832_v45  ;;  %v774_v29 = vadd.f32 %v5431_v17, %v6127_v13  ;;  %v6244_v54 = vpop.permute.xlu1 %712 }
 0x195   : > { %9048 = vst [vmem:[#allocation82_spill] sm:$0xff] %v9047_v58  ;;  %v1151_v27 = vsel %vm1119_vm15, 16843009, %v8922_v46  ;;  %v1077_v41 = vpack.c.b16 %v1014_v61, %v1013_v21  ;;  %v1020_v21 = vunpack.c.2.s8 %v5856_v52  ;;  %v779_v61 = vadd.f32 %v5429_v15, %v6170_v31 }
 0x196   : > { %9049 = vst [vmem:[#allocation83_spill] sm:$0xff] %v6224_v35  ;;  %v1199_v10 = vunpack.c.0.s8 %v1151_v27  ;;  %v1200_v44 = vunpack.c.1.s8 %v1151_v27  ;;  %v837_v27 = vmul.f32 0.2, %v773_v20  ;;  %v838_v3 = vmul.f32 0.2, %v774_v29 }
 0x197   : > { %v1078_v47 = vpack.c.b8 %v1077_v41, %v1077_v41  ;;  %v9074_v42 = vmov 0  ;;  %v9134_v49 = vmov 0 }
 0x198   : > { %vm6236_vm15 = vcmp.ne.s32.totalorder %v1199_v10, 0  ;;  %vm6240_vm13 = vcmp.ne.s32.totalorder %v1200_v44, 0  ;;  %v1019_v44 = vunpack.c.2.s8 %v5853_v28  ;;  %v9057_v28 = vmov 0 }
 0x199   : > { %v6248_v5 = vsel %vm6236_vm15, %v895_v32, -1e+30  ;;  %v6252_v13 = vsel %vm6240_vm13, %v896_v7, -1e+30  ;;  %vm1122_vm7 = vnez %v1078_v47  ;;  %v902_v32 = vmax.f32 %v774_v29, %v838_v3  ;;  %v6281_v29 = vld [vmem:[#allocation2] sm:$0xff] }
 0x19a   : > { %v1154_v1 = vsel %vm1122_vm7, 16843009, %v8922_v46  ;;  %v780_v7 = vadd.f32 %v5431_v17, %v6170_v31  ;;  %v1083_v41 = vpack.c.b16 %v1020_v21, %v1019_v44  ;;  %v9054_v47 = vmov 0 }
 0x19b   : > { %722 = vperm.xlu0 %4769, %v567_v26   ;;  %v1205_v45 = vunpack.c.0.s8 %v1154_v1  ;;  %v1206_v10 = vunpack.c.1.s8 %v1154_v1  ;;  %v1439_v26 = vmax.f32 %v6248_v5, %v6252_v13  ;;  %v843_v1 = vmul.f32 0.2, %v779_v61 }
 0x19c   : > { %1431 = vmax.xlane.f32.xlu2 %v1430_v48  ;;  %v901_v48 = vmax.f32 %v773_v20, %v837_v27  ;;  %v1084_v52 = vpack.c.b8 %v1083_v41, %v1083_v41  ;;  %v844_v58 = vmul.f32 0.2, %v780_v7  ;;  %v1399_v27 = vpop.xlane.xlu1 %1398  ;;  %v785_v44 = vadd.f32 %v5429_v15, %v6208_v50 }
 0x19d   : > { %vm6263_vm6 = vcmp.ne.s32.totalorder %v1205_v45, 0  ;;  %vm6267_vm7 = vcmp.ne.s32.totalorder %v1206_v10, 0  ;;  %v1025_v45 = vunpack.c.1.s8 %v5980_v60  ;;  %v1026_v10 = vunpack.c.1.s8 %v5983_v2 }
 0x19e   : > { %v9055_v47 = vsel %vm6263_vm6, 4294967295, %v9054_v47  ;;  %v9058_v28 = vsel %vm6267_vm7, 4294967295, %v9057_v28  ;;  %v6275_v20 = vsel %vm6263_vm6, %v901_v48, -1e+30  ;;  %v6279_v31 = vsel %vm6267_vm7, %v902_v32, -1e+30  ;;  %v1393_v41 = vpop.xlane.xlu2 %1392 }
 0x19f   : > { %9056 = vst [vmem:[#allocation84_spill] sm:$0xff] %v9055_v47  ;;  %vm1125_vm2 = vnez %v1084_v52  ;;  %v6289_v21 = vmax.f32 %v6271_v4, %v1399_v27  ;;  %v786_v32 = vadd.f32 %v5431_v17, %v6208_v50  ;;  %vm8818_vm7 = vcmask 7168  }
 0x1a0   : > { %9059 = vst [vmem:[#allocation85_spill] sm:$0xff] %v9058_v28  ;;  %v1157_v3 = vsel %vm1125_vm2, 16843009, %v8922_v46  ;;  %v1448_v52 = vmax.f32 %v6275_v20, %v6279_v31  ;;  %v1089_v28 = vpack.c.b16 %v1026_v10, %v1025_v45  ;;  %v907_v60 = vmax.f32 %v779_v61, %v843_v1 }
 0x1a1   : > { %9061 = vst [vmem:[#allocation87_spill] sm:$0xff] %v6275_v20  ;;  %v1212_v48 = vunpack.c.1.s8 %v1157_v3  ;;  %v908_v47 = vmax.f32 %v780_v7, %v844_v58  ;;  %v6296_v2 = vmax.f32 %v6281_v29, %v1393_v41  ;;  %v9064_v27 = vmov 0  ;;  %v6313_v7 = vld [vmem:[#allocation2 + $0x8] sm:$0xff] }
 0x1a2   : > { %9062 = vst [vmem:[#allocation88_spill] sm:$0xff] %v6279_v31  ;;  %v9067_v50 = vmov 0  ;;  %v849_v58 = vmul.f32 0.2, %v785_v44  ;;  %v850_v61 = vmul.f32 0.2, %v786_v32  ;;  %v1031_v45 = vunpack.c.0.s8 %v6077_v51 }
 0x1a3   : > { %9063 = vst [vmem:[#allocation89_spill] sm:$0xff] %v6289_v21  ;;  %vm6304_vm6 = vcmp.ne.s32.totalorder %v1212_v48, 0  ;;  %1617 = vperm.xlu0 %4769, %v6296_v2   ;;  %v1032_v4 = vunpack.c.0.s8 %v6098_v53 }
 0x1a4   : > { %1440 = vmax.xlane.f32.xlu2 %v1439_v26  ;;  %v1211_v26 = vunpack.c.0.s8 %v1157_v3  ;;  %2884 = vst.msk [vmem:[#allocation2 + $0x10] sm:$0xff] %vm8818_vm7, %v6289_v21  ;;  %v9068_v50 = vsel %vm6304_vm6, 4294967295, %v9067_v50  ;;  %v1090_v3 = vpack.c.b8 %v1089_v28, %v1089_v28  ;;  %v6321_v28 = vsel %vm6304_vm6, %v908_v47, -1e+30 }
 0x1a5   : > { %9069 = vst [vmem:[#allocation91_spill] sm:$0xff] %v9068_v50  ;;  %v1095_v57 = vpack.c.b16 %v1032_v4, %v1031_v45  ;;  %v914_v31 = vmax.f32 %v786_v32, %v850_v61  ;;  %v6357_v45 = vld [vmem:[#allocation2 + $0x28] sm:$0xff] }
 0x1a6   : > { %vm6300_vm2 = vcmp.ne.s32.totalorder %v1211_v26, 0  ;;  %2882 = vst.msk [vmem:[#allocation2] sm:$0xff] %vm8818_vm7, %v6296_v2  ;;  %vm1128_vm8 = vnez %v1090_v3  ;;  %v6324_v26 = vld [vmem:[#allocation2 + $0x18] sm:$0xff]  ;;  %v1396_v3 = vpop.xlane.xlu0 %1395  ;;  %v1402_v50 = vpop.xlane.xlu2 %1401 }
 0x1a7   : > { %v9065_v27 = vsel %vm6300_vm2, 4294967295, %v9064_v27  ;;  %9070 = vst [vmem:[#allocation92_spill] sm:$0xff] %v6313_v7  ;;  %v6317_v1 = vsel %vm6300_vm2, %v907_v60, -1e+30  ;;  %v1160_v10 = vsel %vm1128_vm8, 16843009, %v8922_v46  ;;  %v792_v60 = vadd.f32 %v5431_v17, %v6244_v54 }
 0x1a8   : > { %9066 = vst [vmem:[#allocation90_spill] sm:$0xff] %v9065_v27  ;;  %v1217_v48 = vunpack.c.0.s8 %v1160_v10  ;;  %v1218_v41 = vunpack.c.1.s8 %v1160_v10  ;;  %v6333_v47 = vmax.f32 %v6313_v7, %v1396_v3  ;;  %v1457_v27 = vmax.f32 %v6317_v1, %v6321_v28 }
 0x1a9   : > { %9071 = vst [vmem:[#allocation93_spill] sm:$0xff] %v6317_v1  ;;  %v913_v10 = vmax.f32 %v785_v44, %v849_v58  ;;  %v6338_v20 = vmax.f32 %v6324_v26, %v1402_v50  ;;  %v1096_v3 = vpack.c.b8 %v1095_v57, %v1095_v57  ;;  %v856_v32 = vmul.f32 0.2, %v792_v60  ;;  %v6355_v50 = vld [vmem:[#allocation2 + $0x30] sm:$0xff] }
 0x1aa   : > { %9072 = vst [vmem:[#allocation94_spill] sm:$0xff] %v6321_v28  ;;  %vm6342_vm8 = vcmp.ne.s32.totalorder %v1217_v48, 0  ;;  %vm6346_vm6 = vcmp.ne.s32.totalorder %v1218_v41, 0  ;;  %v6368_v48 = vld [vmem:[#allocation2 + $0x20] sm:$0xff] }
 0x1ab   : > { %9073 = vst [vmem:[#allocation95_spill] sm:$0xff] %v6333_v47  ;;  %v9075_v42 = vsel %vm6342_vm8, 4294967295, %v9074_v42  ;;  %1632 = vperm.xlu0 %4769, %v6338_v20   ;;  %vm1131_vm2 = vnez %v1096_v3  ;;  %v6361_v58 = vsel %vm6342_vm8, %v913_v10, -1e+30  ;;  %v6365_v57 = vsel %vm6346_vm6, %v914_v31, -1e+30 }
 0x1ac   : > { %1449 = vmax.xlane.f32.xlu2 %v1448_v52  ;;  %v791_v52 = vadd.f32 %v5429_v15, %v6244_v54  ;;  %2883 = vst.msk [vmem:[#allocation2 + $0x8] sm:$0xff] %vm8818_vm7, %v6333_v47  ;;  %v9077_v54 = vmov 0  ;;  %v1163_v61 = vsel %vm1131_vm2, 16843009, %v8922_v46  ;;  %v1411_v41 = vpop.xlane.xlu1 %1410  ;;  %v1466_v10 = vmax.f32 %v6361_v58, %v6365_v57 }
 0x1ad   : > { %9076 = vst [vmem:[#allocation96_spill] sm:$0xff] %v9075_v42  ;;  %v9078_v54 = vsel %vm6346_vm6, 4294967295, %v9077_v54  ;;  %v1223_v4 = vunpack.c.0.s8 %v1163_v61  ;;  %v1224_v7 = vunpack.c.1.s8 %v1163_v61  ;;  %v6371_v28 = vmax.f32 %v6355_v50, %v1411_v41 }
 0x1ae   : > { %9079 = vst [vmem:[#allocation97_spill] sm:$0xff] %v9078_v54  ;;  %v855_v44 = vmul.f32 0.2, %v791_v52  ;;  %v920_v54 = vmax.f32 %v792_v60, %v856_v32  ;;  %v9087_v41 = vmov 0  ;;  %v6400_v60 = vld [vmem:[#allocation2 + $0x40] sm:$0xff] }
 0x1af   : > { %2885 = vst.msk [vmem:[#allocation2 + $0x18] sm:$0xff] %vm8818_vm7, %v6338_v20  ;;  %v1405_v3 = vpop.xlane.xlu2 %1404  ;;  %vm6387_vm2 = vcmp.ne.s32.totalorder %v1223_v4, 0  ;;  %vm6391_vm6 = vcmp.ne.s32.totalorder %v1224_v7, 0 }
 0x1b0   : > { %9080 = vst [vmem:[#allocation98_spill] sm:$0xff] %v6355_v50  ;;  %v919_v31 = vmax.f32 %v791_v52, %v855_v44  ;;  %v6379_v1 = vmax.f32 %v6368_v48, %v1405_v3  ;;  %v9088_v41 = vsel %vm6387_vm2, 4294967295, %v9087_v41  ;;  %v6398_v52 = vld [vmem:[#allocation2 + $0x48] sm:$0xff]  ;;  %v6408_v7 = vsel %vm6391_vm6, %v920_v54, -1e+30  ;;  %v6425_v54 = vld [vmem:[#allocation2 + $0x60] sm:$0xff] }
 0x1b1   : > { %9081 = vst [vmem:[#allocation99_spill] sm:$0xff] %v6357_v45 }
 0x1b2   : > { %9082 = vst [vmem:[#allocation100_spill] sm:$0xff] %v6361_v58  ;;  %v6404_v4 = vsel %vm6387_vm2, %v919_v31, -1e+30 }
 0x1b3   : > { %9083 = vst [vmem:[#allocation101_spill] sm:$0xff] %v6365_v57  ;;  %v6546_v57 = vld [vmem:[#allocation2 + $0x50] sm:$0xff] }
 0x1b4   : > { %1458 = vmax.xlane.f32.xlu2 %v1457_v27  ;;  %9084 = vst [vmem:[#allocation102_spill] sm:$0xff] %v6368_v48  ;;  %v1408_v27 = vpop.xlane.xlu0 %1407 }
 0x1b5   : > { %v6374_v42 = vmax.f32 %v6357_v45, %v1408_v27  ;;  %9086 = vst [vmem:[#allocation104_spill] sm:$0xff] %v6379_v1  ;;  %v9090_v27 = vmov 0  ;;  %v1420_v44 = vpop.xlane.xlu1 %1419 }
 0x1b6   : > { %2888 = vst.msk [vmem:[#allocation2 + $0x30] sm:$0xff] %vm8818_vm7, %v6371_v28  ;;  %v9091_v27 = vsel %vm6391_vm6, 4294967295, %v9090_v27  ;;  %v6411_v32 = vmax.f32 %v6398_v52, %v1420_v44  ;;  %v6427_v44 = vld [vmem:[#allocation2 + $0x58] sm:$0xff] }
 0x1b7   : > { %9085 = vst [vmem:[#allocation103_spill] sm:$0xff] %v6374_v42  ;;  %1642 = vperm.xlu0 %4769, %v6374_v42  }
 0x1b8   : > { %2887 = vst.msk [vmem:[#allocation2 + $0x28] sm:$0xff] %vm8818_vm7, %v6374_v42 }
 0x1b9   : > { %9089 = vst [vmem:[#allocation105_spill] sm:$0xff] %v9088_v41 }
 0x1ba   : > { %9092 = vst [vmem:[#allocation106_spill] sm:$0xff] %v9091_v27 }
 0x1bb   : > { %2886 = vst.msk [vmem:[#allocation2 + $0x20] sm:$0xff] %vm8818_vm7, %v6379_v1 }
 0x1bc   : > { %9093 = vst [vmem:[#allocation107_spill] sm:$0xff] %v6398_v52  ;;  %1467 = vmax.xlane.f32.xlu2 %v1466_v10  ;;  %v1417_v3 = vpop.xlane.xlu0 %1416  ;;  %v1475_v10 = vmax.f32 %v6404_v4, %v6408_v7 }
 0x1bd   : > { %9094 = vst [vmem:[#allocation108_spill] sm:$0xff] %v6400_v60  ;;  %v6414_v61 = vmax.f32 %v6400_v60, %v1417_v3  ;;  %v1429_v3 = vpop.xlane.xlu1 %1428 }
 0x1be   : > { %9095 = vst [vmem:[#allocation109_spill] sm:$0xff] %v6404_v4  ;;  %v6430_v42 = vmax.f32 %v6425_v54, %v1429_v3 }
 0x1bf   : > { %9096 = vst [vmem:[#allocation110_spill] sm:$0xff] %v6408_v7  ;;  %1657 = vperm.xlu0 %4769, %v6414_v61  }
 0x1c0   : > { %9097 = vst [vmem:[#allocation111_spill] sm:$0xff] %v6411_v32 }
 0x1c1   : > { %9098 = vst [vmem:[#allocation112_spill] sm:$0xff] %v6414_v61 }
 0x1c2   : > { %2891 = vst.msk [vmem:[#allocation2 + $0x48] sm:$0xff] %vm8818_vm7, %v6411_v32 }
 0x1c3   : > { %2890 = vst.msk [vmem:[#allocation2 + $0x40] sm:$0xff] %vm8818_vm7, %v6414_v61  ;;  %v6444_v61 = vld [vmem:[#allocation2 + $0x70] sm:$0xff] }
 0x1c4   : > { %9099 = vst [vmem:[#allocation113_spill] sm:$0xff] %v6425_v54  ;;  %1476 = vmax.xlane.f32.xlu2 %v1475_v10  ;;  %v1426_v45 = vpop.xlane.xlu0 %1425  ;;  %v6442_v10 = vld [vmem:[#allocation2 + $0x78] sm:$0xff] }
 0x1c5   : > { %9100 = vst [vmem:[#allocation114_spill] sm:$0xff] %v6427_v44  ;;  %v6433_v48 = vmax.f32 %v6427_v44, %v1426_v45  ;;  %v6461_v44 = vld [vmem:[#allocation2 + $0x88] sm:$0xff] }
 0x1c6   : > { %9101 = vst [vmem:[#allocation115_spill] sm:$0xff] %v6430_v42 }
 0x1c7   : > { %9102 = vst [vmem:[#allocation116_spill] sm:$0xff] %v6433_v48  ;;  %1672 = vperm.xlu0 %4769, %v6433_v48   ;;  %v1438_v3 = vpop.xlane.xlu1 %1437 }
 0x1c8   : > { %2894 = vst.msk [vmem:[#allocation2 + $0x60] sm:$0xff] %vm8818_vm7, %v6430_v42  ;;  %v6447_v60 = vmax.f32 %v6442_v10, %v1438_v3 }
 0x1c9   : > { %2893 = vst.msk [vmem:[#allocation2 + $0x58] sm:$0xff] %vm8818_vm7, %v6433_v48  ;;  %v6459_v48 = vld [vmem:[#allocation2 + $0x90] sm:$0xff] }
 0x1ca   : > { %9103 = vst [vmem:[#allocation117_spill] sm:$0xff] %v6442_v10 }
 0x1cb   : > { %9104 = vst [vmem:[#allocation118_spill] sm:$0xff] %v6444_v61 }
 0x1cc   : > { %9105 = vst [vmem:[#allocation119_spill] sm:$0xff] %v6447_v60  ;;  %v1435_v45 = vpop.xlane.xlu0 %1434 }
 0x1cd   : > { %v6450_v54 = vmax.f32 %v6444_v61, %v1435_v45  ;;  %2897 = vst.msk [vmem:[#allocation2 + $0x78] sm:$0xff] %vm8818_vm7, %v6447_v60  ;;  %v6478_v61 = vld [vmem:[#allocation2 + $0xa0] sm:$0xff] }
 0x1ce   : > { %9107 = vst [vmem:[#allocation121_spill] sm:$0xff] %v6459_v48 }
 0x1cf   : > { %9106 = vst [vmem:[#allocation120_spill] sm:$0xff] %v6450_v54  ;;  %1687 = vperm.xlu0 %4769, %v6450_v54  }
 0x1d0   : > { %2896 = vst.msk [vmem:[#allocation2 + $0x70] sm:$0xff] %vm8818_vm7, %v6450_v54  ;;  %v1447_v3 = vpop.xlane.xlu1 %1446  ;;  %v6476_v54 = vld [vmem:[#allocation2 + $0xa8] sm:$0xff] }
 0x1d1   : > { %9108 = vst [vmem:[#allocation122_spill] sm:$0xff] %v6461_v44  ;;  %v6464_v10 = vmax.f32 %v6459_v48, %v1447_v3 }
 0x1d2   : > { %9111 = vst [vmem:[#allocation125_spill] sm:$0xff] %v6476_v54 }
 0x1d3   : > { %9109 = vst [vmem:[#allocation123_spill] sm:$0xff] %v6464_v10 }
 0x1d4   : > { %v1444_v45 = vpop.xlane.xlu0 %1443  ;;  %2900 = vst.msk [vmem:[#allocation2 + $0x90] sm:$0xff] %vm8818_vm7, %v6464_v10 }
 0x1d5   : > { %v6467_v52 = vmax.f32 %v6461_v44, %v1444_v45  ;;  %9112 = vst [vmem:[#allocation126_spill] sm:$0xff] %v6478_v61  ;;  %v6495_v44 = vld [vmem:[#allocation2 + $0xc0] sm:$0xff] }
 0x1d6   : > { %9116 = vst [vmem:[#allocation130_spill] sm:$0xff] %v6495_v44 }
 0x1d7   : > { %9110 = vst [vmem:[#allocation124_spill] sm:$0xff] %v6467_v52  ;;  %1702 = vperm.xlu0 %4769, %v6467_v52  }
 0x1d8   : > { %2899 = vst.msk [vmem:[#allocation2 + $0x88] sm:$0xff] %vm8818_vm7, %v6467_v52  ;;  %v6493_v52 = vld [vmem:[#allocation2 + $0xb8] sm:$0xff] }
 0x1d9   : > { %9115 = vst [vmem:[#allocation129_spill] sm:$0xff] %v6493_v52 }
 0x1da   : > { %v1456_v3 = vpop.xlane.xlu1 %1455  ;;  %9127 = vst [vmem:[#allocation141_spill] sm:$0xff] %v6546_v57 }
 0x1db   : > { %v6481_v48 = vmax.f32 %v6476_v54, %v1456_v3 }
 0x1dc   : > { %v1453_v45 = vpop.xlane.xlu0 %1452 }
 0x1dd   : > { %9113 = vst [vmem:[#allocation127_spill] sm:$0xff] %v6481_v48  ;;  %v6484_v50 = vmax.f32 %v6478_v61, %v1453_v45  ;;  %v6512_v61 = vld [vmem:[#allocation2 + $0xd8] sm:$0xff] }
 0x1de   : > { %2903 = vst.msk [vmem:[#allocation2 + $0xa8] sm:$0xff] %vm8818_vm7, %v6481_v48 }
 0x1df   : > { %9114 = vst [vmem:[#allocation128_spill] sm:$0xff] %v6484_v50  ;;  %1717 = vperm.xlu0 %4769, %v6484_v50  }
 0x1e0   : > { %2902 = vst.msk [vmem:[#allocation2 + $0xa0] sm:$0xff] %vm8818_vm7, %v6484_v50  ;;  %v6510_v50 = vld [vmem:[#allocation2 + $0xd0] sm:$0xff] }
 0x1e1   : > { %9119 = vst [vmem:[#allocation133_spill] sm:$0xff] %v6510_v50 }
 0x1e2   : > { %9120 = vst [vmem:[#allocation134_spill] sm:$0xff] %v6512_v61 }
 0x1e4   : > { %v1462_v3 = vpop.xlane.xlu0 %1461 }
 0x1e5   : > { %v6498_v45 = vmax.f32 %v6493_v52, %v1462_v3 }
 0x1e7   : > { %v1465_v54 = vpop.xlane.xlu1 %1464  ;;  %9117 = vst [vmem:[#allocation131_spill] sm:$0xff] %v6498_v45  ;;  %1732 = vperm.xlu0 %4769, %v6498_v45  }
 0x1e8   : > { %v6501_v27 = vmax.f32 %v6495_v44, %v1465_v54  ;;  %2905 = vst.msk [vmem:[#allocation2 + $0xb8] sm:$0xff] %vm8818_vm7, %v6498_v45  ;;  %v6527_v45 = vld [vmem:[#allocation2 + $0xe8] sm:$0xff] }
 0x1e9   : > { %9123 = vst [vmem:[#allocation137_spill] sm:$0xff] %v6527_v45 }
 0x1ea   : > { %9118 = vst [vmem:[#allocation132_spill] sm:$0xff] %v6501_v27 }
 0x1eb   : > { %2906 = vst.msk [vmem:[#allocation2 + $0xc0] sm:$0xff] %vm8818_vm7, %v6501_v27 }
 0x1ee   : > { %v1471_v3 = vpop.xlane.xlu0 %1470 }
 0x1ef   : > { %v6515_v54 = vmax.f32 %v6510_v50, %v1471_v3  ;;  %v6539_v50 = vld [vmem:[#allocation2 + $0x38] sm:$0xff] }
 0x1f0   : > { %9125 = vst [vmem:[#allocation139_spill] sm:$0xff] %v6539_v50 }
 0x1f1   : > { %v1474_v41 = vpop.xlane.xlu1 %1473  ;;  %9121 = vst [vmem:[#allocation135_spill] sm:$0xff] %v6515_v54  ;;  %1747 = vperm.xlu0 %4769, %v6515_v54  }
 0x1f2   : > { %v6518_v44 = vmax.f32 %v6512_v61, %v1474_v41  ;;  %2908 = vst.msk [vmem:[#allocation2 + $0xd0] sm:$0xff] %vm8818_vm7, %v6515_v54  ;;  %v1035_v41 = vunpack.c.2.s8 %v6077_v51  ;;  %v1036_v61 = vunpack.c.2.s8 %v6098_v53 }
 0x1f4   : > { %9122 = vst [vmem:[#allocation136_spill] sm:$0xff] %v6518_v44  ;;  %v1099_v7 = vpack.c.b16 %v1036_v61, %v1035_v41 }
 0x1f5   : > { %2909 = vst.msk [vmem:[#allocation2 + $0xd8] sm:$0xff] %vm8818_vm7, %v6518_v44 }
 0x1fa   : > { %v1480_v52 = vpop.xlane.xlu0 %1479 }
 0x1fb   : > { %v6530_v3 = vmax.f32 %v6527_v45, %v1480_v52  ;;  %v1100_v52 = vpack.c.b8 %v1099_v7, %v1099_v7  ;;  %v6554_v45 = vld [vmem:[#allocation2 + $0x68] sm:$0xff] }
 0x1fc   : > { %9129 = vst [vmem:[#allocation143_spill] sm:$0xff] %v6554_v45 }
 0x1fd   : > { %9124 = vst [vmem:[#allocation138_spill] sm:$0xff] %v6530_v3  ;;  %1762 = vperm.xlu0 %4769, %v6530_v3   ;;  %vm1133_vm6 = vnez %v1100_v52 }
 0x1fe   : > { %2911 = vst.msk [vmem:[#allocation2 + $0xe8] sm:$0xff] %vm8818_vm7, %v6530_v3  ;;  %v1165_v3 = vsel %vm1133_vm6, 16843009, %v8922_v46 }
 0x1ff   : > { %v1414_v54 = vpop.xlane.xlu2 %1413  ;;  %v1227_v41 = vunpack.c.0.s8 %v1165_v3 }
 0x200   : > { %v6542_v4 = vmax.f32 %v6539_v50, %v1414_v54  ;;  %v1228_v54 = vunpack.c.1.s8 %v1165_v3 }
 0x201   : > { %vm6561_vm2 = vcmp.ne.s32.totalorder %v1227_v41, 0 }
 0x202   : > { %9126 = vst [vmem:[#allocation140_spill] sm:$0xff] %v6542_v4  ;;  %vm6565_vm6 = vcmp.ne.s32.totalorder %v1228_v54, 0  ;;  %v6581_v54 = vld [vmem:[#allocation2 + $0x80] sm:$0xff] }
 0x203   : > { %2889 = vst.msk [vmem:[#allocation2 + $0x38] sm:$0xff] %vm8818_vm7, %v6542_v4  ;;  %v9135_v49 = vsel %vm6565_vm6, 4294967295, %v9134_v49 }
 0x204   : > { %9136 = vst [vmem:[#allocation146_spill] sm:$0xff] %v9135_v49 }
 0x205   : > { %9139 = vst [vmem:[#allocation149_spill] sm:$0xff] %v6581_v54 }
 0x207   : > { %v1423_v58 = vpop.xlane.xlu2 %1422 }
 0x208   : > { %v6549_v31 = vmax.f32 %v6546_v57, %v1423_v58  ;;  %v9131_v57 = vmov 0 }
 0x209   : > { %v9132_v57 = vsel %vm6561_vm2, 4294967295, %v9131_v57 }
 0x20a   : > { %9128 = vst [vmem:[#allocation142_spill] sm:$0xff] %v6549_v31 }
 0x20b   : > { %2892 = vst.msk [vmem:[#allocation2 + $0x50] sm:$0xff] %vm8818_vm7, %v6549_v31 }
 0x20c   : > { %9133 = vst [vmem:[#allocation145_spill] sm:$0xff] %v9132_v57 }
 0x20d   : > { %v723_v61 = vpop.permute.xlu0 %722 }
 0x20e   : > { %v795_v50 = vadd.f32 %v5429_v15, %v723_v61  ;;  %v796_v7 = vadd.f32 %v5431_v17, %v723_v61 }
 0x20f   : > { %v1432_v14 = vpop.xlane.xlu2 %1431 }
 0x210   : > { %v859_v63 = vmul.f32 0.2, %v795_v50  ;;  %v860_v52 = vmul.f32 0.2, %v796_v7  ;;  %v6559_v58 = vmax.f32 %v6554_v45, %v1432_v14 }
 0x212   : > { %9130 = vst [vmem:[#allocation144_spill] sm:$0xff] %v6559_v58  ;;  %v923_v3 = vmax.f32 %v795_v50, %v859_v63  ;;  %v924_v35 = vmax.f32 %v796_v7, %v860_v52  ;;  %v6588_v7 = vld [vmem:[#allocation2 + $0x98] sm:$0xff] }
 0x213   : > { %2895 = vst.msk [vmem:[#allocation2 + $0x68] sm:$0xff] %vm8818_vm7, %v6559_v58 }
 0x214   : > { %v6573_v61 = vsel %vm6561_vm2, %v923_v3, -1e+30  ;;  %v6577_v14 = vsel %vm6565_vm6, %v924_v35, -1e+30  ;;  %9141 = vst [vmem:[#allocation151_spill] sm:$0xff] %v6588_v7  ;;  %vm9156_vm6 = vcmask 7168  }
 0x215   : > { %9137 = vst [vmem:[#allocation147_spill] sm:$0xff] %v6573_v61  ;;  %v1481_v41 = vmax.f32 %v6573_v61, %v6577_v14  ;;  %v1618_v50 = vpop.permute.xlu0 %1617  ;;  %v4544_v61 = vld [vmem:[%s5219_s20 + $0x50] sm:$0xff] }
 0x216   : > { %9138 = vst [vmem:[#allocation148_spill] sm:$0xff] %v6577_v14  ;;  %v1775_v52 = vsub.f32 %v5586_v18, %v1618_v50  ;;  %v1776_v35 = vsub.f32 %v5601_v30, %v1618_v50 }
 0x217   : > { %1482 = vmax.xlane.f32.xlu1 %v1481_v41  ;;  %v1441_v45 = vpop.xlane.xlu2 %1440  ;;  %v6597_v41 = vld [vmem:[#allocation2 + $0xb0] sm:$0xff] }
 0x218   : > { %v6584_v63 = vmax.f32 %v6581_v54, %v1441_v45  ;;  %v1839_v49 = vmul.f32 1.442695, %v1775_v52  ;;  %v1841_v57 = vmul.f32 1.442695, %v1776_v35  ;;  %9143 = vst [vmem:[#allocation153_spill] sm:$0xff] %v6597_v41 }
 0x21a   : > { %9140 = vst [vmem:[#allocation150_spill] sm:$0xff] %v6584_v63  ;;  %4772 = vpow2.f32 %v1839_v49 }
 0x21b   : > { %2898 = vst.msk [vmem:[#allocation2 + $0x80] sm:$0xff] %vm8818_vm7, %v6584_v63  ;;  %4774 = vpow2.f32 %v1841_v57 }
 0x21d   : > { %v1633_v45 = vpop.permute.xlu0 %1632 }
 0x21e   : > { %v1781_v54 = vsub.f32 %v5658_v36, %v1633_v45  ;;  %v1782_v18 = vsub.f32 %v5662_v37, %v1633_v45  ;;  %v6617_v45 = vld [vmem:[#allocation2 + $0xc8] sm:$0xff] }
 0x21f   : > { %v1450_v3 = vpop.xlane.xlu2 %1449  ;;  %9145 = vst [vmem:[#allocation155_spill] sm:$0xff] %v6617_v45 }
 0x220   : > { %v6593_v14 = vmax.f32 %v6588_v7, %v1450_v3  ;;  %v6601_v50 = vpop.eup %4772  ;;  %v1851_v52 = vmul.f32 1.442695, %v1781_v54  ;;  %v1853_v35 = vmul.f32 1.442695, %v1782_v18  ;;  %v568_v54 = vld [vmem:[%s5230_s27 + $0xf8] sm:$0xff] }
 0x221   : > { %v6606_v49 = vpop.eup %4774  ;;  %v1967_v57 = vsel %vm5496_vm0, %v6601_v50, 0.0 }
 0x222   : > { %9142 = vst [vmem:[#allocation152_spill] sm:$0xff] %v6593_v14  ;;  %4776 = vpow2.f32 %v1851_v52  ;;  %v1968_v36 = vsel %vm5510_vm3, %v6606_v49, 0.0 }
 0x223   : > { %2901 = vst.msk [vmem:[#allocation2 + $0x98] sm:$0xff] %vm8818_vm7, %v6593_v14  ;;  %4778 = vpow2.f32 %v1853_v35  ;;  %v2095_v37 = vadd.f32 %v1968_v36, %v1967_v57  ;;  %v6634_v36 = vld [vmem:[#allocation2 + $0xe0] sm:$0xff] }
 0x224   : > { %9147 = vst [vmem:[#allocation157_spill] sm:$0xff] %v6634_v36 }
 0x227   : > { %v1459_v30 = vpop.xlane.xlu2 %1458  ;;  %2096 = vadd.xlane.f32.xlu0 %v2095_v37 }
 0x228   : > { %v6604_v3 = vmax.f32 %v6597_v41, %v1459_v30  ;;  %v6619_v30 = vpop.eup %4776 }
 0x229   : > { %v6624_v52 = vpop.eup %4778  ;;  %v1973_v7 = vsel %vm5547_vm9, %v6619_v30, 0.0 }
 0x22a   : > { %9144 = vst [vmem:[#allocation154_spill] sm:$0xff] %v6604_v3  ;;  %v1974_v35 = vsel %vm5551_vm10, %v6624_v52, 0.0 }
 0x22b   : > { %2904 = vst.msk [vmem:[#allocation2 + $0xb0] sm:$0xff] %vm8818_vm7, %v6604_v3  ;;  %v2104_v57 = vadd.f32 %v1974_v35, %v1973_v7 }
 0x22f   : > { %v1468_v18 = vpop.xlane.xlu2 %1467  ;;  %2105 = vadd.xlane.f32.xlu0 %v2104_v57 }
 0x230   : > { %727 = vperm.xlu1 %4770, %v568_v54   ;;  %v6622_v41 = vmax.f32 %v6617_v45, %v1468_v18  ;;  %v6643_v18 = vpop.permute.xlu0 %1642  ;;  %v4549_v45 = vld [vmem:[%s5219_s20 + $0x78] sm:$0xff] }
 0x231   : > { %2729 = vmatpush.bf16.msra.mxu1 %v4549_v45  ;;  %4677 = vmatpush.bf16.msra.mxu3 %v4549_v45 }
 0x232   : > { %9146 = vst [vmem:[#allocation156_spill] sm:$0xff] %v6622_v41 }
 0x233   : > { %2907 = vst.msk [vmem:[#allocation2 + $0xc8] sm:$0xff] %vm8818_vm7, %v6622_v41 }
 0x237   : > { %v1477_v37 = vpop.xlane.xlu2 %1476 }
 0x238   : > { %1622 = vperm.xlu1 %4770, %v6333_v47   ;;  %v6638_v54 = vmax.f32 %v6634_v36, %v1477_v37  ;;  %v6647_v7 = vpop.permute.xlu0 %1657  ;;  %v4541_v36 = vld [vmem:[%s5219_s20 + $0x38] sm:$0xff]  ;;  %v1038_v47 = vunpack.c.3.s8 %v6098_v53 }
 0x239   : > { %2640 = vmatpush.bf16.msra.mxu0 %v4541_v36  ;;  %4669 = vmatpush.bf16.msra.mxu2 %v4541_v36  ;;  %v4538_v36 = vld [vmem:[%s5219_s20 + $0x20] sm:$0xff] }
 0x23a   : > { %9148 = vst [vmem:[#allocation158_spill] sm:$0xff] %v6638_v54 }
 0x23b   : > { %2910 = vst.msk [vmem:[#allocation2 + $0xe0] sm:$0xff] %vm8818_vm7, %v6638_v54 }
 0x240   : > { %1637 = vperm.xlu1 %4770, %v6379_v1   ;;  %v6650_v35 = vpop.permute.xlu0 %1672  ;;  %v6673_v1 = vld [vmem:[#allocation2 + $0xf0] sm:$0xff] }
 0x241   : > { %9150 = vst [vmem:[#allocation160_spill] sm:$0xff] %v6673_v1 }
 0x248   : > { %1652 = vperm.xlu1 %4770, %v6542_v4   ;;  %v6653_v57 = vpop.permute.xlu0 %1687  ;;  %v4547_v4 = vld [vmem:[%s5219_s20 + $0x68] sm:$0xff] }
 0x250   : > { %1667 = vperm.xlu1 %4770, %v6549_v31   ;;  %v6656_v37 = vpop.permute.xlu0 %1702  ;;  %v4540_v31 = vld [vmem:[%s5219_s20 + $0x30] sm:$0xff] }
 0x251   : > { %2641 = vmatpush.bf16.msra.mxu0 %v4540_v31  ;;  %4670 = vmatpush.bf16.msra.mxu2 %v4540_v31  ;;  %v4537_v31 = vld [vmem:[%s5219_s20 + $0x18] sm:$0xff] }
 0x258   : > { %1682 = vperm.xlu1 %4770, %v6559_v58   ;;  %v4548_v58 = vld [vmem:[%s5219_s20 + $0x70] sm:$0xff] }
 0x259   : > { %2730 = vmatpush.bf16.msra.mxu1 %v4548_v58  ;;  %4678 = vmatpush.bf16.msra.mxu3 %v4548_v58  ;;  %v4545_v58 = vld [vmem:[%s5219_s20 + $0x58] sm:$0xff] }
 0x25d   : > { %2731 = vmatpush.bf16.msra.mxu1 %v4547_v4  ;;  %4679 = vmatpush.bf16.msra.mxu3 %v4547_v4 }
 0x260   : > { %1697 = vperm.xlu1 %4770, %v6584_v63   ;;  %v4539_v63 = vld [vmem:[%s5219_s20 + $0x28] sm:$0xff] }
 0x261   : > { %2642 = vmatpush.bf16.msra.mxu0 %v4539_v63  ;;  %4671 = vmatpush.bf16.msra.mxu2 %v4539_v63 }
 0x265   : > { %2643 = vmatpush.bf16.msra.mxu0 %v4538_v36  ;;  %4672 = vmatpush.bf16.msra.mxu2 %v4538_v36  ;;  %v4536_v36 = vld [vmem:[%s5219_s20 + $0x10] sm:$0xff] }
 0x268   : > { %1712 = vperm.xlu1 %4770, %v6593_v14   ;;  %v4546_v14 = vld [vmem:[%s5219_s20 + $0x60] sm:$0xff] }
 0x269   : > { %2732 = vmatpush.bf16.msra.mxu1 %v4546_v14  ;;  %4680 = vmatpush.bf16.msra.mxu3 %v4546_v14  ;;  %v9152_v14 = vsub.f32 %v6281_v29, %v6296_v2  ;;  %v4542_v29 = vld [vmem:[%s5219_s20 + $0x40] sm:$0xff]  ;;  %v9154_v2 = vsub.f32 %v6324_v26, %v6338_v20 }
 0x26a   : > { %2644 = vmatpush.bf16.msra.mxu0 %v4537_v31  ;;  %4673 = vmatpush.bf16.msra.mxu2 %v4537_v31 }
 0x26d   : > { %2733 = vmatpush.bf16.msra.mxu1 %v4545_v58  ;;  %4681 = vmatpush.bf16.msra.mxu3 %v4545_v58  ;;  %v4534_v58 = vld [vmem:[%s5219_s20] sm:$0xff] }
 0x26e   : > { %2645 = vmatpush.bf16.msra.mxu0 %v4536_v36  ;;  %4674 = vmatpush.bf16.msra.mxu2 %v4536_v36 }
 0x270   : > { %1727 = vperm.xlu1 %4770, %v6604_v3   ;;  %v6666_v3 = vpop.permute.xlu0 %1717 }
 0x271   : > { %2734 = vmatpush.bf16.msra.mxu1 %v4544_v61  ;;  %4682 = vmatpush.bf16.msra.mxu3 %v4544_v61 }
 0x278   : > { %1742 = vperm.xlu1 %4770, %v6622_v41   ;;  %v6669_v45 = vpop.permute.xlu0 %1732 }
 0x279   : > { %9149 = vst [vmem:[#allocation159_spill] sm:$0xff] %v6669_v45  ;;  %v4543_v45 = vld [vmem:[%s5219_s20 + $0x48] sm:$0xff] }
 0x27a   : > { %2735 = vmatpush.bf16.msra.mxu1 %v4543_v45  ;;  %4683 = vmatpush.bf16.msra.mxu3 %v4543_v45 }
 0x27e   : > { %2736 = vmatpush.bf16.msra.mxu1 %v4542_v29  ;;  %4684 = vmatpush.bf16.msra.mxu3 %v4542_v29  ;;  %v2034_v29 = vld [vmem:[#allocation3 + $0x18] sm:$0xff] }
 0x280   : > { %1757 = vperm.xlu1 %4770, %v6638_v54   ;;  %v6682_v63 = vpop.permute.xlu0 %1747  ;;  %v1037_v54 = vunpack.c.3.s8 %v6077_v51 }
 0x282   : > { %v1101_v31 = vpack.c.b16 %v1038_v47, %v1037_v54  ;;  %v2031_v47 = vld [vmem:[#allocation3] sm:$0xff] }
 0x284   : > { %v1102_v53 = vpack.c.b8 %v1101_v31, %v1101_v31 }
 0x288   : > { %v6693_v51 = vpop.permute.xlu0 %1762 }
 0x289   : > { %9153 = vst [vmem:[#allocation162_spill] sm:$0xff] %v6693_v51 }
 0x28a   : > { %v1483_v41 = vpop.xlane.xlu1 %1482 }
 0x28b   : > { %v6678_v4 = vmax.f32 %v6673_v1, %v1483_v41  ;;  %v1551_v41 = vmul.f32 1.442695, %v9152_v14  ;;  %v4535_v1 = vld [vmem:[%s5219_s20 + $0x8] sm:$0xff]  ;;  %v1557_v14 = vmul.f32 1.442695, %v9154_v2 }
 0x28c   : > { %2646 = vmatpush.bf16.msra.mxu0 %v4535_v1  ;;  %4675 = vmatpush.bf16.msra.mxu2 %v4535_v1 }
 0x28d   : > { %9151 = vst [vmem:[#allocation161_spill] sm:$0xff] %v6678_v4  ;;  %4780 = vpow2.f32 %v1551_v41 }
 0x28e   : > { %2912 = vst.msk [vmem:[#allocation2 + $0xf0] sm:$0xff] %vm8818_vm7, %v6678_v4  ;;  %vm1134_vm7 = vnez %v1102_v53  ;;  %4782 = vpow2.f32 %v1557_v14  ;;  %v9158_v14 = vmov 0 }
 0x28f   : > { %v1166_v54 = vsel %vm1134_vm7, 16843009, %v8922_v46  ;;  %v9161_v46 = vmov 0 }
 0x290   : > { %2647 = vmatpush.bf16.msra.mxu0 %v4534_v58  ;;  %4676 = vmatpush.bf16.msra.mxu2 %v4534_v58  ;;  %v1229_v31 = vunpack.c.0.s8 %v1166_v54  ;;  %v1230_v51 = vunpack.c.1.s8 %v1166_v54 }
 0x292   : > { %vm6709_vm2 = vcmp.ne.s32.totalorder %v1229_v31, 0  ;;  %vm6713_vm7 = vcmp.ne.s32.totalorder %v1230_v51, 0 }
 0x293   : > { %v6700_v61 = vpop.eup %4780  ;;  %v9159_v14 = vsel %vm6709_vm2, 4294967295, %v9158_v14  ;;  %v9162_v46 = vsel %vm6713_vm7, 4294967295, %v9161_v46 }
 0x294   : > { %9155 = vst [vmem:[#allocation163_spill] sm:$0xff] %v6700_v61  ;;  %v2063_v1 = vmul.f32 %v6700_v61, %v2031_v47  ;;  %v6707_v58 = vpop.eup %4782 }
 0x295   : > { %9157 = vst [vmem:[#allocation164_spill] sm:$0xff] %v6707_v58  ;;  %v2066_v54 = vmul.f32 %v6707_v58, %v2034_v29 }
 0x296   : > { %9160 = vst [vmem:[#allocation165_spill] sm:$0xff] %v9159_v14  ;;  %v9244_v14 = vld [vmem:[#allocation46_spill] sm:$0xff] }
 0x297   : > { %9163 = vst [vmem:[#allocation166_spill] sm:$0xff] %v9162_v46 }
 0x29a   : > { %v2097_v45 = vpop.xlane.xlu0 %2096 }
 0x29b   : > { %v2191_v36 = vadd.f32 %v2097_v45, %v2063_v1 }
 0x29d   : > { %2224 = vst.msk [vmem:[#allocation3] sm:$0xff] %vm9156_vm6, %v2191_v36 }
 0x2a2   : > { %v728_v41 = vpop.permute.xlu1 %727 }
 0x2a3   : > { %v797_v20 = vadd.f32 %v5429_v15, %v728_v41  ;;  %v798_v26 = vadd.f32 %v5431_v17, %v728_v41  ;;  %v2106_v15 = vpop.xlane.xlu0 %2105 }
 0x2a4   : > { %v2194_v45 = vadd.f32 %v2106_v15, %v2066_v54 }
 0x2a5   : > { %v861_v53 = vmul.f32 0.2, %v797_v20  ;;  %v862_v2 = vmul.f32 0.2, %v798_v26 }
 0x2a6   : > { %2227 = vst.msk [vmem:[#allocation3 + $0x18] sm:$0xff] %vm9156_vm6, %v2194_v45  ;;  %vm4338_vm6 = vmpackc.low %vm5555_vm11, %vm5496_vm0 }
 0x2a7   : > { %v925_v47 = vmax.f32 %v797_v20, %v861_v53  ;;  %v926_v1 = vmax.f32 %v798_v26, %v862_v2  ;;  %v1785_v26 = vsub.f32 %v5530_v33, %v6643_v18  ;;  %v1786_v2 = vsub.f32 %v5534_v34, %v6643_v18  ;;  %vm4362_vm0 = vmpackc.low %vm5892_vm14, %vm6236_vm15 }
 0x2a9   : > { %v6720_v17 = vsel %vm6709_vm2, %v925_v47, -1e+30  ;;  %v6724_v36 = vsel %vm6713_vm7, %v926_v1, -1e+30  ;;  %v1859_v47 = vmul.f32 1.442695, %v1785_v26  ;;  %vm4386_vm7 = vmpackc.low %vm5561_vm12, %vm5510_vm3  ;;  %v1798_v26 = vsub.f32 %v9165_v0, %v6650_v35 }
 0x2aa   : > { %v1623_v41 = vpop.permute.xlu1 %1622  ;;  %v1484_v51 = vmax.f32 %v6720_v17, %v6724_v36  ;;  %v1861_v1 = vmul.f32 1.442695, %v1786_v2  ;;  %vm4410_vm3 = vmpackc.low %vm5907_vm1, %vm6240_vm13 }
 0x2ab   : > { %v1777_v31 = vsub.f32 %v5666_v38, %v1623_v41  ;;  %v1778_v20 = vsub.f32 %v5672_v16, %v1623_v41 }
 0x2ac   : > { %1485 = vmax.xlane.f32.xlu2 %v1484_v51 }
 0x2ad   : > { %v1843_v29 = vmul.f32 1.442695, %v1777_v31  ;;  %v1845_v53 = vmul.f32 1.442695, %v1778_v20  ;;  %v1797_v20 = vsub.f32 %v9164_v59, %v6650_v35 }
 0x2af   : > { %4784 = vpow2.f32 %v1843_v29  ;;  %v1883_v2 = vmul.f32 1.442695, %v1797_v20 }
 0x2b0   : > { %4786 = vpow2.f32 %v1845_v53 }
 0x2b1   : > { %4788 = vpow2.f32 %v1859_v47  ;;  %v1885_v47 = vmul.f32 1.442695, %v1798_v26 }
 0x2b2   : > { %v1638_v54 = vpop.permute.xlu1 %1637  ;;  %4790 = vpow2.f32 %v1861_v1 }
 0x2b3   : > { %v1783_v15 = vsub.f32 %v5486_v8, %v1638_v54  ;;  %v1784_v38 = vsub.f32 %v5490_v9, %v1638_v54 }
 0x2b5   : > { %v4785_v45 = vpop.eup %4784  ;;  %v1855_v16 = vmul.f32 1.442695, %v1783_v15  ;;  %v1857_v41 = vmul.f32 1.442695, %v1784_v38 }
 0x2b6   : > { %v4787_v33 = vpop.eup %4786  ;;  %v4339_v34 = vpack.c.bf16 %v4785_v45, %v6601_v50  ;;  %v1969_v8 = vsel %vm5555_vm11, %v4785_v45, 0.0  ;;  %vm9169_vm11 = vcmask 7168  }
 0x2b7   : > { %4792 = vpow2.f32 %v1855_v16  ;;  %v4387_v9 = vpack.c.bf16 %v4787_v33, %v6606_v49  ;;  %v1970_v12 = vsel %vm5561_vm12, %v4787_v33, 0.0  ;;  %v6755_v19 = vpop.eup %4788  ;;  %vm4341_vm12 = vmpackc.low %vm5547_vm9, %vm5514_vm4 }
 0x2b8   : > { %4794 = vpow2.f32 %v1857_v41  ;;  %4340 = vmatmul.msk.bf16.vlgmr.msra.gmra.mxu0 %vm4338_vm6, %v4339_v34  ;;  %v6751_v18 = vadd.f32 %v1970_v12, %v1969_v8  ;;  %v6757_v51 = vpop.eup %4790  ;;  %v1810_v34 = vsub.f32 %v5934_v40, %v6656_v37 }
 0x2b9   : > { %4388 = vmatmul.msk.bf16.vlgmr.msra.gmra.mxu1 %vm4386_vm7, %v4387_v9  ;;  %4796 = vpow2.f32 %v1883_v2 }
 0x2ba   : > { %v6753_v50 = vpop.permute.xlu1 %1652  ;;  %4798 = vpow2.f32 %v1885_v47  ;;  %v1909_v59 = vmul.f32 1.442695, %v1810_v34 }
 0x2bd   : > { %v6759_v31 = vpop.eup %4792 }
 0x2be   : > { %v6763_v49 = vpop.eup %4794 }
 0x2bf   : > { %v6776_v16 = vpop.eup %4796 }
 0x2c0   : > { %v6778_v41 = vpop.eup %4798 }
 0x2c2   : > { %v1668_v1 = vpop.permute.xlu1 %1667 }
 0x2c3   : > { %v1795_v54 = vsub.f32 %v6193_v6, %v1668_v1  ;;  %v1796_v15 = vsub.f32 %v6197_v23, %v1668_v1  ;;  %v1809_v6 = vsub.f32 %v5919_v39, %v6656_v37 }
 0x2c4   : > { %1627 = vperm.xlu2 %4771, %v6289_v21  }
 0x2c5   : > { %v1879_v38 = vmul.f32 1.442695, %v1795_v54  ;;  %v1881_v45 = vmul.f32 1.442695, %v1796_v15  ;;  %v1907_v12 = vmul.f32 1.442695, %v1809_v6 }
 0x2c7   : > { %4800 = vpow2.f32 %v1879_v38 }
 0x2c8   : > { %4802 = vpow2.f32 %v1881_v45 }
 0x2c9   : > { %4804 = vpow2.f32 %v1907_v12 }
 0x2ca   : > { %v6774_v35 = vpop.permute.xlu1 %1682  ;;  %4806 = vpow2.f32 %v1909_v59  ;;  %v9170_v59 = vld [vmem:[#allocation16_spill] sm:$0xff] }
 0x2cc   : > { %1647 = vperm.xlu2 %4771, %v6371_v28  }
 0x2cd   : > { %v6781_v33 = vpop.eup %4800 }
 0x2ce   : > { %v6785_v23 = vpop.eup %4802 }
 0x2cf   : > { %v6796_v40 = vpop.eup %4804 }
 0x2d0   : > { %v6798_v37 = vpop.eup %4806 }
 0x2d2   : > { %v1698_v20 = vpop.permute.xlu1 %1697 }
 0x2d3   : > { %v1807_v0 = vsub.f32 %v6248_v5, %v1698_v20  ;;  %v1808_v26 = vsub.f32 %v6252_v13, %v1698_v20 }
 0x2d4   : > { %1662 = vperm.xlu2 %4771, %v6411_v32  }
 0x2d5   : > { %v1903_v39 = vmul.f32 1.442695, %v1807_v0  ;;  %v1905_v2 = vmul.f32 1.442695, %v1808_v26  ;;  %v9171_v0 = vld [vmem:[#allocation17_spill] sm:$0xff] }
 0x2d7   : > { %4808 = vpow2.f32 %v1903_v39 }
 0x2d8   : > { %4810 = vpow2.f32 %v1905_v2 }
 0x2dc   : > { %1677 = vperm.xlu2 %4771, %v6430_v42  }
 0x2dd   : > { %v4809_v47 = vpop.eup %4808 }
 0x2de   : > { %v4811_v5 = vpop.eup %4810  ;;  %v4363_v13 = vpack.c.bf16 %v6796_v40, %v4809_v47  ;;  %v1999_v54 = vsel %vm6236_vm15, %v4809_v47, 0.0  ;;  %v1789_v47 = vsub.f32 %v6174_v11, %v6753_v50 }
 0x2df   : > { %v4411_v15 = vpack.c.bf16 %v6798_v37, %v4811_v5  ;;  %v2000_v38 = vsel %vm6240_vm13, %v4811_v5, 0.0  ;;  %v1790_v5 = vsub.f32 %v6178_v62, %v6753_v50  ;;  %vm4389_vm13 = vmpackc.low %vm5551_vm10, %vm5518_vm5 }
 0x2e0   : > { %4364 = vmatmul.msk.bf16.vlgmr.msra.gmra.mxu2 %vm4362_vm0, %v4363_v13  ;;  %v6815_v45 = vadd.f32 %v2000_v38, %v1999_v54  ;;  %v9172_v54 = vld [vmem:[#allocation23_spill] sm:$0xff]  ;;  %v9173_v38 = vld [vmem:[#allocation24_spill] sm:$0xff] }
 0x2e1   : > { %4412 = vmatmul.msk.bf16.vlgmr.msra.gmra.mxu3 %vm4410_vm3, %v4411_v15  ;;  %v1869_v11 = vmul.f32 1.442695, %v1790_v5 }
 0x2e4   : > { %1692 = vperm.xlu2 %4771, %v6447_v60  }
 0x2ec   : > { %1707 = vperm.xlu2 %4771, %v6464_v10  }
 0x2f4   : > { %1722 = vperm.xlu2 %4771, %v6481_v48  }
 0x2fc   : > { %1737 = vperm.xlu2 %4771, %v6501_v27   ;;  %v9216_v27 = vld [vmem:[#allocation32_spill] sm:$0xff] }
 0x304   : > { %1752 = vperm.xlu2 %4771, %v6518_v44  }
 0x30c   : > { %1767 = vperm.xlu2 %4771, %v6678_v4   ;;  %v9192_v4 = vld [vmem:[#allocation77_spill] sm:$0xff] }
 0x30d   : > { %vm9193_vm6 = vnez %v9192_v4 }
 0x31f   : > { %v1486_v43 = vpop.xlane.xlu2 %1485 }
 0x320   : > { %v6826_v6 = vmax.f32 %v6823_v24, %v1486_v43 }
 0x322   : > { %9168 = vst [vmem:[#allocation29_spill] sm:$0xff] %v6826_v6  ;;  %1772 = vperm.xlu1 %4770, %v6826_v6  }
 0x323   : > { %2913 = vst.msk [vmem:[#allocation2 + $0xf8] sm:$0xff] %vm9169_vm11, %v6826_v6  ;;  %v9191_v6 = vld [vmem:[#allocation36_spill] sm:$0xff] }
 0x327   : > { %v1628_v12 = vpop.permute.xlu2 %1627 }
 0x328   : > { %v1779_v20 = vsub.f32 %v9170_v59, %v1628_v12  ;;  %v1780_v26 = vsub.f32 %v9171_v0, %v1628_v12  ;;  %v1867_v59 = vmul.f32 1.442695, %v1789_v47  ;;  %v9177_v47 = vld [vmem:[#allocation30_spill] sm:$0xff] }
 0x32a   : > { %v1847_v39 = vmul.f32 1.442695, %v1779_v20  ;;  %v1849_v2 = vmul.f32 1.442695, %v1780_v26 }
 0x32c   : > { %4812 = vpow2.f32 %v1847_v39 }
 0x32d   : > { %4814 = vpow2.f32 %v1849_v2 }
 0x32f   : > { %v1648_v13 = vpop.permute.xlu2 %1647 }
 0x330   : > { %v1787_v15 = vsub.f32 %v9172_v54, %v1648_v13  ;;  %v1788_v43 = vsub.f32 %v9173_v38, %v1648_v13  ;;  %v9181_v54 = vld [vmem:[#allocation9_spill] sm:$0xff]  ;;  %v9183_v38 = vld [vmem:[#allocation18_spill] sm:$0xff] }
 0x331   : > { %vm9182_vm10 = vnez %v9181_v54 }
 0x332   : > { %v6841_v34 = vpop.eup %4812  ;;  %v1863_v9 = vmul.f32 1.442695, %v1787_v15  ;;  %v1865_v12 = vmul.f32 1.442695, %v1788_v43  ;;  %v1791_v43 = vsub.f32 %v9183_v38, %v6647_v7 }
 0x333   : > { %v6847_v0 = vpop.eup %4814  ;;  %v4342_v62 = vpack.c.bf16 %v6619_v30, %v6841_v34 }
 0x334   : > { %4816 = vpow2.f32 %v1863_v9  ;;  %v4390_v26 = vpack.c.bf16 %v6624_v52, %v6847_v0  ;;  %v9179_v9 = vld [vmem:[#allocation8_spill] sm:$0xff] }
 0x335   : > { %4818 = vpow2.f32 %v1865_v12  ;;  %2099 = vadd.xlane.f32.xlu2 %v6751_v18  ;;  %v2649_v55 = vpop.f32.mrf.mxu0  ;;  %4343 = vmatmul.msk.bf16.gmra.mxu0 %vm4341_vm12, %v4342_v62  ;;  %vm9180_vm9 = vnez %v9179_v9  ;;  %v1976_v18 = vsel %vm9182_vm10, %v6763_v49, 0.0  ;;  %v1801_v62 = vsub.f32 %v6220_v22, %v6774_v35 }
 0x336   : > { %4820 = vpow2.f32 %v1867_v59  ;;  %v2738_v39 = vpop.f32.mrf.mxu1  ;;  %4391 = vmatmul.msk.bf16.gmra.mxu1 %vm4389_vm13, %v4390_v26  ;;  %v1975_v52 = vsel %vm9180_vm9, %v6759_v31, 0.0 }
 0x337   : > { %4822 = vpow2.f32 %v1869_v11  ;;  %v6858_v2 = vadd.f32 %v2738_v39, %v2649_v55  ;;  %v1663_v30 = vpop.permute.xlu2 %1662  ;;  %v2107_v26 = vadd.f32 %v1976_v18, %v1975_v52  ;;  %v9184_v55 = vld [vmem:[#allocation20_spill] sm:$0xff]  ;;  %v1871_v52 = vmul.f32 1.442695, %v1791_v43  ;;  %v9189_v18 = vld [vmem:[#allocation83_spill] sm:$0xff]  ;;  %v9196_v43 = vld [vmem:[#allocation38_spill] sm:$0xff] }
 0x338   : > { %v1793_v5 = vsub.f32 %v9177_v47, %v1663_v30  ;;  %v1794_v13 = vsub.f32 %v9178_v56, %v1663_v30  ;;  %vm9185_vm15 = vnez %v9184_v55  ;;  %v9186_v47 = vld [vmem:[#allocation21_spill] sm:$0xff]  ;;  %v1802_v8 = vsub.f32 %v9189_v18, %v6774_v35  ;;  %v9239_v55 = vld [vmem:[#allocation54_spill] sm:$0xff] }
 0x339   : > { %9176 = vst [vmem:[#allocation44_spill] sm:$0xff] %v6858_v2  ;;  %vm9187_vm7 = vnez %v9186_v47  ;;  %v1891_v53 = vmul.f32 1.442695, %v1801_v62  ;;  %v1816_v60 = vsub.f32 %v9239_v55, %v6666_v3 }
 0x33a   : > { %v6868_v15 = vpop.eup %4816  ;;  %v1875_v59 = vmul.f32 1.442695, %v1793_v5  ;;  %v1877_v12 = vmul.f32 1.442695, %v1794_v13  ;;  %v9188_v5 = vld [vmem:[#allocation19_spill] sm:$0xff] }
 0x33b   : > { %v6872_v11 = vpop.eup %4818  ;;  %v1979_v39 = vsel %vm9185_vm15, %v6868_v15, 0.0  ;;  %v1792_v13 = vsub.f32 %v9188_v5, %v6647_v7  ;;  %v9194_v7 = vld [vmem:[#allocation78_spill] sm:$0xff]  ;;  %v1893_v62 = vmul.f32 1.442695, %v1802_v8 }
 0x33c   : > { %v6879_v30 = vpop.eup %4820  ;;  %4824 = vpow2.f32 %v1875_v59  ;;  %v1980_v56 = vsel %vm9187_vm7, %v6872_v11, 0.0  ;;  %v9190_v59 = vld [vmem:[#allocation35_spill] sm:$0xff]  ;;  %vm9195_vm0 = vnez %v9194_v7  ;;  %v9202_v8 = vld [vmem:[#allocation22_spill] sm:$0xff]  ;;  %v9230_v7 = vld [vmem:[#allocation93_spill] sm:$0xff] }
 0x33d   : > { %v6884_v38 = vpop.eup %4822  ;;  %4826 = vpow2.f32 %v1877_v12  ;;  %2108 = vadd.xlane.f32.xlu2 %v2107_v26  ;;  %v2113_v22 = vadd.f32 %v1980_v56, %v1979_v39  ;;  %v1981_v44 = vsel %vm9193_vm6, %v6879_v30, 0.0  ;;  %v1873_v26 = vmul.f32 1.442695, %v1792_v13 }
 0x33e   : > { %v1982_v12 = vsel %vm9195_vm0, %v6884_v38, 0.0  ;;  %v1803_v39 = vsub.f32 %v9196_v43, %v6653_v57  ;;  %4828 = vpow2.f32 %v1871_v52  ;;  %vm9203_vm2 = vnez %v9202_v8  ;;  %v1713_v43 = vpop.permute.xlu1 %1712  ;;  %v9264_v8 = vld [vmem:[#allocation37_spill] sm:$0xff] }
 0x33f   : > { %2114 = vadd.xlane.f32.xlu0 %v2113_v22  ;;  %v1678_v29 = vpop.permute.xlu2 %1677  ;;  %v9199_v22 = vld [vmem:[#allocation39_spill] sm:$0xff]  ;;  %4830 = vpow2.f32 %v1891_v53  ;;  %v2116_v13 = vadd.f32 %v1982_v12, %v1981_v44  ;;  %v9206_v44 = vpack.c.bf16 %v6755_v19, %v6759_v31  ;;  %v9207_v53 = vpack.c.bf16 %v6757_v51, %v6763_v49 }
 0x340   : > { %v1799_v2 = vsub.f32 %v9190_v59, %v1678_v29  ;;  %v1800_v24 = vsub.f32 %v9191_v6, %v1678_v29  ;;  %v9197_v29 = vld [vmem:[#allocation10_spill] sm:$0xff]  ;;  %v1804_v18 = vsub.f32 %v9199_v22, %v6653_v57  ;;  %v9200_v59 = vld [vmem:[#allocation11_spill] sm:$0xff]  ;;  %v1895_v52 = vmul.f32 1.442695, %v1803_v39 }
 0x341   : > { %vm9198_vm3 = vnez %v9197_v29  ;;  %vm9201_vm12 = vnez %v9200_v59  ;;  %v1971_v39 = vsel %vm5514_vm4, %v6841_v34, 0.0  ;;  %v9209_v22 = vld [vmem:[#allocation43_spill] sm:$0xff]  ;;  %vm9217_vm4 = vnez %v9216_v27 }
 0x342   : > { %v6900_v35 = vpop.eup %4824  ;;  %v1887_v56 = vmul.f32 1.442695, %v1799_v2  ;;  %v1889_v5 = vmul.f32 1.442695, %v1800_v24  ;;  %vm4344_vm11 = vmpackc.low %vm9198_vm3, %vm9180_vm9  ;;  %v9204_v2 = vld [vmem:[#allocation25_spill] sm:$0xff]  ;;  %v9210_v49 = vld [vmem:[#allocation79_spill] sm:$0xff]  ;;  %v4396_v4 = vpack.c.bf16 %v6884_v38, %v6872_v11 }
 0x343   : > { %v6906_v6 = vpop.eup %4826  ;;  %vm4392_vm13 = vmpackc.low %vm9201_vm12, %vm9182_vm10  ;;  %v1985_v24 = vsel %vm9203_vm2, %v6900_v35, 0.0  ;;  %vm9205_vm9 = vnez %v9204_v2  ;;  %v1897_v54 = vmul.f32 1.442695, %v1804_v18  ;;  %vm9211_vm10 = vnez %v9210_v49  ;;  %v9212_v18 = vld [vmem:[#allocation80_spill] sm:$0xff]  ;;  %v9224_v29 = vld [vmem:[#allocation47_spill] sm:$0xff] }
 0x344   : > { %4832 = vpow2.f32 %v1887_v56  ;;  %v1986_v9 = vsel %vm9205_vm9, %v6906_v6, 0.0  ;;  %v1972_v56 = vsel %vm5518_vm5, %v6847_v0, 0.0  ;;  %v6932_v31 = vpop.eup %4828  ;;  %v9214_v0 = vld [vmem:[#allocation87_spill] sm:$0xff]  ;;  %v9292_v49 = vld [vmem:[#allocation70_spill] sm:$0xff] }
 0x345   : > { %4834 = vpow2.f32 %v1889_v5  ;;  %2117 = vadd.xlane.f32.xlu2 %v2116_v13  ;;  %4346 = vmatmul.msk.bf16.gmra.mxu0 %vm4344_vm11, %v9206_v44  ;;  %v2122_v57 = vadd.f32 %v1986_v9, %v1985_v24  ;;  %v9208_v5 = vld [vmem:[#allocation42_spill] sm:$0xff]  ;;  %vm9213_vm11 = vnez %v9212_v18  ;;  %v6942_v20 = vpop.eup %4830  ;;  %v1813_v50 = vsub.f32 %v9214_v0, %v1713_v43  ;;  %v9233_v11 = vld [vmem:[#allocation15_spill] sm:$0xff] }
 0x346   : > { %4836 = vpow2.f32 %v1893_v62  ;;  %4394 = vmatmul.msk.bf16.gmra.mxu1 %vm4392_vm13, %v9207_v53  ;;  %v1988_v24 = vsel %vm9213_vm11, %v6785_v23, 0.0  ;;  %v1728_v0 = vpop.permute.xlu1 %1727 }
 0x347   : > { %4838 = vpow2.f32 %v1873_v26  ;;  %2123 = vadd.xlane.f32.xlu0 %v2122_v57  ;;  %v1693_v12 = vpop.permute.xlu2 %1692  ;;  %v1987_v26 = vsel %vm9211_vm10, %v6781_v33, 0.0  ;;  %v2101_v57 = vadd.f32 %v1972_v56, %v1971_v39  ;;  %v1915_v39 = vmul.f32 1.442695, %v1813_v50 }
 0x348   : > { %v1805_v62 = vsub.f32 %v9208_v5, %v1693_v12  ;;  %v1806_v13 = vsub.f32 %v9209_v22, %v1693_v12  ;;  %4840 = vpow2.f32 %v1895_v52  ;;  %v9215_v12 = vld [vmem:[#allocation88_spill] sm:$0xff]  ;;  %v2125_v22 = vadd.f32 %v1988_v24, %v1987_v26  ;;  %v9218_v52 = vld [vmem:[#allocation33_spill] sm:$0xff] }
 0x349   : > { %4842 = vpow2.f32 %v1897_v54  ;;  %v1814_v5 = vsub.f32 %v9215_v12, %v1713_v43  ;;  %vm9219_vm5 = vnez %v9218_v52  ;;  %v1977_v43 = vsel %vm9198_vm3, %v6755_v19, 0.0  ;;  %v9225_v12 = vld [vmem:[#allocation48_spill] sm:$0xff]  ;;  %vm4347_vm3 = vmpackc.low %vm9193_vm6, %vm9185_vm15 }
 0x34a   : > { %v6944_v34 = vpop.eup %4832  ;;  %v1899_v9 = vmul.f32 1.442695, %v1805_v62  ;;  %v1901_v44 = vmul.f32 1.442695, %v1806_v13  ;;  %v1978_v56 = vsel %vm9201_vm12, %v6757_v51, 0.0  ;;  %vm4395_vm12 = vmpackc.low %vm9195_vm0, %vm9187_vm7  ;;  %vm9234_vm6 = vnez %v9233_v11  ;;  %v9267_v11 = vld [vmem:[#allocation71_spill] sm:$0xff] }
 0x34b   : > { %v6947_v53 = vpop.eup %4834  ;;  %v1991_v48 = vsel %vm9217_vm4, %v6944_v34, 0.0  ;;  %v1917_v24 = vmul.f32 1.442695, %v1814_v5  ;;  %v2110_v51 = vadd.f32 %v1978_v56, %v1977_v43  ;;  %v9228_v56 = vld [vmem:[#allocation41_spill] sm:$0xff] }
 0x34c   : > { %v6953_v10 = vpop.eup %4836  ;;  %4844 = vpow2.f32 %v1899_v9  ;;  %2102 = vadd.xlane.f32.xlu1 %v2101_v57  ;;  %v1992_v62 = vsel %vm9219_vm5, %v6947_v53, 0.0  ;;  %v9220_v57 = vld [vmem:[#allocation81_spill] sm:$0xff]  ;;  %vm9229_vm15 = vnez %v9228_v56 }
 0x34d   : > { %v6958_v13 = vpop.eup %4838  ;;  %4846 = vpow2.f32 %v1901_v44  ;;  %2126 = vadd.xlane.f32.xlu2 %v2125_v22  ;;  %v2131_v54 = vadd.f32 %v1992_v62, %v1991_v48  ;;  %vm9221_vm13 = vnez %v9220_v57  ;;  %v9222_v48 = vld [vmem:[#allocation82_spill] sm:$0xff] }
 0x34e   : > { %v6966_v26 = vpop.eup %4840  ;;  %v1993_v44 = vsel %vm9221_vm13, %v6942_v20, 0.0  ;;  %vm9223_vm5 = vnez %v9222_v48  ;;  %4848 = vpow2.f32 %v1915_v39  ;;  %v9226_v39 = vld [vmem:[#allocation40_spill] sm:$0xff]  ;;  %v1984_v38 = vsel %vm9234_vm6, %v6958_v13, 0.0 }
 0x34f   : > { %2132 = vadd.xlane.f32.xlu0 %v2131_v54  ;;  %v1708_v9 = vpop.permute.xlu2 %1707  ;;  %v1994_v50 = vsel %vm9223_vm5, %v6953_v10, 0.0  ;;  %v6976_v59 = vpop.eup %4842  ;;  %4850 = vpow2.f32 %v1917_v24  ;;  %vm9227_vm5 = vnez %v9226_v39  ;;  %v1819_v24 = vsub.f32 %v9230_v7, %v1728_v0 }
 0x350   : > { %v1811_v19 = vsub.f32 %v9224_v29, %v1708_v9  ;;  %v1812_v22 = vsub.f32 %v9225_v12, %v1708_v9  ;;  %v2134_v61 = vadd.f32 %v1994_v50, %v1993_v44  ;;  %v4348_v9 = vpack.c.bf16 %v6879_v30, %v6868_v15  ;;  %v9231_v44 = vld [vmem:[#allocation14_spill] sm:$0xff] }
 0x351   : > { %vm9232_vm7 = vnez %v9231_v44  ;;  %v9235_v29 = vld [vmem:[#allocation94_spill] sm:$0xff]  ;;  %v1927_v42 = vmul.f32 1.442695, %v1819_v24 }
 0x352   : > { %v6978_v62 = vpop.eup %4844  ;;  %v1911_v5 = vmul.f32 1.442695, %v1811_v19  ;;  %v1913_v54 = vmul.f32 1.442695, %v1812_v22  ;;  %v1983_v50 = vsel %vm9232_vm7, %v6932_v31, 0.0  ;;  %v1820_v19 = vsub.f32 %v9235_v29, %v1728_v0  ;;  %v9242_v29 = vld [vmem:[#allocation84_spill] sm:$0xff] }
 0x353   : > { %v6984_v21 = vpop.eup %4846  ;;  %v1997_v43 = vsel %vm9227_vm5, %v6978_v62, 0.0  ;;  %v2119_v7 = vadd.f32 %v1984_v38, %v1983_v50 }
 0x354   : > { %4852 = vpow2.f32 %v1911_v5  ;;  %2111 = vadd.xlane.f32.xlu1 %v2110_v51  ;;  %v1998_v15 = vsel %vm9229_vm15, %v6984_v21, 0.0  ;;  %v4849_v22 = vpop.eup %4848  ;;  %v9236_v51 = vld [vmem:[#allocation55_spill] sm:$0xff]  ;;  %v9237_v5 = vld [vmem:[#allocation56_spill] sm:$0xff]  ;;  %vm9245_vm15 = vnez %v9244_v14 }
 0x355   : > { %4854 = vpow2.f32 %v1913_v54  ;;  %2135 = vadd.xlane.f32.xlu2 %v2134_v61  ;;  %4349 = vmatmul.msk.bf16.gmra.mxu0 %vm4347_vm3, %v4348_v9  ;;  %v2140_v47 = vadd.f32 %v1998_v15, %v1997_v43  ;;  %v4851_v9 = vpop.eup %4850  ;;  %v9238_v43 = vld [vmem:[#allocation51_spill] sm:$0xff]  ;;  %v1743_v15 = vpop.permute.xlu1 %1742  ;;  %vm9243_vm3 = vnez %v9242_v29 }
 0x356   : > { %4397 = vmatmul.msk.bf16.gmra.mxu1 %vm4395_vm12, %v4396_v4  ;;  %v1815_v4 = vsub.f32 %v9238_v43, %v6666_v3  ;;  %v9246_v43 = vld [vmem:[#allocation85_spill] sm:$0xff] }
 0x357   : > { %2141 = vadd.xlane.f32.xlu0 %v2140_v47  ;;  %v1723_v12 = vpop.permute.xlu2 %1722  ;;  %v9240_v47 = vld [vmem:[#allocation45_spill] sm:$0xff]  ;;  %vm9247_vm5 = vnez %v9246_v43  ;;  %v9256_v43 = vld [vmem:[#allocation52_spill] sm:$0xff] }
 0x358   : > { %v1817_v61 = vsub.f32 %v9236_v51, %v1723_v12  ;;  %v1818_v54 = vsub.f32 %v9237_v5, %v1723_v12  ;;  %vm9241_vm0 = vnez %v9240_v47  ;;  %v1929_v12 = vmul.f32 1.442695, %v1820_v19  ;;  %vm4413_vm13 = vmpackc.low %vm9247_vm5, %vm9245_vm15  ;;  %v9248_v19 = vld [vmem:[#allocation26_spill] sm:$0xff]  ;;  %v9250_v47 = vld [vmem:[#allocation100_spill] sm:$0xff] }
 0x359   : > { %vm4365_vm12 = vmpackc.low %vm9243_vm3, %vm9241_vm0  ;;  %v1919_v24 = vmul.f32 1.442695, %v1815_v4  ;;  %vm9249_vm4 = vnez %v9248_v19  ;;  %v9253_v4 = vld [vmem:[#allocation101_spill] sm:$0xff] }
 0x35a   : > { %v4853_v30 = vpop.eup %4852  ;;  %v1923_v46 = vmul.f32 1.442695, %v1817_v61  ;;  %v1925_v0 = vmul.f32 1.442695, %v1818_v54  ;;  %v1989_v61 = vsel %vm9249_vm4, %v6776_v16, 0.0 }
 0x35b   : > { %v4855_v51 = vpop.eup %4854  ;;  %v4366_v5 = vpack.c.bf16 %v4849_v22, %v4853_v30  ;;  %v2003_v50 = vsel %vm9241_vm0, %v4853_v30, 0.0  ;;  %v1921_v54 = vmul.f32 1.442695, %v1816_v60  ;;  %v1825_v30 = vsub.f32 %v9250_v47, %v1743_v15 }
 0x35c   : > { %4856 = vpow2.f32 %v1923_v46  ;;  %2120 = vadd.xlane.f32.xlu1 %v2119_v7  ;;  %v4414_v3 = vpack.c.bf16 %v4851_v9, %v4855_v51  ;;  %v2004_v55 = vsel %vm9245_vm15, %v4855_v51, 0.0  ;;  %v9251_v46 = vld [vmem:[#allocation27_spill] sm:$0xff]  ;;  %v1826_v7 = vsub.f32 %v9253_v4, %v1743_v15 }
 0x35d   : > { %4858 = vpow2.f32 %v1925_v0  ;;  %2144 = vadd.xlane.f32.xlu2 %v6815_v45  ;;  %4367 = vmatmul.msk.bf16.gmra.mxu2 %vm4365_vm12, %v4366_v5  ;;  %v2149_v38 = vadd.f32 %v2004_v55, %v2003_v50  ;;  %vm9252_vm0 = vnez %v9251_v46  ;;  %v9254_v0 = vld [vmem:[#allocation63_spill] sm:$0xff]  ;;  %v9255_v5 = vld [vmem:[#allocation64_spill] sm:$0xff]  ;;  %v2005_v60 = vsel %vm9243_vm3, %v4849_v22, 0.0  ;;  %v1758_v29 = vpop.permute.xlu1 %1757 }
 0x35e   : > { %4860 = vpow2.f32 %v1927_v42  ;;  %4415 = vmatmul.msk.bf16.gmra.mxu3 %vm4413_vm13, %v4414_v3  ;;  %v1990_v14 = vsel %vm9252_vm0, %v6778_v41, 0.0  ;;  %v2006_v42 = vsel %vm9247_vm5, %v4851_v9, 0.0  ;;  %vm4350_vm13 = vmpackc.low %vm9203_vm2, %vm9232_vm7  ;;  %v1941_v4 = vmul.f32 1.442695, %v1826_v7 }
 0x35f   : > { %4862 = vpow2.f32 %v1929_v12  ;;  %2150 = vadd.xlane.f32.xlu0 %v2149_v38  ;;  %v1738_v45 = vpop.permute.xlu2 %1737  ;;  %v2128_v3 = vadd.f32 %v1990_v14, %v1989_v61  ;;  %v1939_v12 = vmul.f32 1.442695, %v1825_v30  ;;  %v4351_v9 = vpack.c.bf16 %v6900_v35, %v6932_v31  ;;  %vm4398_vm5 = vmpackc.low %vm9205_vm9, %vm9234_vm6  ;;  %v9258_v14 = vld [vmem:[#allocation53_spill] sm:$0xff] }
 0x360   : > { %v1823_v51 = vsub.f32 %v9254_v0, %v1738_v45  ;;  %v1824_v50 = vsub.f32 %v9255_v5, %v1738_v45  ;;  %4864 = vpow2.f32 %v1919_v24  ;;  %v2152_v45 = vadd.f32 %v2006_v42, %v2005_v60  ;;  %v9266_v60 = vld [vmem:[#allocation110_spill] sm:$0xff] }
 0x361   : > { %4866 = vpow2.f32 %v1921_v54  ;;  %vm9257_vm15 = vnez %v9256_v43  ;;  %v4399_v30 = vpack.c.bf16 %v6906_v6, %v6958_v13  ;;  %vm9259_vm3 = vnez %v9258_v14  ;;  %v9262_v6 = vld [vmem:[#allocation34_spill] sm:$0xff] }
 0x362   : > { %v7045_v55 = vpop.eup %4856  ;;  %v1935_v47 = vmul.f32 1.442695, %v1823_v51  ;;  %v1937_v15 = vmul.f32 1.442695, %v1824_v50  ;;  %v9261_v51 = vld [vmem:[#allocation109_spill] sm:$0xff]  ;;  %vm9263_vm12 = vnez %v9262_v6  ;;  %vm9265_vm0 = vnez %v9264_v8 }
 0x363   : > { %v4859_v38 = vpop.eup %4858  ;;  %v2689_v22 = vpop.f32.mrf.mxu2  ;;  %v2009_v24 = vsel %vm9257_vm15, %v7045_v55, 0.0  ;;  %v1831_v5 = vsub.f32 %v9261_v51, %v1758_v29  ;;  %v1995_v13 = vsel %vm9263_vm12, %v6966_v26, 0.0  ;;  %v1996_v44 = vsel %vm9265_vm0, %v6976_v59, 0.0 }
 0x364   : > { %v7060_v61 = vpop.eup %4860  ;;  %4868 = vpow2.f32 %v1935_v47  ;;  %v2778_v54 = vpop.f32.mrf.mxu3  ;;  %2129 = vadd.xlane.f32.xlu1 %v2128_v3  ;;  %v2010_v35 = vsel %vm9259_vm3, %v4859_v38, 0.0  ;;  %v1832_v42 = vsub.f32 %v9266_v60, %v1758_v29  ;;  %v9268_v47 = vld [vmem:[#allocation72_spill] sm:$0xff]  ;;  %v2137_v29 = vadd.f32 %v1996_v44, %v1995_v13  ;;  %v9278_v44 = vld [vmem:[#allocation50_spill] sm:$0xff] }
 0x365   : > { %v7066_v31 = vpop.eup %4862  ;;  %4870 = vpow2.f32 %v1937_v15  ;;  %v7068_v7 = vadd.f32 %v2778_v54, %v2689_v22  ;;  %2153 = vadd.xlane.f32.xlu2 %v2152_v45  ;;  %4352 = vmatmul.msk.bf16.gmra.mxu0 %vm4350_vm13, %v4351_v9  ;;  %v2158_v0 = vadd.f32 %v2010_v35, %v2009_v24  ;;  %v9269_v22 = vld [vmem:[#allocation90_spill] sm:$0xff]  ;;  %v9271_v9 = vld [vmem:[#allocation91_spill] sm:$0xff]  ;;  %v1951_v60 = vmul.f32 1.442695, %v1831_v5  ;;  %v9280_v5 = vld [vmem:[#allocation61_spill] sm:$0xff] }
 0x366   : > { %4872 = vpow2.f32 %v1939_v12  ;;  %4400 = vmatmul.msk.bf16.gmra.mxu1 %vm4398_vm5, %v4399_v30  ;;  %v7087_v50 = vpop.eup %4864  ;;  %vm9270_vm2 = vnez %v9269_v22  ;;  %vm9272_vm9 = vnez %v9271_v9  ;;  %v9273_v54 = vld [vmem:[#allocation159_spill] sm:$0xff]  ;;  %v1953_v32 = vmul.f32 1.442695, %v1832_v42  ;;  %v9282_v42 = vld [vmem:[#allocation62_spill] sm:$0xff] }
 0x367   : > { %9260 = vst [vmem:[#allocation16_spill] sm:$0xff] %v7068_v7  ;;  %4874 = vpow2.f32 %v1941_v4  ;;  %2159 = vadd.xlane.f32.xlu0 %v2158_v0  ;;  %v1753_v3 = vpop.permute.xlu2 %1752  ;;  %v7090_v2 = vpop.eup %4866  ;;  %v2011_v45 = vsel %vm9270_vm2, %v7060_v61, 0.0  ;;  %v2012_v24 = vsel %vm9272_vm9, %v7066_v31, 0.0  ;;  %v9274_v4 = vld [vmem:[#allocation59_spill] sm:$0xff]  ;;  %v9275_v0 = vld [vmem:[#allocation60_spill] sm:$0xff]  ;;  %v4369_v13 = vpack.c.bf16 %v7045_v55, %v7087_v50 }
 0x368   : > { %v1829_v12 = vsub.f32 %v9267_v11, %v1753_v3  ;;  %v1830_v15 = vsub.f32 %v9268_v47, %v1753_v3  ;;  %v1821_v30 = vsub.f32 %v9274_v4, %v9273_v54  ;;  %v1822_v51 = vsub.f32 %v9275_v0, %v9273_v54  ;;  %v9276_v47 = vld [vmem:[#allocation49_spill] sm:$0xff]  ;;  %v9284_v0 = vld [vmem:[#allocation147_spill] sm:$0xff] }
 0x369   : > { %vm9277_vm7 = vnez %v9276_v47  ;;  %v2161_v58 = vadd.f32 %v2012_v24, %v2011_v45  ;;  %vm9279_vm13 = vnez %v9278_v44  ;;  %vm9281_vm0 = vnez %v9280_v5 }
 0x36a   : > { %v7102_v35 = vpop.eup %4868  ;;  %v1947_v11 = vmul.f32 1.442695, %v1829_v12  ;;  %v1949_v3 = vmul.f32 1.442695, %v1830_v15  ;;  %vm4368_vm6 = vmpackc.low %vm9257_vm15, %vm9277_vm7  ;;  %v4417_v43 = vpack.c.bf16 %v4859_v38, %v7090_v2  ;;  %vm9283_vm15 = vnez %v9282_v42 }
 0x36b   : > { %v7110_v7 = vpop.eup %4870  ;;  %vm4416_vm5 = vmpackc.low %vm9259_vm3, %vm9279_vm13  ;;  %v2015_v12 = vsel %vm9281_vm0, %v7102_v35, 0.0  ;;  %v1931_v24 = vmul.f32 1.442695, %v1821_v30  ;;  %v1933_v54 = vmul.f32 1.442695, %v1822_v51  ;;  %v2001_v38 = vsel %vm5892_vm14, %v6796_v40, 0.0 }
 0x36c   : > { %v7121_v15 = vpop.eup %4872  ;;  %4876 = vpow2.f32 %v1947_v11  ;;  %2138 = vadd.xlane.f32.xlu1 %v2137_v29  ;;  %v2016_v45 = vsel %vm9283_vm15, %v7110_v7, 0.0  ;;  %v2002_v29 = vsel %vm5907_vm1, %v6798_v37, 0.0  ;;  %vm4353_vm14 = vmpackc.low %vm9249_vm4, %vm9211_vm10  ;;  %vm9289_vm1 = vnez %v9251_v46  ;;  %v9323_v30 = vld [vmem:[#allocation73_spill] sm:$0xff] }
 0x36d   : > { %v7127_v55 = vpop.eup %4874  ;;  %4878 = vpow2.f32 %v1949_v3  ;;  %2162 = vadd.xlane.f32.xlu2 %v2161_v58  ;;  %4370 = vmatmul.msk.bf16.gmra.mxu2 %vm4368_vm6, %v4369_v13  ;;  %v2167_v14 = vadd.f32 %v2016_v45, %v2015_v12  ;;  %v9285_v58 = vld [vmem:[#allocation148_spill] sm:$0xff]  ;;  %v2146_v12 = vadd.f32 %v2002_v29, %v2001_v38  ;;  %vm4401_vm6 = vmpackc.low %vm9289_vm1, %vm9213_vm11  ;;  %vm9293_vm10 = vnez %v9292_v49 }
 0x36e   : > { %4880 = vpow2.f32 %v1951_v60  ;;  %4418 = vmatmul.msk.bf16.gmra.mxu3 %vm4416_vm5, %v4417_v43  ;;  %v2017_v60 = vsel %vm6342_vm8, %v7121_v15, 0.0  ;;  %v9290_v43 = vld [vmem:[#allocation69_spill] sm:$0xff]  ;;  %v9295_v46 = vpack.c.bf16 %v6776_v16, %v6781_v33  ;;  %v9296_v38 = vld [vmem:[#allocation68_spill] sm:$0xff]  ;;  %v4423_v5 = vpack.c.bf16 %v7127_v55, %v7110_v7  ;;  %v9330_v7 = vld [vmem:[#allocation98_spill] sm:$0xff] }
 0x36f   : > { %4882 = vpow2.f32 %v1953_v32  ;;  %2168 = vadd.xlane.f32.xlu0 %v2167_v14  ;;  %v1768_v4 = vpop.permute.xlu2 %1767  ;;  %v9287_v32 = vld [vmem:[#allocation97_spill] sm:$0xff]  ;;  %vm9291_vm5 = vnez %v9290_v43  ;;  %v1828_v29 = vsub.f32 %v9296_v38, %v6682_v63  ;;  %v9331_v6 = vpack.c.bf16 %v6978_v62, %v6966_v26  ;;  %v9336_v62 = vld [vmem:[#allocation104_spill] sm:$0xff] }
 0x370   : > { %v1835_v11 = vsub.f32 %v9284_v0, %v1768_v4  ;;  %v1836_v3 = vsub.f32 %v9285_v58, %v1768_v4  ;;  %vm9288_vm3 = vnez %v9287_v32  ;;  %4884 = vpow2.f32 %v1931_v24  ;;  %v9298_v16 = vld [vmem:[#allocation105_spill] sm:$0xff] }
 0x371   : > { %v2018_v51 = vsel %vm9288_vm3, %v7127_v55, 0.0  ;;  %4886 = vpow2.f32 %v1933_v54  ;;  %v9294_v54 = vld [vmem:[#allocation67_spill] sm:$0xff]  ;;  %v9297_v0 = vpack.c.bf16 %v6778_v41, %v6785_v23  ;;  %v2008_v58 = vsel %vm9279_vm13, %v7090_v2, 0.0 }
 0x372   : > { %v7143_v13 = vpop.eup %4876  ;;  %v1959_v25 = vmul.f32 1.442695, %v1835_v11  ;;  %v1961_v40 = vmul.f32 1.442695, %v1836_v3  ;;  %v2170_v1 = vadd.f32 %v2018_v51, %v2017_v60  ;;  %v1827_v18 = vsub.f32 %v9294_v54, %v6682_v63  ;;  %v9300_v63 = vld [vmem:[#allocation106_spill] sm:$0xff] }
 0x373   : > { %v7149_v37 = vpop.eup %4878  ;;  %v2021_v45 = vsel %vm9291_vm5, %v7143_v13, 0.0  ;;  %v2007_v11 = vsel %vm9277_vm7, %v7087_v50, 0.0  ;;  %vm9299_vm11 = vnez %v9298_v16  ;;  %vm9301_vm4 = vnez %v9300_v63  ;;  %v9302_v50 = vld [vmem:[#allocation57_spill] sm:$0xff] }
 0x374   : > { %v7158_v14 = vpop.eup %4880  ;;  %4888 = vpow2.f32 %v1959_v25  ;;  %2147 = vadd.xlane.f32.xlu1 %v2146_v12  ;;  %v2022_v19 = vsel %vm9293_vm10, %v7149_v37, 0.0  ;;  %v1943_v23 = vmul.f32 1.442695, %v1827_v18  ;;  %v1945_v25 = vmul.f32 1.442695, %v1828_v29  ;;  %v9304_v12 = vld [vmem:[#allocation58_spill] sm:$0xff] }
 0x375   : > { %v7163_v24 = vpop.eup %4882  ;;  %4890 = vpow2.f32 %v1961_v40  ;;  %2171 = vadd.xlane.f32.xlu2 %v2170_v1  ;;  %4355 = vmatmul.msk.bf16.gmra.mxu0 %vm4353_vm14, %v9295_v46  ;;  %v2176_v4 = vadd.f32 %v2022_v19, %v2021_v45  ;;  %v2023_v33 = vsel %vm9299_vm11, %v7158_v14, 0.0  ;;  %v2155_v47 = vadd.f32 %v2008_v58, %v2007_v11  ;;  %v9306_v1 = vld [vmem:[#allocation145_spill] sm:$0xff]  ;;  %v9308_v19 = vld [vmem:[#allocation146_spill] sm:$0xff]  ;;  %v9311_v46 = vld [vmem:[#allocation75_spill] sm:$0xff] }
 0x376   : > { %4403 = vmatmul.msk.bf16.gmra.mxu1 %vm4401_vm6, %v9297_v0  ;;  %v4885_v3 = vpop.eup %4884  ;;  %v2024_v60 = vsel %vm9301_vm4, %v7163_v24, 0.0  ;;  %vm9303_vm7 = vnez %v9302_v50  ;;  %vm9305_vm14 = vnez %v9304_v12  ;;  %vm9307_vm6 = vnez %v9306_v1  ;;  %v9310_v18 = vld [vmem:[#allocation162_spill] sm:$0xff]  ;;  %v9348_v16 = vld [vmem:[#allocation117_spill] sm:$0xff] }
 0x377   : > { %2177 = vadd.xlane.f32.xlu0 %v2176_v4  ;;  %v4887_v41 = vpop.eup %4886  ;;  %vm4371_vm13 = vmpackc.low %vm9303_vm7, %vm9270_vm2  ;;  %v2179_v44 = vadd.f32 %v2024_v60, %v2023_v33  ;;  %v4372_v40 = vpack.c.bf16 %v4885_v3, %v7060_v61  ;;  %vm9309_vm2 = vnez %v9308_v19  ;;  %4892 = vpow2.f32 %v1943_v23  ;;  %v9312_v4 = vld [vmem:[#allocation76_spill] sm:$0xff]  ;;  %v9317_v23 = vld [vmem:[#allocation95_spill] sm:$0xff] }
 0x378   : > { %vm4419_vm1 = vmpackc.low %vm9305_vm14, %vm9272_vm9  ;;  %v4420_v22 = vpack.c.bf16 %v4887_v41, %v7066_v31  ;;  %v1833_v61 = vsub.f32 %v9311_v46, %v9310_v18  ;;  %4894 = vpow2.f32 %v1945_v25  ;;  %v1834_v38 = vsub.f32 %v9312_v4, %v9310_v18  ;;  %v9353_v63 = vld [vmem:[#allocation141_spill] sm:$0xff] }
 0x379   : > { %v2013_v31 = vsel %vm9303_vm7, %v4885_v3, 0.0  ;;  %v2014_v29 = vsel %vm9305_vm14, %v4887_v41, 0.0  ;;  %vm9313_vm9 = vnez %v9216_v27  ;;  %v4357_v60 = vpack.c.bf16 %v6942_v20, %v6944_v34  ;;  %v9318_v41 = vld [vmem:[#allocation92_spill] sm:$0xff]  ;;  %v9321_v34 = vld [vmem:[#allocation66_spill] sm:$0xff] }
 0x37a   : > { %v7187_v51 = vpop.eup %4888  ;;  %v1955_v0 = vmul.f32 1.442695, %v1833_v61  ;;  %v1957_v11 = vmul.f32 1.442695, %v1834_v38  ;;  %v2164_v58 = vadd.f32 %v2014_v29, %v2013_v31  ;;  %v1520_v25 = vsub.f32 %v9318_v41, %v9317_v23  ;;  %v9338_v61 = vld [vmem:[#allocation165_spill] sm:$0xff]  ;;  %v9342_v29 = vld [vmem:[#allocation115_spill] sm:$0xff] }
 0x37b   : > { %v7193_v2 = vpop.eup %4890  ;;  %v2027_v45 = vsel %vm9307_vm6, %v7187_v51, 0.0  ;;  %vm9316_vm6 = vnez %v9222_v48  ;;  %v4405_v27 = vpack.c.bf16 %v6953_v10, %v6947_v53  ;;  %v4375_v10 = vpack.c.bf16 %v7121_v15, %v7102_v35  ;;  %v9325_v35 = vld [vmem:[#allocation74_spill] sm:$0xff] }
 0x37c   : > { %2156 = vadd.xlane.f32.xlu1 %v2155_v47  ;;  %v2028_v54 = vsel %vm9309_vm2, %v7193_v2, 0.0  ;;  %4896 = vpow2.f32 %v1955_v0  ;;  %v1553_v48 = vmul.f32 1.442695, %v1520_v25  ;;  %v1525_v55 = vsub.f32 %v9330_v7, %v6371_v28  ;;  %v9333_v28 = vld [vmem:[#allocation164_spill] sm:$0xff]  ;;  %v9343_v0 = vld [vmem:[#allocation113_spill] sm:$0xff]  ;;  %v9351_v7 = vld [vmem:[#allocation163_spill] sm:$0xff] }
 0x37d   : > { %2180 = vadd.xlane.f32.xlu2 %v2179_v44  ;;  %4373 = vmatmul.msk.bf16.gmra.mxu2 %vm4371_vm13, %v4372_v40  ;;  %v2185_v9 = vadd.f32 %v2028_v54, %v2027_v45  ;;  %vm9314_vm13 = vnez %v9220_v57  ;;  %v4893_v33 = vpop.eup %4892  ;;  %4898 = vpow2.f32 %v1957_v11  ;;  %v9319_v57 = vld [vmem:[#allocation65_spill] sm:$0xff]  ;;  %v9337_v54 = vld [vmem:[#allocation102_spill] sm:$0xff]  ;;  %v1531_v11 = vsub.f32 %v9343_v0, %v9342_v29  ;;  %v9361_v29 = vld [vmem:[#allocation103_spill] sm:$0xff] }
 0x37e   : > { %4421 = vmatmul.msk.bf16.gmra.mxu3 %vm4419_vm1, %v4420_v22  ;;  %vm4356_vm2 = vmpackc.low %vm9314_vm13, %vm9313_vm9  ;;  %vm9315_vm1 = vnez %v9218_v52  ;;  %v4895_v3 = vpop.eup %4894  ;;  %vm9320_vm14 = vnez %v9319_v57  ;;  %vm9322_vm9 = vnez %v9321_v34  ;;  %4900 = vpow2.f32 %v1553_v48  ;;  %v7302_v34 = vpop.f32.mrf.mxu0 }
 0x37f   : > { %2186 = vadd.xlane.f32.xlu0 %v2185_v9  ;;  %vm4404_vm7 = vmpackc.low %vm9316_vm6, %vm9315_vm1  ;;  %v2019_v20 = vsel %vm9320_vm14, %v4893_v33, 0.0  ;;  %v2020_v52 = vsel %vm9322_vm9, %v4895_v3, 0.0  ;;  %vm9328_vm13 = vnez %v9264_v8  ;;  %vm9329_vm1 = vnez %v9228_v56  ;;  %v9340_v9 = vld [vmem:[#allocation166_spill] sm:$0xff] }
 0x380   : > { %v2173_v47 = vadd.f32 %v2020_v52, %v2019_v20  ;;  %vm4374_vm6 = vmpackc.low %vm6342_vm8, %vm9281_vm0  ;;  %vm9324_vm8 = vnez %v9323_v30  ;;  %vm9326_vm0 = vnez %v9325_v35  ;;  %v1563_v22 = vmul.f32 1.442695, %v1525_v55  ;;  %v7308_v52 = vpop.f32.mrf.mxu1  ;;  %v2037_v35 = vld [vmem:[#allocation3 + $0x30] sm:$0xff] }
 0x381   : > { %v1523_v43 = vsub.f32 %v9337_v54, %v9336_v62  ;;  %v1575_v41 = vmul.f32 1.442695, %v1531_v11  ;;  %v2038_v62 = vld [vmem:[#allocation3 + $0x38] sm:$0xff]  ;;  %v9358_v54 = vld [vmem:[#allocation144_spill] sm:$0xff] }
 0x382   : > { %v7237_v50 = vpop.eup %4896 }
 0x383   : > { %v7245_v53 = vpop.eup %4898  ;;  %v2025_v44 = vsel %vm9324_vm8, %v7237_v50, 0.0  ;;  %v4381_v48 = vpack.c.bf16 %v7237_v50, %v7158_v14  ;;  %v9352_v14 = vld [vmem:[#allocation142_spill] sm:$0xff] }
 0x384   : > { %2165 = vadd.xlane.f32.xlu1 %v2164_v58  ;;  %v2026_v15 = vsel %vm9326_vm0, %v7245_v53, 0.0  ;;  %v4901_v42 = vpop.eup %4900  ;;  %v2032_v58 = vld [vmem:[#allocation3 + $0x8] sm:$0xff]  ;;  %v4429_v30 = vpack.c.bf16 %v7245_v53, %v7163_v24  ;;  %v1529_v50 = vsub.f32 %v9353_v63, %v9352_v14  ;;  %v9371_v63 = vld [vmem:[#allocation108_spill] sm:$0xff] }
 0x385   : > { %4358 = vmatmul.msk.bf16.gmra.mxu0 %vm4356_vm2, %v4357_v60  ;;  %vm4422_vm2 = vmpackc.low %vm9288_vm3, %vm9283_vm15  ;;  %v2182_v32 = vadd.f32 %v2026_v15, %v2025_v44  ;;  %vm9327_vm15 = vnez %v9226_v39  ;;  %v9332_v39 = vpack.c.bf16 %v6984_v21, %v6976_v59  ;;  %v9334_v21 = vld [vmem:[#allocation111_spill] sm:$0xff]  ;;  %v4426_v59 = vpack.c.bf16 %v7149_v37, %v4895_v3  ;;  %v2035_v44 = vld [vmem:[#allocation3 + $0x20] sm:$0xff] }
 0x386   : > { %4406 = vmatmul.msk.bf16.gmra.mxu1 %vm4404_vm7, %v4405_v27  ;;  %vm4359_vm3 = vmpackc.low %vm9327_vm15, %vm9263_vm12  ;;  %v1559_v37 = vmul.f32 1.442695, %v1523_v43  ;;  %v9345_v60 = vld [vmem:[#allocation139_spill] sm:$0xff]  ;;  %v2064_v23 = vmul.f32 %v4901_v42, %v2032_v58  ;;  %v9349_v15 = vld [vmem:[#allocation89_spill] sm:$0xff]  ;;  %v1571_v53 = vmul.f32 1.442695, %v1529_v50 }
 0x387   : > { %vm4407_vm7 = vmpackc.low %vm9329_vm1, %vm9328_vm13  ;;  %v9359_v43 = vld [vmem:[#allocation143_spill] sm:$0xff]  ;;  %v9372_v50 = vld [vmem:[#allocation112_spill] sm:$0xff] }
 0x388   : > { %vm4377_vm12 = vmpackc.low %vm9291_vm5, %vm9320_vm14  ;;  %vm9339_vm5 = vnez %v9338_v61  ;;  %v9373_v61 = vsub.f32 %v9371_v63, %v9372_v50  ;;  %v9391_v63 = vld [vmem:[#allocation118_spill] sm:$0xff]  ;;  %v9392_v50 = vld [vmem:[#allocation120_spill] sm:$0xff] }
 0x389   : > { %vm4380_vm14 = vmpackc.low %vm9324_vm8, %vm9299_vm11  ;;  %vm9363_vm8 = vnez %v9306_v1 }
 0x38c   : > { %2174 = vadd.xlane.f32.xlu1 %v2173_v47 }
 0x38d   : > { %4376 = vmatmul.msk.bf16.gmra.mxu2 %vm4374_vm6, %v4375_v10  ;;  %vm4425_vm6 = vmpackc.low %vm9293_vm10, %vm9322_vm9  ;;  %vm9341_vm10 = vnez %v9340_v9  ;;  %vm9346_vm9 = vcmask 7168   ;;  %v9347_v10 = vld [vmem:[#allocation119_spill] sm:$0xff] }
 0x38e   : > { %4424 = vmatmul.msk.bf16.gmra.mxu3 %vm4422_vm2, %v4423_v5  ;;  %vm4428_vm2 = vmpackc.low %vm9326_vm0, %vm9301_vm4  ;;  %v1534_v5 = vsub.f32 %v9348_v16, %v9347_v10  ;;  %v9366_v10 = vld [vmem:[#allocation127_spill] sm:$0xff]  ;;  %v9367_v16 = vld [vmem:[#allocation125_spill] sm:$0xff] }
 0x38f   : > { %vm9354_vm11 = vmmov %vm9346_vm9 }
 0x390   : > { %vm9357_vm4 = vmmov %vm9346_vm9 }
 0x391   : > { %vm4383_vm0 = vmpackc.low %vm9339_vm5, %vm9363_vm8 }
 0x392   : > { %vm9364_vm15 = vmmov %vm9357_vm4 }
 0x393   : > { %2295 = vperm.xlu0 %4769, %v4901_v42   ;;  %v9350_v42 = vld [vmem:[#allocation86_spill] sm:$0xff]  ;;  %vm9368_vm1 = vmmov %vm9357_vm4 }
 0x394   : > { %v1773_v40 = vpop.permute.xlu1 %1772  ;;  %2183 = vadd.xlane.f32.xlu1 %v2182_v32  ;;  %v1521_v32 = vsub.f32 %v9350_v42, %v9349_v15  ;;  %v2041_v15 = vld [vmem:[#allocation3 + $0x50] sm:$0xff]  ;;  %v2043_v42 = vld [vmem:[#allocation3 + $0x60] sm:$0xff]  ;;  %vm9405_vm8 = vmmov %vm9368_vm1 }
 0x395   : > { %v1837_v12 = vsub.f32 %v6720_v17, %v1773_v40  ;;  %v1838_v45 = vsub.f32 %v6724_v36, %v1773_v40  ;;  %4361 = vmatmul.msk.bf16.gmra.mxu0 %vm4359_vm3, %v9331_v6  ;;  %v4378_v17 = vpack.c.bf16 %v7143_v13, %v4893_v33  ;;  %v9335_v36 = vld [vmem:[#allocation107_spill] sm:$0xff]  ;;  %v9344_v33 = vld [vmem:[#allocation140_spill] sm:$0xff]  ;;  %v1581_v40 = vmul.f32 1.442695, %v1534_v5 }
 0x396   : > { %4409 = vmatmul.msk.bf16.gmra.mxu1 %vm4407_vm7, %v9332_v39  ;;  %v1528_v26 = vsub.f32 %v9335_v36, %v9334_v21  ;;  %v1526_v3 = vsub.f32 %v9345_v60, %v9344_v33  ;;  %v9355_v21 = vld [vmem:[#allocation123_spill] sm:$0xff]  ;;  %v9356_v36 = vld [vmem:[#allocation121_spill] sm:$0xff]  ;;  %vm9365_vm3 = vnez %v9308_v19  ;;  %v1540_v5 = vsub.f32 %v9367_v16, %v9366_v10  ;;  %vm9374_vm7 = vmmov %vm9368_vm1 }
 0x397   : > { %v1963_v8 = vmul.f32 1.442695, %v1837_v12  ;;  %v1965_v56 = vmul.f32 1.442695, %v1838_v45  ;;  %v1555_v45 = vmul.f32 1.442695, %v1521_v32  ;;  %vm4431_vm13 = vmpackc.low %vm9341_vm10, %vm9365_vm3 }
 0x398   : > { %v1569_v13 = vmul.f32 1.442695, %v1528_v26  ;;  %v1565_v20 = vmul.f32 1.442695, %v1526_v3  ;;  %v1537_v26 = vsub.f32 %v9356_v36, %v9355_v21  ;;  %v9370_v19 = vld [vmem:[#allocation149_spill] sm:$0xff]  ;;  %v9386_v16 = vld [vmem:[#allocation136_spill] sm:$0xff] }
 0x399   : > { %4902 = vpow2.f32 %v1963_v8  ;;  %v2044_v36 = vld [vmem:[#allocation3 + $0x68] sm:$0xff] }
 0x39a   : > { %4904 = vpow2.f32 %v1965_v56 }
 0x39b   : > { %2305 = vperm.xlu0 %4769, %v9333_v28   ;;  %4906 = vpow2.f32 %v1563_v22 }
 0x39c   : > { %4908 = vpow2.f32 %v1569_v13  ;;  %v1532_v13 = vsub.f32 %v9359_v43, %v9358_v54 }
 0x39d   : > { %4379 = vmatmul.msk.bf16.gmra.mxu2 %vm4377_vm12, %v4378_v17  ;;  %4910 = vpow2.f32 %v1559_v37  ;;  %vm9375_vm12 = vmmov %vm9368_vm1 }
 0x39e   : > { %4427 = vmatmul.msk.bf16.gmra.mxu3 %vm4425_vm6, %v4426_v59  ;;  %4912 = vpow2.f32 %v1575_v41  ;;  %v1577_v3 = vmul.f32 1.442695, %v1532_v13  ;;  %vm9378_vm6 = vmmov %vm9368_vm1  ;;  %v2046_v13 = vld [vmem:[#allocation3 + $0x78] sm:$0xff] }
 0x39f   : > { %v7288_v18 = vpop.eup %4902  ;;  %4914 = vpow2.f32 %v1565_v20 }
 0x3a0   : > { %v7290_v46 = vpop.eup %4904  ;;  %v2029_v49 = vsel %vm9339_vm5, %v7288_v18, 0.0  ;;  %4916 = vpow2.f32 %v1581_v40  ;;  %vm9384_vm5 = vmmov %vm9368_vm1 }
 0x3a1   : > { %v2030_v4 = vsel %vm9341_vm10, %v7290_v46, 0.0  ;;  %v4907_v38 = vpop.eup %4906  ;;  %4918 = vpow2.f32 %v1555_v45  ;;  %vm9385_vm10 = vmmov %vm9368_vm1 }
 0x3a2   : > { %v2188_v31 = vadd.f32 %v2030_v4, %v2029_v49  ;;  %v4909_v57 = vpop.eup %4908  ;;  %v2069_v39 = vmul.f32 %v4907_v38, %v2037_v35  ;;  %4920 = vpow2.f32 %v1571_v53  ;;  %v2040_v49 = vld [vmem:[#allocation3 + $0x48] sm:$0xff]  ;;  %v1567_v35 = vmul.f32 1.442695, %v9373_v61 }
 0x3a3   : > { %2320 = vperm.xlu0 %4769, %v4907_v38   ;;  %v4911_v47 = vpop.eup %4910  ;;  %v1587_v38 = vmul.f32 1.442695, %v1537_v26  ;;  %v2072_v33 = vmul.f32 %v4909_v57, %v2040_v49  ;;  %v9379_v26 = vld [vmem:[#allocation152_spill] sm:$0xff]  ;;  %v9393_v61 = vsub.f32 %v9391_v63, %v9392_v50  ;;  %v9409_v63 = vld [vmem:[#allocation126_spill] sm:$0xff] }
 0x3a4   : > { %2189 = vadd.xlane.f32.xlu2 %v2188_v31  ;;  %v2067_v55 = vmul.f32 %v4911_v47, %v2035_v44  ;;  %v4913_v24 = vpop.eup %4912  ;;  %v9360_v31 = vld [vmem:[#allocation99_spill] sm:$0xff]  ;;  %v4432_v44 = vpack.c.bf16 %v7290_v46, %v7193_v2  ;;  %v1593_v46 = vmul.f32 1.442695, %v1540_v5  ;;  %v9387_v5 = vld [vmem:[#allocation134_spill] sm:$0xff]  ;;  %v9410_v50 = vld [vmem:[#allocation128_spill] sm:$0xff] }
 0x3a5   : > { %v4915_v17 = vpop.eup %4914  ;;  %v9362_v0 = vsub.f32 %v9360_v31, %v9361_v29  ;;  %4922 = vpow2.f32 %v1587_v38  ;;  %v9381_v29 = vld [vmem:[#allocation114_spill] sm:$0xff] }
 0x3a6   : > { %v2070_v4 = vmul.f32 %v4915_v17, %v2038_v62  ;;  %v7337_v60 = vpop.eup %4916  ;;  %v9380_v62 = vld [vmem:[#allocation151_spill] sm:$0xff] }
 0x3a7   : > { %v1561_v11 = vmul.f32 1.442695, %v9362_v0  ;;  %v1538_v54 = vsub.f32 %v9380_v62, %v9379_v26  ;;  %v9382_v0 = vld [vmem:[#allocation116_spill] sm:$0xff]  ;;  %v9400_v62 = vld [vmem:[#allocation155_spill] sm:$0xff] }
 0x3a8   : > { %v2100_v25 = vpop.xlane.xlu2 %2099  ;;  %v9399_v26 = vld [vmem:[#allocation156_spill] sm:$0xff] }
 0x3a9   : > { %v2192_v27 = vadd.f32 %v2100_v25, %v2064_v23  ;;  %v4919_v25 = vpop.eup %4918  ;;  %4924 = vpow2.f32 %v1561_v11  ;;  %v9383_v11 = vsub.f32 %v9381_v29, %v9382_v0  ;;  %v9401_v0 = vld [vmem:[#allocation122_spill] sm:$0xff] }
 0x3aa   : > { %4926 = vpow2.f32 %v1577_v3  ;;  %v2078_v3 = vmul.f32 %v7337_v60, %v2046_v13  ;;  %v2052_v13 = vld [vmem:[#allocation3 + $0xa8] sm:$0xff] }
 0x3ab   : > { %2225 = vst.msk [vmem:[#allocation3 + $0x8] sm:$0xff] %vm9346_vm9, %v2192_v27  ;;  %2335 = vperm.xlu0 %4769, %v4909_v57   ;;  %v4384_v57 = vpack.c.bf16 %v7288_v18, %v7187_v51  ;;  %v9369_v51 = vld [vmem:[#allocation150_spill] sm:$0xff]  ;;  %4928 = vpow2.f32 %v1593_v46  ;;  %vm9394_vm9 = vmmov %vm9368_vm1 }
 0x3ac   : > { %v1535_v18 = vsub.f32 %v9370_v19, %v9369_v51  ;;  %4930 = vpow2.f32 %v1567_v35  ;;  %v9389_v51 = vld [vmem:[#allocation154_spill] sm:$0xff]  ;;  %v9390_v19 = vld [vmem:[#allocation153_spill] sm:$0xff]  ;;  %v1579_v35 = vmul.f32 1.442695, %v9393_v61  ;;  %v9411_v61 = vsub.f32 %v9409_v63, %v9410_v50 }
 0x3ad   : > { %4382 = vmatmul.msk.bf16.gmra.mxu2 %vm4380_vm14, %v4381_v48  ;;  %2290 = vperm.xlu1 %4770, %v9351_v7   ;;  %v2033_v48 = vld [vmem:[#allocation3 + $0x10] sm:$0xff]  ;;  %vm9388_vm14 = vmmov %vm9368_vm1 }
 0x3ae   : > { %4430 = vmatmul.msk.bf16.gmra.mxu3 %vm4428_vm2, %v4429_v30  ;;  %v2065_v9 = vmul.f32 %v4919_v25, %v2033_v48  ;;  %vm9395_vm2 = vmmov %vm9368_vm1 }
 0x3b0   : > { %v2109_v12 = vpop.xlane.xlu2 %2108 }
 0x3b1   : > { %v2195_v6 = vadd.f32 %v2109_v12, %v2067_v55  ;;  %v2075_v55 = vmul.f32 %v4913_v24, %v2043_v42  ;;  %v1583_v12 = vmul.f32 1.442695, %v1535_v18  ;;  %v1541_v18 = vsub.f32 %v9390_v19, %v9389_v51  ;;  %v2049_v42 = vld [vmem:[#allocation3 + $0x90] sm:$0xff]  ;;  %v9408_v19 = vld [vmem:[#allocation157_spill] sm:$0xff] }
 0x3b2   : > { %v2115_v8 = vpop.xlane.xlu0 %2114  ;;  %v2654_v56 = vpop.f32.mrf.mxu0  ;;  %v2053_v51 = vld [vmem:[#allocation3 + $0xb0] sm:$0xff] }
 0x3b3   : > { %2228 = vst.msk [vmem:[#allocation3 + $0x20] sm:$0xff] %vm9354_vm11, %v2195_v6  ;;  %v2197_v22 = vadd.f32 %v2115_v8, %v2069_v39  ;;  %v2743_v28 = vpop.f32.mrf.mxu1  ;;  %2350 = vperm.xlu0 %4769, %v4913_v24   ;;  %4932 = vpow2.f32 %v1583_v12  ;;  %vm9398_vm11 = vmmov %vm9368_vm1 }
 0x3b4   : > { %v7329_v59 = vadd.f32 %v2743_v28, %v2654_v56  ;;  %v2036_v56 = vld [vmem:[#allocation3 + $0x28] sm:$0xff]  ;;  %v9376_v28 = vld [vmem:[#allocation132_spill] sm:$0xff] }
 0x3b5   : > { %2230 = vst.msk [vmem:[#allocation3 + $0x30] sm:$0xff] %vm9357_vm4, %v2197_v22  ;;  %2310 = vperm.xlu1 %4770, %v4911_v47   ;;  %v4921_v47 = vpop.eup %4920  ;;  %vm9404_vm4 = vmmov %vm9368_vm1 }
 0x3b6   : > { %v2073_v2 = vmul.f32 %v4921_v47, %v2041_v15  ;;  %v7368_v40 = vpop.eup %4922  ;;  %v2047_v15 = vld [vmem:[#allocation3 + $0x80] sm:$0xff] }
 0x3b7   : > { %v4925_v39 = vpop.eup %4924 }
 0x3b8   : > { %v2118_v37 = vpop.xlane.xlu2 %2117  ;;  %v4927_v22 = vpop.eup %4926  ;;  %v2068_v43 = vmul.f32 %v4925_v39, %v2036_v56 }
 0x3b9   : > { %v2198_v58 = vadd.f32 %v2118_v37, %v2070_v4  ;;  %v2076_v4 = vmul.f32 %v4927_v22, %v2044_v36  ;;  %v2050_v36 = vld [vmem:[#allocation3 + $0x98] sm:$0xff] }
 0x3ba   : > { %v2124_v23 = vpop.xlane.xlu0 %2123  ;;  %v2656_v41 = vpop.f32.mrf.mxu0 }
 0x3bb   : > { %2231 = vst.msk [vmem:[#allocation3 + $0x38] sm:$0xff] %vm9364_vm15, %v2198_v58  ;;  %v2200_v27 = vadd.f32 %v2124_v23, %v2072_v33  ;;  %v2745_v20 = vpop.f32.mrf.mxu1  ;;  %2365 = vperm.xlu0 %4769, %v7337_v60   ;;  %v1573_v58 = vmul.f32 1.442695, %v9383_v11  ;;  %v7384_v23 = vpop.eup %4928  ;;  %v1546_v60 = vsub.f32 %v9387_v5, %v9386_v16  ;;  %v9402_v11 = vld [vmem:[#allocation124_spill] sm:$0xff]  ;;  %v2045_v5 = vld [vmem:[#allocation3 + $0x70] sm:$0xff] }
 0x3bc   : > { %v7353_v30 = vadd.f32 %v2745_v20, %v2656_v41  ;;  %2300 = vperm.xlu2 %4771, %v4919_v25   ;;  %v1589_v41 = vmul.f32 1.442695, %v1538_v54  ;;  %v4931_v20 = vpop.eup %4930  ;;  %v1544_v54 = vsub.f32 %v9400_v62, %v9399_v26  ;;  %v2056_v26 = vld [vmem:[#allocation3 + $0xc8] sm:$0xff] }
 0x3bd   : > { %2233 = vst.msk [vmem:[#allocation3 + $0x48] sm:$0xff] %vm9368_vm1, %v2200_v27  ;;  %4385 = vmatmul.msk.bf16.gmra.mxu2 %vm4383_vm0, %v4384_v57  ;;  %2325 = vperm.xlu1 %4770, %v4915_v17   ;;  %v9377_v17 = vld [vmem:[#allocation130_spill] sm:$0xff]  ;;  %v4933_v10 = vpop.eup %4932  ;;  %v1605_v46 = vmul.f32 1.442695, %v1546_v60  ;;  %vm9406_vm0 = vmmov %vm9368_vm1 }
 0x3be   : > { %4433 = vmatmul.msk.bf16.gmra.mxu3 %vm4431_vm13, %v4432_v44  ;;  %v1543_v24 = vsub.f32 %v9377_v17, %v9376_v28  ;;  %v9397_v17 = vld [vmem:[#allocation160_spill] sm:$0xff]  ;;  %vm9412_vm15 = vmmov %vm9406_vm0 }
 0x3bf   : > { %v2103_v32 = vpop.xlane.xlu1 %2102  ;;  %vm9413_vm3 = vmmov %vm9406_vm0 }
 0x3c0   : > { %v2193_v7 = vadd.f32 %v2103_v32, %v2065_v9  ;;  %v2127_v14 = vpop.xlane.xlu2 %2126  ;;  %v1599_v38 = vmul.f32 1.442695, %v1543_v24  ;;  %vm9414_vm13 = vmmov %vm9406_vm0 }
 0x3c1   : > { %v2201_v1 = vadd.f32 %v2127_v14, %v2073_v2  ;;  %v2079_v2 = vmul.f32 %v4933_v10, %v2047_v15  ;;  %vm9418_vm1 = vmmov %vm9406_vm0 }
 0x3c2   : > { %2226 = vst.msk [vmem:[#allocation3 + $0x10] sm:$0xff] %vm9374_vm7, %v2193_v7  ;;  %v2133_v45 = vpop.xlane.xlu0 %2132  ;;  %v2659_v6 = vpop.f32.mrf.mxu0  ;;  %4934 = vpow2.f32 %v1599_v38  ;;  %vm9419_vm7 = vmmov %vm9406_vm0 }
 0x3c3   : > { %2234 = vst.msk [vmem:[#allocation3 + $0x50] sm:$0xff] %vm9375_vm12, %v2201_v1  ;;  %v2203_v53 = vadd.f32 %v2133_v45, %v2075_v55  ;;  %2380 = vperm.xlu0 %4769, %v7368_v40   ;;  %v2748_v8 = vpop.f32.mrf.mxu1  ;;  %4936 = vpow2.f32 %v1573_v58  ;;  %v2081_v55 = vmul.f32 %v7368_v40, %v2049_v42  ;;  %v1595_v45 = vmul.f32 1.442695, %v1541_v18  ;;  %v9396_v40 = vld [vmem:[#allocation161_spill] sm:$0xff]  ;;  %v2055_v42 = vld [vmem:[#allocation3 + $0xc0] sm:$0xff]  ;;  %vm9420_vm12 = vmmov %vm9406_vm0 }
 0x3c4   : > { %v7375_v21 = vadd.f32 %v2748_v8, %v2659_v6  ;;  %2315 = vperm.xlu2 %4771, %v4925_v39   ;;  %4938 = vpow2.f32 %v1589_v41  ;;  %v1549_v24 = vsub.f32 %v9397_v17, %v9396_v40  ;;  %v9403_v58 = vsub.f32 %v9401_v0, %v9402_v11 }
 0x3c5   : > { %2236 = vst.msk [vmem:[#allocation3 + $0x60] sm:$0xff] %vm9378_vm6, %v2203_v53  ;;  %2340 = vperm.xlu1 %4770, %v4921_v47   ;;  %v2039_v47 = vld [vmem:[#allocation3 + $0x40] sm:$0xff]  ;;  %4940 = vpow2.f32 %v1605_v46  ;;  %vm9427_vm6 = vmmov %vm9406_vm0 }
 0x3c6   : > { %v2071_v9 = vmul.f32 %v4931_v20, %v2039_v47  ;;  %4942 = vpow2.f32 %v1579_v35  ;;  %v1611_v38 = vmul.f32 1.442695, %v1549_v24  ;;  %v1591_v35 = vmul.f32 1.442695, %v9411_v61  ;;  %v2048_v24 = vld [vmem:[#allocation3 + $0x88] sm:$0xff]  ;;  %v9424_v61 = vld [vmem:[#allocation28_spill] sm:$0xff] }
 0x3c7   : > { %v2112_v49 = vpop.xlane.xlu1 %2111  ;;  %4944 = vpow2.f32 %v1595_v45 }
 0x3c8   : > { %v2196_v37 = vadd.f32 %v2112_v49, %v2068_v43  ;;  %v2136_v31 = vpop.xlane.xlu2 %2135  ;;  %v7400_v12 = vpop.eup %4934  ;;  %4946 = vpow2.f32 %v1611_v38 }
 0x3c9   : > { %v2204_v33 = vadd.f32 %v2136_v31, %v2076_v4  ;;  %v4937_v53 = vpop.eup %4936  ;;  %v2087_v45 = vmul.f32 %v7400_v12, %v2055_v42 }
 0x3ca   : > { %2229 = vst.msk [vmem:[#allocation3 + $0x28] sm:$0xff] %vm9384_vm5, %v2196_v37  ;;  %v2142_v25 = vpop.xlane.xlu0 %2141  ;;  %v2661_v27 = vpop.f32.mrf.mxu0  ;;  %vm9428_vm5 = vmmov %vm9406_vm0 }
 0x3cb   : > { %2237 = vst.msk [vmem:[#allocation3 + $0x68] sm:$0xff] %vm9385_vm10, %v2204_v33  ;;  %v2206_v57 = vadd.f32 %v2142_v25, %v2078_v3  ;;  %2395 = vperm.xlu0 %4769, %v7384_v23   ;;  %v2750_v48 = vpop.f32.mrf.mxu1  ;;  %v4939_v28 = vpop.eup %4938  ;;  %v1585_v33 = vmul.f32 1.442695, %v9403_v58  ;;  %v2084_v25 = vmul.f32 %v7384_v23, %v2052_v13  ;;  %v9407_v23 = vld [vmem:[#allocation158_spill] sm:$0xff]  ;;  %vm9429_vm10 = vmmov %vm9406_vm0 }
 0x3cc   : > { %v7391_v44 = vadd.f32 %v2750_v48, %v2661_v27  ;;  %2330 = vperm.xlu2 %4771, %v4931_v20   ;;  %v2082_v4 = vmul.f32 %v4939_v28, %v2050_v36  ;;  %v7414_v37 = vpop.f32.mrf.mxu2  ;;  %v7419_v3 = vpop.f32.mrf.mxu3  ;;  %v1601_v20 = vmul.f32 1.442695, %v1544_v54  ;;  %v1547_v18 = vsub.f32 %v9408_v19, %v9407_v23  ;;  %v2058_v54 = vld [vmem:[#allocation3 + $0xd8] sm:$0xff] }
 0x3cd   : > { %2239 = vst.msk [vmem:[#allocation3 + $0x78] sm:$0xff] %vm9388_vm14, %v2206_v57  ;;  %2355 = vperm.xlu1 %4770, %v4927_v22   ;;  %v2042_v22 = vld [vmem:[#allocation3 + $0x58] sm:$0xff]  ;;  %v4941_v27 = vpop.eup %4940  ;;  %4948 = vpow2.f32 %v1585_v33  ;;  %vm9433_vm14 = vmmov %vm9406_vm0 }
 0x3ce   : > { %v2074_v43 = vmul.f32 %v4937_v53, %v2042_v22  ;;  %v4943_v47 = vpop.eup %4942  ;;  %4950 = vpow2.f32 %v1601_v20 }
 0x3cf   : > { %v2121_v32 = vpop.xlane.xlu1 %2120  ;;  %v4945_v60 = vpop.eup %4944  ;;  %4952 = vpow2.f32 %v1591_v35  ;;  %v9425_v35 = vld [vmem:[#allocation29_spill] sm:$0xff] }
 0x3d0   : > { %v2199_v7 = vadd.f32 %v2121_v32, %v2071_v9  ;;  %v2145_v14 = vpop.xlane.xlu2 %2144  ;;  %v2077_v9 = vmul.f32 %v4943_v47, %v2045_v5 }
 0x3d1   : > { %v2207_v1 = vadd.f32 %v2145_v14, %v2079_v2  ;;  %v2085_v2 = vmul.f32 %v4945_v60, %v2053_v51 }
 0x3d2   : > { %2232 = vst.msk [vmem:[#allocation3 + $0x40] sm:$0xff] %vm9394_vm9, %v2199_v7  ;;  %v2151_v6 = vpop.xlane.xlu0 %2150  ;;  %v7403_v39 = vpop.f32.mrf.mxu0  ;;  %vm9434_vm9 = vmmov %vm9406_vm0 }
 0x3d3   : > { %2240 = vst.msk [vmem:[#allocation3 + $0x80] sm:$0xff] %vm9395_vm2, %v2207_v1  ;;  %v2209_v8 = vadd.f32 %v2151_v6, %v2081_v55  ;;  %2410 = vperm.xlu0 %4769, %v7400_v12   ;;  %v7407_v56 = vpop.f32.mrf.mxu1  ;;  %v4947_v6 = vpop.eup %4946  ;;  %vm9435_vm2 = vmmov %vm9406_vm0 }
 0x3d4   : > { %2345 = vperm.xlu2 %4771, %v4937_v53   ;;  %v1607_v53 = vmul.f32 1.442695, %v1547_v18 }
 0x3d5   : > { %2242 = vst.msk [vmem:[#allocation3 + $0x90] sm:$0xff] %vm9398_vm11, %v2209_v8  ;;  %2370 = vperm.xlu1 %4770, %v4933_v10   ;;  %vm9436_vm11 = vmmov %vm9406_vm0 }
 0x3d6   : > { %4954 = vpow2.f32 %v1607_v53 }
 0x3d7   : > { %v2130_v49 = vpop.xlane.xlu1 %2129 }
 0x3d8   : > { %v2202_v31 = vadd.f32 %v2130_v49, %v2074_v43  ;;  %v2154_v29 = vpop.xlane.xlu2 %2153 }
 0x3d9   : > { %v2210_v41 = vadd.f32 %v2154_v29, %v2082_v4  ;;  %v9416_v29 = vld [vmem:[#allocation131_spill] sm:$0xff] }
 0x3da   : > { %2235 = vst.msk [vmem:[#allocation3 + $0x58] sm:$0xff] %vm9404_vm4, %v2202_v31  ;;  %v2160_v57 = vpop.xlane.xlu0 %2159  ;;  %v2666_v48 = vpop.f32.mrf.mxu0  ;;  %v9415_v31 = vld [vmem:[#allocation129_spill] sm:$0xff] }
 0x3db   : > { %2243 = vst.msk [vmem:[#allocation3 + $0x98] sm:$0xff] %vm9405_vm8, %v2210_v41  ;;  %v2212_v10 = vadd.f32 %v2160_v57, %v2084_v25  ;;  %2425 = vperm.xlu0 %4769, %v4941_v27   ;;  %v2755_v16 = vpop.f32.mrf.mxu1  ;;  %v9417_v0 = vsub.f32 %v9415_v31, %v9416_v29  ;;  %v2090_v41 = vmul.f32 %v4941_v27, %v2058_v54  ;;  %v9430_v54 = vld [vmem:[#allocation137_spill] sm:$0xff]  ;;  %v2057_v29 = vld [vmem:[#allocation3 + $0xd0] sm:$0xff] }
 0x3dc   : > { %v7424_v15 = vadd.f32 %v2755_v16, %v2666_v48  ;;  %2360 = vperm.xlu2 %4771, %v4943_v47   ;;  %v2051_v47 = vld [vmem:[#allocation3 + $0xa0] sm:$0xff] }
 0x3dd   : > { %2245 = vst.msk [vmem:[#allocation3 + $0xa8] sm:$0xff] %vm9406_vm0, %v2212_v10  ;;  %2385 = vperm.xlu1 %4770, %v4939_v28   ;;  %v4949_v28 = vpop.eup %4948  ;;  %v1597_v11 = vmul.f32 1.442695, %v9417_v0  ;;  %v2059_v16 = vld [vmem:[#allocation3 + $0xe0] sm:$0xff] }
 0x3de   : > { %v4951_v36 = vpop.eup %4950  ;;  %v2080_v62 = vmul.f32 %v4949_v28, %v2048_v24 }
 0x3df   : > { %v2139_v32 = vpop.xlane.xlu1 %2138  ;;  %v2088_v13 = vmul.f32 %v4951_v36, %v2056_v26  ;;  %v4953_v57 = vpop.eup %4952  ;;  %4956 = vpow2.f32 %v1597_v11 }
 0x3e0   : > { %v2205_v46 = vadd.f32 %v2139_v32, %v2077_v9  ;;  %v2163_v7 = vpop.xlane.xlu2 %2162  ;;  %v2694_v14 = vpop.f32.mrf.mxu2  ;;  %v2083_v27 = vmul.f32 %v4953_v57, %v2051_v47  ;;  %v9421_v32 = vld [vmem:[#allocation133_spill] sm:$0xff] }
 0x3e1   : > { %v2213_v1 = vadd.f32 %v2163_v7, %v2085_v2  ;;  %v2783_v55 = vpop.f32.mrf.mxu3  ;;  %v4955_v10 = vpop.eup %4954  ;;  %v9422_v2 = vld [vmem:[#allocation135_spill] sm:$0xff] }
 0x3e2   : > { %2238 = vst.msk [vmem:[#allocation3 + $0x70] sm:$0xff] %vm9412_vm15, %v2205_v46  ;;  %v7434_v8 = vadd.f32 %v2783_v55, %v2694_v14  ;;  %v2169_v22 = vpop.xlane.xlu0 %2168  ;;  %v7437_v17 = vpop.f32.mrf.mxu0  ;;  %v2091_v19 = vmul.f32 %v4955_v10, %v2059_v16  ;;  %v9423_v46 = vsub.f32 %v9421_v32, %v9422_v2  ;;  %v2257_v16 = vld [vmem:[#allocation4] sm:$0xff] }
 0x3e3   : > { %2246 = vst.msk [vmem:[#allocation3 + $0xb0] sm:$0xff] %vm9413_vm3, %v2213_v1  ;;  %v2215_v40 = vadd.f32 %v2169_v22, %v2087_v45  ;;  %2440 = vperm.xlu0 %4769, %v4947_v6   ;;  %v7440_v12 = vpop.f32.mrf.mxu1  ;;  %v9426_v1 = vsub.f32 %v9424_v61, %v9425_v35 }
 0x3e4   : > { %2375 = vperm.xlu2 %4771, %v4949_v28   ;;  %v1603_v7 = vmul.f32 1.442695, %v9423_v46  ;;  %v2259_v46 = vld [vmem:[#allocation4 + $0x18] sm:$0xff] }
 0x3e5   : > { %2248 = vst.msk [vmem:[#allocation3 + $0xc0] sm:$0xff] %vm9414_vm13, %v2215_v40  ;;  %2400 = vperm.xlu1 %4770, %v4945_v60   ;;  %v2061_v60 = vld [vmem:[#allocation3 + $0xf0] sm:$0xff]  ;;  %v1613_v55 = vmul.f32 1.442695, %v9426_v1  ;;  %v4957_v22 = vpop.eup %4956  ;;  %v2054_v40 = vld [vmem:[#allocation3 + $0xb8] sm:$0xff] }
 0x3e6   : > { %v2093_v50 = vmul.f32 %v4947_v6, %v2061_v60  ;;  %4958 = vpow2.f32 %v1603_v7  ;;  %v2086_v6 = vmul.f32 %v4957_v22, %v2054_v40 }
 0x3e7   : > { %v2148_v43 = vpop.xlane.xlu1 %2147  ;;  %4960 = vpow2.f32 %v1613_v55 }
 0x3e8   : > { %v2208_v49 = vadd.f32 %v2148_v43, %v2080_v62  ;;  %v2172_v4 = vpop.xlane.xlu2 %2171  ;;  %v2696_v38 = vpop.f32.mrf.mxu2  ;;  %v9431_v43 = vld [vmem:[#allocation138_spill] sm:$0xff] }
 0x3e9   : > { %v2216_v58 = vadd.f32 %v2172_v4, %v2088_v13  ;;  %v2785_v33 = vpop.f32.mrf.mxu3  ;;  %v9432_v13 = vsub.f32 %v9430_v54, %v9431_v43  ;;  %v2265_v43 = vld [vmem:[#allocation4 + $0x88] sm:$0xff] }
 0x3ea   : > { %2241 = vst.msk [vmem:[#allocation3 + $0x88] sm:$0xff] %vm9418_vm1, %v2208_v49  ;;  %v7446_v25 = vadd.f32 %v2785_v33, %v2696_v38  ;;  %v2178_v20 = vpop.xlane.xlu0 %2177  ;;  %v7450_v5 = vpop.f32.mrf.mxu0 }
 0x3eb   : > { %2249 = vst.msk [vmem:[#allocation3 + $0xc8] sm:$0xff] %vm9419_vm7, %v2216_v58  ;;  %v2218_v48 = vadd.f32 %v2178_v20, %v2090_v41  ;;  %v7452_v51 = vpop.f32.mrf.mxu1  ;;  %v1609_v49 = vmul.f32 1.442695, %v9432_v13 }
 0x3ec   : > { %2390 = vperm.xlu2 %4771, %v4953_v57   ;;  %v4959_v31 = vpop.eup %4958 }
 0x3ed   : > { %2251 = vst.msk [vmem:[#allocation3 + $0xd8] sm:$0xff] %vm9420_vm12, %v2218_v48  ;;  %2415 = vperm.xlu1 %4770, %v4951_v36   ;;  %v4961_v0 = vpop.eup %4960  ;;  %4962 = vpow2.f32 %v1609_v49  ;;  %v2089_v11 = vmul.f32 %v4959_v31, %v2057_v29  ;;  %v2258_v49 = vld [vmem:[#allocation4 + $0xd8] sm:$0xff] }
 0x3ef   : > { %v2157_v23 = vpop.xlane.xlu1 %2156 }
 0x3f0   : > { %v2211_v18 = vadd.f32 %v2157_v23, %v2083_v27  ;;  %v2181_v9 = vpop.xlane.xlu2 %2180  ;;  %v2699_v42 = vpop.f32.mrf.mxu2  ;;  %v2060_v27 = vld [vmem:[#allocation3 + $0xe8] sm:$0xff]  ;;  %v2741_v23 = vadd.f32 %v7308_v52, %v7302_v34  ;;  %v2262_v34 = vld [vmem:[#allocation4 + $0x30] sm:$0xff]  ;;  %v2062_v52 = vld [vmem:[#allocation3 + $0xf8] sm:$0xff] }
 0x3f1   : > { %v2219_v14 = vadd.f32 %v2181_v9, %v2091_v19  ;;  %v2788_v63 = vpop.f32.mrf.mxu3 }
 0x3f2   : > { %2244 = vst.msk [vmem:[#allocation3 + $0xa0] sm:$0xff] %vm9427_vm6, %v2211_v18  ;;  %v7461_v45 = vadd.f32 %v2788_v63, %v2699_v42  ;;  %v2187_v53 = vpop.xlane.xlu0 %2186  ;;  %v7465_v24 = vpop.f32.mrf.mxu0 }
 0x3f3   : > { %2252 = vst.msk [vmem:[#allocation3 + $0xe0] sm:$0xff] %vm9428_vm5, %v2219_v14  ;;  %v2221_v28 = vadd.f32 %v2187_v53, %v2093_v50  ;;  %v7472_v4 = vpop.f32.mrf.mxu1  ;;  %v4963_v47 = vpop.eup %4962  ;;  %v2754_v53 = vadd.f32 %v7407_v56, %v7403_v39  ;;  %v2761_v39 = vadd.f32 %v7452_v51, %v7450_v5  ;;  %v2268_v5 = vld [vmem:[#allocation4 + $0x60] sm:$0xff] }
 0x3f4   : > { %2405 = vperm.xlu2 %4771, %v4957_v22   ;;  %v2092_v18 = vmul.f32 %v4963_v47, %v2060_v27 }
 0x3f5   : > { %2254 = vst.msk [vmem:[#allocation3 + $0xf0] sm:$0xff] %vm9429_vm10, %v2221_v28  ;;  %2430 = vperm.xlu1 %4770, %v4955_v10  }
 0x3f7   : > { %v2166_v36 = vpop.xlane.xlu1 %2165 }
 0x3f8   : > { %v2214_v26 = vadd.f32 %v2166_v36, %v2086_v6  ;;  %v7467_v62 = vpop.f32.mrf.mxu2  ;;  %v2094_v6 = vmul.f32 %v4961_v0, %v2062_v52 }
 0x3f9   : > { %v7474_v38 = vpop.f32.mrf.mxu3 }
 0x3fa   : > { %2247 = vst.msk [vmem:[#allocation3 + $0xb8] sm:$0xff] %vm9433_vm14, %v2214_v26  ;;  %v7477_v20 = vpop.f32.mrf.mxu0 }
 0x3fb   : > { %v7482_v10 = vpop.f32.mrf.mxu1 }
 0x3fc   : > { %2420 = vperm.xlu2 %4771, %v4959_v31   ;;  %v2256_v31 = vld [vmem:[#allocation4 + $0xb0] sm:$0xff] }
 0x3fd   : > { %2445 = vperm.xlu1 %4770, %v4961_v0  }
 0x3ff   : > { %v2175_v58 = vpop.xlane.xlu1 %2174 }
 0x400   : > { %v2217_v33 = vadd.f32 %v2175_v58, %v2089_v11  ;;  %v2704_v41 = vpop.f32.mrf.mxu2 }
 0x401   : > { %v2793_v57 = vpop.f32.mrf.mxu3 }
 0x402   : > { %2250 = vst.msk [vmem:[#allocation3 + $0xd0] sm:$0xff] %vm9434_vm9, %v2217_v33  ;;  %v7480_v48 = vadd.f32 %v2793_v57, %v2704_v41  ;;  %v2679_v2 = vpop.f32.mrf.mxu0 }
 0x403   : > { %v2768_v63 = vpop.f32.mrf.mxu1 }
 0x404   : > { %2435 = vperm.xlu2 %4771, %v4963_v47  }
 0x405   : > { %v2296_v60 = vpop.permute.xlu0 %2295 }
 0x406   : > { %v2449_v19 = vmul.f32 %v2296_v60, %v2257_v16  ;;  %v9437_v60 = vld [vmem:[#allocation44_spill] sm:$0xff] }
 0x407   : > { %v2184_v9 = vpop.xlane.xlu1 %2183 }
 0x408   : > { %v2819_v42 = vadd.f32 %v2741_v23, %v2449_v19  ;;  %v2220_v32 = vadd.f32 %v2184_v9, %v2092_v18  ;;  %v7487_v7 = vpop.f32.mrf.mxu2  ;;  %v2261_v19 = vld [vmem:[#allocation4 + $0x68] sm:$0xff]  ;;  %v2260_v18 = vld [vmem:[#allocation4 + $0x50] sm:$0xff]  ;;  %v2769_v9 = vadd.f32 %v2768_v63, %v2679_v2  ;;  %v2264_v63 = vld [vmem:[#allocation4 + $0x80] sm:$0xff] }
 0x409   : > { %v7489_v14 = vpop.f32.mrf.mxu3 }
 0x40a   : > { %2851 = vst [vmem:[#allocation4] sm:$0xff] %v2819_v42  ;;  %v7492_v1 = vpop.f32.mrf.mxu0 }
 0x40b   : > { %2253 = vst.msk [vmem:[#allocation3 + $0xe8] sm:$0xff] %vm9435_vm2, %v2220_v32  ;;  %v7500_v36 = vpop.f32.mrf.mxu1 }
 0x40d   : > { %v2306_v50 = vpop.permute.xlu0 %2305 }
 0x40e   : > { %v2451_v61 = vmul.f32 %v2306_v50, %v2259_v46 }
 0x410   : > { %v2821_v35 = vadd.f32 %v7353_v30, %v2451_v61  ;;  %v7496_v22 = vpop.f32.mrf.mxu2 }
 0x411   : > { %v7498_v28 = vpop.f32.mrf.mxu3 }
 0x412   : > { %2853 = vst [vmem:[#allocation4 + $0x18] sm:$0xff] %v2821_v35  ;;  %v7509_v47 = vpop.f32.mrf.mxu0 }
 0x413   : > { %v7511_v16 = vpop.f32.mrf.mxu1 }
 0x415   : > { %v2321_v55 = vpop.permute.xlu0 %2320 }
 0x416   : > { %v2454_v40 = vmul.f32 %v2321_v55, %v2262_v34 }
 0x417   : > { %v2190_v26 = vpop.xlane.xlu2 %2189 }
 0x418   : > { %v2824_v54 = vadd.f32 %v2754_v53, %v2454_v40  ;;  %v2222_v30 = vadd.f32 %v2190_v26, %v2094_v6  ;;  %v7505_v58 = vpop.f32.mrf.mxu2  ;;  %v2271_v6 = vld [vmem:[#allocation4 + $0x78] sm:$0xff]  ;;  %v2263_v26 = vld [vmem:[#allocation4 + $0x48] sm:$0xff] }
 0x419   : > { %v7507_v0 = vpop.f32.mrf.mxu3 }
 0x41a   : > { %2856 = vst [vmem:[#allocation4 + $0x30] sm:$0xff] %v2824_v54  ;;  %v2686_v53 = vpop.f32.mrf.mxu0 }
 0x41b   : > { %2255 = vst.msk [vmem:[#allocation3 + $0xf8] sm:$0xff] %vm9436_vm11, %v2222_v30  ;;  %v2775_v40 = vpop.f32.mrf.mxu1 }
 0x41c   : > { %v2776_v54 = vadd.f32 %v2775_v40, %v2686_v53 }
 0x41d   : > { %v2336_v13 = vpop.permute.xlu0 %2335 }
 0x41e   : > { %v2457_v56 = vmul.f32 %v2336_v13, %v2265_v43 }
 0x41f   : > { %v2301_v29 = vpop.permute.xlu2 %2300  ;;  %v2291_v11 = vpop.permute.xlu1 %2290 }
 0x420   : > { %v2827_v33 = vadd.f32 %v2761_v39, %v2457_v56  ;;  %v2450_v41 = vmul.f32 %v2301_v29, %v2258_v49  ;;  %v2448_v57 = vmul.f32 %v2291_v11, %v2256_v31  ;;  %v7515_v34 = vpop.f32.mrf.mxu2  ;;  %v2759_v49 = vadd.f32 %v7440_v12, %v7437_v17  ;;  %v2274_v29 = vld [vmem:[#allocation4 + $0x40] sm:$0xff] }
 0x421   : > { %v7517_v52 = vpop.f32.mrf.mxu3  ;;  %v2764_v17 = vadd.f32 %v7472_v4, %v7465_v24  ;;  %v2791_v24 = vadd.f32 %v7474_v38, %v7467_v62  ;;  %v2280_v62 = vld [vmem:[#allocation4 + $0xa8] sm:$0xff] }
 0x422   : > { %2859 = vst [vmem:[#allocation4 + $0x88] sm:$0xff] %v2827_v33  ;;  %v2820_v27 = vadd.f32 %v7329_v59, %v2450_v41  ;;  %v2818_v23 = vadd.f32 %v9437_v60, %v2448_v57  ;;  %v2267_v57 = vld [vmem:[#allocation4 + $0xb8] sm:$0xff] }
 0x424   : > { %2852 = vst [vmem:[#allocation4 + $0xd8] sm:$0xff] %v2820_v27  ;;  %v2266_v27 = vld [vmem:[#allocation4 + $0xe8] sm:$0xff] }
 0x425   : > { %2850 = vst [vmem:[#allocation4 + $0xb0] sm:$0xff] %v2818_v23  ;;  %v2351_v51 = vpop.permute.xlu0 %2350 }
 0x426   : > { %v2460_v42 = vmul.f32 %v2351_v51, %v2268_v5  ;;  %v2766_v5 = vadd.f32 %v7482_v10, %v7477_v20 }
 0x427   : > { %v2316_v32 = vpop.permute.xlu2 %2315  ;;  %v2311_v46 = vpop.permute.xlu1 %2310 }
 0x428   : > { %v2830_v50 = vadd.f32 %v2769_v9, %v2460_v42  ;;  %v2453_v61 = vmul.f32 %v2316_v32, %v2261_v19  ;;  %v2452_v35 = vmul.f32 %v2311_v46, %v2260_v18  ;;  %v7524_v11 = vpop.f32.mrf.mxu2  ;;  %v2277_v42 = vld [vmem:[#allocation4 + $0x90] sm:$0xff]  ;;  %v2270_v46 = vld [vmem:[#allocation4 + $0x8] sm:$0xff] }
 0x429   : > { %v2805_v33 = vpop.f32.mrf.mxu3 }
 0x42a   : > { %2862 = vst [vmem:[#allocation4 + $0x60] sm:$0xff] %v2830_v50  ;;  %v2823_v59 = vadd.f32 %v7391_v44, %v2453_v61  ;;  %v2822_v55 = vadd.f32 %v7375_v21, %v2452_v35  ;;  %v2269_v50 = vld [vmem:[#allocation4 + $0xf0] sm:$0xff] }
 0x42c   : > { %2855 = vst [vmem:[#allocation4 + $0x68] sm:$0xff] %v2823_v59  ;;  %v2774_v59 = vadd.f32 %v7511_v16, %v7509_v47  ;;  %v2781_v47 = vadd.f32 %v7419_v3, %v7414_v37 }
 0x42d   : > { %2854 = vst [vmem:[#allocation4 + $0x50] sm:$0xff] %v2822_v55  ;;  %v2366_v2 = vpop.permute.xlu0 %2365 }
 0x42e   : > { %v2463_v30 = vmul.f32 %v2366_v2, %v2271_v6 }
 0x42f   : > { %v2331_v43 = vpop.permute.xlu2 %2330  ;;  %v2326_v13 = vpop.permute.xlu1 %2325 }
 0x430   : > { %v2833_v31 = vadd.f32 %v2776_v54, %v2463_v30  ;;  %v2456_v39 = vmul.f32 %v2331_v43, %v2264_v63  ;;  %v2455_v44 = vmul.f32 %v2326_v13, %v2263_v26  ;;  %v7533_v4 = vpop.f32.mrf.mxu2  ;;  %v2273_v63 = vld [vmem:[#allocation4 + $0x58] sm:$0xff] }
 0x431   : > { %v7535_v61 = vpop.f32.mrf.mxu3  ;;  %v2272_v26 = vld [vmem:[#allocation4 + $0x38] sm:$0xff] }
 0x432   : > { %2865 = vst [vmem:[#allocation4 + $0x78] sm:$0xff] %v2833_v31  ;;  %v2826_v21 = vadd.f32 %v2759_v49, %v2456_v39  ;;  %v2825_v56 = vadd.f32 %v7424_v15, %v2455_v44  ;;  %v9438_v44 = vld [vmem:[#allocation16_spill] sm:$0xff] }
 0x434   : > { %2858 = vst [vmem:[#allocation4 + $0x80] sm:$0xff] %v2826_v21 }
 0x435   : > { %2857 = vst [vmem:[#allocation4 + $0x48] sm:$0xff] %v2825_v56  ;;  %v2381_v41 = vpop.permute.xlu0 %2380  ;;  %v2283_v56 = vld [vmem:[#allocation4 + $0x28] sm:$0xff] }
 0x436   : > { %v2466_v60 = vmul.f32 %v2381_v41, %v2274_v29  ;;  %v2806_v41 = vadd.f32 %v2805_v33, %v7524_v11 }
 0x437   : > { %v2346_v12 = vpop.permute.xlu2 %2345  ;;  %v2341_v23 = vpop.permute.xlu1 %2340 }
 0x438   : > { %v2836_v15 = vadd.f32 %v7434_v8, %v2466_v60  ;;  %v2459_v51 = vmul.f32 %v2346_v12, %v2267_v57  ;;  %v2458_v19 = vmul.f32 %v2341_v23, %v2266_v27  ;;  %v2771_v8 = vadd.f32 %v7500_v36, %v7492_v1  ;;  %v2721_v49 = vpop.f32.mrf.mxu2 }
 0x439   : > { %v2799_v1 = vadd.f32 %v7498_v28, %v7496_v22  ;;  %v2810_v31 = vpop.f32.mrf.mxu3  ;;  %v2276_v22 = vld [vmem:[#allocation4 + $0xe0] sm:$0xff]  ;;  %v2275_v28 = vld [vmem:[#allocation4 + $0xc8] sm:$0xff] }
 0x43a   : > { %2868 = vst [vmem:[#allocation4 + $0x40] sm:$0xff] %v2836_v15  ;;  %v2829_v18 = vadd.f32 %v2766_v5, %v2459_v51  ;;  %v2828_v9 = vadd.f32 %v2764_v17, %v2458_v19  ;;  %v2286_v51 = vld [vmem:[#allocation4 + $0x20] sm:$0xff] }
 0x43c   : > { %2861 = vst [vmem:[#allocation4 + $0xb8] sm:$0xff] %v2829_v18  ;;  %v2279_v18 = vld [vmem:[#allocation4 + $0xc0] sm:$0xff] }
 0x43d   : > { %2860 = vst [vmem:[#allocation4 + $0xe8] sm:$0xff] %v2828_v9  ;;  %v2396_v32 = vpop.permute.xlu0 %2395  ;;  %v2278_v9 = vld [vmem:[#allocation4 + $0x70] sm:$0xff] }
 0x43e   : > { %v2469_v20 = vmul.f32 %v2396_v32, %v2277_v42 }
 0x43f   : > { %v2361_v10 = vpop.permute.xlu2 %2360  ;;  %v2356_v35 = vpop.permute.xlu1 %2355 }
 0x440   : > { %v2839_v55 = vadd.f32 %v2791_v24, %v2469_v20  ;;  %v2462_v53 = vmul.f32 %v2361_v10, %v2270_v46  ;;  %v2461_v40 = vmul.f32 %v2356_v35, %v2269_v50  ;;  %v2724_v5 = vpop.f32.mrf.mxu2  ;;  %v2796_v46 = vadd.f32 %v7489_v14, %v7487_v7  ;;  %v2281_v10 = vld [vmem:[#allocation4 + $0xd0] sm:$0xff] }
 0x441   : > { %v2813_v15 = vpop.f32.mrf.mxu3 }
 0x442   : > { %2871 = vst [vmem:[#allocation4 + $0x90] sm:$0xff] %v2839_v55  ;;  %v2832_v6 = vadd.f32 %v2774_v59, %v2462_v53  ;;  %v2831_v2 = vadd.f32 %v2771_v8, %v2461_v40  ;;  %v2814_v11 = vadd.f32 %v2813_v15, %v2724_v5  ;;  %v2282_v8 = vld [vmem:[#allocation4 + $0x10] sm:$0xff]  ;;  %v2801_v55 = vadd.f32 %v7507_v0, %v7505_v58 }
 0x443   : > { %v2804_v53 = vadd.f32 %v7517_v52, %v7515_v34 }
 0x444   : > { %2864 = vst [vmem:[#allocation4 + $0x8] sm:$0xff] %v2832_v6 }
 0x445   : > { %2863 = vst [vmem:[#allocation4 + $0xf0] sm:$0xff] %v2831_v2  ;;  %v2411_v38 = vpop.permute.xlu0 %2410  ;;  %v2285_v2 = vld [vmem:[#allocation4 + $0xf8] sm:$0xff] }
 0x446   : > { %v2472_v36 = vmul.f32 %v2411_v38, %v2280_v62 }
 0x447   : > { %v2376_v54 = vpop.permute.xlu2 %2375  ;;  %v2371_v30 = vpop.permute.xlu1 %2370 }
 0x448   : > { %v2842_v16 = vadd.f32 %v2799_v1, %v2472_v36  ;;  %v2465_v43 = vmul.f32 %v2376_v54, %v2273_v63  ;;  %v2464_v13 = vmul.f32 %v2371_v30, %v2272_v26  ;;  %v2809_v63 = vadd.f32 %v7535_v61, %v7533_v4  ;;  %v2726_v34 = vpop.f32.mrf.mxu2  ;;  %v2287_v54 = vld [vmem:[#allocation4 + $0x98] sm:$0xff] }
 0x449   : > { %v2811_v26 = vadd.f32 %v2810_v31, %v2721_v49  ;;  %v2815_v52 = vpop.f32.mrf.mxu3 }
 0x44a   : > { %2874 = vst [vmem:[#allocation4 + $0xa8] sm:$0xff] %v2842_v16  ;;  %v2835_v39 = vadd.f32 %v2781_v47, %v2465_v43  ;;  %v2834_v21 = vadd.f32 %v9438_v44, %v2464_v13  ;;  %v2816_v47 = vadd.f32 %v2815_v52, %v2726_v34 }
 0x44c   : > { %2867 = vst [vmem:[#allocation4 + $0x58] sm:$0xff] %v2835_v39 }
 0x44d   : > { %2866 = vst [vmem:[#allocation4 + $0x38] sm:$0xff] %v2834_v21  ;;  %v2426_v29 = vpop.permute.xlu0 %2425 }
 0x44e   : > { %v2475_v57 = vmul.f32 %v2426_v29, %v2283_v56 }
 0x44f   : > { %v2391_v27 = vpop.permute.xlu2 %2390  ;;  %v2386_v37 = vpop.permute.xlu1 %2385 }
 0x450   : > { %v2845_v3 = vadd.f32 %v2806_v41, %v2475_v57  ;;  %v2468_v60 = vmul.f32 %v2391_v27, %v2276_v22  ;;  %v2467_v17 = vmul.f32 %v2386_v37, %v2275_v28 }
 0x452   : > { %2877 = vst [vmem:[#allocation4 + $0x28] sm:$0xff] %v2845_v3  ;;  %v2838_v12 = vadd.f32 %v7461_v45, %v2468_v60  ;;  %v2837_v23 = vadd.f32 %v7446_v25, %v2467_v17 }
 0x454   : > { %2870 = vst [vmem:[#allocation4 + $0xe0] sm:$0xff] %v2838_v12 }
 0x455   : > { %2869 = vst [vmem:[#allocation4 + $0xc8] sm:$0xff] %v2837_v23  ;;  %v2441_v19 = vpop.permute.xlu0 %2440 }
 0x456   : > { %v2478_v33 = vmul.f32 %v2441_v19, %v2286_v51 }
 0x457   : > { %v2406_v42 = vpop.permute.xlu2 %2405  ;;  %v2401_v32 = vpop.permute.xlu1 %2400 }
 0x458   : > { %v2848_v50 = vadd.f32 %v2814_v11, %v2478_v33  ;;  %v2471_v24 = vmul.f32 %v2406_v42, %v2279_v18  ;;  %v2470_v45 = vmul.f32 %v2401_v32, %v2278_v9 }
 0x45a   : > { %2880 = vst [vmem:[#allocation4 + $0x20] sm:$0xff] %v2848_v50  ;;  %v2841_v25 = vadd.f32 %v2796_v46, %v2471_v24  ;;  %v2840_v20 = vadd.f32 %v7480_v48, %v2470_v45  ;;  %v2284_v48 = vld [vmem:[#allocation4 + $0xa0] sm:$0xff] }
 0x45c   : > { %2873 = vst [vmem:[#allocation4 + $0xc0] sm:$0xff] %v2841_v25 }
 0x45d   : > { %2872 = vst [vmem:[#allocation4 + $0x70] sm:$0xff] %v2840_v20 }
 0x45f   : > { %v2421_v35 = vpop.permute.xlu2 %2420  ;;  %v2416_v59 = vpop.permute.xlu1 %2415 }
 0x460   : > { %v2474_v7 = vmul.f32 %v2421_v35, %v2282_v8  ;;  %v2473_v14 = vmul.f32 %v2416_v59, %v2281_v10 }
 0x462   : > { %v2844_v40 = vadd.f32 %v2804_v53, %v2474_v7  ;;  %v2843_v6 = vadd.f32 %v2801_v55, %v2473_v14 }
 0x464   : > { %2876 = vst [vmem:[#allocation4 + $0x10] sm:$0xff] %v2844_v40 }
 0x465   : > { %2875 = vst [vmem:[#allocation4 + $0xd0] sm:$0xff] %v2843_v6 }
 0x467   : > { %v2436_v62 = vpop.permute.xlu2 %2435  ;;  %v2431_v38 = vpop.permute.xlu1 %2430 }
 0x468   : > { %v2477_v1 = vmul.f32 %v2436_v62, %v2285_v2  ;;  %v2476_v36 = vmul.f32 %v2431_v38, %v2284_v48 }
 0x46a   : > { %v2847_v58 = vadd.f32 %v2811_v26, %v2477_v1  ;;  %v2846_v0 = vadd.f32 %v2809_v63, %v2476_v36 }
 0x46c   : > { %2879 = vst [vmem:[#allocation4 + $0xf8] sm:$0xff] %v2847_v58 }
 0x46d   : > { %2878 = vst [vmem:[#allocation4 + $0xa0] sm:$0xff] %v2846_v0 }
 0x46f   : > { %v2446_v30 = vpop.permute.xlu1 %2445 }
 0x470   : > { %v2479_v16 = vmul.f32 %v2446_v30, %v2287_v54  ;;  %2917 = sbr.rel (%p4434_p0) target bundleno = 1394 (0x572), region = 79 }
 0x472   : > { %v2849_v43 = vadd.f32 %v2816_v47, %v2479_v16 }
 0x474   : > { %2881 = vst [vmem:[#allocation4 + $0x98] sm:$0xff] %v2849_v43 }
 0x475   : > { %v4573_v4 = vld [vmem:[%s8519_s5 + $0x38] sm:$0xff]  ;;  %v5091_v61 = vmov 0   ;;  %v7564_v49 = vld [vmem:[#allocation3 + $0x10] sm:$0xff]  ;;  %v4572_v31 = vld [vmem:[%s8519_s5 + $0x30] sm:$0xff] }
 0x476   : > { %4966 = vset.pattern.permute.xlu2 %v5091_v61  ;;  %4965 = vset.pattern.permute.xlu1 %v5091_v61  ;;  %v7562_v13 = vld [vmem:[#allocation3 + $0x20] sm:$0xff]  ;;  %v7575_v56 = vld [vmem:[#allocation3 + $0x28] sm:$0xff]  ;;  %v3306_v29 = vand.u32 2147483647, %v7564_v49  ;;  %v7579_v22 = vld [vmem:[#allocation3 + $0x18] sm:$0xff]  ;;  %v3308_v41 = vand.u32 2147483648, %v7564_v49  ;;  %vm3302_vm0 = vweird.f32 %v7564_v49 }
 0x477   : > { %3114 = vmatpush.bf16.msra.mxu0 %v4573_v4  ;;  %4685 = vmatpush.bf16.msra.mxu1 %v4573_v4  ;;  %4968 = vrcp.f32 %v7562_v13  ;;  %v7570_v39 = vld [vmem:[#allocation3] sm:$0xff]  ;;  %v3336_v44 = vand.u32 2147483647, %v7562_v13  ;;  %v3338_v21 = vand.u32 2147483648, %v7562_v13  ;;  %v4571_v28 = vld [vmem:[%s8519_s5 + $0x28] sm:$0xff]  ;;  %vm3332_vm4 = vweird.f32 %v7562_v13  ;;  %v7601_v17 = vld [vmem:[#allocation3 + $0x8] sm:$0xff] }
 0x478   : > { %4686 = vmatpush.bf16.msra.mxu2 %v4573_v4  ;;  %4687 = vmatpush.bf16.msra.mxu3 %v4573_v4  ;;  %4970 = vrcp.f32 %v7564_v49  ;;  %v3276_v57 = vand.u32 2147483647, %v7570_v39  ;;  %vm3239_vm15 = vcmp.gt.f32.partialorder %v7562_v13, 0.0  ;;  %vm3272_vm3 = vweird.f32 %v7570_v39  ;;  %v4570_v19 = vld [vmem:[%s8519_s5 + $0x20] sm:$0xff]  ;;  %v4569_v7 = vld [vmem:[%s8519_s5 + $0x18] sm:$0xff]  ;;  %v4568_v47 = vld [vmem:[%s8519_s5 + $0x10] sm:$0xff] }
 0x479   : > { %4964 = vset.pattern.permute.xlu0 %v5091_v61  ;;  %4972 = vrcp.f32 %v7570_v39  ;;  %vm7587_vm8 = vcmp.eq.f32.partialorder %v3336_v44, 8.507059e+37  ;;  %v7596_v3 = vor.u32 1.1754944e-38, %v3338_v21  ;;  %v3278_v60 = vand.u32 2147483648, %v7570_v39  ;;  %v7662_v40 = vld [vmem:[#allocation3 + $0x40] sm:$0xff]  ;;  %v4550_v59 = vld [vmem:[%s5235_s17] sm:$0xff] }
 0x47a   : > { %4974 = vrcp.f32 %v7575_v56  ;;  %vm3237_vm13 = vcmp.gt.f32.partialorder %v7564_v49, 0.0  ;;  %vm7608_vm1 = vcmp.eq.f32.partialorder %v3306_v29, 8.507059e+37  ;;  %v3351_v15 = vand.u32 2147483647, %v7575_v56  ;;  %v4558_v2 = vld [vmem:[%s5235_s17 + $0x40] sm:$0xff] }
 0x47b   : > { %3115 = vmatpush.bf16.msra.mxu0 %v4572_v31  ;;  %4688 = vmatpush.bf16.msra.mxu1 %v4572_v31  ;;  %4976 = vrcp.f32 %v7579_v22  ;;  %v3353_v51 = vand.u32 2147483648, %v7575_v56  ;;  %v3309_v9 = vor.u32 1.1754944e-38, %v3308_v41  ;;  %vm7619_vm7 = vcmp.eq.f32.partialorder %v3276_v57, 8.507059e+37  ;;  %v7739_v57 = vld [vmem:[#allocation3 + $0x38] sm:$0xff] }
 0x47c   : > { %4689 = vmatpush.bf16.msra.mxu2 %v4572_v31  ;;  %4690 = vmatpush.bf16.msra.mxu3 %v4572_v31  ;;  %vm3347_vm12 = vweird.f32 %v7575_v56  ;;  %v3321_v32 = vand.u32 2147483647, %v7579_v22  ;;  %4978 = vrcp.f32 %v7601_v17  ;;  %v3279_v24 = vor.u32 1.1754944e-38, %v3278_v60 }
 0x47d   : > { %v7593_v37 = vpop.eup %4968  ;;  %vm7636_vm14 = vcmp.eq.f32.partialorder %v3351_v15, 8.507059e+37  ;;  %v7640_v8 = vor.u32 1.1754944e-38, %v3353_v51  ;;  %vm3317_vm9 = vweird.f32 %v7579_v22  ;;  %v3323_v10 = vand.u32 2147483648, %v7579_v22 }
 0x47e   : > { %v7603_v12 = vpop.eup %4970  ;;  %v3328_v23 = vmul.f32 %v7593_v37, %v7562_v13  ;;  %vm3333_vm6 = vweird.f32 %v7593_v37  ;;  %vm7676_vm5 = vcmp.eq.f32.partialorder %v3321_v32, 8.507059e+37  ;;  %v3291_v38 = vand.u32 2147483647, %v7601_v17 }
 0x47f   : > { %3116 = vmatpush.bf16.msra.mxu0 %v4571_v28  ;;  %4691 = vmatpush.bf16.msra.mxu1 %v4571_v28  ;;  %v3298_v18 = vmul.f32 %v7603_v12, %v7564_v49  ;;  %v7624_v33 = vpop.eup %4972  ;;  %vm3303_vm10 = vweird.f32 %v7603_v12  ;;  %vm7650_vm2 = vmor %vm3332_vm4, %vm3333_vm6  ;;  %4980 = vrcp.f32 %v7662_v40  ;;  %v3293_v16 = vand.u32 2147483648, %v7601_v17 }
 0x480   : > { %4692 = vmatpush.bf16.msra.mxu2 %v4571_v28  ;;  %4693 = vmatpush.bf16.msra.mxu3 %v4571_v28  ;;  %v3329_v42 = vsub.f32 1.0, %v3328_v23  ;;  %v3268_v50 = vmul.f32 %v7624_v33, %v7570_v39  ;;  %v7633_v45 = vpop.eup %4974  ;;  %vm3273_vm11 = vweird.f32 %v7624_v33  ;;  %vm7669_vm4 = vmor %vm3302_vm0, %vm3303_vm10  ;;  %v3324_v28 = vor.u32 1.1754944e-38, %v3323_v10  ;;  %v4567_v23 = vld [vmem:[%s8519_s5 + $0x8] sm:$0xff] }
 0x481   : > { %v3299_v46 = vsub.f32 1.0, %v3298_v18  ;;  %v7644_v35 = vpop.eup %4976  ;;  %v3343_v14 = vmul.f32 %v7633_v45, %v7575_v56  ;;  %vm3348_vm0 = vweird.f32 %v7633_v45  ;;  %vm7693_vm10 = vmor %vm3272_vm3, %vm3273_vm11  ;;  %vm3287_vm3 = vweird.f32 %v7601_v17 }
 0x482   : > { %v3330_v25 = vmul.f32 %v7593_v37, %v3329_v42  ;;  %v3269_v53 = vsub.f32 1.0, %v3268_v50  ;;  %v3313_v48 = vmul.f32 %v7644_v35, %v7579_v22  ;;  %v7684_v36 = vpop.eup %4978  ;;  %vm3318_vm6 = vweird.f32 %v7644_v35 }
 0x483   : > { %3117 = vmatpush.bf16.msra.mxu0 %v4570_v19  ;;  %4694 = vmatpush.bf16.msra.mxu1 %v4570_v19  ;;  %v3300_v55 = vmul.f32 %v7603_v12, %v3299_v46  ;;  %v3344_v1 = vsub.f32 1.0, %v3343_v14  ;;  %v3283_v41 = vmul.f32 %v7684_v36, %v7601_v17  ;;  %v3294_v51 = vor.u32 1.1754944e-38, %v3293_v16  ;;  %v7850_v16 = vld [vmem:[#allocation3 + $0x48] sm:$0xff] }
 0x484   : > { %4695 = vmatpush.bf16.msra.mxu2 %v4570_v19  ;;  %4696 = vmatpush.bf16.msra.mxu3 %v4570_v19  ;;  %v3331_v6 = vadd.f32 %v7593_v37, %v3330_v25  ;;  %v3270_v26 = vmul.f32 %v7624_v33, %v3269_v53  ;;  %v3314_v34 = vsub.f32 1.0, %v3313_v48  ;;  %4982 = vrcp.f32 %v7739_v57 }
 0x485   : > { %v3301_v63 = vadd.f32 %v7603_v12, %v3300_v55  ;;  %v3345_v61 = vmul.f32 %v7633_v45, %v3344_v1  ;;  %v3284_v60 = vsub.f32 1.0, %v3283_v41  ;;  %v7756_v5 = vpop.eup %4980  ;;  %v3396_v46 = vand.u32 2147483647, %v7662_v40  ;;  %v4554_v55 = vld [vmem:[%s5235_s17 + $0x20] sm:$0xff] }
 0x486   : > { %v3335_v58 = vsel %vm7650_vm2, %v7593_v37, %v3331_v6  ;;  %v3271_v30 = vadd.f32 %v7624_v33, %v3270_v26  ;;  %v3315_v44 = vmul.f32 %v7644_v35, %v3314_v34  ;;  %v3388_v11 = vmul.f32 %v7756_v5, %v7662_v40 }
 0x487   : > { %v3340_v52 = vsel %vm7587_vm8, %v7596_v3, %v3335_v58  ;;  %v3305_v54 = vsel %vm7669_vm4, %v7603_v12, %v3301_v63  ;;  %3118 = vmatpush.bf16.msra.mxu0 %v4569_v7  ;;  %4697 = vmatpush.bf16.msra.mxu1 %v4569_v7  ;;  %vm7719_vm8 = vmor %vm3347_vm12, %vm3348_vm0  ;;  %v3346_v27 = vadd.f32 %v7633_v45, %v3345_v61  ;;  %vm7749_vm12 = vcmp.eq.f32.partialorder %v3291_v38, 8.507059e+37  ;;  %v7829_v38 = vld [vmem:[#allocation3 + $0x50] sm:$0xff]  ;;  %v4562_v63 = vld [vmem:[%s5235_s17 + $0x60] sm:$0xff] }
 0x488   : > { %v3751_v43 = vsel %vm3239_vm15, %v3340_v52, 0.0  ;;  %v3310_v4 = vsel %vm7608_vm1, %v3309_v9, %v3305_v54  ;;  %4698 = vmatpush.bf16.msra.mxu2 %v4569_v7  ;;  %4699 = vmatpush.bf16.msra.mxu3 %v4569_v7  ;;  %v3275_v21 = vsel %vm7693_vm10, %v7624_v33, %v3271_v30  ;;  %vm7733_vm15 = vmor %vm3317_vm9, %vm3318_vm6  ;;  %v3316_v37 = vadd.f32 %v7644_v35, %v3315_v44  ;;  %v7773_v33 = vld [vmem:[#allocation3 + $0x30] sm:$0xff] }
 0x489   : > { %3833 = vperm.xlu2 %4966, %v3751_v43   ;;  %v3749_v13 = vsel %vm3237_vm13, %v3310_v4, 0.0  ;;  %v3280_v49 = vsel %vm7619_vm7, %v3279_v24, %v3275_v21  ;;  %vm9459_vm13 = vcmp.gt.f32.partialorder %v7570_v39, 0.0  ;;  %vm3288_vm1 = vweird.f32 %v7684_v36 }
 0x48a   : > { %3823 = vperm.xlu1 %4965, %v3749_v13   ;;  %v3747_v3 = vsel %vm9459_vm13, %v3280_v49, 0.0  ;;  %v3350_v39 = vsel %vm7719_vm8, %v7633_v45, %v3346_v27  ;;  %v3320_v15 = vsel %vm7733_vm15, %v7644_v35, %v3316_v37  ;;  %v3285_v9 = vmul.f32 %v7684_v36, %v3284_v60  ;;  %vm7781_vm9 = vmor %vm3287_vm3, %vm3288_vm1  ;;  %v4566_v45 = vld [vmem:[%s8519_s5] sm:$0xff]  ;;  %v7803_v10 = vpop.eup %4982  ;;  %v7879_v37 = vld [vmem:[#allocation3 + $0x70] sm:$0xff] }
 0x48b   : > { %3119 = vmatpush.bf16.msra.mxu0 %v4568_v47  ;;  %4700 = vmatpush.bf16.msra.mxu1 %v4568_v47  ;;  %v3355_v19 = vsel %vm7636_vm14, %v7640_v8, %v3350_v39  ;;  %v3325_v18 = vsel %vm7676_vm5, %v3324_v28, %v3320_v15  ;;  %vm9462_vm7 = vcmp.gt.f32.partialorder %v7575_v56, 0.0  ;;  %vm3392_vm5 = vweird.f32 %v7662_v40  ;;  %v7801_v8 = vld [vmem:[#allocation3 + $0x58] sm:$0xff] }
 0x48c   : > { %3813 = vperm.xlu0 %4964, %v3747_v3   ;;  %4701 = vmatpush.bf16.msra.mxu2 %v4568_v47  ;;  %v3752_v42 = vsel %vm9462_vm7, %v3355_v19, 0.0  ;;  %v3398_v50 = vand.u32 2147483648, %v7662_v40  ;;  %vm9465_vm14 = vcmp.gt.f32.partialorder %v7579_v22, 0.0  ;;  %v3286_v56 = vadd.f32 %v7684_v36, %v3285_v9 }
 0x48d   : > { %4702 = vmatpush.bf16.msra.mxu3 %v4568_v47  ;;  %v3750_v24 = vsel %vm9465_vm14, %v3325_v18, 0.0  ;;  %v3389_v25 = vsub.f32 1.0, %v3388_v11  ;;  %vm3393_vm2 = vweird.f32 %v7756_v5  ;;  %vm3236_vm11 = vcmp.gt.f32.partialorder %v7601_v17, 0.0 }
 0x48e   : > { %4984 = vrcp.f32 %v7773_v33  ;;  %v3290_v22 = vsel %vm7781_vm9, %v7684_v36, %v3286_v56  ;;  %vm3243_vm4 = vcmp.gt.f32.partialorder %v7662_v40, 0.0  ;;  %vm7814_vm6 = vmor %vm3392_vm5, %vm3393_vm2  ;;  %vm7818_vm0 = vcmp.eq.f32.partialorder %v3396_v46, 8.507059e+37 }
 0x48f   : > { %3120 = vmatpush.bf16.msra.mxu0 %v4567_v23  ;;  %4703 = vmatpush.bf16.msra.mxu1 %v4567_v23  ;;  %v3390_v20 = vmul.f32 %v7756_v5, %v3389_v25  ;;  %v3295_v35 = vsel %vm7749_vm12, %v3294_v51, %v3290_v22  ;;  %v3399_v14 = vor.u32 1.1754944e-38, %v3398_v50  ;;  %v3373_v62 = vmul.f32 %v7803_v10, %v7739_v57 }
 0x490   : > { %4704 = vmatpush.bf16.msra.mxu2 %v4567_v23  ;;  %v3748_v6 = vsel %vm3236_vm11, %v3295_v35, 0.0  ;;  %vm3377_vm10 = vweird.f32 %v7739_v57  ;;  %v3381_v26 = vand.u32 2147483647, %v7739_v57  ;;  %v3383_v17 = vand.u32 2147483648, %v7739_v57 }
 0x491   : > { %3838 = vperm.xlu2 %4966, %v3752_v42   ;;  %4705 = vmatpush.bf16.msra.mxu3 %v4567_v23  ;;  %v3391_v48 = vadd.f32 %v7756_v5, %v3390_v20  ;;  %v3366_v1 = vand.u32 2147483647, %v7773_v33  ;;  %4986 = vrcp.f32 %v7801_v8  ;;  %v3374_v58 = vsub.f32 1.0, %v3373_v62  ;;  %v7903_v42 = vld [vmem:[#allocation3 + $0x68] sm:$0xff] }
 0x492   : > { %3828 = vperm.xlu1 %4965, %v3750_v24   ;;  %vm3378_vm8 = vweird.f32 %v7803_v10  ;;  %v3368_v0 = vand.u32 2147483648, %v7773_v33  ;;  %vm3242_vm15 = vcmp.gt.f32.partialorder %v7739_v57, 0.0  ;;  %4988 = vrcp.f32 %v7829_v38 }
 0x493   : > { %3121 = vmatpush.bf16.msra.mxu0 %v4566_v45  ;;  %4706 = vmatpush.bf16.msra.mxu1 %v4566_v45  ;;  %v3395_v36 = vsel %vm7814_vm6, %v7756_v5, %v3391_v48  ;;  %v3375_v30 = vmul.f32 %v7803_v10, %v3374_v58  ;;  %vm3241_vm3 = vcmp.gt.f32.partialorder %v7773_v33, 0.0  ;;  %vm7856_vm13 = vmor %vm3377_vm10, %vm3378_vm8  ;;  %vm7860_vm1 = vcmp.eq.f32.partialorder %v3381_v26, 8.507059e+37  ;;  %v4563_v26 = vld [vmem:[%s5235_s17 + $0x68] sm:$0xff] }
 0x494   : > { %3818 = vperm.xlu0 %4964, %v3748_v6   ;;  %4707 = vmatpush.bf16.msra.mxu2 %v4566_v45  ;;  %v4985_v34 = vpop.eup %4984  ;;  %v3400_v52 = vsel %vm7818_vm0, %v3399_v14, %v3395_v36  ;;  %v3384_v4 = vor.u32 1.1754944e-38, %v3383_v17  ;;  %vm3362_vm12 = vweird.f32 %v7773_v33  ;;  %vm7865_vm7 = vcmp.eq.f32.partialorder %v3366_v1, 8.507059e+37  ;;  %v4555_v6 = vld [vmem:[%s5235_s17 + $0x28] sm:$0xff]  ;;  %v7945_v36 = vld [vmem:[#allocation3 + $0x60] sm:$0xff] }
 0x495   : > { %4708 = vmatpush.bf16.msra.mxu3 %v4566_v45  ;;  %v3755_v54 = vsel %vm3243_vm4, %v3400_v52, 0.0  ;;  %v3358_v47 = vmul.f32 %v4985_v34, %v7773_v33  ;;  %v3376_v31 = vadd.f32 %v7803_v10, %v3375_v30  ;;  %vm3363_vm9 = vweird.f32 %v4985_v34 }
 0x496   : > { %3122 = vmatmul.bf16.vlgmr.msra.gmra.mxu0 %v4550_v59  ;;  %3142 = vmatmul.bf16.vlgmr.msra.gmra.mxu1 %v4554_v55  ;;  %v3369_v13 = vor.u32 1.1754944e-38, %v3368_v0  ;;  %vm3246_vm5 = vcmp.gt.f32.partialorder %v7801_v8, 0.0  ;;  %vm3437_vm14 = vweird.f32 %v7801_v8  ;;  %v3441_v29 = vand.u32 2147483647, %v7801_v8  ;;  %vm7885_vm2 = vmor %vm3362_vm12, %vm3363_vm9  ;;  %v4551_v55 = vld [vmem:[%s5235_s17 + $0x8] sm:$0xff] }
 0x497   : > { %3162 = vmatmul.bf16.vlgmr.msra.gmra.mxu2 %v4558_v2  ;;  %v3359_v44 = vsub.f32 1.0, %v3358_v47  ;;  %v4987_v21 = vpop.eup %4986  ;;  %4990 = vrcp.f32 %v7850_v16  ;;  %v3380_v28 = vsel %vm7856_vm13, %v7803_v10, %v3376_v31  ;;  %v3443_v27 = vand.u32 2147483648, %v7801_v8  ;;  %v4559_v2 = vld [vmem:[%s5235_s17 + $0x48] sm:$0xff]  ;;  %v8069_v31 = vld [vmem:[#allocation3 + $0x98] sm:$0xff] }
 0x498   : > { %3182 = vmatmul.bf16.vlgmr.msra.gmra.mxu3 %v4562_v63  ;;  %v3433_v49 = vmul.f32 %v4987_v21, %v7801_v8  ;;  %v4989_v3 = vpop.eup %4988  ;;  %v3385_v60 = vsel %vm7860_vm1, %v3384_v4, %v3380_v28  ;;  %vm3438_vm11 = vweird.f32 %v4987_v21  ;;  %vm3245_vm4 = vcmp.gt.f32.partialorder %v7829_v38, 0.0  ;;  %v7965_v4 = vld [vmem:[#allocation3 + $0x88] sm:$0xff]  ;;  %v7977_v28 = vld [vmem:[#allocation3 + $0x80] sm:$0xff] }
 0x499   : > { %3853 = vperm.xlu2 %4966, %v3755_v54   ;;  %v3360_v41 = vmul.f32 %v4985_v34, %v3359_v44  ;;  %v3426_v23 = vand.u32 2147483647, %v7829_v38  ;;  %v3754_v5 = vsel %vm3242_vm15, %v3385_v60, 0.0  ;;  %v3418_v51 = vmul.f32 %v4989_v3, %v7829_v38  ;;  %vm7910_vm8 = vmor %vm3437_vm14, %vm3438_vm11  ;;  %v4561_v63 = vld [vmem:[%s5235_s17 + $0x58] sm:$0xff] }
 0x49a   : > { %v3434_v15 = vsub.f32 1.0, %v3433_v49  ;;  %3848 = vperm.xlu1 %4965, %v3754_v5   ;;  %vm7894_vm6 = vcmp.eq.f32.partialorder %v3441_v29, 8.507059e+37  ;;  %vm3422_vm0 = vweird.f32 %v7829_v38  ;;  %v3428_v18 = vand.u32 2147483648, %v7829_v38 }
 0x49b   : > { %v3361_v39 = vadd.f32 %v4985_v34, %v3360_v41  ;;  %4992 = vrcp.f32 %v7879_v37  ;;  %v3419_v11 = vsub.f32 1.0, %v3418_v51  ;;  %vm3423_vm10 = vweird.f32 %v4989_v3  ;;  %v7998_v51 = vld [vmem:[#allocation3 + $0x78] sm:$0xff] }
 0x49c   : > { %v3435_v57 = vmul.f32 %v4987_v21, %v3434_v15  ;;  %v3444_v24 = vor.u32 1.1754944e-38, %v3443_v27  ;;  %vm7914_vm15 = vcmp.eq.f32.partialorder %v3426_v23, 8.507059e+37  ;;  %v3411_v45 = vand.u32 2147483647, %v7850_v16  ;;  %vm7924_vm13 = vmor %vm3422_vm0, %vm3423_vm10 }
 0x49d   : > { %v3365_v9 = vsel %vm7885_vm2, %v4985_v34, %v3361_v39  ;;  %v4991_v32 = vpop.eup %4990  ;;  %v3420_v20 = vmul.f32 %v4989_v3, %v3419_v11  ;;  %v3429_v59 = vor.u32 1.1754944e-38, %v3428_v18  ;;  %vm3407_vm1 = vweird.f32 %v7850_v16 }
 0x49e   : > { %v3370_v46 = vsel %vm7865_vm7, %v3369_v13, %v3365_v9  ;;  %v3436_v22 = vadd.f32 %v4987_v21, %v3435_v57  ;;  %v3403_v10 = vmul.f32 %v4991_v32, %v7850_v16  ;;  %v3413_v33 = vand.u32 2147483648, %v7850_v16 }
 0x49f   : > { %v3753_v25 = vsel %vm3241_vm3, %v3370_v46, 0.0  ;;  %4994 = vrcp.f32 %v7903_v42  ;;  %v3421_v7 = vadd.f32 %v4989_v3, %v3420_v20  ;;  %vm3408_vm3 = vweird.f32 %v4991_v32 }
 0x4a0   : > { %3843 = vperm.xlu0 %4964, %v3753_v25   ;;  %v3440_v53 = vsel %vm7910_vm8, %v4987_v21, %v3436_v22  ;;  %v3404_v14 = vsub.f32 1.0, %v3403_v10  ;;  %vm7938_vm12 = vcmp.eq.f32.partialorder %v3411_v45, 8.507059e+37  ;;  %v3486_v17 = vand.u32 2147483647, %v7879_v37  ;;  %vm7957_vm7 = vmor %vm3407_vm1, %vm3408_vm3 }
 0x4a1   : > { %v4993_v48 = vpop.eup %4992  ;;  %v3445_v62 = vsel %vm7894_vm6, %v3444_v24, %v3440_v53  ;;  %v3488_v1 = vand.u32 2147483648, %v7879_v37  ;;  %v3425_v0 = vsel %vm7924_vm13, %v4989_v3, %v3421_v7  ;;  %v3414_v47 = vor.u32 1.1754944e-38, %v3413_v33  ;;  %v8030_v53 = vld [vmem:[#allocation3 + $0xa0] sm:$0xff] }
 0x4a2   : > { %v3758_v58 = vsel %vm3246_vm5, %v3445_v62, 0.0  ;;  %v3405_v34 = vmul.f32 %v4991_v32, %v3404_v14  ;;  %v3478_v52 = vmul.f32 %v4993_v48, %v7879_v37  ;;  %v3430_v54 = vsel %vm7914_vm15, %v3429_v59, %v3425_v0 }
 0x4a3   : > { %3868 = vperm.xlu2 %4966, %v3758_v58   ;;  %vm3482_vm9 = vweird.f32 %v7879_v37  ;;  %vm3483_vm5 = vweird.f32 %v4993_v48  ;;  %v3757_v8 = vsel %vm3245_vm4, %v3430_v54, 0.0  ;;  %4996 = vrcp.f32 %v7945_v36 }
 0x4a4   : > { %v3406_v43 = vadd.f32 %v4991_v32, %v3405_v34  ;;  %v3479_v40 = vsub.f32 1.0, %v3478_v52  ;;  %3863 = vperm.xlu1 %4965, %v3757_v8   ;;  %vm3244_vm14 = vcmp.gt.f32.partialorder %v7850_v16, 0.0  ;;  %vm7968_vm2 = vcmp.eq.f32.partialorder %v3486_v17, 8.507059e+37  ;;  %vm7984_vm4 = vmor %vm3482_vm9, %vm3483_vm5  ;;  %v4564_v17 = vld [vmem:[%s5235_s17 + $0x70] sm:$0xff] }
 0x4a5   : > { %v4995_v61 = vpop.eup %4994  ;;  %v3489_v44 = vor.u32 1.1754944e-38, %v3488_v1  ;;  %vm3467_vm11 = vweird.f32 %v7903_v42  ;;  %v3471_v29 = vand.u32 2147483647, %v7903_v42  ;;  %v3473_v49 = vand.u32 2147483648, %v7903_v42 }
 0x4a6   : > { %3127 = vmatmul.bf16.gmra.mxu0 %v4551_v55  ;;  %3147 = vmatmul.bf16.gmra.mxu1 %v4555_v6  ;;  %v3410_v38 = vsel %vm7957_vm7, %v4991_v32, %v3406_v43  ;;  %v3480_v13 = vmul.f32 %v4993_v48, %v3479_v40  ;;  %v3463_v21 = vmul.f32 %v4995_v61, %v7903_v42  ;;  %v3456_v27 = vand.u32 2147483647, %v7945_v36  ;;  %v4552_v55 = vld [vmem:[%s5235_s17 + $0x10] sm:$0xff] }
 0x4a7   : > { %3167 = vmatmul.bf16.gmra.mxu2 %v4559_v2  ;;  %v3415_v16 = vsel %vm7938_vm12, %v3414_v47, %v3410_v38  ;;  %4998 = vrcp.f32 %v7965_v4  ;;  %vm3468_vm6 = vweird.f32 %v4995_v61  ;;  %vm3249_vm0 = vcmp.gt.f32.partialorder %v7879_v37, 0.0  ;;  %v8109_v37 = vld [vmem:[#allocation3 + $0xb8] sm:$0xff] }
 0x4a8   : > { %3187 = vmatmul.bf16.gmra.mxu3 %v4563_v26  ;;  %v3756_v3 = vsel %vm3244_vm14, %v3415_v16, 0.0  ;;  %v3481_v60 = vadd.f32 %v4993_v48, %v3480_v13  ;;  %v3464_v12 = vsub.f32 1.0, %v3463_v21  ;;  %vm3248_vm10 = vcmp.gt.f32.partialorder %v7903_v42, 0.0  ;;  %vm8004_vm15 = vmor %vm3467_vm11, %vm3468_vm6  ;;  %v4560_v26 = vld [vmem:[%s5235_s17 + $0x50] sm:$0xff] }
 0x4a9   : > { %3858 = vperm.xlu0 %4964, %v3756_v3   ;;  %5000 = vrcp.f32 %v7977_v28  ;;  %v4997_v23 = vpop.eup %4996  ;;  %vm3247_vm8 = vcmp.gt.f32.partialorder %v7945_v36, 0.0  ;;  %v3458_v15 = vand.u32 2147483648, %v7945_v36  ;;  %vm8008_vm13 = vcmp.eq.f32.partialorder %v3471_v29, 8.507059e+37 }
 0x4aa   : > { %v3485_v5 = vsel %vm7984_vm4, %v4993_v48, %v3481_v60  ;;  %v3465_v39 = vmul.f32 %v4995_v61, %v3464_v12  ;;  %v3474_v9 = vor.u32 1.1754944e-38, %v3473_v49  ;;  %v3448_v57 = vmul.f32 %v4997_v23, %v7945_v36  ;;  %v4556_v48 = vld [vmem:[%s5235_s17 + $0x30] sm:$0xff] }
 0x4ab   : > { %v3490_v19 = vsel %vm7968_vm2, %v3489_v44, %v3485_v5  ;;  %vm3452_vm1 = vweird.f32 %v7945_v36  ;;  %vm8014_vm3 = vcmp.eq.f32.partialorder %v3456_v27, 8.507059e+37  ;;  %vm3453_vm12 = vweird.f32 %v4997_v23 }
 0x4ac   : > { %v3761_v11 = vsel %vm3249_vm0, %v3490_v19, 0.0  ;;  %v3466_v32 = vadd.f32 %v4995_v61, %v3465_v39  ;;  %v3449_v24 = vsub.f32 1.0, %v3448_v57  ;;  %vm3252_vm7 = vcmp.gt.f32.partialorder %v7965_v4, 0.0  ;;  %vm8037_vm5 = vmor %vm3452_vm1, %vm3453_vm12 }
 0x4ad   : > { %v4999_v50 = vpop.eup %4998  ;;  %3883 = vperm.xlu2 %4966, %v3761_v11   ;;  %v3531_v56 = vand.u32 2147483647, %v7965_v4  ;;  %5002 = vrcp.f32 %v7998_v51  ;;  %v3459_v25 = vor.u32 1.1754944e-38, %v3458_v15  ;;  %vm3527_vm9 = vweird.f32 %v7965_v4 }
 0x4ae   : > { %v3470_v45 = vsel %vm8004_vm15, %v4995_v61, %v3466_v32  ;;  %v3523_v22 = vmul.f32 %v4999_v50, %v7965_v4  ;;  %v3450_v35 = vmul.f32 %v4997_v23, %v3449_v24  ;;  %v3533_v59 = vand.u32 2147483648, %v7965_v4 }
 0x4af   : > { %v5001_v20 = vpop.eup %5000  ;;  %v3475_v10 = vsel %vm8008_vm13, %v3474_v9, %v3470_v45  ;;  %v3516_v33 = vand.u32 2147483647, %v7977_v28  ;;  %vm3528_vm14 = vweird.f32 %v4999_v50  ;;  %vm8043_vm2 = vcmp.eq.f32.partialorder %v3531_v56, 8.507059e+37 }
 0x4b0   : > { %v3760_v7 = vsel %vm3248_vm10, %v3475_v10, 0.0  ;;  %v3524_v6 = vsub.f32 1.0, %v3523_v22  ;;  %v3508_v2 = vmul.f32 %v5001_v20, %v7977_v28  ;;  %v3451_v62 = vadd.f32 %v4997_v23, %v3450_v35  ;;  %vm8057_vm6 = vmor %vm3527_vm9, %vm3528_vm14 }
 0x4b1   : > { %3878 = vperm.xlu1 %4965, %v3760_v7   ;;  %vm3512_vm11 = vweird.f32 %v7977_v28  ;;  %v3518_v42 = vand.u32 2147483648, %v7977_v28  ;;  %vm3513_vm4 = vweird.f32 %v5001_v20  ;;  %5004 = vrcp.f32 %v8030_v53 }
 0x4b2   : > { %v3525_v1 = vmul.f32 %v4999_v50, %v3524_v6  ;;  %v3509_v58 = vsub.f32 1.0, %v3508_v2  ;;  %v3455_v34 = vsel %vm8037_vm5, %v4997_v23, %v3451_v62  ;;  %v3534_v54 = vor.u32 1.1754944e-38, %v3533_v59  ;;  %vm8076_vm10 = vmor %vm3512_vm11, %vm3513_vm4  ;;  %v8097_v23 = vld [vmem:[#allocation3 + $0x90] sm:$0xff]  ;;  %v4557_v6 = vld [vmem:[%s5235_s17 + $0x38] sm:$0xff] }
 0x4b3   : > { %v5003_v0 = vpop.eup %5002  ;;  %vm8061_vm0 = vcmp.eq.f32.partialorder %v3516_v33, 8.507059e+37  ;;  %v3501_v47 = vand.u32 2147483647, %v7998_v51  ;;  %v3460_v8 = vsel %vm8014_vm3, %v3459_v25, %v3455_v34  ;;  %v3519_v13 = vor.u32 1.1754944e-38, %v3518_v42  ;;  %v8128_v25 = vld [vmem:[#allocation3 + $0xb0] sm:$0xff]  ;;  %v4565_v42 = vld [vmem:[%s5235_s17 + $0x78] sm:$0xff] }
 0x4b4   : > { %v3526_v43 = vadd.f32 %v4999_v50, %v3525_v1  ;;  %v3510_v40 = vmul.f32 %v5001_v20, %v3509_v58  ;;  %v3493_v61 = vmul.f32 %v5003_v0, %v7998_v51  ;;  %v3759_v44 = vsel %vm3247_vm8, %v3460_v8, 0.0  ;;  %v8164_v34 = vld [vmem:[#allocation3 + $0xa8] sm:$0xff] }
 0x4b5   : > { %vm3497_vm15 = vweird.f32 %v7998_v51  ;;  %v3503_v21 = vand.u32 2147483648, %v7998_v51  ;;  %3873 = vperm.xlu0 %4964, %v3759_v44   ;;  %vm3498_vm8 = vweird.f32 %v5003_v0  ;;  %vm3251_vm13 = vcmp.gt.f32.partialorder %v7977_v28, 0.0 }
 0x4b6   : > { %3132 = vmatmul.bf16.gmra.mxu0 %v4552_v55  ;;  %3152 = vmatmul.bf16.gmra.mxu1 %v4556_v48  ;;  %v3530_v29 = vsel %vm8057_vm6, %v4999_v50, %v3526_v43  ;;  %v3511_v36 = vadd.f32 %v5001_v20, %v3510_v40  ;;  %v3494_v16 = vsub.f32 1.0, %v3493_v61  ;;  %vm3250_vm1 = vcmp.gt.f32.partialorder %v7998_v51, 0.0  ;;  %vm8103_vm12 = vmor %vm3497_vm15, %vm3498_vm8  ;;  %v4553_v55 = vld [vmem:[%s5235_s17 + $0x18] sm:$0xff] }
 0x4b7   : > { %3172 = vmatmul.bf16.gmra.mxu2 %v4560_v26  ;;  %v3535_v41 = vsel %vm8043_vm2, %v3534_v54, %v3530_v29  ;;  %5006 = vrcp.f32 %v8069_v31  ;;  %v5005_v49 = vpop.eup %5004  ;;  %vm8093_vm3 = vcmp.eq.f32.partialorder %v3501_v47, 8.507059e+37  ;;  %v3504_v4 = vor.u32 1.1754944e-38, %v3503_v21  ;;  %v8184_v29 = vld [vmem:[#allocation3 + $0xd0] sm:$0xff] }
 0x4b8   : > { %3192 = vmatmul.bf16.gmra.mxu3 %v4564_v17  ;;  %v3764_v27 = vsel %vm3252_vm7, %v3535_v41, 0.0  ;;  %v3515_v3 = vsel %vm8076_vm10, %v5001_v20, %v3511_v36  ;;  %v3495_v60 = vmul.f32 %v5003_v0, %v3494_v16  ;;  %v3568_v15 = vmul.f32 %v5005_v49, %v8030_v53 }
 0x4b9   : > { %3898 = vperm.xlu2 %4966, %v3764_v27   ;;  %v3520_v5 = vsel %vm8061_vm0, %v3519_v13, %v3515_v3  ;;  %v3576_v19 = vand.u32 2147483647, %v8030_v53  ;;  %vm3572_vm7 = vweird.f32 %v8030_v53  ;;  %v3578_v57 = vand.u32 2147483648, %v8030_v53 }
 0x4ba   : > { %v3763_v18 = vsel %vm3251_vm13, %v3520_v5, 0.0  ;;  %v3496_v9 = vadd.f32 %v5003_v0, %v3495_v60  ;;  %v3569_v11 = vsub.f32 1.0, %v3568_v15  ;;  %vm3573_vm9 = vweird.f32 %v5005_v49 }
 0x4bb   : > { %3893 = vperm.xlu1 %4965, %v3763_v18   ;;  %v3561_v32 = vand.u32 2147483647, %v8069_v31  ;;  %5008 = vrcp.f32 %v8097_v23  ;;  %v3563_v50 = vand.u32 2147483648, %v8069_v31  ;;  %vm3255_vm5 = vcmp.gt.f32.partialorder %v8030_v53, 0.0  ;;  %vm8134_vm2 = vmor %vm3572_vm7, %vm3573_vm9 }
 0x4bc   : > { %v3500_v46 = vsel %vm8103_vm12, %v5003_v0, %v3496_v9  ;;  %5010 = vrcp.f32 %v8109_v37  ;;  %v3570_v56 = vmul.f32 %v5005_v49, %v3569_v11  ;;  %vm8124_vm14 = vcmp.eq.f32.partialorder %v3576_v19, 8.507059e+37 }
 0x4bd   : > { %v5007_v28 = vpop.eup %5006  ;;  %v3505_v24 = vsel %vm8093_vm3, %v3504_v4, %v3500_v46  ;;  %v3579_v10 = vor.u32 1.1754944e-38, %v3578_v57  ;;  %v3546_v59 = vand.u32 2147483647, %v8097_v23  ;;  %vm3254_vm11 = vcmp.gt.f32.partialorder %v8069_v31, 0.0  ;;  %v8210_v4 = vld [vmem:[#allocation3 + $0xc8] sm:$0xff] }
 0x4be   : > { %v3762_v22 = vsel %vm3250_vm1, %v3505_v24, 0.0  ;;  %v3553_v35 = vmul.f32 %v5007_v28, %v8069_v31  ;;  %v3571_v33 = vadd.f32 %v5005_v49, %v3570_v56  ;;  %vm3557_vm4 = vweird.f32 %v8069_v31 }
 0x4bf   : > { %3888 = vperm.xlu0 %4964, %v3762_v22   ;;  %vm8142_vm6 = vcmp.eq.f32.partialorder %v3561_v32, 8.507059e+37  ;;  %vm3558_vm0 = vweird.f32 %v5007_v28  ;;  %v3564_v14 = vor.u32 1.1754944e-38, %v3563_v50  ;;  %5012 = vrcp.f32 %v8128_v25  ;;  %v8234_v22 = vld [vmem:[#allocation3 + $0xc0] sm:$0xff] }
 0x4c0   : > { %v3554_v7 = vsub.f32 1.0, %v3553_v35  ;;  %v3575_v48 = vsel %vm8134_vm2, %v5005_v49, %v3571_v33  ;;  %vm3253_vm10 = vcmp.gt.f32.partialorder %v8097_v23, 0.0  ;;  %vm3542_vm15 = vweird.f32 %v8097_v23  ;;  %vm8171_vm1 = vmor %vm3557_vm4, %vm3558_vm0 }
 0x4c1   : > { %v5009_v2 = vpop.eup %5008  ;;  %v3548_v62 = vand.u32 2147483648, %v8097_v23  ;;  %v3580_v17 = vsel %vm8124_vm14, %v3579_v10, %v3575_v48  ;;  %vm8159_vm8 = vcmp.eq.f32.partialorder %v3546_v59, 8.507059e+37  ;;  %vm3258_vm13 = vcmp.gt.f32.partialorder %v8109_v37, 0.0 }
 0x4c2   : > { %v5011_v26 = vpop.eup %5010  ;;  %v3555_v1 = vmul.f32 %v5007_v28, %v3554_v7  ;;  %v3538_v58 = vmul.f32 %v5009_v2, %v8097_v23  ;;  %v3767_v52 = vsel %vm3255_vm5, %v3580_v17, 0.0  ;;  %vm3617_vm3 = vweird.f32 %v8109_v37 }
 0x4c3   : > { %v3613_v30 = vmul.f32 %v5011_v26, %v8109_v37  ;;  %v3621_v47 = vand.u32 2147483647, %v8109_v37  ;;  %3913 = vperm.xlu2 %4966, %v3767_v52   ;;  %vm3543_vm12 = vweird.f32 %v5009_v2  ;;  %v3623_v53 = vand.u32 2147483648, %v8109_v37 }
 0x4c4   : > { %v3556_v8 = vadd.f32 %v5007_v28, %v3555_v1  ;;  %v3539_v43 = vsub.f32 1.0, %v3538_v58  ;;  %v3549_v40 = vor.u32 1.1754944e-38, %v3548_v62  ;;  %vm3618_vm7 = vweird.f32 %v5011_v26  ;;  %vm8191_vm5 = vmor %vm3542_vm15, %vm3543_vm12 }
 0x4c5   : > { %v3614_v61 = vsub.f32 1.0, %v3613_v30  ;;  %5014 = vrcp.f32 %v8164_v34  ;;  %v5013_v44 = vpop.eup %5012  ;;  %vm3602_vm9 = vweird.f32 %v8128_v25  ;;  %v3608_v21 = vand.u32 2147483648, %v8128_v25  ;;  %vm8202_vm14 = vmor %vm3617_vm3, %vm3618_vm7 }
 0x4c6   : > { %3137 = vmatmul.bf16.gmra.mxu0 %v4553_v55  ;;  %3157 = vmatmul.bf16.gmra.mxu1 %v4557_v6  ;;  %v3560_v38 = vsel %vm8171_vm1, %v5007_v28, %v3556_v8  ;;  %v3540_v13 = vmul.f32 %v5009_v2, %v3539_v43  ;;  %v3598_v49 = vmul.f32 %v5013_v44, %v8128_v25  ;;  %v3606_v27 = vand.u32 2147483647, %v8128_v25  ;;  %v8250_v6 = vld [vmem:[#allocation3 + $0xe8] sm:$0xff] }
 0x4c7   : > { %3177 = vmatmul.bf16.gmra.mxu2 %v4561_v63  ;;  %v3565_v36 = vsel %vm8142_vm6, %v3564_v14, %v3560_v38  ;;  %v3615_v41 = vmul.f32 %v5011_v26, %v3614_v61  ;;  %vm8206_vm2 = vcmp.eq.f32.partialorder %v3621_v47, 8.507059e+37  ;;  %v3624_v39 = vor.u32 1.1754944e-38, %v3623_v53 }
 0x4c8   : > { %3197 = vmatmul.bf16.gmra.mxu3 %v4565_v42  ;;  %v3766_v3 = vsel %vm3254_vm11, %v3565_v36, 0.0  ;;  %v3541_v60 = vadd.f32 %v5009_v2, %v3540_v13  ;;  %v3599_v19 = vsub.f32 1.0, %v3598_v49  ;;  %vm3603_vm4 = vweird.f32 %v5013_v44 }
 0x4c9   : > { %3908 = vperm.xlu1 %4965, %v3766_v3   ;;  %v3616_v15 = vadd.f32 %v5011_v26, %v3615_v41  ;;  %5016 = vrcp.f32 %v8184_v29  ;;  %vm3257_vm11 = vcmp.gt.f32.partialorder %v8128_v25, 0.0  ;;  %v3609_v18 = vor.u32 1.1754944e-38, %v3608_v21  ;;  %vm8228_vm6 = vmor %vm3602_vm9, %vm3603_vm4 }
 0x4ca   : > { %v3545_v31 = vsel %vm8191_vm5, %v5009_v2, %v3541_v60  ;;  %v3591_v9 = vand.u32 2147483647, %v8164_v34  ;;  %v3600_v46 = vmul.f32 %v5013_v44, %v3599_v19  ;;  %5018 = vrcp.f32 %v8210_v4 }
 0x4cb   : > { %v5015_v57 = vpop.eup %5014  ;;  %v3550_v11 = vsel %vm8159_vm8, %v3549_v40, %v3545_v31  ;;  %v3620_v32 = vsel %vm8202_vm14, %v5011_v26, %v3616_v15  ;;  %v3593_v45 = vand.u32 2147483648, %v8164_v34  ;;  %vm3607_vm0 = vcmp.eq.f32.partialorder %v3606_v27, 8.507059e+37  ;;  %v8281_v40 = vld [vmem:[#allocation3 + $0xe0] sm:$0xff] }
 0x4cc   : > { %v3765_v50 = vsel %vm3253_vm10, %v3550_v11, 0.0  ;;  %v3625_v28 = vsel %vm8206_vm2, %v3624_v39, %v3620_v32  ;;  %v3583_v56 = vmul.f32 %v5015_v57, %v8164_v34  ;;  %v3601_v20 = vadd.f32 %v5013_v44, %v3600_v46  ;;  %v8326_v11 = vld [vmem:[#allocation3 + $0xf8] sm:$0xff] }
 0x4cd   : > { %3903 = vperm.xlu0 %4964, %v3765_v50   ;;  %v3770_v23 = vsel %vm3258_vm13, %v3625_v28, 0.0  ;;  %v3666_v10 = vand.u32 2147483647, %v8184_v29  ;;  %vm3256_vm10 = vcmp.gt.f32.partialorder %v8164_v34, 0.0  ;;  %vm3587_vm15 = vweird.f32 %v8164_v34 }
 0x4ce   : > { %3928 = vperm.xlu2 %4966, %v3770_v23   ;;  %v3584_v35 = vsub.f32 1.0, %v3583_v56  ;;  %vm3588_vm8 = vweird.f32 %v5015_v57  ;;  %v3605_v33 = vsel %vm8228_vm6, %v5013_v44, %v3601_v20  ;;  %vm8243_vm1 = vcmp.eq.f32.partialorder %v3591_v9, 8.507059e+37 }
 0x4cf   : > { %v5017_v59 = vpop.eup %5016  ;;  %vm3261_vm13 = vcmp.gt.f32.partialorder %v8184_v29, 0.0  ;;  %5020 = vrcp.f32 %v8234_v22  ;;  %v3610_v37 = vsel %vm3607_vm0, %v3609_v18, %v3605_v33  ;;  %v3594_v7 = vor.u32 1.1754944e-38, %v3593_v45  ;;  %vm8254_vm3 = vmor %vm3587_vm15, %vm3588_vm8  ;;  %v8313_v18 = vld [vmem:[#allocation3 + $0xd8] sm:$0xff] }
 0x4d0   : > { %v3585_v55 = vmul.f32 %v5015_v57, %v3584_v35  ;;  %v3658_v14 = vmul.f32 %v5017_v59, %v8184_v29  ;;  %v5019_v2 = vpop.eup %5018  ;;  %v3769_v48 = vsel %vm3257_vm11, %v3610_v37, 0.0  ;;  %vm3662_vm12 = vweird.f32 %v8184_v29 }
 0x4d1   : > { %vm8259_vm7 = vcmp.eq.f32.partialorder %v3666_v10, 8.507059e+37  ;;  %v3668_v42 = vand.u32 2147483648, %v8184_v29  ;;  %3923 = vperm.xlu1 %4965, %v3769_v48   ;;  %vm3663_vm9 = vweird.f32 %v5017_v59  ;;  %v3643_v1 = vmul.f32 %v5019_v2, %v8210_v4 }
 0x4d2   : > { %v3586_v26 = vadd.f32 %v5015_v57, %v3585_v55  ;;  %v3659_v17 = vsub.f32 1.0, %v3658_v14  ;;  %vm3647_vm5 = vweird.f32 %v8210_v4  ;;  %v3651_v25 = vand.u32 2147483647, %v8210_v4  ;;  %vm8275_vm2 = vmor %vm3662_vm12, %vm3663_vm9 }
 0x4d3   : > { %v3653_v58 = vand.u32 2147483648, %v8210_v4  ;;  %5022 = vrcp.f32 %v8250_v6  ;;  %v3644_v54 = vsub.f32 1.0, %v3643_v1  ;;  %vm3648_vm14 = vweird.f32 %v5019_v2 }
 0x4d4   : > { %v3590_v0 = vsel %vm8254_vm3, %v5015_v57, %v3586_v26  ;;  %v3660_v52 = vmul.f32 %v5017_v59, %v3659_v17  ;;  %v3669_v43 = vor.u32 1.1754944e-38, %v3668_v42  ;;  %vm3632_vm4 = vweird.f32 %v8234_v22  ;;  %vm8288_vm11 = vmor %vm3647_vm5, %vm3648_vm14 }
 0x4d5   : > { %v5021_v30 = vpop.eup %5020  ;;  %v3595_v47 = vsel %vm8243_vm1, %v3594_v7, %v3590_v0  ;;  %v3636_v53 = vand.u32 2147483647, %v8234_v22  ;;  %v3645_v38 = vmul.f32 %v5019_v2, %v3644_v54  ;;  %vm8292_vm6 = vcmp.eq.f32.partialorder %v3651_v25, 8.507059e+37 }
 0x4d6   : > { %v3768_v61 = vsel %vm3256_vm10, %v3595_v47, 0.0  ;;  %v3661_v44 = vadd.f32 %v5017_v59, %v3660_v52  ;;  %v3628_v13 = vmul.f32 %v5021_v30, %v8234_v22  ;;  %v3654_v16 = vor.u32 1.1754944e-38, %v3653_v58 }
 0x4d7   : > { %3918 = vperm.xlu0 %4964, %v3768_v61   ;;  %vm3633_vm0 = vweird.f32 %v5021_v30  ;;  %v3638_v34 = vand.u32 2147483648, %v8234_v22  ;;  %v3646_v49 = vadd.f32 %v5019_v2, %v3645_v38  ;;  %5024 = vrcp.f32 %v8281_v40 }
 0x4d8   : > { %v3665_v41 = vsel %vm8275_vm2, %v5017_v59, %v3661_v44  ;;  %v3629_v27 = vsub.f32 1.0, %v3628_v13  ;;  %vm3260_vm10 = vcmp.gt.f32.partialorder %v8210_v4, 0.0  ;;  %vm8303_vm15 = vcmp.eq.f32.partialorder %v3636_v53, 8.507059e+37  ;;  %vm8320_vm8 = vmor %vm3632_vm4, %vm3633_vm0  ;;  %v8344_v59 = vld [vmem:[#allocation3 + $0xf0] sm:$0xff] }
 0x4d9   : > { %v5023_v3 = vpop.eup %5022  ;;  %v3670_v60 = vsel %vm8259_vm7, %v3669_v43, %v3665_v41  ;;  %v3713_v5 = vand.u32 2147483648, %v8250_v6  ;;  %v3650_v15 = vsel %vm8288_vm11, %v5019_v2, %v3646_v49  ;;  %v3639_v29 = vor.u32 1.1754944e-38, %v3638_v34 }
 0x4da   : > { %v3773_v39 = vsel %vm3261_vm13, %v3670_v60, 0.0  ;;  %v3630_v19 = vmul.f32 %v5021_v30, %v3629_v27  ;;  %v3703_v31 = vmul.f32 %v5023_v3, %v8250_v6  ;;  %v3655_v4 = vsel %vm8292_vm6, %v3654_v16, %v3650_v15 }
 0x4db   : > { %3943 = vperm.xlu2 %4966, %v3773_v39   ;;  %vm3707_vm1 = vweird.f32 %v8250_v6  ;;  %v3711_v57 = vand.u32 2147483647, %v8250_v6  ;;  %v3772_v32 = vsel %vm3260_vm10, %v3655_v4, 0.0  ;;  %vm3708_vm13 = vweird.f32 %v5023_v3 }
 0x4dc   : > { %v3631_v46 = vadd.f32 %v5021_v30, %v3630_v19  ;;  %v3704_v50 = vsub.f32 1.0, %v3703_v31  ;;  %3938 = vperm.xlu1 %4965, %v3772_v32   ;;  %vm3259_vm3 = vcmp.gt.f32.partialorder %v8234_v22, 0.0  ;;  %5026 = vrcp.f32 %v8313_v18  ;;  %vm8337_vm12 = vmor %vm3707_vm1, %vm3708_vm13 }
 0x4dd   : > { %v5025_v28 = vpop.eup %5024  ;;  %v3714_v45 = vor.u32 1.1754944e-38, %v3713_v5  ;;  %5028 = vrcp.f32 %v8326_v11  ;;  %v3696_v10 = vand.u32 2147483647, %v8281_v40  ;;  %v3698_v35 = vand.u32 2147483648, %v8281_v40 }
 0x4de   : > { %v3635_v24 = vsel %vm8320_vm8, %v5021_v30, %v3631_v46  ;;  %v3705_v56 = vmul.f32 %v5023_v3, %v3704_v50  ;;  %v3688_v22 = vmul.f32 %v5025_v28, %v8281_v40  ;;  %vm3712_vm7 = vcmp.eq.f32.partialorder %v3711_v57, 8.507059e+37 }
 0x4df   : > { %v3640_v23 = vsel %vm8303_vm15, %v3639_v29, %v3635_v24  ;;  %vm3264_vm9 = vcmp.gt.f32.partialorder %v8250_v6, 0.0  ;;  %vm3692_vm5 = vweird.f32 %v8281_v40  ;;  %vm3693_vm14 = vweird.f32 %v5025_v28 }
 0x4e0   : > { %v3771_v33 = vsel %vm3259_vm3, %v3640_v23, 0.0  ;;  %v3706_v51 = vadd.f32 %v5023_v3, %v3705_v56  ;;  %v3689_v37 = vsub.f32 1.0, %v3688_v22  ;;  %vm3263_vm2 = vcmp.gt.f32.partialorder %v8281_v40, 0.0  ;;  %vm8356_vm11 = vmor %vm3692_vm5, %vm3693_vm14  ;;  %v8412_v22 = vld [vmem:[%s8520_s6] ss:$0 sm:$0xff] }
 0x4e1   : > { %3933 = vperm.xlu0 %4964, %v3771_v33   ;;  %5030 = vrcp.f32 %v8344_v59  ;;  %vm8352_vm4 = vcmp.eq.f32.partialorder %v3696_v10, 8.507059e+37  ;;  %v3699_v62 = vor.u32 1.1754944e-38, %v3698_v35  ;;  %v3681_v17 = vand.u32 2147483647, %v8313_v18  ;;  %v3779_v35 = vld [vmem:[#allocation4 + $0xb0] sm:$0xff]  ;;  %v3780_v33 = vld [vmem:[#allocation4] sm:$0xff] }
 0x4e2   : > { %v3710_v55 = vsel %vm8337_vm12, %v5023_v3, %v3706_v51  ;;  %v5027_v7 = vpop.eup %5026  ;;  %v3690_v2 = vmul.f32 %v5025_v28, %v3689_v37  ;;  %v3683_v1 = vand.u32 2147483648, %v8313_v18  ;;  %vm3262_vm6 = vcmp.gt.f32.partialorder %v8313_v18, 0.0  ;;  %v3787_v51 = vld [vmem:[#allocation4 + $0x80] sm:$0xff] }
 0x4e3   : > { %v3715_v14 = vsel %vm3712_vm7, %v3714_v45, %v3710_v55  ;;  %v5029_v6 = vpop.eup %5028  ;;  %v3673_v26 = vmul.f32 %v5027_v7, %v8313_v18  ;;  %vm3677_vm0 = vweird.f32 %v8313_v18  ;;  %vm3678_vm10 = vweird.f32 %v5027_v7 }
 0x4e4   : > { %v3776_v63 = vsel %vm3264_vm9, %v3715_v14, 0.0  ;;  %v3691_v25 = vadd.f32 %v5025_v28, %v3690_v2  ;;  %v3733_v58 = vmul.f32 %v5029_v6, %v8326_v11  ;;  %vm3737_vm15 = vweird.f32 %v8326_v11  ;;  %vm8381_vm13 = vmor %vm3677_vm0, %vm3678_vm10 }
 0x4e5   : > { %3958 = vperm.xlu2 %4966, %v3776_v63   ;;  %v3674_v0 = vsub.f32 1.0, %v3673_v26  ;;  %v3743_v52 = vand.u32 2147483648, %v8326_v11  ;;  %vm3738_vm8 = vweird.f32 %v5029_v6  ;;  %v3741_v47 = vand.u32 2147483647, %v8326_v11 }
 0x4e6   : > { %v3695_v54 = vsel %vm8356_vm11, %v5025_v28, %v3691_v25  ;;  %v3734_v30 = vsub.f32 1.0, %v3733_v58  ;;  %vm8373_vm1 = vcmp.eq.f32.partialorder %v3681_v17, 8.507059e+37  ;;  %v3684_v44 = vor.u32 1.1754944e-38, %v3683_v1  ;;  %vm3739_vm12 = vmor %vm3737_vm15, %vm3738_vm8 }
 0x4e7   : > { %v5031_v8 = vpop.eup %5030  ;;  %v3700_v43 = vsel %vm8352_vm4, %v3699_v62, %v3695_v54  ;;  %v3675_v53 = vmul.f32 %v5027_v7, %v3674_v0  ;;  %vm3722_vm3 = vweird.f32 %v8344_v59  ;;  %v3744_v34 = vor.u32 1.1754944e-38, %v3743_v52  ;;  %v3788_v62 = vld [vmem:[#allocation4 + $0x88] sm:$0xff] }
 0x4e8   : > { %v3775_v38 = vsel %vm3263_vm2, %v3700_v43, 0.0  ;;  %v3735_v21 = vmul.f32 %v5029_v6, %v3734_v30  ;;  %v3718_v36 = vmul.f32 %v5031_v8, %v8344_v59  ;;  %v3726_v40 = vand.u32 2147483647, %v8344_v59 }
 0x4e9   : > { %3953 = vperm.xlu1 %4965, %v3775_v38   ;;  %v3676_v16 = vadd.f32 %v5027_v7, %v3675_v53  ;;  %v3728_v41 = vand.u32 2147483648, %v8344_v59  ;;  %vm3742_vm7 = vcmp.eq.f32.partialorder %v3741_v47, 8.507059e+37  ;;  %vm3723_vm9 = vweird.f32 %v5031_v8 }
 0x4ea   : > { %v3736_v49 = vadd.f32 %v5029_v6, %v3735_v21  ;;  %v3719_v27 = vsub.f32 1.0, %v3718_v36  ;;  %vm3266_vm5 = vcmp.gt.f32.partialorder %v8326_v11, 0.0  ;;  %vm3724_vm14 = vmor %vm3722_vm3, %vm3723_vm9  ;;  %vm3727_vm2 = vcmp.eq.f32.partialorder %v3726_v40, 8.507059e+37  ;;  %v8401_v11 = vpop.permute.xlu2 %3833  ;;  %v3789_v40 = vld [vmem:[#allocation4 + $0xe8] sm:$0xff] }
 0x4eb   : > { %v3680_v3 = vsel %vm8381_vm13, %v5027_v7, %v3676_v16  ;;  %v3729_v19 = vor.u32 1.1754944e-38, %v3728_v41  ;;  %vm3265_vm4 = vcmp.gt.f32.partialorder %v8344_v59, 0.0  ;;  %v3781_v16 = vld [vmem:[#allocation4 + $0xd8] sm:$0xff] }
 0x4ec   : > { %v3685_v60 = vsel %vm8373_vm1, %v3684_v44, %v3680_v3  ;;  %v3740_v12 = vsel %vm3739_vm12, %v5029_v6, %v3736_v49  ;;  %v3720_v5 = vmul.f32 %v5031_v8, %v3719_v27  ;;  %v3782_v49 = vld [vmem:[#allocation4 + $0x18] sm:$0xff] }
 0x4ed   : > { %v3774_v39 = vsel %vm3262_vm6, %v3685_v60, 0.0  ;;  %v3745_v15 = vsel %vm3742_vm7, %v3744_v34, %v3740_v12  ;;  %v3796_v27 = vld [vmem:[#allocation4 + $0x58] sm:$0xff] }
 0x4ee   : > { %3948 = vperm.xlu0 %4964, %v3774_v39   ;;  %v3778_v31 = vsel %vm3266_vm5, %v3745_v15, 0.0  ;;  %v3721_v4 = vadd.f32 %v5031_v8, %v3720_v5  ;;  %v3790_v5 = vld [vmem:[#allocation4 + $0xb8] sm:$0xff] }
 0x4f0   : > { %v3725_v9 = vsel %vm3724_vm14, %v5031_v8, %v3721_v4 }
 0x4f1   : > { %3968 = vperm.xlu1 %4965, %v3778_v31   ;;  %v3730_v29 = vsel %vm3727_vm2, %v3729_v19, %v3725_v9 }
 0x4f2   : > { %v3777_v57 = vsel %vm3265_vm4, %v3730_v29, 0.0  ;;  %v8403_v46 = vpop.permute.xlu2 %3838 }
 0x4f6   : > { %3963 = vperm.xlu0 %4964, %v3777_v57  }
 0x4fa   : > { %v3854_v24 = vpop.permute.xlu2 %3853 }
 0x4fb   : > { %v3979_v26 = vmul.f32 %v3854_v24, %v3787_v51 }
 0x4fc   : > { %v3824_v18 = vpop.permute.xlu1 %3823 }
 0x4fd   : > { %v3973_v39 = vmul.f32 %v3824_v18, %v3781_v16 }
 0x4fe   : > { %v3814_v32 = vpop.permute.xlu0 %3813 }
 0x4ff   : > { %v3971_v37 = vmul.f32 %v3814_v32, %v3779_v35 }
 0x502   : > { %v3869_v10 = vpop.permute.xlu2 %3868 }
 0x504   : > { %v3829_v50 = vpop.permute.xlu1 %3828 }
 0x505   : > { %v3974_v4 = vmul.f32 %v3829_v50, %v3782_v49 }
 0x506   : > { %v3819_v28 = vpop.permute.xlu0 %3818 }
 0x507   : > { %v3972_v2 = vmul.f32 %v3819_v28, %v3780_v33  ;;  %v3982_v28 = vmul.f32 %v3869_v10, %v3790_v5 }
 0x50a   : > { %v8420_v54 = vpop.permute.xlu2 %3883 }
 0x50c   : > { %v8405_v56 = vpop.permute.xlu1 %3848 }
 0x512   : > { %v8407_v20 = vpop.permute.xlu0 %3843 }
 0x513   : > { %v3123_v45 = vpop.f32.mrf.mxu0  ;;  %v3143_v23 = vpop.f32.mrf.mxu1 }
 0x514   : > { %v3124_v59 = vadd.f32 %v8412_v22, %v3123_v45  ;;  %v3144_v7 = vadd.f32 %v8412_v22, %v3143_v23  ;;  %v3899_v3 = vpop.permute.xlu2 %3898  ;;  %v3795_v45 = vld [vmem:[#allocation4 + $0x38] sm:$0xff] }
 0x515   : > { %v3988_v9 = vmul.f32 %v3899_v3, %v3796_v27 }
 0x516   : > { %v3864_v48 = vpop.permute.xlu1 %3863  ;;  %v4003_v6 = vadd.f32 %v3971_v37, %v3124_v59  ;;  %v4011_v52 = vadd.f32 %v3979_v26, %v3144_v7 }
 0x517   : > { %v3981_v19 = vmul.f32 %v3864_v48, %v3789_v40 }
 0x518   : > { %v4035_v30 = vmax.f32 %v4003_v6, 0.0  ;;  %v4043_v61 = vmax.f32 %v4011_v52, 0.0  ;;  %v3783_v52 = vld [vmem:[#allocation4 + $0x50] sm:$0xff] }
 0x51a   : > { %v3163_v55 = vpop.f32.mrf.mxu2 }
 0x51b   : > { %v3125_v14 = vpop.f32.mrf.mxu0  ;;  %v3145_v42 = vpop.f32.mrf.mxu1  ;;  %v3164_v37 = vadd.f32 %v8412_v22, %v3163_v55 }
 0x51c   : > { %v3126_v63 = vadd.f32 %v8412_v22, %v3125_v14  ;;  %v3146_v17 = vadd.f32 %v8412_v22, %v3145_v42  ;;  %v3859_v1 = vpop.permute.xlu0 %3858  ;;  %v8418_v25 = vpop.f32.mrf.mxu3 }
 0x51d   : > { %v3980_v0 = vmul.f32 %v3859_v1, %v3788_v62 }
 0x51e   : > { %v4004_v58 = vadd.f32 %v3972_v2, %v3126_v63 }
 0x51f   : > { %v4012_v8 = vadd.f32 %v3980_v0, %v3146_v17 }
 0x520   : > { %v4036_v47 = vmax.f32 %v4004_v58, 0.0 }
 0x521   : > { %v4044_v44 = vmax.f32 %v4012_v8, 0.0  ;;  %v3914_v8 = vpop.permute.xlu2 %3913 }
 0x522   : > { %v4577_v43 = vpack.c.bf16 %v4036_v47, %v4035_v30  ;;  %v3165_v53 = vpop.f32.mrf.mxu2  ;;  %v3791_v30 = vld [vmem:[#allocation4 + $0x60] sm:$0xff]  ;;  %v3784_v47 = vld [vmem:[#allocation4 + $0x68] sm:$0xff] }
 0x523   : > { %v3128_v38 = vpop.f32.mrf.mxu0  ;;  %v3148_v13 = vpop.f32.mrf.mxu1  ;;  %v4597_v21 = vpack.c.bf16 %v4044_v44, %v4043_v61  ;;  %v3166_v15 = vadd.f32 %v8412_v22, %v3165_v53  ;;  %v3976_v40 = vmul.f32 %v8403_v46, %v3784_v47 }
 0x524   : > { %4578 = vst [vmem:[%s5240_s1] sm:$0xff] %v4577_v43   ;;  %v8423_v36 = vpop.permute.xlu1 %3878  ;;  %v8426_v34 = vpop.f32.mrf.mxu3  ;;  %v3129_v41 = vadd.f32 %v8412_v22, %v3128_v38  ;;  %v3149_v60 = vadd.f32 %v8412_v22, %v3148_v13  ;;  %v3792_v43 = vld [vmem:[#allocation4 + $0xf0] sm:$0xff]  ;;  %v3975_v38 = vmul.f32 %v8401_v11, %v3783_v52 }
 0x525   : > { %4657 = vst [vmem:[%s5240_s1 + $0x20] sm:$0xff] %v4597_v21   ;;  %v4020_v59 = vadd.f32 %v3988_v9, %v3166_v15  ;;  %v3798_v21 = vld [vmem:[#allocation4 + $0xc8] sm:$0xff] }
 0x526   : > { %v4005_v29 = vadd.f32 %v3973_v39, %v3129_v41  ;;  %v4013_v23 = vadd.f32 %v3981_v19, %v3149_v60  ;;  %v3984_v41 = vmul.f32 %v8423_v36, %v3792_v43 }
 0x527   : > { %v3874_v24 = vpop.permute.xlu0 %3873  ;;  %v4052_v63 = vmax.f32 %v4020_v59, 0.0 }
 0x528   : > { %v4037_v7 = vmax.f32 %v4005_v29, 0.0  ;;  %v4045_v2 = vmax.f32 %v4013_v23, 0.0  ;;  %v3983_v13 = vmul.f32 %v3874_v24, %v3791_v30 }
 0x52a   : > { %v8430_v12 = vpop.f32.mrf.mxu2 }
 0x52b   : > { %v3130_v31 = vpop.f32.mrf.mxu0  ;;  %v3150_v32 = vpop.f32.mrf.mxu1  ;;  %v3169_v46 = vadd.f32 %v8412_v22, %v8430_v12 }
 0x52c   : > { %v3131_v57 = vadd.f32 %v8412_v22, %v3130_v31  ;;  %v3151_v35 = vadd.f32 %v8412_v22, %v3150_v32  ;;  %v8436_v48 = vpop.f32.mrf.mxu3  ;;  %v3797_v31 = vld [vmem:[#allocation4 + $0x40] sm:$0xff] }
 0x52d   : > { %v3894_v18 = vpop.permute.xlu1 %3893 }
 0x52e   : > { %v4006_v33 = vadd.f32 %v3974_v4, %v3131_v57  ;;  %v4014_v51 = vadd.f32 %v3982_v28, %v3151_v35  ;;  %v3987_v50 = vmul.f32 %v3894_v18, %v3795_v45  ;;  %v3929_v35 = vpop.permute.xlu2 %3928 }
 0x530   : > { %v4038_v14 = vmax.f32 %v4006_v33, 0.0  ;;  %v4046_v10 = vmax.f32 %v4014_v51, 0.0  ;;  %v4019_v6 = vadd.f32 %v3987_v50, %v3164_v37 }
 0x531   : > { %v8440_v0 = vpop.permute.xlu0 %3888 }
 0x532   : > { %v3170_v62 = vpop.f32.mrf.mxu2  ;;  %v4582_v42 = vpack.c.bf16 %v4038_v14, %v4037_v7  ;;  %v4602_v26 = vpack.c.bf16 %v4046_v10, %v4045_v2  ;;  %v4051_v17 = vmax.f32 %v4019_v6, 0.0  ;;  %v3799_v14 = vld [vmem:[#allocation4 + $0xe0] sm:$0xff]  ;;  %v3793_v10 = vld [vmem:[#allocation4 + $0x8] sm:$0xff] }
 0x533   : > { %v3133_v1 = vpop.f32.mrf.mxu0  ;;  %v3153_v58 = vpop.f32.mrf.mxu1  ;;  %v3171_v49 = vadd.f32 %v8412_v22, %v3170_v62  ;;  %v3785_v62 = vld [vmem:[#allocation4 + $0x30] sm:$0xff]  ;;  %v3985_v47 = vmul.f32 %v8420_v54, %v3793_v10  ;;  %v3808_v10 = vld [vmem:[#allocation4 + $0xf8] sm:$0xff] }
 0x534   : > { %4654 = vst [vmem:[%s5240_s1 + $0x8] sm:$0xff] %v4582_v42   ;;  %v4617_v55 = vpack.c.bf16 %v4052_v63, %v4051_v17  ;;  %v3134_v53 = vadd.f32 %v8412_v22, %v3133_v1  ;;  %v3154_v61 = vadd.f32 %v8412_v22, %v3153_v58  ;;  %v8446_v16 = vpop.f32.mrf.mxu3  ;;  %v3786_v42 = vld [vmem:[#allocation4 + $0x48] sm:$0xff]  ;;  %v3800_v17 = vld [vmem:[#allocation4 + $0x90] sm:$0xff]  ;;  %v3977_v43 = vmul.f32 %v8407_v20, %v3785_v62 }
 0x535   : > { %4658 = vst [vmem:[%s5240_s1 + $0x28] sm:$0xff] %v4602_v26   ;;  %v3794_v26 = vld [vmem:[#allocation4 + $0x78] sm:$0xff]  ;;  %v3804_v20 = vld [vmem:[#allocation4 + $0xd0] sm:$0xff] }
 0x536   : > { %4661 = vst [vmem:[%s5240_s1 + $0x40] sm:$0xff] %v4617_v55   ;;  %v4007_v5 = vadd.f32 %v3975_v38, %v3134_v53  ;;  %v4015_v39 = vadd.f32 %v3983_v13, %v3154_v61  ;;  %v3991_v55 = vmul.f32 %v3914_v8, %v3799_v14  ;;  %v3978_v61 = vmul.f32 %v8405_v56, %v3786_v42 }
 0x538   : > { %v4039_v57 = vmax.f32 %v4007_v5, 0.0  ;;  %v4047_v32 = vmax.f32 %v4015_v39, 0.0  ;;  %v3802_v5 = vld [vmem:[#allocation4 + $0xc0] sm:$0xff] }
 0x53a   : > { %v3173_v44 = vpop.f32.mrf.mxu2 }
 0x53b   : > { %v3135_v27 = vpop.f32.mrf.mxu0  ;;  %v3155_v3 = vpop.f32.mrf.mxu1  ;;  %v3174_v63 = vadd.f32 %v8412_v22, %v3173_v44  ;;  %v3986_v44 = vmul.f32 %v8440_v0, %v3794_v26 }
 0x53c   : > { %v3909_v60 = vpop.permute.xlu1 %3908  ;;  %v3136_v15 = vadd.f32 %v8412_v22, %v3135_v27  ;;  %v3156_v19 = vadd.f32 %v8412_v22, %v3155_v3  ;;  %v8455_v7 = vpop.f32.mrf.mxu3 }
 0x53d   : > { %v3990_v11 = vmul.f32 %v3909_v60, %v3798_v21  ;;  %v4023_v13 = vadd.f32 %v3991_v55, %v3174_v63  ;;  %v3944_v60 = vpop.permute.xlu2 %3943 }
 0x53e   : > { %v4008_v4 = vadd.f32 %v3976_v40, %v3136_v15  ;;  %v4016_v9 = vadd.f32 %v3984_v41, %v3156_v19  ;;  %v3801_v41 = vld [vmem:[#allocation4 + $0x70] sm:$0xff] }
 0x53f   : > { %v4022_v29 = vadd.f32 %v3990_v11, %v3171_v49  ;;  %v3904_v36 = vpop.permute.xlu0 %3903  ;;  %v4055_v11 = vmax.f32 %v4023_v13, 0.0 }
 0x540   : > { %v4040_v28 = vmax.f32 %v4008_v4, 0.0  ;;  %v4048_v24 = vmax.f32 %v4016_v9, 0.0  ;;  %v3989_v45 = vmul.f32 %v3904_v36, %v3797_v31 }
 0x541   : > { %v4054_v51 = vmax.f32 %v4022_v29, 0.0 }
 0x542   : > { %v3175_v23 = vpop.f32.mrf.mxu2  ;;  %v4587_v59 = vpack.c.bf16 %v4040_v28, %v4039_v57  ;;  %v4607_v33 = vpack.c.bf16 %v4048_v24, %v4047_v32  ;;  %v4021_v18 = vadd.f32 %v3989_v45, %v3169_v46  ;;  %v3994_v57 = vmul.f32 %v3929_v35, %v3802_v5 }
 0x543   : > { %v3138_v37 = vpop.f32.mrf.mxu0  ;;  %v3158_v50 = vpop.f32.mrf.mxu1  ;;  %v3176_v52 = vadd.f32 %v8412_v22, %v3175_v23  ;;  %v3186_v32 = vadd.f32 %v8412_v22, %v8426_v34  ;;  %v3803_v23 = vld [vmem:[#allocation4 + $0xa8] sm:$0xff]  ;;  %v3184_v35 = vadd.f32 %v8412_v22, %v8418_v25 }
 0x544   : > { %4655 = vst [vmem:[%s5240_s1 + $0x10] sm:$0xff] %v4587_v59   ;;  %v4053_v12 = vmax.f32 %v4021_v18, 0.0  ;;  %v3924_v2 = vpop.permute.xlu1 %3923  ;;  %v3139_v1 = vadd.f32 %v8412_v22, %v3138_v37  ;;  %v3159_v58 = vadd.f32 %v8412_v22, %v3158_v50  ;;  %v3195_v39 = vpop.f32.mrf.mxu3 }
 0x545   : > { %4659 = vst [vmem:[%s5240_s1 + $0x30] sm:$0xff] %v4607_v33   ;;  %v3993_v19 = vmul.f32 %v3924_v2, %v3801_v41  ;;  %v3959_v62 = vpop.permute.xlu2 %3958  ;;  %v3196_v42 = vadd.f32 %v8412_v22, %v3195_v39 }
 0x546   : > { %v4622_v6 = vpack.c.bf16 %v4054_v51, %v4053_v12  ;;  %v4009_v49 = vadd.f32 %v3977_v43, %v3139_v1  ;;  %v4017_v8 = vadd.f32 %v3985_v47, %v3159_v58  ;;  %v4000_v58 = vmul.f32 %v3959_v62, %v3808_v10  ;;  %v3805_v47 = vld [vmem:[#allocation4 + $0x10] sm:$0xff] }
 0x547   : > { %v3194_v43 = vadd.f32 %v8412_v22, %v8455_v7  ;;  %v3810_v7 = vld [vmem:[#allocation4 + $0x98] sm:$0xff] }
 0x548   : > { %4662 = vst [vmem:[%s5240_s1 + $0x48] sm:$0xff] %v4622_v6   ;;  %v4041_v9 = vmax.f32 %v4009_v49, 0.0  ;;  %v4049_v46 = vmax.f32 %v4017_v8, 0.0 }
 0x549   : > { %v3919_v53 = vpop.permute.xlu0 %3918 }
 0x54a   : > { %v3178_v30 = vpop.f32.mrf.mxu2  ;;  %v3992_v38 = vmul.f32 %v3919_v53, %v3800_v17 }
 0x54b   : > { %v3140_v21 = vpop.f32.mrf.mxu0  ;;  %v3160_v40 = vpop.f32.mrf.mxu1  ;;  %v3179_v56 = vadd.f32 %v8412_v22, %v3178_v30  ;;  %v4032_v30 = vadd.f32 %v4000_v58, %v3196_v42 }
 0x54c   : > { %v3141_v27 = vadd.f32 %v8412_v22, %v3140_v21  ;;  %v3161_v3 = vadd.f32 %v8412_v22, %v3160_v40  ;;  %v4024_v54 = vadd.f32 %v3992_v38, %v3176_v52  ;;  %v3198_v26 = vpop.f32.mrf.mxu3  ;;  %v3807_v52 = vld [vmem:[#allocation4 + $0xa0] sm:$0xff]  ;;  %v3806_v38 = vld [vmem:[#allocation4 + $0x28] sm:$0xff]  ;;  %v3997_v21 = vmul.f32 %v3944_v60, %v3805_v47 }
 0x54d   : > { %v4025_v59 = vadd.f32 %v3993_v19, %v3179_v56  ;;  %v4064_v13 = vmax.f32 %v4032_v30, 0.0  ;;  %v3199_v19 = vadd.f32 %v8412_v22, %v3198_v26 }
 0x54e   : > { %v4010_v15 = vadd.f32 %v3978_v61, %v3141_v27  ;;  %v4018_v0 = vadd.f32 %v3986_v44, %v3161_v3  ;;  %v4056_v31 = vmax.f32 %v4024_v54, 0.0  ;;  %v3939_v4 = vpop.permute.xlu1 %3938  ;;  %v3189_v61 = vadd.f32 %v8412_v22, %v8436_v48 }
 0x54f   : > { %v3996_v28 = vmul.f32 %v3939_v4, %v3804_v20  ;;  %v4057_v14 = vmax.f32 %v4025_v59, 0.0  ;;  %v3191_v27 = vadd.f32 %v8412_v22, %v8446_v16 }
 0x550   : > { %v4042_v29 = vmax.f32 %v4010_v15, 0.0  ;;  %v4050_v36 = vmax.f32 %v4018_v0, 0.0  ;;  %v4627_v24 = vpack.c.bf16 %v4056_v31, %v4055_v11  ;;  %v4029_v8 = vadd.f32 %v3997_v21, %v3189_v61  ;;  %v3809_v15 = vld [vmem:[#allocation4 + $0x20] sm:$0xff] }
 0x551   : > { %v4028_v37 = vadd.f32 %v3996_v28, %v3186_v32 }
 0x552   : > { %v3180_v45 = vpop.f32.mrf.mxu2  ;;  %v4592_v33 = vpack.c.bf16 %v4042_v29, %v4041_v9  ;;  %v4612_v18 = vpack.c.bf16 %v4050_v36, %v4049_v46  ;;  %4663 = vst [vmem:[%s5240_s1 + $0x50] sm:$0xff] %v4627_v24   ;;  %v4061_v39 = vmax.f32 %v4029_v8, 0.0 }
 0x553   : > { %v3181_v51 = vadd.f32 %v8412_v22, %v3180_v45  ;;  %v3934_v50 = vpop.permute.xlu0 %3933  ;;  %v4060_v6 = vmax.f32 %v4028_v37, 0.0 }
 0x554   : > { %4656 = vst [vmem:[%s5240_s1 + $0x18] sm:$0xff] %v4592_v33   ;;  %v3995_v34 = vmul.f32 %v3934_v50, %v3803_v23  ;;  %v3200_v49 = vpop.f32.mrf.mxu3 }
 0x555   : > { %v4026_v12 = vadd.f32 %v3994_v57, %v3181_v51  ;;  %4660 = vst [vmem:[%s5240_s1 + $0x38] sm:$0xff] %v4612_v18   ;;  %v3201_v48 = vadd.f32 %v8412_v22, %v3200_v49 }
 0x556   : > { %v4027_v63 = vadd.f32 %v3995_v34, %v3184_v35 }
 0x557   : > { %v4058_v2 = vmax.f32 %v4026_v12, 0.0 }
 0x558   : > { %v4059_v1 = vmax.f32 %v4027_v63, 0.0 }
 0x559   : > { %v4632_v17 = vpack.c.bf16 %v4058_v2, %v4057_v14 }
 0x55a   : > { %v4637_v55 = vpack.c.bf16 %v4060_v6, %v4059_v1 }
 0x55b   : > { %4664 = vst [vmem:[%s5240_s1 + $0x58] sm:$0xff] %v4632_v17   ;;  %v3954_v25 = vpop.permute.xlu1 %3953 }
 0x55c   : > { %4665 = vst [vmem:[%s5240_s1 + $0x60] sm:$0xff] %v4637_v55   ;;  %v3999_v53 = vmul.f32 %v3954_v25, %v3807_v52 }
 0x55e   : > { %v4031_v44 = vadd.f32 %v3999_v53, %v3194_v43 }
 0x560   : > { %v4063_v40 = vmax.f32 %v4031_v44, 0.0  ;;  %v3949_v41 = vpop.permute.xlu0 %3948 }
 0x561   : > { %v3998_v3 = vmul.f32 %v3949_v41, %v3806_v38 }
 0x562   : > { %v4647_v54 = vpack.c.bf16 %v4064_v13, %v4063_v40 }
 0x563   : > { %v4030_v5 = vadd.f32 %v3998_v3, %v3191_v27  ;;  %v3969_v20 = vpop.permute.xlu1 %3968 }
 0x564   : > { %4667 = vst [vmem:[%s5240_s1 + $0x70] sm:$0xff] %v4647_v54   ;;  %v4002_v60 = vmul.f32 %v3969_v20, %v3810_v7 }
 0x565   : > { %v4062_v56 = vmax.f32 %v4030_v5, 0.0 }
 0x566   : > { %v4034_v11 = vadd.f32 %v4002_v60, %v3201_v48 }
 0x567   : > { %v4642_v0 = vpack.c.bf16 %v4062_v56, %v4061_v39 }
 0x568   : > { %v3964_v31 = vpop.permute.xlu0 %3963  ;;  %v4066_v9 = vmax.f32 %v4034_v11, 0.0 }
 0x569   : > { %4666 = vst [vmem:[%s5240_s1 + $0x68] sm:$0xff] %v4642_v0   ;;  %v4001_v16 = vmul.f32 %v3964_v31, %v3809_v15 }
 0x56b   : > { %v4033_v4 = vadd.f32 %v4001_v16, %v3199_v19 }
 0x56d   : > { %v4065_v46 = vmax.f32 %v4033_v4, 0.0 }
 0x56f   : > { %v4652_v29 = vpack.c.bf16 %v4066_v9, %v4065_v46 }
 0x571   : > { %4668 = vst [vmem:[%s5240_s1 + $0x78] sm:$0xff] %v4652_v29  }
 0x572 PF: > { %s17_s30 = sadd.s32 1, %s5086_s30   ;;  %s9558_s9 = sld [smem:[#allocation6_spill]] }
 0x573   : > { %p14_p1 = scmp.ge.s32.totalorder %s17_s30, 6   ;;  %s9559_s8 = sld [smem:[#allocation7_spill]] }
 0x574   : > { %s9560_s24 = smov %s5066_s25  ;;  %s9561_s25 = smov %s5183_s14 }
 0x575   : > { %s9562_s26 = smov %s5078_s28  ;;  %s9563_s27 = smov %s5082_s29 }
 0x576   :  { %16 = sbr.rel (!%p14_p1) target bundleno = 7 (0x7), region = 126 }
 0x578   : > { %s9564_s28 = smov %s9558_s9 }
 0x579   : > { %s9565_s29 = smov %s9559_s8 }

// kernel: gat_forward.3
= control target key start
LH: loop header
LB: loop body
LE: loop exit
PB: predicated region body
PF: predicated region fallthrough
CT: control target
= control target key end

     0   :  { %s8371_s0 = inlined_call_operand.vmem [shape: s8[512,512], index: 0, kind: input, shape index: {}]   ;;  %s8372_s1 = inlined_call_operand.vmem [shape: bf16[512,128], index: 1, kind: input, shape index: {}]   ;;  %s8373_s2 = inlined_call_operand.vmem [shape: f32[1,512], index: 2, kind: input, shape index: {}]   ;;  %s8374_s3 = inlined_call_operand.vmem [shape: f32[512,1], index: 3, kind: input, shape index: {}]   ;;  %s8375_s4 = inlined_call_operand.vmem [shape: bf16[512,128], index: 4, kind: input, shape index: {}]   ;;  %s8376_s5 = inlined_call_operand.vmem [shape: bf16[128,128], index: 5, kind: input, shape index: {}]   ;;  %s8377_s6 = inlined_call_operand.vmem [shape: f32[1,128], index: 6, kind: input, shape index: {}]   ;;  %s8378_s7 = inlined_call_operand.vmem [shape: f32[512,128], index: 7, kind: output, shape index: {}]  }
   0x1   :  { %8702 = sst [smem:[#allocation167_spill]] %s8371_s0 }
   0x2   :  { %8703 = sst [smem:[#allocation168_spill]] %s8372_s1 }
   0x3   :  { %s4973_s24 = smov 0   ;;  %s4975_s25 = smov 0  }
   0x4   :  { %s4977_s26 = smov 0   ;;  %s4979_s27 = smov 0  }
   0x5   :  { %s4981_s28 = smov 0   ;;  %s4983_s29 = smov 0  }
   0x6   :  { %s4985_s30 = smov 0  }
   0x7 LB: > { %s26_s8 = sadd.s32 1, %s4919_s28  ;;  %s29_s9 = sadd.s32 1, %s4923_s29  ;;  %s4927_s30 = sphi %s4985_s30, %s17_s30   ;;  %s4923_s29 = sphi %s4983_s29, %s9422_s29   ;;  %s4919_s28 = sphi %s4981_s28, %s9421_s28   ;;  %s4915_s27 = sphi %s4979_s27, %s9420_s27   ;;  %s4911_s26 = sphi %s4977_s26, %s9419_s26   ;;  %s4907_s25 = sphi %s4975_s25, %s9418_s25   ;;  %s4903_s24 = sphi %s4973_s24, %s9417_s24  }
   0x8   : > { %p27_p0 = scmp.ge.s32.totalorder %s26_s8, 2  ;;  %p45_p1 = scmp.ne.s32.totalorder %s4907_s25, %s4903_s24 }
   0x9   : > { %p46_p2 = scmp.eq.s32.totalorder %s4927_s30, 0  ;;  %s38_s13 = sadd.s32 1, %s4907_s25 }
   0xa   : > { %s9424_s8 = smov (%p27_p0, %s26_s8), 0  ;;  %s9426_s9 = smov (!%p27_p0, %s29_s9), %s4923_s29 }
   0xb   : > { %8704 = sst [smem:[#allocation6_spill]] %s9424_s8  ;;  %p47_p3 = por %p46_p2, %p45_p1 }
   0xc   : > { %p31_p4 = scmp.ge.s32.totalorder %s9426_s9, 2  ;;  %s34_s10 = ssub.s32 %s4919_s28, %s9424_s8 }
   0xd   : > { %p4192_p6 = scmp.ge.s32.totalorder %s4927_s30, 4 }
   0xe   : > { %s9428_s9 = smov (%p31_p4, %s9426_s9), 0 }
   0xf   : > { %8705 = sst [smem:[#allocation7_spill]] %s9428_s9  ;;  %s33_s11 = ssub.s32 %s4923_s29, %s9428_s9 }
  0x10   : > { %s35_s12 = sor.u32 %s34_s10, %s33_s11  ;;  %249 = sbr.rel (%p4192_p6) target bundleno = 47 (0x2f), region = 24 }
  0x11   : > { %p36_p5 = scmp.eq.s32.totalorder %s35_s12, 0 }
  0x13   : > { %s5024_s14 = scalar_select %p36_p5, %s4907_s25, %s38_s13  }
  0x15   : > { %252 = sbr.rel (!%p47_p3) target bundleno = 47 (0x2f), region = 28  ;;  %s254_s15 = sand.u32 (%p47_p3), 1, %s4907_s25  }
  0x16   : > { %s4195_s16 = sshll.u32 (%p47_p3), %s4919_s28, 1  ;;  %s4193_s17 = sshll.u32 (%p47_p3), %s254_s15, 7 }
  0x17   : > { %s4469_s18 = sshll.u32 (%p47_p3), %s4923_s29, 5  ;;  %s8706_s0 = sld [smem:[#allocation167_spill]] (%p47_p3) }
  0x18   : > { %s260_s19 = sadd.s32 (%p47_p3), %s4469_s18, %s4195_s16  ;;  %s256_s10 = scalar_lea.vmem (%p47_p3), [#allocation5], %s4193_s17 }
  0x19   : > { %s4197_s20 = sshll.u32 (%p47_p3), %s260_s19, 3 }
  0x1d   : > { %s5033_s23 = scalar_lea.vmem %s8706_s0, %s4197_s20 }
  0x1e   : > { %v275_v0 = vld [vmem:[%s5033_s23] sm:$0xff]  ;;  %v277_v1 = vld [vmem:[%s5033_s23 + $0x8] sm:$0xff] }
  0x1f   : > { %v279_v2 = vld [vmem:[%s5033_s23 + $0x20] sm:$0xff]  ;;  %276 = vst [vmem:[%s256_s10] sm:$0xff] %v275_v0  ;;  %v281_v3 = vld [vmem:[%s5033_s23 + $0x28] sm:$0xff] }
  0x20   : > { %278 = vst [vmem:[%s256_s10 + $0x8] sm:$0xff] %v277_v1  ;;  %v283_v4 = vld [vmem:[%s5033_s23 + $0x40] sm:$0xff]  ;;  %v285_v5 = vld [vmem:[%s5033_s23 + $0x48] sm:$0xff] }
  0x21   : > { %280 = vst [vmem:[%s256_s10 + $0x10] sm:$0xff] %v279_v2  ;;  %v287_v6 = vld [vmem:[%s5033_s23 + $0x60] sm:$0xff]  ;;  %v289_v7 = vld [vmem:[%s5033_s23 + $0x68] sm:$0xff] }
  0x22   : > { %282 = vst [vmem:[%s256_s10 + $0x18] sm:$0xff] %v281_v3  ;;  %v291_v8 = vld [vmem:[%s5033_s23 + $0x80] sm:$0xff]  ;;  %v293_v9 = vld [vmem:[%s5033_s23 + $0x88] sm:$0xff] }
  0x23   : > { %284 = vst [vmem:[%s256_s10 + $0x20] sm:$0xff] %v283_v4  ;;  %v295_v10 = vld [vmem:[%s5033_s23 + $0xa0] sm:$0xff]  ;;  %v297_v11 = vld [vmem:[%s5033_s23 + $0xa8] sm:$0xff] }
  0x24   : > { %286 = vst [vmem:[%s256_s10 + $0x28] sm:$0xff] %v285_v5  ;;  %v299_v12 = vld [vmem:[%s5033_s23 + $0xc0] sm:$0xff]  ;;  %v301_v13 = vld [vmem:[%s5033_s23 + $0xc8] sm:$0xff] }
  0x25   : > { %288 = vst [vmem:[%s256_s10 + $0x30] sm:$0xff] %v287_v6  ;;  %v303_v14 = vld [vmem:[%s5033_s23 + $0xe0] sm:$0xff]  ;;  %v305_v15 = vld [vmem:[%s5033_s23 + $0xe8] sm:$0xff] }
  0x26   : > { %290 = vst [vmem:[%s256_s10 + $0x38] sm:$0xff] %v289_v7 }
  0x27   : > { %292 = vst [vmem:[%s256_s10 + $0x40] sm:$0xff] %v291_v8 }
  0x28   : > { %294 = vst [vmem:[%s256_s10 + $0x48] sm:$0xff] %v293_v9 }
  0x29   : > { %296 = vst [vmem:[%s256_s10 + $0x50] sm:$0xff] %v295_v10 }
  0x2a   : > { %298 = vst [vmem:[%s256_s10 + $0x58] sm:$0xff] %v297_v11 }
  0x2b   : > { %300 = vst [vmem:[%s256_s10 + $0x60] sm:$0xff] %v299_v12 }
  0x2c   : > { %302 = vst [vmem:[%s256_s10 + $0x68] sm:$0xff] %v301_v13 }
  0x2d   : > { %304 = vst [vmem:[%s256_s10 + $0x70] sm:$0xff] %v303_v14 }
  0x2e   : > { %306 = vst [vmem:[%s256_s10 + $0x78] sm:$0xff] %v305_v15 }
  0x2f PF: > { %p4198_p7 = scmp.ge.s32.totalorder %s4927_s30, 1  ;;  %p346_p8 = scmp.lt.s32.totalorder %s4927_s30, 5 }
  0x31   : > { %p347_p9 = pnand %p4198_p7, %p346_p8 }
  0x33   : > { %350 = sbr.rel (%p347_p9) target bundleno = 1390 (0x56e), region = 67 }
  0x38   : > { %s353_s11 = sand.u32 1, %s4903_s24   ;;  %s4200_s12 = sshll.u32 %s4911_s26, 5 }
  0x39   : > { %s4199_s13 = sshll.u32 %s353_s11, 7  ;;  %p406_p10 = scmp.lt.s32.totalorder %s4200_s12, 63 }
  0x3a   : > { %s4202_s15 = sshll.u32 %s4911_s26, 1  ;;  %s4203_s16 = sshll.u32 %s4915_s27, 5 }
  0x3b   : > { %s9430_s12 = smov (!%p406_p10, %s4200_s12), 63  ;;  %p412_p11 = scmp.lt.s32.totalorder %s4202_s15, 3 }
  0x3c   : > { %s4201_s17 = sshll.u32 %s9430_s12, 2  ;;  %p417_p12 = scmp.lt.s32.totalorder %s4203_s16, 63 }
  0x3d   : > { %s8707_s1 = sld [smem:[#allocation168_spill]]  ;;  %s9432_s15 = smov (!%p412_p11, %s4202_s15), 3 }
  0x3e   : > { %s9434_s16 = smov (!%p417_p12, %s4203_s16), 63  ;;  %s414_s22 = scalar_lea.vmem %s8373_s2, %s9432_s15 }
  0x3f   : > { %s4204_s23 = sshll.u32 %s9434_s16, 3  ;;  %s4206_s10 = sshll.u32 %s9434_s16, 2 }
  0x40   : > { %s5071_s27 = scalar_lea.vmem %s8374_s3, %s4204_s23  ;;  %s5083_s8 = scalar_lea.vmem [#allocation5], %s4199_s13 }
  0x41   : > { %p4209_p13 = scmp.ne.s32.totalorder %s4911_s26, 0 }
  0x43   : > { %s5060_s20 = scalar_lea.vmem %s8707_s1, %s4201_s17  ;;  %s5076_s17 = scalar_lea.vmem %s8375_s4, %s4206_s10 }
  0x44   : > { %s5081_s1 = scalar_lea.vmem %s8378_s7, %s4204_s23  ;;  %439 = sbr.rel (%p4209_p13) target bundleno = 170 (0xaa), region = 75 }
  0x49   : > { %vm440_vm0 = vcmask 7168   ;;  %v4929_v16 = vmov -1e+30   ;;  %v4930_v17 = vmov 0.0  }
  0x4a   : > { %441 = vst.msk [vmem:[#allocation2] sm:$0xff] %vm440_vm0, %v4929_v16 }
  0x4b   : > { %442 = vst.msk [vmem:[#allocation2 + $0x8] sm:$0xff] %vm440_vm0, %v4929_v16 }
  0x4c   : > { %443 = vst.msk [vmem:[#allocation2 + $0x10] sm:$0xff] %vm440_vm0, %v4929_v16 }
  0x4d   : > { %444 = vst.msk [vmem:[#allocation2 + $0x18] sm:$0xff] %vm440_vm0, %v4929_v16 }
  0x4e   : > { %445 = vst.msk [vmem:[#allocation2 + $0x20] sm:$0xff] %vm440_vm0, %v4929_v16 }
  0x4f   : > { %446 = vst.msk [vmem:[#allocation2 + $0x28] sm:$0xff] %vm440_vm0, %v4929_v16 }
  0x50   : > { %447 = vst.msk [vmem:[#allocation2 + $0x30] sm:$0xff] %vm440_vm0, %v4929_v16 }
  0x51   : > { %448 = vst.msk [vmem:[#allocation2 + $0x38] sm:$0xff] %vm440_vm0, %v4929_v16 }
  0x52   : > { %449 = vst.msk [vmem:[#allocation2 + $0x40] sm:$0xff] %vm440_vm0, %v4929_v16 }
  0x53   : > { %450 = vst.msk [vmem:[#allocation2 + $0x48] sm:$0xff] %vm440_vm0, %v4929_v16 }
  0x54   : > { %451 = vst.msk [vmem:[#allocation2 + $0x50] sm:$0xff] %vm440_vm0, %v4929_v16 }
  0x55   : > { %452 = vst.msk [vmem:[#allocation2 + $0x58] sm:$0xff] %vm440_vm0, %v4929_v16 }
  0x56   : > { %453 = vst.msk [vmem:[#allocation2 + $0x60] sm:$0xff] %vm440_vm0, %v4929_v16 }
  0x57   : > { %454 = vst.msk [vmem:[#allocation2 + $0x68] sm:$0xff] %vm440_vm0, %v4929_v16 }
  0x58   : > { %455 = vst.msk [vmem:[#allocation2 + $0x70] sm:$0xff] %vm440_vm0, %v4929_v16 }
  0x59   : > { %456 = vst.msk [vmem:[#allocation2 + $0x78] sm:$0xff] %vm440_vm0, %v4929_v16 }
  0x5a   : > { %457 = vst.msk [vmem:[#allocation2 + $0x80] sm:$0xff] %vm440_vm0, %v4929_v16 }
  0x5b   : > { %458 = vst.msk [vmem:[#allocation2 + $0x88] sm:$0xff] %vm440_vm0, %v4929_v16 }
  0x5c   : > { %459 = vst.msk [vmem:[#allocation2 + $0x90] sm:$0xff] %vm440_vm0, %v4929_v16 }
  0x5d   : > { %460 = vst.msk [vmem:[#allocation2 + $0x98] sm:$0xff] %vm440_vm0, %v4929_v16 }
  0x5e   : > { %461 = vst.msk [vmem:[#allocation2 + $0xa0] sm:$0xff] %vm440_vm0, %v4929_v16 }
  0x5f   : > { %462 = vst.msk [vmem:[#allocation2 + $0xa8] sm:$0xff] %vm440_vm0, %v4929_v16 }
  0x60   : > { %463 = vst.msk [vmem:[#allocation2 + $0xb0] sm:$0xff] %vm440_vm0, %v4929_v16 }
  0x61   : > { %464 = vst.msk [vmem:[#allocation2 + $0xb8] sm:$0xff] %vm440_vm0, %v4929_v16 }
  0x62   : > { %465 = vst.msk [vmem:[#allocation2 + $0xc0] sm:$0xff] %vm440_vm0, %v4929_v16 }
  0x63   : > { %466 = vst.msk [vmem:[#allocation2 + $0xc8] sm:$0xff] %vm440_vm0, %v4929_v16 }
  0x64   : > { %467 = vst.msk [vmem:[#allocation2 + $0xd0] sm:$0xff] %vm440_vm0, %v4929_v16 }
  0x65   : > { %468 = vst.msk [vmem:[#allocation2 + $0xd8] sm:$0xff] %vm440_vm0, %v4929_v16 }
  0x66   : > { %469 = vst.msk [vmem:[#allocation2 + $0xe0] sm:$0xff] %vm440_vm0, %v4929_v16 }
  0x67   : > { %470 = vst.msk [vmem:[#allocation2 + $0xe8] sm:$0xff] %vm440_vm0, %v4929_v16 }
  0x68   : > { %471 = vst.msk [vmem:[#allocation2 + $0xf0] sm:$0xff] %vm440_vm0, %v4929_v16 }
  0x69   : > { %472 = vst.msk [vmem:[#allocation2 + $0xf8] sm:$0xff] %vm440_vm0, %v4929_v16 }
  0x6a   : > { %473 = vst.msk [vmem:[#allocation3] sm:$0xff] %vm440_vm0, %v4930_v17 }
  0x6b   : > { %474 = vst.msk [vmem:[#allocation3 + $0x8] sm:$0xff] %vm440_vm0, %v4930_v17 }
  0x6c   : > { %475 = vst.msk [vmem:[#allocation3 + $0x10] sm:$0xff] %vm440_vm0, %v4930_v17 }
  0x6d   : > { %476 = vst.msk [vmem:[#allocation3 + $0x18] sm:$0xff] %vm440_vm0, %v4930_v17 }
  0x6e   : > { %477 = vst.msk [vmem:[#allocation3 + $0x20] sm:$0xff] %vm440_vm0, %v4930_v17 }
  0x6f   : > { %478 = vst.msk [vmem:[#allocation3 + $0x28] sm:$0xff] %vm440_vm0, %v4930_v17 }
  0x70   : > { %479 = vst.msk [vmem:[#allocation3 + $0x30] sm:$0xff] %vm440_vm0, %v4930_v17 }
  0x71   : > { %480 = vst.msk [vmem:[#allocation3 + $0x38] sm:$0xff] %vm440_vm0, %v4930_v17 }
  0x72   : > { %481 = vst.msk [vmem:[#allocation3 + $0x40] sm:$0xff] %vm440_vm0, %v4930_v17 }
  0x73   : > { %482 = vst.msk [vmem:[#allocation3 + $0x48] sm:$0xff] %vm440_vm0, %v4930_v17 }
  0x74   : > { %483 = vst.msk [vmem:[#allocation3 + $0x50] sm:$0xff] %vm440_vm0, %v4930_v17 }
  0x75   : > { %484 = vst.msk [vmem:[#allocation3 + $0x58] sm:$0xff] %vm440_vm0, %v4930_v17 }
  0x76   : > { %485 = vst.msk [vmem:[#allocation3 + $0x60] sm:$0xff] %vm440_vm0, %v4930_v17 }
  0x77   : > { %486 = vst.msk [vmem:[#allocation3 + $0x68] sm:$0xff] %vm440_vm0, %v4930_v17 }
  0x78   : > { %487 = vst.msk [vmem:[#allocation3 + $0x70] sm:$0xff] %vm440_vm0, %v4930_v17 }
  0x79   : > { %488 = vst.msk [vmem:[#allocation3 + $0x78] sm:$0xff] %vm440_vm0, %v4930_v17 }
  0x7a   : > { %489 = vst.msk [vmem:[#allocation3 + $0x80] sm:$0xff] %vm440_vm0, %v4930_v17 }
  0x7b   : > { %490 = vst.msk [vmem:[#allocation3 + $0x88] sm:$0xff] %vm440_vm0, %v4930_v17 }
  0x7c   : > { %491 = vst.msk [vmem:[#allocation3 + $0x90] sm:$0xff] %vm440_vm0, %v4930_v17 }
  0x7d   : > { %492 = vst.msk [vmem:[#allocation3 + $0x98] sm:$0xff] %vm440_vm0, %v4930_v17 }
  0x7e   : > { %493 = vst.msk [vmem:[#allocation3 + $0xa0] sm:$0xff] %vm440_vm0, %v4930_v17 }
  0x7f   : > { %494 = vst.msk [vmem:[#allocation3 + $0xa8] sm:$0xff] %vm440_vm0, %v4930_v17 }
  0x80   : > { %495 = vst.msk [vmem:[#allocation3 + $0xb0] sm:$0xff] %vm440_vm0, %v4930_v17 }
  0x81   : > { %496 = vst.msk [vmem:[#allocation3 + $0xb8] sm:$0xff] %vm440_vm0, %v4930_v17 }
  0x82   : > { %497 = vst.msk [vmem:[#allocation3 + $0xc0] sm:$0xff] %vm440_vm0, %v4930_v17 }
  0x83   : > { %498 = vst.msk [vmem:[#allocation3 + $0xc8] sm:$0xff] %vm440_vm0, %v4930_v17 }
  0x84   : > { %499 = vst.msk [vmem:[#allocation3 + $0xd0] sm:$0xff] %vm440_vm0, %v4930_v17 }
  0x85   : > { %500 = vst.msk [vmem:[#allocation3 + $0xd8] sm:$0xff] %vm440_vm0, %v4930_v17 }
  0x86   : > { %501 = vst.msk [vmem:[#allocation3 + $0xe0] sm:$0xff] %vm440_vm0, %v4930_v17 }
  0x87   : > { %502 = vst.msk [vmem:[#allocation3 + $0xe8] sm:$0xff] %vm440_vm0, %v4930_v17 }
  0x88   : > { %503 = vst.msk [vmem:[#allocation3 + $0xf0] sm:$0xff] %vm440_vm0, %v4930_v17 }
  0x89   : > { %504 = vst.msk [vmem:[#allocation3 + $0xf8] sm:$0xff] %vm440_vm0, %v4930_v17 }
  0x8a   : > { %505 = vst [vmem:[#allocation4 + $0xb0] sm:$0xff] %v4930_v17 }
  0x8b   : > { %506 = vst [vmem:[#allocation4] sm:$0xff] %v4930_v17 }
  0x8c   : > { %507 = vst [vmem:[#allocation4 + $0xd8] sm:$0xff] %v4930_v17 }
  0x8d   : > { %508 = vst [vmem:[#allocation4 + $0x18] sm:$0xff] %v4930_v17 }
  0x8e   : > { %509 = vst [vmem:[#allocation4 + $0x50] sm:$0xff] %v4930_v17 }
  0x8f   : > { %510 = vst [vmem:[#allocation4 + $0x68] sm:$0xff] %v4930_v17 }
  0x90   : > { %511 = vst [vmem:[#allocation4 + $0x30] sm:$0xff] %v4930_v17 }
  0x91   : > { %512 = vst [vmem:[#allocation4 + $0x48] sm:$0xff] %v4930_v17 }
  0x92   : > { %513 = vst [vmem:[#allocation4 + $0x80] sm:$0xff] %v4930_v17 }
  0x93   : > { %514 = vst [vmem:[#allocation4 + $0x88] sm:$0xff] %v4930_v17 }
  0x94   : > { %515 = vst [vmem:[#allocation4 + $0xe8] sm:$0xff] %v4930_v17 }
  0x95   : > { %516 = vst [vmem:[#allocation4 + $0xb8] sm:$0xff] %v4930_v17 }
  0x96   : > { %517 = vst [vmem:[#allocation4 + $0x60] sm:$0xff] %v4930_v17 }
  0x97   : > { %518 = vst [vmem:[#allocation4 + $0xf0] sm:$0xff] %v4930_v17 }
  0x98   : > { %519 = vst [vmem:[#allocation4 + $0x8] sm:$0xff] %v4930_v17 }
  0x99   : > { %520 = vst [vmem:[#allocation4 + $0x78] sm:$0xff] %v4930_v17 }
  0x9a   : > { %521 = vst [vmem:[#allocation4 + $0x38] sm:$0xff] %v4930_v17 }
  0x9b   : > { %522 = vst [vmem:[#allocation4 + $0x58] sm:$0xff] %v4930_v17 }
  0x9c   : > { %523 = vst [vmem:[#allocation4 + $0x40] sm:$0xff] %v4930_v17 }
  0x9d   : > { %524 = vst [vmem:[#allocation4 + $0xc8] sm:$0xff] %v4930_v17 }
  0x9e   : > { %525 = vst [vmem:[#allocation4 + $0xe0] sm:$0xff] %v4930_v17 }
  0x9f   : > { %526 = vst [vmem:[#allocation4 + $0x90] sm:$0xff] %v4930_v17 }
  0xa0   : > { %527 = vst [vmem:[#allocation4 + $0x70] sm:$0xff] %v4930_v17 }
  0xa1   : > { %528 = vst [vmem:[#allocation4 + $0xc0] sm:$0xff] %v4930_v17 }
  0xa2   : > { %529 = vst [vmem:[#allocation4 + $0xa8] sm:$0xff] %v4930_v17 }
  0xa3   : > { %530 = vst [vmem:[#allocation4 + $0xd0] sm:$0xff] %v4930_v17 }
  0xa4   : > { %531 = vst [vmem:[#allocation4 + $0x10] sm:$0xff] %v4930_v17 }
  0xa5   : > { %532 = vst [vmem:[#allocation4 + $0x28] sm:$0xff] %v4930_v17 }
  0xa6   : > { %533 = vst [vmem:[#allocation4 + $0xa0] sm:$0xff] %v4930_v17 }
  0xa7   : > { %534 = vst [vmem:[#allocation4 + $0xf8] sm:$0xff] %v4930_v17 }
  0xa8   : > { %535 = vst [vmem:[#allocation4 + $0x20] sm:$0xff] %v4930_v17 }
  0xa9   : > { %536 = vst [vmem:[#allocation4 + $0x98] sm:$0xff] %v4930_v17 }
  0xaa PF: > { %v541_v18 = vld [vmem:[%s5071_s27 + $0x20] sm:$0xff]  ;;  %v539_v19 = vld [vmem:[%s5071_s27 + $0x10] sm:$0xff]  ;;  %v8385_v21 = vmov 0   ;;  %v542_v22 = vld [vmem:[%s5071_s27 + $0x28] sm:$0xff]  ;;  %p4370_p0 = scmp.ne.s32.totalorder %s4911_s26, 1 }
  0xab   : > { %v537_v20 = vld [vmem:[%s5071_s27] sm:$0xff]  ;;  %4612 = vset.pattern.permute.xlu2 %v8385_v21  ;;  %4611 = vset.pattern.permute.xlu1 %v8385_v21  ;;  %v540_v23 = vld [vmem:[%s5071_s27 + $0x18] sm:$0xff]  ;;  %v538_v24 = vld [vmem:[%s5071_s27 + $0x8] sm:$0xff] }
  0xac   : > { %4610 = vset.pattern.permute.xlu0 %v8385_v21  ;;  %592 = vperm.xlu2 %4612, %v541_v18   ;;  %v545_v25 = vld [vmem:[%s5071_s27 + $0x40] sm:$0xff]  ;;  %v543_v26 = vld [vmem:[%s5071_s27 + $0x30] sm:$0xff]  ;;  %v544_v27 = vld [vmem:[%s5071_s27 + $0x38] sm:$0xff] }
  0xad   : > { %582 = vperm.xlu1 %4611, %v539_v19   ;;  %572 = vperm.xlu0 %4610, %v537_v20   ;;  %v548_v28 = vld [vmem:[%s5071_s27 + $0x58] sm:$0xff]  ;;  %v546_v29 = vld [vmem:[%s5071_s27 + $0x48] sm:$0xff]  ;;  %v547_v30 = vld [vmem:[%s5071_s27 + $0x50] sm:$0xff] }
  0xae   : > { %v551_v31 = vld [vmem:[%s5071_s27 + $0x70] sm:$0xff]  ;;  %v549_v32 = vld [vmem:[%s5071_s27 + $0x60] sm:$0xff]  ;;  %v550_v33 = vld [vmem:[%s5071_s27 + $0x68] sm:$0xff] }
  0xaf   : > { %v554_v34 = vld [vmem:[%s5071_s27 + $0x88] sm:$0xff]  ;;  %v552_v35 = vld [vmem:[%s5071_s27 + $0x78] sm:$0xff]  ;;  %v553_v36 = vld [vmem:[%s5071_s27 + $0x80] sm:$0xff] }
  0xb0   : > { %v557_v37 = vld [vmem:[%s5071_s27 + $0xa0] sm:$0xff]  ;;  %v555_v38 = vld [vmem:[%s5071_s27 + $0x90] sm:$0xff]  ;;  %v556_v39 = vld [vmem:[%s5071_s27 + $0x98] sm:$0xff] }
  0xb1   : > { %v560_v40 = vld [vmem:[%s5071_s27 + $0xb8] sm:$0xff]  ;;  %v558_v41 = vld [vmem:[%s5071_s27 + $0xa8] sm:$0xff]  ;;  %v559_v42 = vld [vmem:[%s5071_s27 + $0xb0] sm:$0xff] }
  0xb2   : > { %v563_v43 = vld [vmem:[%s5071_s27 + $0xd0] sm:$0xff]  ;;  %v561_v44 = vld [vmem:[%s5071_s27 + $0xc0] sm:$0xff]  ;;  %v562_v45 = vld [vmem:[%s5071_s27 + $0xc8] sm:$0xff] }
  0xb3   : > { %v566_v46 = vld [vmem:[%s5071_s27 + $0xe8] sm:$0xff]  ;;  %v564_v47 = vld [vmem:[%s5071_s27 + $0xd8] sm:$0xff]  ;;  %v565_v48 = vld [vmem:[%s5071_s27 + $0xe0] sm:$0xff] }
  0xb4   : > { %597 = vperm.xlu2 %4612, %v542_v22   ;;  %v927_v49 = vld [vmem:[%s5083_s8] sm:$0xff]  ;;  %v928_v50 = vld [vmem:[%s5083_s8 + $0x8] sm:$0xff]  ;;  %v929_v55 = vld [vmem:[%s5083_s8 + $0x10] sm:$0xff] }
  0xb5   : > { %587 = vperm.xlu1 %4611, %v540_v23   ;;  %577 = vperm.xlu0 %4610, %v538_v24   ;;  %vm943_vm1 = vnez %v927_v49  ;;  %vm944_vm2 = vnez %v928_v50  ;;  %v930_v56 = vld [vmem:[%s5083_s8 + $0x18] sm:$0xff]  ;;  %vm945_vm3 = vnez %v929_v55  ;;  %v569_v4 = vld [vmem:[%s414_s22] sm:$0x3]  ;;  %v931_v9 = vld [vmem:[%s5083_s8 + $0x20] sm:$0xff] }
  0xb6   : > { %v959_v51 = vsel %vm943_vm1, 16843009, %v8385_v21  ;;  %v960_v52 = vsel %vm944_vm2, 16843009, %v8385_v21  ;;  %vm946_vm4 = vnez %v930_v56  ;;  %v5254_v57 = vsel %vm945_vm3, 16843009, %v8385_v21 }
  0xb7   : > { %v975_v53 = vunpack.c.0.s8 %v959_v51  ;;  %v976_v54 = vunpack.c.0.s8 %v960_v52  ;;  %v5257_v58 = vsel %vm946_vm4, 16843009, %v8385_v21  ;;  %v983_v60 = vunpack.c.0.s8 %v5254_v57  ;;  %v932_v14 = vld [vmem:[%s5083_s8 + $0x28] sm:$0xff] }
  0xb8   : > { %v984_v61 = vunpack.c.0.s8 %v5257_v58  ;;  %v985_v62 = vunpack.c.1.s8 %v5254_v57  ;;  %v986_v63 = vunpack.c.1.s8 %v5257_v58  ;;  %v979_v0 = vunpack.c.2.s8 %v959_v51 }
  0xb9   : > { %v1039_v59 = vpack.c.b16 %v976_v54, %v975_v53  ;;  %v980_v1 = vunpack.c.2.s8 %v960_v52  ;;  %v981_v2 = vunpack.c.3.s8 %v959_v51  ;;  %v982_v3 = vunpack.c.3.s8 %v960_v52 }
  0xba   : > { %v977_v8 = vunpack.c.1.s8 %v959_v51  ;;  %v978_v11 = vunpack.c.1.s8 %v960_v52  ;;  %v1047_v12 = vpack.c.b16 %v984_v61, %v983_v60  ;;  %v1049_v13 = vpack.c.b16 %v986_v63, %v985_v62 }
  0xbb   : > { %v1040_v6 = vpack.c.b8 %v1039_v59, %v1039_v59  ;;  %v1043_v7 = vpack.c.b16 %v980_v1, %v979_v0  ;;  %v1045_v10 = vpack.c.b16 %v982_v3, %v981_v2  ;;  %v5270_v15 = vperm.slane %v569_v4, 0 }
  0xbc   : > { %612 = vperm.xlu2 %4612, %v545_v25   ;;  %v1048_v16 = vpack.c.b8 %v1047_v12, %v1047_v12  ;;  %vm947_vm5 = vnez %v931_v9  ;;  %v5272_v17 = vperm.slane %v569_v4, 1  ;;  %vm948_vm6 = vnez %v932_v14 }
  0xbd   : > { %602 = vperm.xlu0 %4610, %v543_v26   ;;  %607 = vperm.xlu1 %4611, %v544_v27   ;;  %v1044_v19 = vpack.c.b8 %v1043_v7, %v1043_v7  ;;  %vm1103_vm7 = vnez %v1040_v6  ;;  %v1046_v20 = vpack.c.b8 %v1045_v10, %v1045_v10  ;;  %v1041_v22 = vpack.c.b16 %v978_v11, %v977_v8 }
  0xbe   : > { %v1050_v23 = vpack.c.b8 %v1049_v13, %v1049_v13  ;;  %v5276_v24 = vsel %vm947_vm5, 16843009, %v8385_v21  ;;  %vm1107_vm8 = vnez %v1048_v16  ;;  %v5280_v27 = vsel %vm948_vm6, 16843009, %v8385_v21 }
  0xbf   : > { %vm1105_vm9 = vnez %v1044_v19  ;;  %vm5283_vm10 = vnez %v1046_v20  ;;  %v8712_v61 = vmov 0  ;;  %v8715_v62 = vmov 0 }
  0xc0   : > { %vm1108_vm11 = vnez %v1050_v23  ;;  %v8718_v11 = vmov 0  ;;  %v8723_v13 = vmov 0  ;;  %v993_v16 = vunpack.c.1.s8 %v5276_v24 }
  0xc1   : > { %v8730_v20 = vmov 0 }
  0xc4   : > { %627 = vperm.xlu2 %4612, %v548_v28  }
  0xc5   : > { %617 = vperm.xlu0 %4610, %v546_v29   ;;  %622 = vperm.xlu1 %4611, %v547_v30   ;;  %v1135_v29 = vsel %vm1103_vm7, 16843009, %v8385_v21 }
  0xcc   : > { %642 = vperm.xlu2 %4612, %v551_v31   ;;  %v1042_v31 = vpack.c.b8 %v1041_v22, %v1041_v22  ;;  %v8733_v22 = vmov 0 }
  0xcd   : > { %632 = vperm.xlu0 %4610, %v549_v32   ;;  %637 = vperm.xlu1 %4611, %v550_v33   ;;  %v991_v32 = vunpack.c.0.s8 %v5276_v24 }
  0xce   : > { %vm5301_vm12 = vnez %v1042_v31 }
  0xcf   : > { %v1136_v6 = vsel %vm5301_vm12, 16843009, %v8385_v21 }
  0xd0   : > { %v1169_v23 = vunpack.c.0.s8 %v1136_v6  ;;  %v1170_v30 = vunpack.c.1.s8 %v1136_v6 }
  0xd2   : > { %vm5402_vm12 = vcmp.ne.s32.totalorder %v1170_v30, 0 }
  0xd4   : > { %657 = vperm.xlu2 %4612, %v554_v34   ;;  %v1139_v34 = vsel %vm1107_vm8, 16843009, %v8385_v21 }
  0xd5   : > { %647 = vperm.xlu0 %4610, %v552_v35   ;;  %652 = vperm.xlu1 %4611, %v553_v36   ;;  %v987_v35 = vunpack.c.2.s8 %v5254_v57  ;;  %v992_v36 = vunpack.c.0.s8 %v5280_v27 }
  0xd7   : > { %v1055_v52 = vpack.c.b16 %v992_v36, %v991_v32  ;;  %v998_v36 = vunpack.c.3.s8 %v5280_v27 }
  0xd9   : > { %v1056_v3 = vpack.c.b8 %v1055_v52, %v1055_v52 }
  0xdb   : > { %vm5345_vm2 = vnez %v1056_v3 }
  0xdc   : > { %672 = vperm.xlu2 %4612, %v557_v37  }
  0xdd   : > { %662 = vperm.xlu0 %4610, %v555_v38   ;;  %667 = vperm.xlu1 %4611, %v556_v39   ;;  %v1167_v39 = vunpack.c.0.s8 %v1135_v29 }
  0xdf   : > { %vm5337_vm0 = vcmp.ne.s32.totalorder %v1167_v39, 0 }
  0xe4   : > { %687 = vperm.xlu2 %4612, %v560_v40   ;;  %v1137_v40 = vsel %vm1105_vm9, 16843009, %v8385_v21 }
  0xe5   : > { %677 = vperm.xlu0 %4610, %v558_v41   ;;  %682 = vperm.xlu1 %4611, %v559_v42   ;;  %v1175_v41 = vunpack.c.0.s8 %v1139_v34  ;;  %v1176_v42 = vunpack.c.1.s8 %v1139_v34  ;;  %v1171_v55 = vunpack.c.0.s8 %v1137_v40  ;;  %v1172_v60 = vunpack.c.1.s8 %v1137_v40 }
  0xe7   : > { %vm5306_vm13 = vcmp.ne.s32.totalorder %v1175_v41, 0  ;;  %vm5310_vm14 = vcmp.ne.s32.totalorder %v1176_v42, 0  ;;  %vm5355_vm4 = vcmp.ne.s32.totalorder %v1171_v55, 0  ;;  %vm5359_vm5 = vcmp.ne.s32.totalorder %v1172_v60, 0 }
  0xe8   : > { %v8713_v61 = vsel %vm5306_vm13, 4294967295, %v8712_v61  ;;  %v8716_v62 = vsel %vm5310_vm14, 4294967295, %v8715_v62  ;;  %v8731_v20 = vsel %vm5355_vm4, 4294967295, %v8730_v20  ;;  %v8734_v22 = vsel %vm5359_vm5, 4294967295, %v8733_v22 }
  0xe9   : > { %8714 = vst [vmem:[#allocation8_spill] sm:$0xff] %v8713_v61 }
  0xea   : > { %8717 = vst [vmem:[#allocation9_spill] sm:$0xff] %v8716_v62 }
  0xeb   : > { %8732 = vst [vmem:[#allocation12_spill] sm:$0xff] %v8731_v20  ;;  %v8790_v20 = vmov 0 }
  0xec   : > { %702 = vperm.xlu2 %4612, %v563_v43   ;;  %v1140_v43 = vsel %vm1108_vm11, 16843009, %v8385_v21  ;;  %8735 = vst [vmem:[#allocation13_spill] sm:$0xff] %v8734_v22  ;;  %vm5396_vm11 = vcmp.ne.s32.totalorder %v1169_v23, 0 }
  0xed   : > { %692 = vperm.xlu0 %4610, %v561_v44   ;;  %697 = vperm.xlu1 %4611, %v562_v45   ;;  %v988_v44 = vunpack.c.2.s8 %v5257_v58  ;;  %v1168_v45 = vunpack.c.1.s8 %v1135_v29  ;;  %v1177_v59 = vunpack.c.0.s8 %v1140_v43  ;;  %v1178_v63 = vunpack.c.1.s8 %v1140_v43 }
  0xef   : > { %v1051_v51 = vpack.c.b16 %v988_v44, %v987_v35  ;;  %vm5333_vm15 = vcmp.ne.s32.totalorder %v1177_v59, 0  ;;  %vm5341_vm1 = vcmp.ne.s32.totalorder %v1178_v63, 0  ;;  %vm5351_vm3 = vcmp.ne.s32.totalorder %v1168_v45, 0 }
  0xf0   : > { %v8719_v11 = vsel %vm5333_vm15, 4294967295, %v8718_v11  ;;  %v8724_v13 = vsel %vm5341_vm1, 4294967295, %v8723_v13  ;;  %v1143_v35 = vsel %vm5345_vm2, 16843009, %v8385_v21 }
  0xf1   : > { %v1052_v2 = vpack.c.b8 %v1051_v51, %v1051_v51  ;;  %8720 = vst [vmem:[#allocation10_spill] sm:$0xff] %v8719_v11  ;;  %v8775_v11 = vmov 0 }
  0xf2   : > { %8725 = vst [vmem:[#allocation11_spill] sm:$0xff] %v8724_v13 }
  0xf3   : > { %vm1109_vm6 = vnez %v1052_v2 }
  0xf4   : > { %717 = vperm.xlu2 %4612, %v566_v46   ;;  %v5299_v46 = vsel %vm5283_vm10, 16843009, %v8385_v21  ;;  %v1141_v39 = vsel %vm1109_vm6, 16843009, %v8385_v21 }
  0xf5   : > { %707 = vperm.xlu0 %4610, %v564_v47   ;;  %712 = vperm.xlu1 %4611, %v565_v48   ;;  %v997_v48 = vunpack.c.3.s8 %v5276_v24  ;;  %v1173_v0 = vunpack.c.0.s8 %v5299_v46  ;;  %v1174_v1 = vunpack.c.1.s8 %v5299_v46  ;;  %v1183_v47 = vunpack.c.0.s8 %v1143_v35 }
  0xf6   : > { %v1180_v60 = vunpack.c.1.s8 %v1141_v39 }
  0xf7   : > { %vm5388_vm9 = vcmp.ne.s32.totalorder %v1173_v0, 0  ;;  %vm5392_vm10 = vcmp.ne.s32.totalorder %v1174_v1, 0  ;;  %v1061_v2 = vpack.c.b16 %v998_v36, %v997_v48  ;;  %vm5410_vm2 = vcmp.ne.s32.totalorder %v1183_v47, 0 }
 0x106   : > { %v593_v5 = vpop.permute.xlu2 %592 }
 0x107   : > { %v743_v18 = vadd.f32 %v5270_v15, %v593_v5  ;;  %v744_v25 = vadd.f32 %v5272_v17, %v593_v5 }
 0x109   : > { %v807_v28 = vmul.f32 0.2, %v743_v18  ;;  %v808_v37 = vmul.f32 0.2, %v744_v25 }
 0x10b   : > { %v871_v50 = vmax.f32 %v743_v18, %v807_v28  ;;  %v872_v56 = vmax.f32 %v744_v25, %v808_v37  ;;  %v994_v18 = vunpack.c.1.s8 %v5280_v27  ;;  %v933_v25 = vld [vmem:[%s5083_s8 + $0x30] sm:$0xff] }
 0x10c   : > { %vm949_vm7 = vnez %v933_v25 }
 0x10d   : > { %v5327_v8 = vsel %vm5306_vm13, %v871_v50, -1e+30  ;;  %v5331_v9 = vsel %vm5310_vm14, %v872_v56, -1e+30  ;;  %v1057_v40 = vpack.c.b16 %v994_v18, %v993_v16  ;;  %v5408_v1 = vsel %vm949_vm7, 16843009, %v8385_v21 }
 0x10e   : > { %v598_v26 = vpop.permute.xlu2 %597 }
 0x10f   : > { %v745_v33 = vadd.f32 %v5270_v15, %v598_v26  ;;  %v746_v38 = vadd.f32 %v5272_v17, %v598_v26  ;;  %v934_v26 = vld [vmem:[%s5083_s8 + $0x38] sm:$0xff]  ;;  %v1058_v63 = vpack.c.b8 %v1057_v40, %v1057_v40 }
 0x110   : > { %vm950_vm8 = vnez %v934_v26 }
 0x111   : > { %v809_v49 = vmul.f32 0.2, %v745_v33  ;;  %v810_v53 = vmul.f32 0.2, %v746_v38  ;;  %v5420_v48 = vsel %vm950_vm8, 16843009, %v8385_v21  ;;  %vm5446_vm7 = vnez %v1058_v63 }
 0x112   : > { %v1000_v63 = vunpack.c.0.s8 %v5420_v48  ;;  %v1004_v31 = vunpack.c.2.s8 %v5420_v48 }
 0x113   : > { %v873_v7 = vmax.f32 %v745_v33, %v809_v49  ;;  %v874_v10 = vmax.f32 %v746_v38, %v810_v53  ;;  %v1184_v49 = vunpack.c.1.s8 %v1143_v35  ;;  %v1179_v53 = vunpack.c.0.s8 %v1141_v39 }
 0x115   : > { %v5371_v33 = vsel %vm5333_vm15, %v873_v7, -1e+30  ;;  %v5375_v34 = vsel %vm5341_vm1, %v874_v10, -1e+30  ;;  %v8744_v7 = vmov 0  ;;  %vm5414_vm6 = vcmp.ne.s32.totalorder %v1184_v49, 0 }
 0x116   : > { %v613_v54 = vpop.permute.xlu2 %612  ;;  %v8745_v7 = vsel %vm5410_vm2, 4294967295, %v8744_v7  ;;  %v8747_v10 = vmov 0  ;;  %vm5466_vm8 = vcmp.ne.s32.totalorder %v1179_v53, 0  ;;  %vm5470_vm1 = vcmp.ne.s32.totalorder %v1180_v60, 0 }
 0x117   : > { %v5317_v4 = vadd.f32 %v5270_v15, %v613_v54  ;;  %v5320_v5 = vadd.f32 %v5272_v17, %v613_v54  ;;  %8746 = vst [vmem:[#allocation14_spill] sm:$0xff] %v8745_v7  ;;  %v8748_v10 = vsel %vm5414_vm6, 4294967295, %v8747_v10  ;;  %v935_v7 = vld [vmem:[%s5083_s8 + $0x40] sm:$0xff] }
 0x118   : > { %8749 = vst [vmem:[#allocation15_spill] sm:$0xff] %v8748_v10  ;;  %vm8781_vm13 = vnez %v935_v7 }
 0x119   : > { %v815_v28 = vmul.f32 0.2, %v5317_v4  ;;  %v816_v29 = vmul.f32 0.2, %v5320_v5 }
 0x11b   : > { %v879_v45 = vmax.f32 %v5317_v4, %v815_v28  ;;  %v880_v46 = vmax.f32 %v5320_v5, %v816_v29 }
 0x11e   : > { %v628_v32 = vpop.permute.xlu2 %627 }
 0x11f   : > { %v583_v37 = vpop.permute.xlu1 %582  ;;  %v573_v38 = vpop.permute.xlu0 %572  ;;  %v5423_v14 = vadd.f32 %v5270_v15, %v628_v32  ;;  %v5438_v26 = vadd.f32 %v5272_v17, %v628_v32 }
 0x120   : > { %v739_v41 = vadd.f32 %v5270_v15, %v583_v37  ;;  %v740_v42 = vadd.f32 %v5272_v17, %v583_v37  ;;  %v735_v43 = vadd.f32 %v5270_v15, %v573_v38  ;;  %v736_v44 = vadd.f32 %v5272_v17, %v573_v38 }
 0x121   : > { %v5485_v60 = vmul.f32 0.2, %v5423_v14 }
 0x122   : > { %v803_v50 = vmul.f32 0.2, %v739_v41  ;;  %v804_v51 = vmul.f32 0.2, %v740_v42  ;;  %v799_v52 = vmul.f32 0.2, %v735_v43 }
 0x123   : > { %v800_v54 = vmul.f32 0.2, %v736_v44 }
 0x124   : > { %v863_v3 = vmax.f32 %v735_v43, %v799_v52  ;;  %v867_v4 = vmax.f32 %v739_v41, %v803_v50  ;;  %v868_v5 = vmax.f32 %v740_v42, %v804_v51  ;;  %v5458_v41 = vsel %vm5410_vm2, %v879_v45, -1e+30 }
 0x125   : > { %v864_v6 = vmax.f32 %v736_v44, %v800_v54  ;;  %8754 = vst [vmem:[#allocation18_spill] sm:$0xff] %v5458_v41  ;;  %v5462_v42 = vsel %vm5414_vm6, %v880_v46, -1e+30  ;;  %v1062_v43 = vpack.c.b8 %v1061_v2, %v1061_v2  ;;  %v8756_v52 = vmov 0 }
 0x126   : > { %v643_v16 = vpop.permute.xlu2 %642  ;;  %v5427_v18 = vsel %vm5337_vm0, %v863_v3, -1e+30  ;;  %v5431_v23 = vsel %vm5355_vm4, %v867_v4, -1e+30  ;;  %v5435_v25 = vsel %vm5359_vm5, %v868_v5, -1e+30  ;;  %v999_v54 = vunpack.c.0.s8 %v5408_v1 }
 0x127   : > { %8750 = vst [vmem:[#allocation16_spill] sm:$0xff] %v5431_v23  ;;  %v588_v28 = vpop.permute.xlu1 %587  ;;  %v578_v29 = vpop.permute.xlu0 %577  ;;  %v5442_v30 = vsel %vm5351_vm3, %v864_v6, -1e+30  ;;  %v1397_v35 = vmax.f32 %v5431_v23, %v5435_v25  ;;  %v8757_v52 = vsel %vm5466_vm8, 4294967295, %v8756_v52  ;;  %v8759_v45 = vmov 0 }
 0x128   : > { %8751 = vst [vmem:[#allocation17_spill] sm:$0xff] %v5435_v25  ;;  %v741_v37 = vadd.f32 %v5270_v15, %v588_v28  ;;  %v742_v38 = vadd.f32 %v5272_v17, %v588_v28  ;;  %v737_v32 = vadd.f32 %v5270_v15, %v578_v29  ;;  %v738_v39 = vadd.f32 %v5272_v17, %v578_v29 }
 0x129   : > { %v1391_v40 = vmax.f32 %v5427_v18, %v5442_v30  ;;  %1398 = vmax.xlane.f32.xlu1 %v1397_v35  ;;  %8755 = vst [vmem:[#allocation19_spill] sm:$0xff] %v5462_v42  ;;  %v8760_v45 = vsel %vm5470_vm1, 4294967295, %v8759_v45  ;;  %v5477_v46 = vsel %vm5446_vm7, 16843009, %v8385_v21  ;;  %v5482_v2 = vadd.f32 %v5270_v15, %v643_v16 }
 0x12a   : > { %v805_v44 = vmul.f32 0.2, %v741_v37  ;;  %v806_v47 = vmul.f32 0.2, %v742_v38  ;;  %v801_v49 = vmul.f32 0.2, %v737_v32  ;;  %vm5490_vm6 = vnez %v1062_v43 }
 0x12b   : > { %v802_v51 = vmul.f32 0.2, %v738_v39  ;;  %1392 = vmax.xlane.f32.xlu2 %v1391_v40  ;;  %8758 = vst [vmem:[#allocation20_spill] sm:$0xff] %v8757_v52  ;;  %v5488_v5 = vmul.f32 0.2, %v5438_v26  ;;  %v5495_v29 = vadd.f32 %v5272_v17, %v643_v16  ;;  %v1185_v40 = vunpack.c.0.s8 %v5477_v46 }
 0x12c   : > { %8761 = vst [vmem:[#allocation21_spill] sm:$0xff] %v8760_v45  ;;  %v869_v53 = vmax.f32 %v741_v37, %v805_v44  ;;  %v870_v3 = vmax.f32 %v742_v38, %v806_v47  ;;  %v865_v4 = vmax.f32 %v737_v32, %v801_v49  ;;  %v1063_v43 = vpack.c.b16 %v1000_v63, %v999_v54 }
 0x12d   : > { %v866_v6 = vmax.f32 %v738_v39, %v802_v51  ;;  %v5517_v44 = vmul.f32 0.2, %v5482_v2  ;;  %v1146_v54 = vsel %vm5490_vm6, 16843009, %v8385_v21  ;;  %v1003_v63 = vunpack.c.2.s8 %v5408_v1 }
 0x12e   : > { %v658_v35 = vpop.permute.xlu2 %657  ;;  %v5499_v36 = vsel %vm5388_vm9, %v869_v53, -1e+30  ;;  %v5503_v37 = vsel %vm5392_vm10, %v870_v3, -1e+30  ;;  %v5507_v38 = vsel %vm5396_vm11, %v865_v4, -1e+30  ;;  %v885_v3 = vmax.f32 %v5423_v14, %v5485_v60 }
 0x12f   : > { %v603_v32 = vpop.permute.xlu0 %602  ;;  %v1400_v39 = vmax.f32 %v5499_v36, %v5503_v37  ;;  %v5513_v16 = vsel %vm5402_vm12, %v866_v6, -1e+30  ;;  %v5532_v4 = vmul.f32 0.2, %v5495_v29  ;;  %v1186_v53 = vunpack.c.1.s8 %v5477_v46 }
 0x130   : > { %v747_v47 = vadd.f32 %v5270_v15, %v603_v32  ;;  %v748_v49 = vadd.f32 %v5272_v17, %v603_v32  ;;  %v1394_v51 = vmax.f32 %v5507_v38, %v5513_v16  ;;  %vm5536_vm7 = vcmp.ne.s32.totalorder %v1185_v40, 0 }
 0x131   : > { %v8764_v14 = vmov 0  ;;  %v886_v60 = vmax.f32 %v5438_v26, %v5488_v5  ;;  %v1064_v28 = vpack.c.b8 %v1063_v43, %v1063_v43  ;;  %v1190_v13 = vunpack.c.1.s8 %v1146_v54  ;;  %v936_v43 = vld [vmem:[%s5083_s8 + $0x48] sm:$0xff] }
 0x132   : > { %v811_v6 = vmul.f32 0.2, %v747_v47  ;;  %v812_v32 = vmul.f32 0.2, %v748_v49  ;;  %1395 = vmax.xlane.f32.xlu0 %v1394_v51  ;;  %v8765_v14 = vsel %vm5536_vm7, 4294967295, %v8764_v14  ;;  %v1189_v51 = vunpack.c.0.s8 %v1146_v54 }
 0x133   : > { %1401 = vmax.xlane.f32.xlu2 %v1400_v39  ;;  %8766 = vst [vmem:[#allocation22_spill] sm:$0xff] %v8765_v14  ;;  %v1067_v39 = vpack.c.b16 %v1004_v31, %v1003_v63  ;;  %v1005_v46 = vunpack.c.3.s8 %v5408_v1  ;;  %v1006_v40 = vunpack.c.3.s8 %v5420_v48  ;;  %v5550_v62 = vadd.f32 %v5270_v15, %v658_v35 }
 0x134   : > { %v875_v50 = vmax.f32 %v747_v47, %v811_v6  ;;  %v876_v10 = vmax.f32 %v748_v49, %v812_v32  ;;  %v5562_v31 = vadd.f32 %v5272_v17, %v658_v35  ;;  %vm1115_vm6 = vnez %v1064_v28 }
 0x135   : > { %v1068_v6 = vpack.c.b8 %v1067_v39, %v1067_v39  ;;  %v1069_v32 = vpack.c.b16 %v1006_v40, %v1005_v46  ;;  %vm5568_vm15 = vcmp.ne.s32.totalorder %v1186_v53, 0  ;;  %v8772_v35 = vmov 0 }
 0x136   : > { %v5554_v26 = vsel %vm5466_vm8, %v875_v50, -1e+30  ;;  %v5558_v5 = vsel %vm5470_vm1, %v876_v10, -1e+30  ;;  %v673_v54 = vpop.permute.xlu2 %672  ;;  %v8769_v10 = vmov 0  ;;  %vm5572_vm1 = vcmp.ne.s32.totalorder %v1189_v51, 0 }
 0x137   : > { %8767 = vst [vmem:[#allocation23_spill] sm:$0xff] %v5554_v26  ;;  %v618_v47 = vpop.permute.xlu0 %617  ;;  %v1409_v49 = vmax.f32 %v5554_v26, %v5558_v5  ;;  %v8770_v10 = vsel %vm5568_vm15, 4294967295, %v8769_v10  ;;  %v8773_v35 = vsel %vm5572_vm1, 4294967295, %v8772_v35  ;;  %vm5576_vm8 = vcmp.ne.s32.totalorder %v1190_v13, 0  ;;  %v937_v26 = vld [vmem:[%s5083_s8 + $0x50] sm:$0xff] }
 0x138   : > { %8768 = vst [vmem:[#allocation24_spill] sm:$0xff] %v5558_v5  ;;  %v753_v63 = vadd.f32 %v5270_v15, %v618_v47  ;;  %v754_v50 = vadd.f32 %v5272_v17, %v618_v47  ;;  %v8776_v11 = vsel %vm5576_vm8, 4294967295, %v8775_v11  ;;  %vm952_vm2 = vnez %v936_v43 }
 0x139   : > { %1410 = vmax.xlane.f32.xlu1 %v1409_v49  ;;  %8771 = vst [vmem:[#allocation25_spill] sm:$0xff] %v8770_v10  ;;  %v8778_v39 = vmax.f32 %v5371_v33, %v5375_v34  ;;  %v8779_v46 = vmov 0   ;;  %vm1117_vm14 = vnez %v1068_v6  ;;  %v5585_v40 = vmul.f32 0.2, %v5550_v62 }
 0x13a   : > { %8774 = vst [vmem:[#allocation26_spill] sm:$0xff] %v8773_v35  ;;  %v817_v28 = vmul.f32 0.2, %v753_v63  ;;  %v818_v21 = vmul.f32 0.2, %v754_v50  ;;  %v8780_v51 = vmax.f32 %v5327_v8, %v5331_v9  ;;  %v1070_v13 = vpack.c.b8 %v1069_v32, %v1069_v32 }
 0x13b   : > { %8777 = vst [vmem:[#allocation27_spill] sm:$0xff] %v8776_v11  ;;  %1407 = vmax.xlane.f32.xlu0 %v8778_v39  ;;  %v1147_v53 = vsel %vm1115_vm6, 16843009, %v8779_v46  ;;  %v5592_v43 = vsel %vm8781_vm13, 16843009, %v8779_v46  ;;  %v8786_v10 = vmov 0 }
 0x13c   : > { %1404 = vmax.xlane.f32.xlu2 %v8780_v51  ;;  %v5595_v47 = vsel %vm952_vm2, 16843009, %v8779_v46  ;;  %v5598_v49 = vmul.f32 0.2, %v5562_v31  ;;  %v881_v39 = vmax.f32 %v753_v63, %v817_v28  ;;  %v882_v6 = vmax.f32 %v754_v50, %v818_v21 }
 0x13d   : > { %v5602_v45 = vsel %vm5572_vm1, %v885_v3, -1e+30  ;;  %v5606_v51 = vsel %vm5576_vm8, %v886_v60, -1e+30  ;;  %v1191_v32 = vunpack.c.0.s8 %v1147_v53  ;;  %v1192_v7 = vunpack.c.1.s8 %v1147_v53 }
 0x13e   : > { %8782 = vst [vmem:[#allocation28_spill] sm:$0xff] %v5602_v45  ;;  %v1149_v52 = vsel %vm1117_vm14, 16843009, %v8779_v46  ;;  %v5611_v61 = vsel %vm5536_vm7, %v881_v39, -1e+30  ;;  %v1009_v21 = vunpack.c.1.s8 %v5592_v43  ;;  %v1010_v3 = vunpack.c.1.s8 %v5595_v47  ;;  %v688_v39 = vpop.permute.xlu2 %687 }
 0x13f   : > { %8783 = vst [vmem:[#allocation29_spill] sm:$0xff] %v5606_v51  ;;  %v5615_v63 = vsel %vm5568_vm15, %v882_v6, -1e+30  ;;  %v5620_v50 = vadd.f32 %v5270_v15, %v673_v54  ;;  %v5623_v60 = vadd.f32 %v5272_v17, %v673_v54  ;;  %v633_v28 = vpop.permute.xlu0 %632  ;;  %vm1118_vm13 = vnez %v1070_v13 }
 0x140   : > { %8784 = vst [vmem:[#allocation30_spill] sm:$0xff] %v5611_v61  ;;  %v1418_v53 = vmax.f32 %v5611_v61, %v5615_v63  ;;  %v759_v11 = vadd.f32 %v5270_v15, %v633_v28  ;;  %v760_v35 = vadd.f32 %v5272_v17, %v633_v28  ;;  %v1424_v54 = vmax.f32 %v5602_v45, %v5606_v51 }
 0x141   : > { %8785 = vst [vmem:[#allocation31_spill] sm:$0xff] %v5615_v63  ;;  %vm5635_vm14 = vcmp.ne.s32.totalorder %v1191_v32, 0  ;;  %v1195_v13 = vunpack.c.0.s8 %v1149_v52  ;;  %v1011_v14 = vunpack.c.2.s8 %v5592_v43  ;;  %v8789_v61 = vmax.f32 %v5458_v41, %v5462_v42  ;;  %v938_v41 = vld [vmem:[%s5083_s8 + $0x58] sm:$0xff] }
 0x142   : > { %1419 = vmax.xlane.f32.xlu1 %v1418_v53  ;;  %v8787_v10 = vsel %vm5635_vm14, 4294967295, %v8786_v10  ;;  %v823_v63 = vmul.f32 0.2, %v759_v11  ;;  %v824_v6 = vmul.f32 0.2, %v760_v35  ;;  %v1073_v53 = vpack.c.b16 %v1010_v3, %v1009_v21 }
 0x143   : > { %8788 = vst [vmem:[#allocation32_spill] sm:$0xff] %v8787_v10  ;;  %1416 = vmax.xlane.f32.xlu0 %v8789_v61  ;;  %v1150_v28 = vsel %vm1118_vm13, 16843009, %v8779_v46  ;;  %v5645_v22 = vmul.f32 0.2, %v5620_v50  ;;  %vm5650_vm2 = vcmp.ne.s32.totalorder %v1192_v7, 0  ;;  %v1012_v5 = vunpack.c.2.s8 %v5595_v47 }
 0x144   : > { %v5648_v32 = vmul.f32 0.2, %v5623_v60  ;;  %v8791_v20 = vsel %vm5650_vm2, 4294967295, %v8790_v20  ;;  %v887_v25 = vmax.f32 %v759_v11, %v823_v63  ;;  %v888_v23 = vmax.f32 %v760_v35, %v824_v6 }
 0x145   : > { %8792 = vst [vmem:[#allocation33_spill] sm:$0xff] %v8791_v20  ;;  %v1196_v42 = vunpack.c.1.s8 %v1149_v52  ;;  %v1074_v61 = vpack.c.b8 %v1073_v53, %v1073_v53  ;;  %v5658_v21 = vadd.f32 %v5270_v15, %v688_v39  ;;  %vm5660_vm6 = vcmp.ne.s32.totalorder %v1195_v13, 0  ;;  %v5720_v20 = vpop.permute.xlu1 %607  ;;  %v9021_v59 = vld [vmem:[#allocation28_spill] sm:$0xff] }
 0x146   : > { %v8793_v3 = vmov 0  ;;  %v1197_v51 = vunpack.c.0.s8 %v1150_v28  ;;  %v1075_v7 = vpack.c.b16 %v1012_v5, %v1011_v14  ;;  %v5666_v45 = vsel %vm5635_vm14, %v887_v25, -1e+30  ;;  %v9022_v0 = vld [vmem:[#allocation29_spill] sm:$0xff] }
 0x147   : > { %v8794_v3 = vsel %vm5660_vm6, 4294967295, %v8793_v3  ;;  %8796 = vst [vmem:[#allocation35_spill] sm:$0xff] %v5666_v45  ;;  %v5670_v11 = vsel %vm5650_vm2, %v888_v23, -1e+30  ;;  %vm1120_vm13 = vnez %v1074_v61  ;;  %vm953_vm8 = vnez %v937_v26  ;;  %v648_v52 = vpop.permute.xlu0 %647 }
 0x148   : > { %8795 = vst [vmem:[#allocation34_spill] sm:$0xff] %v8794_v3  ;;  %v1427_v35 = vmax.f32 %v5666_v45, %v5670_v11  ;;  %v1198_v63 = vunpack.c.1.s8 %v1150_v28  ;;  %v1152_v6 = vsel %vm1120_vm13, 16843009, %v8779_v46  ;;  %vm954_vm1 = vnez %v938_v41  ;;  %v9035_v56 = vld [vmem:[#allocation31_spill] sm:$0xff] }
 0x149   : > { %8797 = vst [vmem:[#allocation36_spill] sm:$0xff] %v5670_v11  ;;  %v5676_v14 = vadd.f32 %v5272_v17, %v688_v39  ;;  %v765_v25 = vadd.f32 %v5270_v15, %v648_v52  ;;  %v766_v5 = vadd.f32 %v5272_v17, %v648_v52  ;;  %vm5680_vm14 = vcmp.ne.s32.totalorder %v1196_v42, 0 }
 0x14a   : > { %v8798_v23 = vmov 0  ;;  %1428 = vmax.xlane.f32.xlu1 %v1427_v35  ;;  %v8801_v13 = vmax.f32 %v5482_v2, %v5517_v44  ;;  %v1076_v39 = vpack.c.b8 %v1075_v7, %v1075_v7  ;;  %v5694_v28 = vsel %vm953_vm8, 16843009, %v8779_v46 }
 0x14b   : > { %v8799_v23 = vsel %vm5680_vm14, 4294967295, %v8798_v23  ;;  %v829_v53 = vmul.f32 0.2, %v765_v25  ;;  %v830_v42 = vmul.f32 0.2, %v766_v5  ;;  %1425 = vmax.xlane.f32.xlu0 %v1424_v54  ;;  %v1201_v61 = vunpack.c.0.s8 %v1152_v6 }
 0x14c   : > { %8800 = vst [vmem:[#allocation37_spill] sm:$0xff] %v8799_v23  ;;  %v5691_v41 = vsel %vm5660_vm6, %v8801_v13, -1e+30  ;;  %v5697_v52 = vsel %vm954_vm1, 16843009, %v8779_v46  ;;  %v8803_v2 = vmax.f32 %v5495_v29, %v5532_v4  ;;  %vm5709_vm13 = vcmp.ne.s32.totalorder %v1197_v51, 0 }
 0x14d   : > { %8802 = vst [vmem:[#allocation38_spill] sm:$0xff] %v5691_v41  ;;  %v5700_v35 = vmul.f32 0.2, %v5658_v21  ;;  %v8805_v7 = vmov 0  ;;  %vm5713_vm8 = vcmp.ne.s32.totalorder %v1198_v63, 0  ;;  %v8808_v54 = vmov 0 }
 0x14e   : > { %v5707_v44 = vsel %vm5680_vm14, %v8803_v2, -1e+30  ;;  %v8806_v7 = vsel %vm5709_vm13, 4294967295, %v8805_v7  ;;  %v8809_v54 = vsel %vm5713_vm8, 4294967295, %v8808_v54  ;;  %v5718_v13 = vmul.f32 0.2, %v5676_v14 }
 0x14f   : > { %8804 = vst [vmem:[#allocation39_spill] sm:$0xff] %v5707_v44  ;;  %v893_v26 = vmax.f32 %v765_v25, %v829_v53  ;;  %v894_v3 = vmax.f32 %v766_v5, %v830_v42  ;;  %vm1121_vm1 = vnez %v1076_v39  ;;  %v1202_v29 = vunpack.c.1.s8 %v1152_v6  ;;  %v663_v5 = vpop.permute.xlu0 %662 }
 0x150   : > { %8807 = vst [vmem:[#allocation40_spill] sm:$0xff] %v8806_v7  ;;  %v1153_v4 = vsel %vm1121_vm1, 16843009, %v8779_v46  ;;  %v1015_v51 = vunpack.c.0.s8 %v5694_v28  ;;  %v1016_v2 = vunpack.c.0.s8 %v5697_v52  ;;  %vm5733_vm14 = vcmp.ne.s32.totalorder %v1201_v61, 0 }
 0x151   : > { %8810 = vst [vmem:[#allocation41_spill] sm:$0xff] %v8809_v54  ;;  %v5727_v63 = vsel %vm5709_vm13, %v893_v26, -1e+30  ;;  %v5731_v23 = vsel %vm5713_vm8, %v894_v3, -1e+30  ;;  %v1017_v6 = vunpack.c.1.s8 %v5694_v28  ;;  %v1203_v53 = vunpack.c.0.s8 %v1153_v4 }
 0x152   : > { %8811 = vst [vmem:[#allocation42_spill] sm:$0xff] %v5727_v63  ;;  %v1436_v39 = vmax.f32 %v5727_v63, %v5731_v23  ;;  %v1204_v42 = vunpack.c.1.s8 %v1153_v4  ;;  %v1079_v10 = vpack.c.b16 %v1016_v2, %v1015_v51  ;;  %v904_v26 = vmax.f32 %v5623_v60, %v5648_v32 }
 0x153   : > { %8812 = vst [vmem:[#allocation43_spill] sm:$0xff] %v5731_v23  ;;  %v771_v54 = vadd.f32 %v5270_v15, %v663_v5  ;;  %v772_v3 = vadd.f32 %v5272_v17, %v663_v5  ;;  %v1433_v61 = vmax.f32 %v5691_v41, %v5707_v44  ;;  %vm5748_vm1 = vcmp.ne.s32.totalorder %v1202_v29, 0  ;;  %v703_v29 = vpop.permute.xlu2 %702  ;;  %v939_v41 = vld [vmem:[%s5083_s8 + $0x60] sm:$0xff] }
 0x154   : > { %1437 = vmax.xlane.f32.xlu1 %v1436_v39  ;;  %v8815_v11 = vmov 0  ;;  %v1080_v4 = vpack.c.b8 %v1079_v10, %v1079_v10  ;;  %v1018_v51 = vunpack.c.1.s8 %v5697_v52  ;;  %v8818_v5 = vmax.f32 %v5550_v62, %v5585_v40 }
 0x155   : > { %v8816_v11 = vsel %vm5748_vm1, 4294967295, %v8815_v11  ;;  %v835_v32 = vmul.f32 0.2, %v771_v54  ;;  %v836_v2 = vmul.f32 0.2, %v772_v3  ;;  %1434 = vmax.xlane.f32.xlu0 %v1433_v61  ;;  %vm5762_vm6 = vcmp.ne.s32.totalorder %v1203_v53, 0 }
 0x156   : > { %8817 = vst [vmem:[#allocation44_spill] sm:$0xff] %v8816_v11  ;;  %v5760_v39 = vsel %vm5733_vm14, %v8818_v5, -1e+30  ;;  %v8819_v7 = vmov 0  ;;  %vm5766_vm8 = vcmp.ne.s32.totalorder %v1204_v42, 0  ;;  %v8822_v10 = vmov 0 }
 0x157   : > { %v8820_v7 = vsel %vm5762_vm6, 4294967295, %v8819_v7  ;;  %v8823_v10 = vsel %vm5766_vm8, 4294967295, %v8822_v10  ;;  %vm1123_vm13 = vnez %v1080_v4  ;;  %v1081_v60 = vpack.c.b16 %v1018_v51, %v1017_v6  ;;  %v940_v6 = vld [vmem:[%s5083_s8 + $0x68] sm:$0xff] }
 0x158   : > { %8821 = vst [vmem:[#allocation45_spill] sm:$0xff] %v8820_v7  ;;  %v899_v61 = vmax.f32 %v771_v54, %v835_v32  ;;  %v900_v23 = vmax.f32 %v772_v3, %v836_v2  ;;  %v8825_v62 = vmax.f32 %v5562_v31, %v5598_v49  ;;  %v1155_v53 = vsel %vm1123_vm13, 16843009, %v8779_v46  ;;  %v5793_v3 = vpop.permute.xlu1 %622 }
 0x159   : > { %8824 = vst [vmem:[#allocation46_spill] sm:$0xff] %v8823_v10  ;;  %v1207_v5 = vunpack.c.0.s8 %v1155_v53  ;;  %v1208_v63 = vunpack.c.1.s8 %v1155_v53  ;;  %v1082_v42 = vpack.c.b8 %v1081_v60, %v1081_v60  ;;  %v1021_v44 = vunpack.c.3.s8 %v5694_v28  ;;  %v678_v60 = vpop.permute.xlu0 %677 }
 0x15a   : > { %v5775_v40 = vsel %vm5748_vm1, %v8825_v62, -1e+30  ;;  %v5781_v4 = vadd.f32 %v5270_v15, %v703_v29  ;;  %v5785_v54 = vsel %vm5762_vm6, %v899_v61, -1e+30  ;;  %v5789_v31 = vsel %vm5766_vm8, %v900_v23, -1e+30 }
 0x15b   : > { %8826 = vst [vmem:[#allocation47_spill] sm:$0xff] %v5785_v54  ;;  %v1022_v49 = vunpack.c.3.s8 %v5697_v52  ;;  %v5796_v51 = vadd.f32 %v5272_v17, %v703_v29  ;;  %v1442_v32 = vmax.f32 %v5760_v39, %v5775_v40  ;;  %v1445_v2 = vmax.f32 %v5785_v54, %v5789_v31 }
 0x15c   : > { %8827 = vst [vmem:[#allocation48_spill] sm:$0xff] %v5789_v31  ;;  %vm1124_vm13 = vnez %v1082_v42  ;;  %v777_v61 = vadd.f32 %v5270_v15, %v678_v60  ;;  %v778_v23 = vadd.f32 %v5272_v17, %v678_v60  ;;  %vm5804_vm8 = vcmp.ne.s32.totalorder %v1207_v5, 0 }
 0x15d   : > { %v8828_v62 = vmov 0  ;;  %vm955_vm6 = vnez %v939_v41  ;;  %1446 = vmax.xlane.f32.xlu1 %v1445_v2  ;;  %vm5808_vm2 = vcmp.ne.s32.totalorder %v1208_v63, 0  ;;  %v8831_v29 = vmov 0  ;;  %1443 = vmax.xlane.f32.xlu0 %v1442_v32 }
 0x15e   : > { %v8829_v62 = vsel %vm5804_vm8, 4294967295, %v8828_v62  ;;  %v8832_v29 = vsel %vm5808_vm2, 4294967295, %v8831_v29  ;;  %v1156_v53 = vsel %vm1124_vm13, 16843009, %v8779_v46  ;;  %v1085_v10 = vpack.c.b16 %v1022_v49, %v1021_v44 }
 0x15f   : > { %8830 = vst [vmem:[#allocation49_spill] sm:$0xff] %v8829_v62  ;;  %vm956_vm15 = vnez %v940_v6  ;;  %v841_v7 = vmul.f32 0.2, %v777_v61  ;;  %v842_v42 = vmul.f32 0.2, %v778_v23  ;;  %v1209_v31 = vunpack.c.0.s8 %v1156_v53 }
 0x160   : > { %8833 = vst [vmem:[#allocation50_spill] sm:$0xff] %v8832_v29  ;;  %v1210_v54 = vunpack.c.1.s8 %v1156_v53  ;;  %v8834_v5 = vmax.f32 %v5620_v50, %v5645_v22  ;;  %v1086_v63 = vpack.c.b8 %v1085_v10, %v1085_v10  ;;  %v5821_v60 = vsel %vm955_vm6, 16843009, %v8779_v46  ;;  %v5857_v62 = vpop.permute.xlu1 %637 }
 0x161   : > { %v5824_v2 = vsel %vm956_vm15, 16843009, %v8779_v46  ;;  %v905_v44 = vmax.f32 %v777_v61, %v841_v7  ;;  %v906_v49 = vmax.f32 %v778_v23, %v842_v42  ;;  %vm5826_vm13 = vcmp.ne.s32.totalorder %v1209_v31, 0  ;;  %v693_v23 = vpop.permute.xlu0 %692 }
 0x162   : > { %v5818_v41 = vsel %vm5804_vm8, %v8834_v5, -1e+30  ;;  %v8836_v6 = vmov 0  ;;  %vm5830_vm7 = vcmp.ne.s32.totalorder %v1210_v54, 0  ;;  %v8839_v32 = vmov 0 }
 0x163   : > { %8835 = vst [vmem:[#allocation51_spill] sm:$0xff] %v5818_v41  ;;  %v8837_v6 = vsel %vm5826_vm13, 4294967295, %v8836_v6  ;;  %v8840_v32 = vsel %vm5830_vm7, 4294967295, %v8839_v32  ;;  %v5836_v22 = vsel %vm5808_vm2, %v904_v26, -1e+30  ;;  %vm1126_vm8 = vnez %v1086_v63 }
 0x164   : > { %8838 = vst [vmem:[#allocation52_spill] sm:$0xff] %v8837_v6  ;;  %v1023_v50 = vunpack.c.0.s8 %v5821_v60  ;;  %v1024_v10 = vunpack.c.0.s8 %v5824_v2  ;;  %v5842_v7 = vsel %vm5826_vm13, %v905_v44, -1e+30  ;;  %v5846_v31 = vsel %vm5830_vm7, %v906_v49, -1e+30 }
 0x165   : > { %8841 = vst [vmem:[#allocation53_spill] sm:$0xff] %v8840_v32  ;;  %v1158_v54 = vsel %vm1126_vm8, 16843009, %v8779_v46  ;;  %v1027_v61 = vunpack.c.2.s8 %v5821_v60  ;;  %v1454_v26 = vmax.f32 %v5842_v7, %v5846_v31  ;;  %v851_v63 = vmul.f32 0.2, %v5781_v4 }
 0x166   : > { %8842 = vst [vmem:[#allocation54_spill] sm:$0xff] %v5836_v22  ;;  %v1213_v53 = vunpack.c.0.s8 %v1158_v54  ;;  %v1214_v42 = vunpack.c.1.s8 %v1158_v54  ;;  %v1087_v5 = vpack.c.b16 %v1024_v10, %v1023_v50  ;;  %v783_v44 = vadd.f32 %v5270_v15, %v693_v23 }
 0x167   : > { %8843 = vst [vmem:[#allocation55_spill] sm:$0xff] %v5842_v7  ;;  %v784_v29 = vadd.f32 %v5272_v17, %v693_v23  ;;  %v1451_v49 = vmax.f32 %v5818_v41, %v5836_v22  ;;  %1455 = vmax.xlane.f32.xlu1 %v1454_v26  ;;  %v8845_v32 = vmov 0  ;;  %v8848_v54 = vmov 0 }
 0x168   : > { %8844 = vst [vmem:[#allocation56_spill] sm:$0xff] %v5846_v31  ;;  %vm5859_vm15 = vcmp.ne.s32.totalorder %v1213_v53, 0  ;;  %vm5863_vm6 = vcmp.ne.s32.totalorder %v1214_v42, 0  ;;  %v1088_v50 = vpack.c.b8 %v1087_v5, %v1087_v5  ;;  %v1028_v10 = vunpack.c.2.s8 %v5824_v2  ;;  %v941_v31 = vld [vmem:[%s5083_s8 + $0x70] sm:$0xff] }
 0x169   : > { %v8846_v32 = vsel %vm5859_vm15, 4294967295, %v8845_v32  ;;  %v8849_v54 = vsel %vm5863_vm6, 4294967295, %v8848_v54  ;;  %v847_v6 = vmul.f32 0.2, %v783_v44  ;;  %v848_v23 = vmul.f32 0.2, %v784_v29  ;;  %1452 = vmax.xlane.f32.xlu0 %v1451_v49 }
 0x16a   : > { %8847 = vst [vmem:[#allocation57_spill] sm:$0xff] %v8846_v32  ;;  %v8851_v22 = vmax.f32 %v5658_v21, %v5700_v35  ;;  %v1029_v53 = vunpack.c.3.s8 %v5821_v60  ;;  %v8853_v42 = vmax.f32 %v5676_v14, %v5718_v13  ;;  %vm1127_vm8 = vnez %v1088_v50 }
 0x16b   : > { %8850 = vst [vmem:[#allocation58_spill] sm:$0xff] %v8849_v54  ;;  %v1091_v41 = vpack.c.b16 %v1028_v10, %v1027_v61  ;;  %v1030_v49 = vunpack.c.3.s8 %v5824_v2  ;;  %v852_v21 = vmul.f32 0.2, %v5796_v51  ;;  %v911_v35 = vmax.f32 %v783_v44, %v847_v6  ;;  %v708_v61 = vpop.permute.xlu0 %707 }
 0x16c   : > { %v5873_v26 = vsel %vm5859_vm15, %v8851_v22, -1e+30  ;;  %v5881_v5 = vsel %vm5863_vm6, %v8853_v42, -1e+30  ;;  %v912_v32 = vmax.f32 %v784_v29, %v848_v23  ;;  %v1159_v22 = vsel %vm1127_vm8, 16843009, %v8779_v46 }
 0x16d   : > { %8852 = vst [vmem:[#allocation59_spill] sm:$0xff] %v5873_v26  ;;  %v1215_v7 = vunpack.c.0.s8 %v1159_v22  ;;  %v1216_v45 = vunpack.c.1.s8 %v1159_v22  ;;  %v1092_v11 = vpack.c.b8 %v1091_v41, %v1091_v41  ;;  %v1093_v14 = vpack.c.b16 %v1030_v49, %v1029_v53 }
 0x16e   : > { %8854 = vst [vmem:[#allocation60_spill] sm:$0xff] %v5881_v5  ;;  %v915_v13 = vmax.f32 %v5781_v4, %v851_v63  ;;  %v1460_v50 = vmax.f32 %v5873_v26, %v5881_v5  ;;  %v8855_v10 = vmov 0  ;;  %v8858_v29 = vmov 0  ;;  %v942_v63 = vld [vmem:[%s5083_s8 + $0x78] sm:$0xff] }
 0x16f   : > { %vm5890_vm15 = vcmp.ne.s32.totalorder %v1215_v7, 0  ;;  %vm5894_vm2 = vcmp.ne.s32.totalorder %v1216_v45, 0  ;;  %vm1129_vm8 = vnez %v1092_v11  ;;  %v1094_v6 = vpack.c.b8 %v1093_v14, %v1093_v14  ;;  %v718_v14 = vpop.permute.xlu2 %717 }
 0x170   : > { %v8856_v10 = vsel %vm5890_vm15, 4294967295, %v8855_v10  ;;  %v8859_v29 = vsel %vm5894_vm2, 4294967295, %v8858_v29  ;;  %v789_v41 = vadd.f32 %v5270_v15, %v708_v61  ;;  %v790_v44 = vadd.f32 %v5272_v17, %v708_v61 }
 0x171   : > { %8857 = vst [vmem:[#allocation61_spill] sm:$0xff] %v8856_v10  ;;  %v5902_v4 = vsel %vm5890_vm15, %v911_v35, -1e+30  ;;  %v5906_v7 = vsel %vm5894_vm2, %v912_v32, -1e+30  ;;  %v916_v45 = vmax.f32 %v5796_v51, %v852_v21  ;;  %vm1130_vm6 = vnez %v1094_v6  ;;  %1461 = vmax.xlane.f32.xlu0 %v1460_v50  ;;  %v5913_v35 = vpop.permute.xlu1 %652 }
 0x172   : > { %8860 = vst [vmem:[#allocation62_spill] sm:$0xff] %v8859_v29  ;;  %v1463_v23 = vmax.f32 %v5902_v4, %v5906_v7  ;;  %v1161_v11 = vsel %vm1129_vm8, 16843009, %v8779_v46  ;;  %v853_v53 = vmul.f32 0.2, %v789_v41  ;;  %vm958_vm2 = vnez %v942_v63 }
 0x173   : > { %8861 = vst [vmem:[#allocation63_spill] sm:$0xff] %v5902_v4  ;;  %v854_v42 = vmul.f32 0.2, %v790_v44  ;;  %v1219_v49 = vunpack.c.0.s8 %v1161_v11  ;;  %v1220_v22 = vunpack.c.1.s8 %v1161_v11  ;;  %v1162_v32 = vsel %vm1130_vm6, 16843009, %v8779_v46  ;;  %v6112_v4 = vld [vmem:[#allocation2 + $0x10] sm:$0xff] }
 0x174   : > { %8862 = vst [vmem:[#allocation64_spill] sm:$0xff] %v5906_v7  ;;  %1464 = vmax.xlane.f32.xlu1 %v1463_v23  ;;  %vm8863_vm15 = vnez %v941_v31  ;;  %v917_v21 = vmax.f32 %v789_v41, %v853_v53  ;;  %v8864_v6 = vmov 0  ;;  %v8867_v50 = vmov 0 }
 0x175   : > { %v5918_v51 = vsel %vm8863_vm15, 16843009, %v8779_v46  ;;  %v918_v61 = vmax.f32 %v790_v44, %v854_v42  ;;  %vm5920_vm8 = vcmp.ne.s32.totalorder %v1219_v49, 0  ;;  %vm5924_vm7 = vcmp.ne.s32.totalorder %v1220_v22, 0  ;;  %8917 = vst [vmem:[#allocation86_spill] sm:$0xff] %v6112_v4 }
 0x176   : > { %v8865_v6 = vsel %vm5920_vm8, 4294967295, %v8864_v6  ;;  %v8868_v50 = vsel %vm5924_vm7, 4294967295, %v8867_v50  ;;  %v5930_v23 = vsel %vm5920_vm8, %v915_v13, -1e+30  ;;  %v5934_v63 = vsel %vm5924_vm7, %v916_v45, -1e+30 }
 0x177   : > { %8866 = vst [vmem:[#allocation65_spill] sm:$0xff] %v8865_v6  ;;  %v1221_v31 = vunpack.c.0.s8 %v1162_v32  ;;  %v1222_v11 = vunpack.c.1.s8 %v1162_v32  ;;  %v793_v41 = vadd.f32 %v5270_v15, %v718_v14  ;;  %v794_v44 = vadd.f32 %v5272_v17, %v718_v14 }
 0x178   : > { %8869 = vst [vmem:[#allocation66_spill] sm:$0xff] %v8868_v50  ;;  %v5939_v53 = vsel %vm958_vm2, 16843009, %v8779_v46  ;;  %v1033_v42 = vunpack.c.1.s8 %v5918_v51  ;;  %v8872_v49 = vmov 0  ;;  %v8875_v13 = vmov 0 }
 0x179   : > { %8870 = vst [vmem:[#allocation67_spill] sm:$0xff] %v5930_v23  ;;  %vm5942_vm15 = vcmp.ne.s32.totalorder %v1221_v31, 0  ;;  %vm5946_vm6 = vcmp.ne.s32.totalorder %v1222_v11, 0  ;;  %v1034_v45 = vunpack.c.1.s8 %v5939_v53  ;;  %v1469_v22 = vmax.f32 %v5930_v23, %v5934_v63 }
 0x17a   : > { %8871 = vst [vmem:[#allocation68_spill] sm:$0xff] %v5934_v63  ;;  %v8873_v49 = vsel %vm5942_vm15, 4294967295, %v8872_v49  ;;  %v8876_v13 = vsel %vm5946_vm6, 4294967295, %v8875_v13  ;;  %v5955_v14 = vsel %vm5942_vm15, %v917_v21, -1e+30  ;;  %v749_v31 = vadd.f32 %v5270_v15, %v5720_v20 }
 0x17b   : > { %8874 = vst [vmem:[#allocation69_spill] sm:$0xff] %v8873_v49  ;;  %v5959_v32 = vsel %vm5946_vm6, %v918_v61, -1e+30  ;;  %v1097_v50 = vpack.c.b16 %v1034_v45, %v1033_v42  ;;  %v857_v6 = vmul.f32 0.2, %v793_v41  ;;  %1470 = vmax.xlane.f32.xlu0 %v1469_v22  ;;  %v750_v63 = vadd.f32 %v5272_v17, %v5720_v20 }
 0x17c   : > { %8877 = vst [vmem:[#allocation70_spill] sm:$0xff] %v8876_v13  ;;  %v1472_v11 = vmax.f32 %v5955_v14, %v5959_v32  ;;  %v858_v54 = vmul.f32 0.2, %v794_v44  ;;  %v989_v23 = vunpack.c.3.s8 %v5254_v57  ;;  %v5968_v13 = vpop.permute.xlu1 %667  ;;  %v990_v61 = vunpack.c.3.s8 %v5257_v58 }
 0x17d   : > { %8878 = vst [vmem:[#allocation71_spill] sm:$0xff] %v5955_v14  ;;  %v1098_v21 = vpack.c.b8 %v1097_v50, %v1097_v50  ;;  %v813_v49 = vmul.f32 0.2, %v749_v31  ;;  %v755_v29 = vadd.f32 %v5270_v15, %v5793_v3  ;;  %v756_v42 = vadd.f32 %v5272_v17, %v5793_v3 }
 0x17e   : > { %8879 = vst [vmem:[#allocation72_spill] sm:$0xff] %v5959_v32  ;;  %1473 = vmax.xlane.f32.xlu1 %v1472_v11  ;;  %v921_v45 = vmax.f32 %v793_v41, %v857_v6  ;;  %v922_v22 = vmax.f32 %v794_v44, %v858_v54  ;;  %v1053_v11 = vpack.c.b16 %v990_v61, %v989_v23  ;;  %v814_v50 = vmul.f32 0.2, %v750_v63 }
 0x17f   : > { %vm1132_vm2 = vnez %v1098_v21  ;;  %v995_v5 = vunpack.c.2.s8 %v5276_v24  ;;  %v996_v58 = vunpack.c.2.s8 %v5280_v27  ;;  %v819_v32 = vmul.f32 0.2, %v755_v29 }
 0x180   : > { %v1164_v20 = vsel %vm1132_vm2, 16843009, %v8779_v46  ;;  %v1054_v26 = vpack.c.b8 %v1053_v11, %v1053_v11  ;;  %v820_v14 = vmul.f32 0.2, %v756_v42  ;;  %v8880_v7 = vmov 0 }
 0x181   : > { %v1225_v10 = vunpack.c.0.s8 %v1164_v20  ;;  %v1226_v57 = vunpack.c.1.s8 %v1164_v20  ;;  %v8883_v3 = vmov 0  ;;  %v1059_v27 = vpack.c.b16 %v996_v58, %v995_v5 }
 0x182   : > { %vm1110_vm2 = vnez %v1054_v26  ;;  %v877_v6 = vmax.f32 %v749_v31, %v813_v49  ;;  %v878_v23 = vmax.f32 %v750_v63, %v814_v50  ;;  %v1001_v20 = vunpack.c.1.s8 %v5408_v1 }
 0x183   : > { %vm5978_vm7 = vcmp.ne.s32.totalorder %v1225_v10, 0  ;;  %vm5982_vm8 = vcmp.ne.s32.totalorder %v1226_v57, 0  ;;  %v1142_v41 = vsel %vm1110_vm2, 16843009, %v8779_v46  ;;  %v1060_v61 = vpack.c.b8 %v1059_v27, %v1059_v27 }
 0x184   : > { %v8881_v7 = vsel %vm5978_vm7, 4294967295, %v8880_v7  ;;  %v8884_v3 = vsel %vm5982_vm8, 4294967295, %v8883_v3  ;;  %v5988_v54 = vsel %vm5978_vm7, %v921_v45, -1e+30  ;;  %v5992_v24 = vsel %vm5982_vm8, %v922_v22, -1e+30  ;;  %v6011_v31 = vpop.permute.xlu1 %682 }
 0x185   : > { %8882 = vst [vmem:[#allocation73_spill] sm:$0xff] %v8881_v7  ;;  %v1478_v10 = vmax.f32 %v5988_v54, %v5992_v24  ;;  %v1181_v44 = vunpack.c.0.s8 %v1142_v41  ;;  %v1182_v21 = vunpack.c.1.s8 %v1142_v41  ;;  %v761_v45 = vadd.f32 %v5270_v15, %v5857_v62 }
 0x186   : > { %8885 = vst [vmem:[#allocation74_spill] sm:$0xff] %v8884_v3  ;;  %v762_v22 = vadd.f32 %v5272_v17, %v5857_v62  ;;  %v883_v26 = vmax.f32 %v755_v29, %v819_v32  ;;  %v1002_v5 = vunpack.c.1.s8 %v5420_v48  ;;  %v8888_v49 = vmov 0 }
 0x187   : > { %8886 = vst [vmem:[#allocation75_spill] sm:$0xff] %v5988_v54  ;;  %1479 = vmax.xlane.f32.xlu0 %v1478_v10  ;;  %vm6003_vm8 = vcmp.ne.s32.totalorder %v1181_v44, 0  ;;  %vm6007_vm2 = vcmp.ne.s32.totalorder %v1182_v21, 0  ;;  %v8891_v63 = vmov 0  ;;  %v884_v1 = vmax.f32 %v756_v42, %v820_v14 }
 0x188   : > { %8887 = vst [vmem:[#allocation76_spill] sm:$0xff] %v5992_v24  ;;  %v8889_v49 = vsel %vm6003_vm8, 4294967295, %v8888_v49  ;;  %v8892_v63 = vsel %vm6007_vm2, 4294967295, %v8891_v63  ;;  %vm1113_vm7 = vnez %v1060_v61  ;;  %v6015_v11 = vsel %vm6003_vm8, %v877_v6, -1e+30  ;;  %v6664_v24 = vld [vmem:[#allocation2 + $0xf8] sm:$0xff] }
 0x189   : > { %8890 = vst [vmem:[#allocation77_spill] sm:$0xff] %v8889_v49  ;;  %v6019_v62 = vsel %vm6007_vm2, %v878_v23, -1e+30  ;;  %v1145_v48 = vsel %vm1113_vm7, 16843009, %v8779_v46  ;;  %v1065_v29 = vpack.c.b16 %v1002_v5, %v1001_v20  ;;  %v8894_v14 = vmov 0 }
 0x18a   : > { %8893 = vst [vmem:[#allocation78_spill] sm:$0xff] %v8892_v63  ;;  %v1412_v32 = vmax.f32 %v6015_v11, %v6019_v62  ;;  %v1187_v50 = vunpack.c.0.s8 %v1145_v48  ;;  %v1188_v57 = vunpack.c.1.s8 %v1145_v48  ;;  %v825_v27 = vmul.f32 0.2, %v761_v45 }
 0x18b   : > { %v1066_v58 = vpack.c.b8 %v1065_v29, %v1065_v29  ;;  %v8897_v42 = vmov 0  ;;  %v826_v10 = vmul.f32 0.2, %v762_v22  ;;  %v1007_v61 = vunpack.c.0.s8 %v5592_v43  ;;  %9024 = vst [vmem:[#allocation28_spill] sm:$0xff] %v6664_v24 }
 0x18c   : > { %1413 = vmax.xlane.f32.xlu2 %v1412_v32  ;;  %vm6024_vm6 = vcmp.ne.s32.totalorder %v1187_v50, 0  ;;  %vm6028_vm15 = vcmp.ne.s32.totalorder %v1188_v57, 0  ;;  %v1008_v20 = vunpack.c.0.s8 %v5595_v47  ;;  %v767_v5 = vadd.f32 %v5270_v15, %v5913_v35  ;;  %v6049_v50 = vpop.permute.xlu1 %697 }
 0x18d   : > { %v8895_v14 = vsel %vm6024_vm6, 4294967295, %v8894_v14  ;;  %v8898_v42 = vsel %vm6028_vm15, 4294967295, %v8897_v42  ;;  %v6034_v6 = vsel %vm6024_vm6, %v883_v26, -1e+30  ;;  %v6038_v23 = vsel %vm6028_vm15, %v884_v1, -1e+30 }
 0x18e   : > { %8896 = vst [vmem:[#allocation79_spill] sm:$0xff] %v8895_v14  ;;  %vm1116_vm7 = vnez %v1066_v58  ;;  %v1421_v26 = vmax.f32 %v6034_v6, %v6038_v23  ;;  %v889_v48 = vmax.f32 %v761_v45, %v825_v27  ;;  %v890_v29 = vmax.f32 %v762_v22, %v826_v10 }
 0x18f   : > { %8899 = vst [vmem:[#allocation80_spill] sm:$0xff] %v8898_v42  ;;  %v1148_v41 = vsel %vm1116_vm7, 16843009, %v8779_v46  ;;  %v768_v1 = vadd.f32 %v5272_v17, %v5913_v35  ;;  %v1071_v32 = vpack.c.b16 %v1008_v20, %v1007_v61  ;;  %v8900_v57 = vmov 0 }
 0x190   : > { %v1193_v44 = vunpack.c.0.s8 %v1148_v41  ;;  %v1194_v21 = vunpack.c.1.s8 %v1148_v41  ;;  %v8903_v58 = vmov 0  ;;  %v831_v3 = vmul.f32 0.2, %v767_v5 }
 0x191   : > { %v1072_v41 = vpack.c.b8 %v1071_v32, %v1071_v32  ;;  %v832_v45 = vmul.f32 0.2, %v768_v1  ;;  %v1014_v61 = vunpack.c.3.s8 %v5595_v47  ;;  %v773_v20 = vadd.f32 %v5270_v15, %v5968_v13 }
 0x192   : > { %vm6051_vm7 = vcmp.ne.s32.totalorder %v1193_v44, 0  ;;  %vm6055_vm13 = vcmp.ne.s32.totalorder %v1194_v21, 0  ;;  %v1013_v21 = vunpack.c.3.s8 %v5592_v43  ;;  %v895_v32 = vmax.f32 %v767_v5, %v831_v3 }
 0x193   : > { %v8901_v57 = vsel %vm6051_vm7, 4294967295, %v8900_v57  ;;  %v8904_v58 = vsel %vm6055_vm13, 4294967295, %v8903_v58  ;;  %v6061_v22 = vsel %vm6051_vm7, %v889_v48, -1e+30  ;;  %v6065_v35 = vsel %vm6055_vm13, %v890_v29, -1e+30 }
 0x194   : > { %8902 = vst [vmem:[#allocation81_spill] sm:$0xff] %v8901_v57  ;;  %1422 = vmax.xlane.f32.xlu2 %v1421_v26  ;;  %vm1119_vm15 = vnez %v1072_v41  ;;  %v567_v26 = vld [vmem:[%s5071_s27 + $0xf0] sm:$0xff]  ;;  %v1430_v48 = vmax.f32 %v6061_v22, %v6065_v35  ;;  %v896_v7 = vmax.f32 %v768_v1, %v832_v45  ;;  %v774_v29 = vadd.f32 %v5272_v17, %v5968_v13  ;;  %v6085_v54 = vpop.permute.xlu1 %712 }
 0x195   : > { %8905 = vst [vmem:[#allocation82_spill] sm:$0xff] %v8904_v58  ;;  %v1151_v27 = vsel %vm1119_vm15, 16843009, %v8779_v46  ;;  %v1077_v41 = vpack.c.b16 %v1014_v61, %v1013_v21  ;;  %v1020_v21 = vunpack.c.2.s8 %v5697_v52  ;;  %v779_v61 = vadd.f32 %v5270_v15, %v6011_v31 }
 0x196   : > { %8906 = vst [vmem:[#allocation83_spill] sm:$0xff] %v6065_v35  ;;  %v1199_v10 = vunpack.c.0.s8 %v1151_v27  ;;  %v1200_v44 = vunpack.c.1.s8 %v1151_v27  ;;  %v837_v27 = vmul.f32 0.2, %v773_v20  ;;  %v838_v3 = vmul.f32 0.2, %v774_v29 }
 0x197   : > { %v1078_v47 = vpack.c.b8 %v1077_v41, %v1077_v41  ;;  %v8931_v42 = vmov 0  ;;  %v8991_v49 = vmov 0 }
 0x198   : > { %vm6077_vm15 = vcmp.ne.s32.totalorder %v1199_v10, 0  ;;  %vm6081_vm13 = vcmp.ne.s32.totalorder %v1200_v44, 0  ;;  %v1019_v44 = vunpack.c.2.s8 %v5694_v28  ;;  %v8914_v28 = vmov 0 }
 0x199   : > { %v6089_v5 = vsel %vm6077_vm15, %v895_v32, -1e+30  ;;  %v6093_v13 = vsel %vm6081_vm13, %v896_v7, -1e+30  ;;  %vm1122_vm7 = vnez %v1078_v47  ;;  %v902_v32 = vmax.f32 %v774_v29, %v838_v3  ;;  %v6122_v29 = vld [vmem:[#allocation2] sm:$0xff] }
 0x19a   : > { %v1154_v1 = vsel %vm1122_vm7, 16843009, %v8779_v46  ;;  %v780_v7 = vadd.f32 %v5272_v17, %v6011_v31  ;;  %v1083_v41 = vpack.c.b16 %v1020_v21, %v1019_v44  ;;  %v8911_v47 = vmov 0 }
 0x19b   : > { %722 = vperm.xlu0 %4610, %v567_v26   ;;  %v1205_v45 = vunpack.c.0.s8 %v1154_v1  ;;  %v1206_v10 = vunpack.c.1.s8 %v1154_v1  ;;  %v1439_v26 = vmax.f32 %v6089_v5, %v6093_v13  ;;  %v843_v1 = vmul.f32 0.2, %v779_v61 }
 0x19c   : > { %1431 = vmax.xlane.f32.xlu2 %v1430_v48  ;;  %v901_v48 = vmax.f32 %v773_v20, %v837_v27  ;;  %v1084_v52 = vpack.c.b8 %v1083_v41, %v1083_v41  ;;  %v844_v58 = vmul.f32 0.2, %v780_v7  ;;  %v1399_v27 = vpop.xlane.xlu1 %1398  ;;  %v785_v44 = vadd.f32 %v5270_v15, %v6049_v50 }
 0x19d   : > { %vm6104_vm6 = vcmp.ne.s32.totalorder %v1205_v45, 0  ;;  %vm6108_vm7 = vcmp.ne.s32.totalorder %v1206_v10, 0  ;;  %v1025_v45 = vunpack.c.1.s8 %v5821_v60  ;;  %v1026_v10 = vunpack.c.1.s8 %v5824_v2 }
 0x19e   : > { %v8912_v47 = vsel %vm6104_vm6, 4294967295, %v8911_v47  ;;  %v8915_v28 = vsel %vm6108_vm7, 4294967295, %v8914_v28  ;;  %v6116_v20 = vsel %vm6104_vm6, %v901_v48, -1e+30  ;;  %v6120_v31 = vsel %vm6108_vm7, %v902_v32, -1e+30  ;;  %v1393_v41 = vpop.xlane.xlu2 %1392 }
 0x19f   : > { %8913 = vst [vmem:[#allocation84_spill] sm:$0xff] %v8912_v47  ;;  %vm1125_vm2 = vnez %v1084_v52  ;;  %v6130_v21 = vmax.f32 %v6112_v4, %v1399_v27  ;;  %v786_v32 = vadd.f32 %v5272_v17, %v6049_v50  ;;  %vm8675_vm7 = vcmask 7168  }
 0x1a0   : > { %8916 = vst [vmem:[#allocation85_spill] sm:$0xff] %v8915_v28  ;;  %v1157_v3 = vsel %vm1125_vm2, 16843009, %v8779_v46  ;;  %v1448_v52 = vmax.f32 %v6116_v20, %v6120_v31  ;;  %v1089_v28 = vpack.c.b16 %v1026_v10, %v1025_v45  ;;  %v907_v60 = vmax.f32 %v779_v61, %v843_v1 }
 0x1a1   : > { %8918 = vst [vmem:[#allocation87_spill] sm:$0xff] %v6116_v20  ;;  %v1212_v48 = vunpack.c.1.s8 %v1157_v3  ;;  %v908_v47 = vmax.f32 %v780_v7, %v844_v58  ;;  %v6137_v2 = vmax.f32 %v6122_v29, %v1393_v41  ;;  %v8921_v27 = vmov 0  ;;  %v6154_v7 = vld [vmem:[#allocation2 + $0x8] sm:$0xff] }
 0x1a2   : > { %8919 = vst [vmem:[#allocation88_spill] sm:$0xff] %v6120_v31  ;;  %v8924_v50 = vmov 0  ;;  %v849_v58 = vmul.f32 0.2, %v785_v44  ;;  %v850_v61 = vmul.f32 0.2, %v786_v32  ;;  %v1031_v45 = vunpack.c.0.s8 %v5918_v51 }
 0x1a3   : > { %8920 = vst [vmem:[#allocation89_spill] sm:$0xff] %v6130_v21  ;;  %vm6145_vm6 = vcmp.ne.s32.totalorder %v1212_v48, 0  ;;  %1617 = vperm.xlu0 %4610, %v6137_v2   ;;  %v1032_v4 = vunpack.c.0.s8 %v5939_v53 }
 0x1a4   : > { %1440 = vmax.xlane.f32.xlu2 %v1439_v26  ;;  %v1211_v26 = vunpack.c.0.s8 %v1157_v3  ;;  %2884 = vst.msk [vmem:[#allocation2 + $0x10] sm:$0xff] %vm8675_vm7, %v6130_v21  ;;  %v8925_v50 = vsel %vm6145_vm6, 4294967295, %v8924_v50  ;;  %v1090_v3 = vpack.c.b8 %v1089_v28, %v1089_v28  ;;  %v6162_v28 = vsel %vm6145_vm6, %v908_v47, -1e+30 }
 0x1a5   : > { %8926 = vst [vmem:[#allocation91_spill] sm:$0xff] %v8925_v50  ;;  %v1095_v57 = vpack.c.b16 %v1032_v4, %v1031_v45  ;;  %v914_v31 = vmax.f32 %v786_v32, %v850_v61  ;;  %v6198_v45 = vld [vmem:[#allocation2 + $0x28] sm:$0xff] }
 0x1a6   : > { %vm6141_vm2 = vcmp.ne.s32.totalorder %v1211_v26, 0  ;;  %2882 = vst.msk [vmem:[#allocation2] sm:$0xff] %vm8675_vm7, %v6137_v2  ;;  %vm1128_vm8 = vnez %v1090_v3  ;;  %v6165_v26 = vld [vmem:[#allocation2 + $0x18] sm:$0xff]  ;;  %v1396_v3 = vpop.xlane.xlu0 %1395  ;;  %v1402_v50 = vpop.xlane.xlu2 %1401 }
 0x1a7   : > { %v8922_v27 = vsel %vm6141_vm2, 4294967295, %v8921_v27  ;;  %8927 = vst [vmem:[#allocation92_spill] sm:$0xff] %v6154_v7  ;;  %v6158_v1 = vsel %vm6141_vm2, %v907_v60, -1e+30  ;;  %v1160_v10 = vsel %vm1128_vm8, 16843009, %v8779_v46  ;;  %v792_v60 = vadd.f32 %v5272_v17, %v6085_v54 }
 0x1a8   : > { %8923 = vst [vmem:[#allocation90_spill] sm:$0xff] %v8922_v27  ;;  %v1217_v48 = vunpack.c.0.s8 %v1160_v10  ;;  %v1218_v41 = vunpack.c.1.s8 %v1160_v10  ;;  %v6174_v47 = vmax.f32 %v6154_v7, %v1396_v3  ;;  %v1457_v27 = vmax.f32 %v6158_v1, %v6162_v28 }
 0x1a9   : > { %8928 = vst [vmem:[#allocation93_spill] sm:$0xff] %v6158_v1  ;;  %v913_v10 = vmax.f32 %v785_v44, %v849_v58  ;;  %v6179_v20 = vmax.f32 %v6165_v26, %v1402_v50  ;;  %v1096_v3 = vpack.c.b8 %v1095_v57, %v1095_v57  ;;  %v856_v32 = vmul.f32 0.2, %v792_v60  ;;  %v6196_v50 = vld [vmem:[#allocation2 + $0x30] sm:$0xff] }
 0x1aa   : > { %8929 = vst [vmem:[#allocation94_spill] sm:$0xff] %v6162_v28  ;;  %vm6183_vm8 = vcmp.ne.s32.totalorder %v1217_v48, 0  ;;  %vm6187_vm6 = vcmp.ne.s32.totalorder %v1218_v41, 0  ;;  %v6209_v48 = vld [vmem:[#allocation2 + $0x20] sm:$0xff] }
 0x1ab   : > { %8930 = vst [vmem:[#allocation95_spill] sm:$0xff] %v6174_v47  ;;  %v8932_v42 = vsel %vm6183_vm8, 4294967295, %v8931_v42  ;;  %1632 = vperm.xlu0 %4610, %v6179_v20   ;;  %vm1131_vm2 = vnez %v1096_v3  ;;  %v6202_v58 = vsel %vm6183_vm8, %v913_v10, -1e+30  ;;  %v6206_v57 = vsel %vm6187_vm6, %v914_v31, -1e+30 }
 0x1ac   : > { %1449 = vmax.xlane.f32.xlu2 %v1448_v52  ;;  %v791_v52 = vadd.f32 %v5270_v15, %v6085_v54  ;;  %2883 = vst.msk [vmem:[#allocation2 + $0x8] sm:$0xff] %vm8675_vm7, %v6174_v47  ;;  %v8934_v54 = vmov 0  ;;  %v1163_v61 = vsel %vm1131_vm2, 16843009, %v8779_v46  ;;  %v1411_v41 = vpop.xlane.xlu1 %1410  ;;  %v1466_v10 = vmax.f32 %v6202_v58, %v6206_v57 }
 0x1ad   : > { %8933 = vst [vmem:[#allocation96_spill] sm:$0xff] %v8932_v42  ;;  %v8935_v54 = vsel %vm6187_vm6, 4294967295, %v8934_v54  ;;  %v1223_v4 = vunpack.c.0.s8 %v1163_v61  ;;  %v1224_v7 = vunpack.c.1.s8 %v1163_v61  ;;  %v6212_v28 = vmax.f32 %v6196_v50, %v1411_v41 }
 0x1ae   : > { %8936 = vst [vmem:[#allocation97_spill] sm:$0xff] %v8935_v54  ;;  %v855_v44 = vmul.f32 0.2, %v791_v52  ;;  %v920_v54 = vmax.f32 %v792_v60, %v856_v32  ;;  %v8944_v41 = vmov 0  ;;  %v6241_v60 = vld [vmem:[#allocation2 + $0x40] sm:$0xff] }
 0x1af   : > { %2885 = vst.msk [vmem:[#allocation2 + $0x18] sm:$0xff] %vm8675_vm7, %v6179_v20  ;;  %v1405_v3 = vpop.xlane.xlu2 %1404  ;;  %vm6228_vm2 = vcmp.ne.s32.totalorder %v1223_v4, 0  ;;  %vm6232_vm6 = vcmp.ne.s32.totalorder %v1224_v7, 0 }
 0x1b0   : > { %8937 = vst [vmem:[#allocation98_spill] sm:$0xff] %v6196_v50  ;;  %v919_v31 = vmax.f32 %v791_v52, %v855_v44  ;;  %v6220_v1 = vmax.f32 %v6209_v48, %v1405_v3  ;;  %v8945_v41 = vsel %vm6228_vm2, 4294967295, %v8944_v41  ;;  %v6239_v52 = vld [vmem:[#allocation2 + $0x48] sm:$0xff]  ;;  %v6249_v7 = vsel %vm6232_vm6, %v920_v54, -1e+30  ;;  %v6266_v54 = vld [vmem:[#allocation2 + $0x60] sm:$0xff] }
 0x1b1   : > { %8938 = vst [vmem:[#allocation99_spill] sm:$0xff] %v6198_v45 }
 0x1b2   : > { %8939 = vst [vmem:[#allocation100_spill] sm:$0xff] %v6202_v58  ;;  %v6245_v4 = vsel %vm6228_vm2, %v919_v31, -1e+30 }
 0x1b3   : > { %8940 = vst [vmem:[#allocation101_spill] sm:$0xff] %v6206_v57  ;;  %v6387_v57 = vld [vmem:[#allocation2 + $0x50] sm:$0xff] }
 0x1b4   : > { %1458 = vmax.xlane.f32.xlu2 %v1457_v27  ;;  %8941 = vst [vmem:[#allocation102_spill] sm:$0xff] %v6209_v48  ;;  %v1408_v27 = vpop.xlane.xlu0 %1407 }
 0x1b5   : > { %v6215_v42 = vmax.f32 %v6198_v45, %v1408_v27  ;;  %8943 = vst [vmem:[#allocation104_spill] sm:$0xff] %v6220_v1  ;;  %v8947_v27 = vmov 0  ;;  %v1420_v44 = vpop.xlane.xlu1 %1419 }
 0x1b6   : > { %2888 = vst.msk [vmem:[#allocation2 + $0x30] sm:$0xff] %vm8675_vm7, %v6212_v28  ;;  %v8948_v27 = vsel %vm6232_vm6, 4294967295, %v8947_v27  ;;  %v6252_v32 = vmax.f32 %v6239_v52, %v1420_v44  ;;  %v6268_v44 = vld [vmem:[#allocation2 + $0x58] sm:$0xff] }
 0x1b7   : > { %8942 = vst [vmem:[#allocation103_spill] sm:$0xff] %v6215_v42  ;;  %1642 = vperm.xlu0 %4610, %v6215_v42  }
 0x1b8   : > { %2887 = vst.msk [vmem:[#allocation2 + $0x28] sm:$0xff] %vm8675_vm7, %v6215_v42 }
 0x1b9   : > { %8946 = vst [vmem:[#allocation105_spill] sm:$0xff] %v8945_v41 }
 0x1ba   : > { %8949 = vst [vmem:[#allocation106_spill] sm:$0xff] %v8948_v27 }
 0x1bb   : > { %2886 = vst.msk [vmem:[#allocation2 + $0x20] sm:$0xff] %vm8675_vm7, %v6220_v1 }
 0x1bc   : > { %8950 = vst [vmem:[#allocation107_spill] sm:$0xff] %v6239_v52  ;;  %1467 = vmax.xlane.f32.xlu2 %v1466_v10  ;;  %v1417_v3 = vpop.xlane.xlu0 %1416  ;;  %v1475_v10 = vmax.f32 %v6245_v4, %v6249_v7 }
 0x1bd   : > { %8951 = vst [vmem:[#allocation108_spill] sm:$0xff] %v6241_v60  ;;  %v6255_v61 = vmax.f32 %v6241_v60, %v1417_v3  ;;  %v1429_v3 = vpop.xlane.xlu1 %1428 }
 0x1be   : > { %8952 = vst [vmem:[#allocation109_spill] sm:$0xff] %v6245_v4  ;;  %v6271_v42 = vmax.f32 %v6266_v54, %v1429_v3 }
 0x1bf   : > { %8953 = vst [vmem:[#allocation110_spill] sm:$0xff] %v6249_v7  ;;  %1657 = vperm.xlu0 %4610, %v6255_v61  }
 0x1c0   : > { %8954 = vst [vmem:[#allocation111_spill] sm:$0xff] %v6252_v32 }
 0x1c1   : > { %8955 = vst [vmem:[#allocation112_spill] sm:$0xff] %v6255_v61 }
 0x1c2   : > { %2891 = vst.msk [vmem:[#allocation2 + $0x48] sm:$0xff] %vm8675_vm7, %v6252_v32 }
 0x1c3   : > { %2890 = vst.msk [vmem:[#allocation2 + $0x40] sm:$0xff] %vm8675_vm7, %v6255_v61  ;;  %v6285_v61 = vld [vmem:[#allocation2 + $0x70] sm:$0xff] }
 0x1c4   : > { %8956 = vst [vmem:[#allocation113_spill] sm:$0xff] %v6266_v54  ;;  %1476 = vmax.xlane.f32.xlu2 %v1475_v10  ;;  %v1426_v45 = vpop.xlane.xlu0 %1425  ;;  %v6283_v10 = vld [vmem:[#allocation2 + $0x78] sm:$0xff] }
 0x1c5   : > { %8957 = vst [vmem:[#allocation114_spill] sm:$0xff] %v6268_v44  ;;  %v6274_v48 = vmax.f32 %v6268_v44, %v1426_v45  ;;  %v6302_v44 = vld [vmem:[#allocation2 + $0x88] sm:$0xff] }
 0x1c6   : > { %8958 = vst [vmem:[#allocation115_spill] sm:$0xff] %v6271_v42 }
 0x1c7   : > { %8959 = vst [vmem:[#allocation116_spill] sm:$0xff] %v6274_v48  ;;  %1672 = vperm.xlu0 %4610, %v6274_v48   ;;  %v1438_v3 = vpop.xlane.xlu1 %1437 }
 0x1c8   : > { %2894 = vst.msk [vmem:[#allocation2 + $0x60] sm:$0xff] %vm8675_vm7, %v6271_v42  ;;  %v6288_v60 = vmax.f32 %v6283_v10, %v1438_v3 }
 0x1c9   : > { %2893 = vst.msk [vmem:[#allocation2 + $0x58] sm:$0xff] %vm8675_vm7, %v6274_v48  ;;  %v6300_v48 = vld [vmem:[#allocation2 + $0x90] sm:$0xff] }
 0x1ca   : > { %8960 = vst [vmem:[#allocation117_spill] sm:$0xff] %v6283_v10 }
 0x1cb   : > { %8961 = vst [vmem:[#allocation118_spill] sm:$0xff] %v6285_v61 }
 0x1cc   : > { %8962 = vst [vmem:[#allocation119_spill] sm:$0xff] %v6288_v60  ;;  %v1435_v45 = vpop.xlane.xlu0 %1434 }
 0x1cd   : > { %v6291_v54 = vmax.f32 %v6285_v61, %v1435_v45  ;;  %2897 = vst.msk [vmem:[#allocation2 + $0x78] sm:$0xff] %vm8675_vm7, %v6288_v60  ;;  %v6319_v61 = vld [vmem:[#allocation2 + $0xa0] sm:$0xff] }
 0x1ce   : > { %8964 = vst [vmem:[#allocation121_spill] sm:$0xff] %v6300_v48 }
 0x1cf   : > { %8963 = vst [vmem:[#allocation120_spill] sm:$0xff] %v6291_v54  ;;  %1687 = vperm.xlu0 %4610, %v6291_v54  }
 0x1d0   : > { %2896 = vst.msk [vmem:[#allocation2 + $0x70] sm:$0xff] %vm8675_vm7, %v6291_v54  ;;  %v1447_v3 = vpop.xlane.xlu1 %1446  ;;  %v6317_v54 = vld [vmem:[#allocation2 + $0xa8] sm:$0xff] }
 0x1d1   : > { %8965 = vst [vmem:[#allocation122_spill] sm:$0xff] %v6302_v44  ;;  %v6305_v10 = vmax.f32 %v6300_v48, %v1447_v3 }
 0x1d2   : > { %8968 = vst [vmem:[#allocation125_spill] sm:$0xff] %v6317_v54 }
 0x1d3   : > { %8966 = vst [vmem:[#allocation123_spill] sm:$0xff] %v6305_v10 }
 0x1d4   : > { %v1444_v45 = vpop.xlane.xlu0 %1443  ;;  %2900 = vst.msk [vmem:[#allocation2 + $0x90] sm:$0xff] %vm8675_vm7, %v6305_v10 }
 0x1d5   : > { %v6308_v52 = vmax.f32 %v6302_v44, %v1444_v45  ;;  %8969 = vst [vmem:[#allocation126_spill] sm:$0xff] %v6319_v61  ;;  %v6336_v44 = vld [vmem:[#allocation2 + $0xc0] sm:$0xff] }
 0x1d6   : > { %8973 = vst [vmem:[#allocation130_spill] sm:$0xff] %v6336_v44 }
 0x1d7   : > { %8967 = vst [vmem:[#allocation124_spill] sm:$0xff] %v6308_v52  ;;  %1702 = vperm.xlu0 %4610, %v6308_v52  }
 0x1d8   : > { %2899 = vst.msk [vmem:[#allocation2 + $0x88] sm:$0xff] %vm8675_vm7, %v6308_v52  ;;  %v6334_v52 = vld [vmem:[#allocation2 + $0xb8] sm:$0xff] }
 0x1d9   : > { %8972 = vst [vmem:[#allocation129_spill] sm:$0xff] %v6334_v52 }
 0x1da   : > { %v1456_v3 = vpop.xlane.xlu1 %1455  ;;  %8984 = vst [vmem:[#allocation141_spill] sm:$0xff] %v6387_v57 }
 0x1db   : > { %v6322_v48 = vmax.f32 %v6317_v54, %v1456_v3 }
 0x1dc   : > { %v1453_v45 = vpop.xlane.xlu0 %1452 }
 0x1dd   : > { %8970 = vst [vmem:[#allocation127_spill] sm:$0xff] %v6322_v48  ;;  %v6325_v50 = vmax.f32 %v6319_v61, %v1453_v45  ;;  %v6353_v61 = vld [vmem:[#allocation2 + $0xd8] sm:$0xff] }
 0x1de   : > { %2903 = vst.msk [vmem:[#allocation2 + $0xa8] sm:$0xff] %vm8675_vm7, %v6322_v48 }
 0x1df   : > { %8971 = vst [vmem:[#allocation128_spill] sm:$0xff] %v6325_v50  ;;  %1717 = vperm.xlu0 %4610, %v6325_v50  }
 0x1e0   : > { %2902 = vst.msk [vmem:[#allocation2 + $0xa0] sm:$0xff] %vm8675_vm7, %v6325_v50  ;;  %v6351_v50 = vld [vmem:[#allocation2 + $0xd0] sm:$0xff] }
 0x1e1   : > { %8976 = vst [vmem:[#allocation133_spill] sm:$0xff] %v6351_v50 }
 0x1e2   : > { %8977 = vst [vmem:[#allocation134_spill] sm:$0xff] %v6353_v61 }
 0x1e4   : > { %v1462_v3 = vpop.xlane.xlu0 %1461 }
 0x1e5   : > { %v6339_v45 = vmax.f32 %v6334_v52, %v1462_v3 }
 0x1e7   : > { %v1465_v54 = vpop.xlane.xlu1 %1464  ;;  %8974 = vst [vmem:[#allocation131_spill] sm:$0xff] %v6339_v45  ;;  %1732 = vperm.xlu0 %4610, %v6339_v45  }
 0x1e8   : > { %v6342_v27 = vmax.f32 %v6336_v44, %v1465_v54  ;;  %2905 = vst.msk [vmem:[#allocation2 + $0xb8] sm:$0xff] %vm8675_vm7, %v6339_v45  ;;  %v6368_v45 = vld [vmem:[#allocation2 + $0xe8] sm:$0xff] }
 0x1e9   : > { %8980 = vst [vmem:[#allocation137_spill] sm:$0xff] %v6368_v45 }
 0x1ea   : > { %8975 = vst [vmem:[#allocation132_spill] sm:$0xff] %v6342_v27 }
 0x1eb   : > { %2906 = vst.msk [vmem:[#allocation2 + $0xc0] sm:$0xff] %vm8675_vm7, %v6342_v27 }
 0x1ee   : > { %v1471_v3 = vpop.xlane.xlu0 %1470 }
 0x1ef   : > { %v6356_v54 = vmax.f32 %v6351_v50, %v1471_v3  ;;  %v6380_v50 = vld [vmem:[#allocation2 + $0x38] sm:$0xff] }
 0x1f0   : > { %8982 = vst [vmem:[#allocation139_spill] sm:$0xff] %v6380_v50 }
 0x1f1   : > { %v1474_v41 = vpop.xlane.xlu1 %1473  ;;  %8978 = vst [vmem:[#allocation135_spill] sm:$0xff] %v6356_v54  ;;  %1747 = vperm.xlu0 %4610, %v6356_v54  }
 0x1f2   : > { %v6359_v44 = vmax.f32 %v6353_v61, %v1474_v41  ;;  %2908 = vst.msk [vmem:[#allocation2 + $0xd0] sm:$0xff] %vm8675_vm7, %v6356_v54  ;;  %v1035_v41 = vunpack.c.2.s8 %v5918_v51  ;;  %v1036_v61 = vunpack.c.2.s8 %v5939_v53 }
 0x1f4   : > { %8979 = vst [vmem:[#allocation136_spill] sm:$0xff] %v6359_v44  ;;  %v1099_v7 = vpack.c.b16 %v1036_v61, %v1035_v41 }
 0x1f5   : > { %2909 = vst.msk [vmem:[#allocation2 + $0xd8] sm:$0xff] %vm8675_vm7, %v6359_v44 }
 0x1fa   : > { %v1480_v52 = vpop.xlane.xlu0 %1479 }
 0x1fb   : > { %v6371_v3 = vmax.f32 %v6368_v45, %v1480_v52  ;;  %v1100_v52 = vpack.c.b8 %v1099_v7, %v1099_v7  ;;  %v6395_v45 = vld [vmem:[#allocation2 + $0x68] sm:$0xff] }
 0x1fc   : > { %8986 = vst [vmem:[#allocation143_spill] sm:$0xff] %v6395_v45 }
 0x1fd   : > { %8981 = vst [vmem:[#allocation138_spill] sm:$0xff] %v6371_v3  ;;  %1762 = vperm.xlu0 %4610, %v6371_v3   ;;  %vm1133_vm6 = vnez %v1100_v52 }
 0x1fe   : > { %2911 = vst.msk [vmem:[#allocation2 + $0xe8] sm:$0xff] %vm8675_vm7, %v6371_v3  ;;  %v1165_v3 = vsel %vm1133_vm6, 16843009, %v8779_v46 }
 0x1ff   : > { %v1414_v54 = vpop.xlane.xlu2 %1413  ;;  %v1227_v41 = vunpack.c.0.s8 %v1165_v3 }
 0x200   : > { %v6383_v4 = vmax.f32 %v6380_v50, %v1414_v54  ;;  %v1228_v54 = vunpack.c.1.s8 %v1165_v3 }
 0x201   : > { %vm6402_vm2 = vcmp.ne.s32.totalorder %v1227_v41, 0 }
 0x202   : > { %8983 = vst [vmem:[#allocation140_spill] sm:$0xff] %v6383_v4  ;;  %vm6406_vm6 = vcmp.ne.s32.totalorder %v1228_v54, 0  ;;  %v6422_v54 = vld [vmem:[#allocation2 + $0x80] sm:$0xff] }
 0x203   : > { %2889 = vst.msk [vmem:[#allocation2 + $0x38] sm:$0xff] %vm8675_vm7, %v6383_v4  ;;  %v8992_v49 = vsel %vm6406_vm6, 4294967295, %v8991_v49 }
 0x204   : > { %8993 = vst [vmem:[#allocation146_spill] sm:$0xff] %v8992_v49 }
 0x205   : > { %8996 = vst [vmem:[#allocation149_spill] sm:$0xff] %v6422_v54 }
 0x207   : > { %v1423_v58 = vpop.xlane.xlu2 %1422 }
 0x208   : > { %v6390_v31 = vmax.f32 %v6387_v57, %v1423_v58  ;;  %v8988_v57 = vmov 0 }
 0x209   : > { %v8989_v57 = vsel %vm6402_vm2, 4294967295, %v8988_v57 }
 0x20a   : > { %8985 = vst [vmem:[#allocation142_spill] sm:$0xff] %v6390_v31 }
 0x20b   : > { %2892 = vst.msk [vmem:[#allocation2 + $0x50] sm:$0xff] %vm8675_vm7, %v6390_v31 }
 0x20c   : > { %8990 = vst [vmem:[#allocation145_spill] sm:$0xff] %v8989_v57 }
 0x20d   : > { %v723_v61 = vpop.permute.xlu0 %722 }
 0x20e   : > { %v795_v50 = vadd.f32 %v5270_v15, %v723_v61  ;;  %v796_v7 = vadd.f32 %v5272_v17, %v723_v61 }
 0x20f   : > { %v1432_v14 = vpop.xlane.xlu2 %1431 }
 0x210   : > { %v859_v63 = vmul.f32 0.2, %v795_v50  ;;  %v860_v52 = vmul.f32 0.2, %v796_v7  ;;  %v6400_v58 = vmax.f32 %v6395_v45, %v1432_v14 }
 0x212   : > { %8987 = vst [vmem:[#allocation144_spill] sm:$0xff] %v6400_v58  ;;  %v923_v3 = vmax.f32 %v795_v50, %v859_v63  ;;  %v924_v35 = vmax.f32 %v796_v7, %v860_v52  ;;  %v6429_v7 = vld [vmem:[#allocation2 + $0x98] sm:$0xff] }
 0x213   : > { %2895 = vst.msk [vmem:[#allocation2 + $0x68] sm:$0xff] %vm8675_vm7, %v6400_v58 }
 0x214   : > { %v6414_v61 = vsel %vm6402_vm2, %v923_v3, -1e+30  ;;  %v6418_v14 = vsel %vm6406_vm6, %v924_v35, -1e+30  ;;  %8998 = vst [vmem:[#allocation151_spill] sm:$0xff] %v6429_v7  ;;  %vm9013_vm6 = vcmask 7168  }
 0x215   : > { %8994 = vst [vmem:[#allocation147_spill] sm:$0xff] %v6414_v61  ;;  %v1481_v41 = vmax.f32 %v6414_v61, %v6418_v14  ;;  %v1618_v50 = vpop.permute.xlu0 %1617  ;;  %v4480_v61 = vld [vmem:[%s5060_s20 + $0x50] sm:$0xff] }
 0x216   : > { %8995 = vst [vmem:[#allocation148_spill] sm:$0xff] %v6418_v14  ;;  %v1775_v52 = vsub.f32 %v5427_v18, %v1618_v50  ;;  %v1776_v35 = vsub.f32 %v5442_v30, %v1618_v50 }
 0x217   : > { %1482 = vmax.xlane.f32.xlu1 %v1481_v41  ;;  %v1441_v45 = vpop.xlane.xlu2 %1440  ;;  %v6438_v41 = vld [vmem:[#allocation2 + $0xb0] sm:$0xff] }
 0x218   : > { %v6425_v63 = vmax.f32 %v6422_v54, %v1441_v45  ;;  %v1839_v49 = vmul.f32 1.442695, %v1775_v52  ;;  %v1841_v57 = vmul.f32 1.442695, %v1776_v35  ;;  %9000 = vst [vmem:[#allocation153_spill] sm:$0xff] %v6438_v41 }
 0x21a   : > { %8997 = vst [vmem:[#allocation150_spill] sm:$0xff] %v6425_v63  ;;  %4613 = vpow2.f32 %v1839_v49 }
 0x21b   : > { %2898 = vst.msk [vmem:[#allocation2 + $0x80] sm:$0xff] %vm8675_vm7, %v6425_v63  ;;  %4615 = vpow2.f32 %v1841_v57 }
 0x21d   : > { %v1633_v45 = vpop.permute.xlu0 %1632 }
 0x21e   : > { %v1781_v54 = vsub.f32 %v5499_v36, %v1633_v45  ;;  %v1782_v18 = vsub.f32 %v5503_v37, %v1633_v45  ;;  %v6458_v45 = vld [vmem:[#allocation2 + $0xc8] sm:$0xff] }
 0x21f   : > { %v1450_v3 = vpop.xlane.xlu2 %1449  ;;  %9002 = vst [vmem:[#allocation155_spill] sm:$0xff] %v6458_v45 }
 0x220   : > { %v6434_v14 = vmax.f32 %v6429_v7, %v1450_v3  ;;  %v6442_v50 = vpop.eup %4613  ;;  %v1851_v52 = vmul.f32 1.442695, %v1781_v54  ;;  %v1853_v35 = vmul.f32 1.442695, %v1782_v18  ;;  %v568_v54 = vld [vmem:[%s5071_s27 + $0xf8] sm:$0xff] }
 0x221   : > { %v6447_v49 = vpop.eup %4615  ;;  %v1967_v57 = vsel %vm5337_vm0, %v6442_v50, 0.0 }
 0x222   : > { %8999 = vst [vmem:[#allocation152_spill] sm:$0xff] %v6434_v14  ;;  %4617 = vpow2.f32 %v1851_v52  ;;  %v1968_v36 = vsel %vm5351_vm3, %v6447_v49, 0.0 }
 0x223   : > { %2901 = vst.msk [vmem:[#allocation2 + $0x98] sm:$0xff] %vm8675_vm7, %v6434_v14  ;;  %4619 = vpow2.f32 %v1853_v35  ;;  %v2095_v37 = vadd.f32 %v1968_v36, %v1967_v57  ;;  %v6475_v36 = vld [vmem:[#allocation2 + $0xe0] sm:$0xff] }
 0x224   : > { %9004 = vst [vmem:[#allocation157_spill] sm:$0xff] %v6475_v36 }
 0x227   : > { %v1459_v30 = vpop.xlane.xlu2 %1458  ;;  %2096 = vadd.xlane.f32.xlu0 %v2095_v37 }
 0x228   : > { %v6445_v3 = vmax.f32 %v6438_v41, %v1459_v30  ;;  %v6460_v30 = vpop.eup %4617 }
 0x229   : > { %v6465_v52 = vpop.eup %4619  ;;  %v1973_v7 = vsel %vm5388_vm9, %v6460_v30, 0.0 }
 0x22a   : > { %9001 = vst [vmem:[#allocation154_spill] sm:$0xff] %v6445_v3  ;;  %v1974_v35 = vsel %vm5392_vm10, %v6465_v52, 0.0 }
 0x22b   : > { %2904 = vst.msk [vmem:[#allocation2 + $0xb0] sm:$0xff] %vm8675_vm7, %v6445_v3  ;;  %v2104_v57 = vadd.f32 %v1974_v35, %v1973_v7 }
 0x22f   : > { %v1468_v18 = vpop.xlane.xlu2 %1467  ;;  %2105 = vadd.xlane.f32.xlu0 %v2104_v57 }
 0x230   : > { %727 = vperm.xlu1 %4611, %v568_v54   ;;  %v6463_v41 = vmax.f32 %v6458_v45, %v1468_v18  ;;  %v6484_v18 = vpop.permute.xlu0 %1642  ;;  %v4485_v45 = vld [vmem:[%s5060_s20 + $0x78] sm:$0xff] }
 0x231   : > { %2729 = vmatpush.bf16.msra.mxu1 %v4485_v45  ;;  %4518 = vmatpush.bf16.msra.mxu3 %v4485_v45 }
 0x232   : > { %9003 = vst [vmem:[#allocation156_spill] sm:$0xff] %v6463_v41 }
 0x233   : > { %2907 = vst.msk [vmem:[#allocation2 + $0xc8] sm:$0xff] %vm8675_vm7, %v6463_v41 }
 0x237   : > { %v1477_v37 = vpop.xlane.xlu2 %1476 }
 0x238   : > { %1622 = vperm.xlu1 %4611, %v6174_v47   ;;  %v6479_v54 = vmax.f32 %v6475_v36, %v1477_v37  ;;  %v6488_v7 = vpop.permute.xlu0 %1657  ;;  %v4477_v36 = vld [vmem:[%s5060_s20 + $0x38] sm:$0xff]  ;;  %v1038_v47 = vunpack.c.3.s8 %v5939_v53 }
 0x239   : > { %2640 = vmatpush.bf16.msra.mxu0 %v4477_v36  ;;  %4510 = vmatpush.bf16.msra.mxu2 %v4477_v36  ;;  %v4474_v36 = vld [vmem:[%s5060_s20 + $0x20] sm:$0xff] }
 0x23a   : > { %9005 = vst [vmem:[#allocation158_spill] sm:$0xff] %v6479_v54 }
 0x23b   : > { %2910 = vst.msk [vmem:[#allocation2 + $0xe0] sm:$0xff] %vm8675_vm7, %v6479_v54 }
 0x240   : > { %1637 = vperm.xlu1 %4611, %v6220_v1   ;;  %v6491_v35 = vpop.permute.xlu0 %1672  ;;  %v6514_v1 = vld [vmem:[#allocation2 + $0xf0] sm:$0xff] }
 0x241   : > { %9007 = vst [vmem:[#allocation160_spill] sm:$0xff] %v6514_v1 }
 0x248   : > { %1652 = vperm.xlu1 %4611, %v6383_v4   ;;  %v6494_v57 = vpop.permute.xlu0 %1687  ;;  %v4483_v4 = vld [vmem:[%s5060_s20 + $0x68] sm:$0xff] }
 0x250   : > { %1667 = vperm.xlu1 %4611, %v6390_v31   ;;  %v6497_v37 = vpop.permute.xlu0 %1702  ;;  %v4476_v31 = vld [vmem:[%s5060_s20 + $0x30] sm:$0xff] }
 0x251   : > { %2641 = vmatpush.bf16.msra.mxu0 %v4476_v31  ;;  %4511 = vmatpush.bf16.msra.mxu2 %v4476_v31  ;;  %v4473_v31 = vld [vmem:[%s5060_s20 + $0x18] sm:$0xff] }
 0x258   : > { %1682 = vperm.xlu1 %4611, %v6400_v58   ;;  %v4484_v58 = vld [vmem:[%s5060_s20 + $0x70] sm:$0xff] }
 0x259   : > { %2730 = vmatpush.bf16.msra.mxu1 %v4484_v58  ;;  %4519 = vmatpush.bf16.msra.mxu3 %v4484_v58  ;;  %v4481_v58 = vld [vmem:[%s5060_s20 + $0x58] sm:$0xff] }
 0x25d   : > { %2731 = vmatpush.bf16.msra.mxu1 %v4483_v4  ;;  %4520 = vmatpush.bf16.msra.mxu3 %v4483_v4 }
 0x260   : > { %1697 = vperm.xlu1 %4611, %v6425_v63   ;;  %v4475_v63 = vld [vmem:[%s5060_s20 + $0x28] sm:$0xff] }
 0x261   : > { %2642 = vmatpush.bf16.msra.mxu0 %v4475_v63  ;;  %4512 = vmatpush.bf16.msra.mxu2 %v4475_v63 }
 0x265   : > { %2643 = vmatpush.bf16.msra.mxu0 %v4474_v36  ;;  %4513 = vmatpush.bf16.msra.mxu2 %v4474_v36  ;;  %v4472_v36 = vld [vmem:[%s5060_s20 + $0x10] sm:$0xff] }
 0x268   : > { %1712 = vperm.xlu1 %4611, %v6434_v14   ;;  %v4482_v14 = vld [vmem:[%s5060_s20 + $0x60] sm:$0xff] }
 0x269   : > { %2732 = vmatpush.bf16.msra.mxu1 %v4482_v14  ;;  %4521 = vmatpush.bf16.msra.mxu3 %v4482_v14  ;;  %v9009_v14 = vsub.f32 %v6122_v29, %v6137_v2  ;;  %v4478_v29 = vld [vmem:[%s5060_s20 + $0x40] sm:$0xff]  ;;  %v9011_v2 = vsub.f32 %v6165_v26, %v6179_v20 }
 0x26a   : > { %2644 = vmatpush.bf16.msra.mxu0 %v4473_v31  ;;  %4514 = vmatpush.bf16.msra.mxu2 %v4473_v31 }
 0x26d   : > { %2733 = vmatpush.bf16.msra.mxu1 %v4481_v58  ;;  %4522 = vmatpush.bf16.msra.mxu3 %v4481_v58  ;;  %v4470_v58 = vld [vmem:[%s5060_s20] sm:$0xff] }
 0x26e   : > { %2645 = vmatpush.bf16.msra.mxu0 %v4472_v36  ;;  %4515 = vmatpush.bf16.msra.mxu2 %v4472_v36 }
 0x270   : > { %1727 = vperm.xlu1 %4611, %v6445_v3   ;;  %v6507_v3 = vpop.permute.xlu0 %1717 }
 0x271   : > { %2734 = vmatpush.bf16.msra.mxu1 %v4480_v61  ;;  %4523 = vmatpush.bf16.msra.mxu3 %v4480_v61 }
 0x278   : > { %1742 = vperm.xlu1 %4611, %v6463_v41   ;;  %v6510_v45 = vpop.permute.xlu0 %1732 }
 0x279   : > { %9006 = vst [vmem:[#allocation159_spill] sm:$0xff] %v6510_v45  ;;  %v4479_v45 = vld [vmem:[%s5060_s20 + $0x48] sm:$0xff] }
 0x27a   : > { %2735 = vmatpush.bf16.msra.mxu1 %v4479_v45  ;;  %4524 = vmatpush.bf16.msra.mxu3 %v4479_v45 }
 0x27e   : > { %2736 = vmatpush.bf16.msra.mxu1 %v4478_v29  ;;  %4525 = vmatpush.bf16.msra.mxu3 %v4478_v29  ;;  %v2034_v29 = vld [vmem:[#allocation3 + $0x18] sm:$0xff] }
 0x280   : > { %1757 = vperm.xlu1 %4611, %v6479_v54   ;;  %v6523_v63 = vpop.permute.xlu0 %1747  ;;  %v1037_v54 = vunpack.c.3.s8 %v5918_v51 }
 0x282   : > { %v1101_v31 = vpack.c.b16 %v1038_v47, %v1037_v54  ;;  %v2031_v47 = vld [vmem:[#allocation3] sm:$0xff] }
 0x284   : > { %v1102_v53 = vpack.c.b8 %v1101_v31, %v1101_v31 }
 0x288   : > { %v6534_v51 = vpop.permute.xlu0 %1762 }
 0x289   : > { %9010 = vst [vmem:[#allocation162_spill] sm:$0xff] %v6534_v51 }
 0x28a   : > { %v1483_v41 = vpop.xlane.xlu1 %1482 }
 0x28b   : > { %v6519_v4 = vmax.f32 %v6514_v1, %v1483_v41  ;;  %v1551_v41 = vmul.f32 1.442695, %v9009_v14  ;;  %v4471_v1 = vld [vmem:[%s5060_s20 + $0x8] sm:$0xff]  ;;  %v1557_v14 = vmul.f32 1.442695, %v9011_v2 }
 0x28c   : > { %2646 = vmatpush.bf16.msra.mxu0 %v4471_v1  ;;  %4516 = vmatpush.bf16.msra.mxu2 %v4471_v1 }
 0x28d   : > { %9008 = vst [vmem:[#allocation161_spill] sm:$0xff] %v6519_v4  ;;  %4621 = vpow2.f32 %v1551_v41 }
 0x28e   : > { %2912 = vst.msk [vmem:[#allocation2 + $0xf0] sm:$0xff] %vm8675_vm7, %v6519_v4  ;;  %vm1134_vm7 = vnez %v1102_v53  ;;  %4623 = vpow2.f32 %v1557_v14  ;;  %v9015_v14 = vmov 0 }
 0x28f   : > { %v1166_v54 = vsel %vm1134_vm7, 16843009, %v8779_v46  ;;  %v9018_v46 = vmov 0 }
 0x290   : > { %2647 = vmatpush.bf16.msra.mxu0 %v4470_v58  ;;  %4517 = vmatpush.bf16.msra.mxu2 %v4470_v58  ;;  %v1229_v31 = vunpack.c.0.s8 %v1166_v54  ;;  %v1230_v51 = vunpack.c.1.s8 %v1166_v54 }
 0x292   : > { %vm6550_vm2 = vcmp.ne.s32.totalorder %v1229_v31, 0  ;;  %vm6554_vm7 = vcmp.ne.s32.totalorder %v1230_v51, 0 }
 0x293   : > { %v6541_v61 = vpop.eup %4621  ;;  %v9016_v14 = vsel %vm6550_vm2, 4294967295, %v9015_v14  ;;  %v9019_v46 = vsel %vm6554_vm7, 4294967295, %v9018_v46 }
 0x294   : > { %9012 = vst [vmem:[#allocation163_spill] sm:$0xff] %v6541_v61  ;;  %v2063_v1 = vmul.f32 %v6541_v61, %v2031_v47  ;;  %v6548_v58 = vpop.eup %4623 }
 0x295   : > { %9014 = vst [vmem:[#allocation164_spill] sm:$0xff] %v6548_v58  ;;  %v2066_v54 = vmul.f32 %v6548_v58, %v2034_v29 }
 0x296   : > { %9017 = vst [vmem:[#allocation165_spill] sm:$0xff] %v9016_v14  ;;  %v9101_v14 = vld [vmem:[#allocation46_spill] sm:$0xff] }
 0x297   : > { %9020 = vst [vmem:[#allocation166_spill] sm:$0xff] %v9019_v46 }
 0x29a   : > { %v2097_v45 = vpop.xlane.xlu0 %2096 }
 0x29b   : > { %v2191_v36 = vadd.f32 %v2097_v45, %v2063_v1 }
 0x29d   : > { %2224 = vst.msk [vmem:[#allocation3] sm:$0xff] %vm9013_vm6, %v2191_v36 }
 0x2a2   : > { %v728_v41 = vpop.permute.xlu1 %727 }
 0x2a3   : > { %v797_v20 = vadd.f32 %v5270_v15, %v728_v41  ;;  %v798_v26 = vadd.f32 %v5272_v17, %v728_v41  ;;  %v2106_v15 = vpop.xlane.xlu0 %2105 }
 0x2a4   : > { %v2194_v45 = vadd.f32 %v2106_v15, %v2066_v54 }
 0x2a5   : > { %v861_v53 = vmul.f32 0.2, %v797_v20  ;;  %v862_v2 = vmul.f32 0.2, %v798_v26 }
 0x2a6   : > { %2227 = vst.msk [vmem:[#allocation3 + $0x18] sm:$0xff] %vm9013_vm6, %v2194_v45  ;;  %vm4274_vm6 = vmpackc.low %vm5396_vm11, %vm5337_vm0 }
 0x2a7   : > { %v925_v47 = vmax.f32 %v797_v20, %v861_v53  ;;  %v926_v1 = vmax.f32 %v798_v26, %v862_v2  ;;  %v1785_v26 = vsub.f32 %v5371_v33, %v6484_v18  ;;  %v1786_v2 = vsub.f32 %v5375_v34, %v6484_v18  ;;  %vm4298_vm0 = vmpackc.low %vm5733_vm14, %vm6077_vm15 }
 0x2a9   : > { %v6561_v17 = vsel %vm6550_vm2, %v925_v47, -1e+30  ;;  %v6565_v36 = vsel %vm6554_vm7, %v926_v1, -1e+30  ;;  %v1859_v47 = vmul.f32 1.442695, %v1785_v26  ;;  %vm4322_vm7 = vmpackc.low %vm5402_vm12, %vm5351_vm3  ;;  %v1798_v26 = vsub.f32 %v9022_v0, %v6491_v35 }
 0x2aa   : > { %v1623_v41 = vpop.permute.xlu1 %1622  ;;  %v1484_v51 = vmax.f32 %v6561_v17, %v6565_v36  ;;  %v1861_v1 = vmul.f32 1.442695, %v1786_v2  ;;  %vm4346_vm3 = vmpackc.low %vm5748_vm1, %vm6081_vm13 }
 0x2ab   : > { %v1777_v31 = vsub.f32 %v5507_v38, %v1623_v41  ;;  %v1778_v20 = vsub.f32 %v5513_v16, %v1623_v41 }
 0x2ac   : > { %1485 = vmax.xlane.f32.xlu2 %v1484_v51 }
 0x2ad   : > { %v1843_v29 = vmul.f32 1.442695, %v1777_v31  ;;  %v1845_v53 = vmul.f32 1.442695, %v1778_v20  ;;  %v1797_v20 = vsub.f32 %v9021_v59, %v6491_v35 }
 0x2af   : > { %4625 = vpow2.f32 %v1843_v29  ;;  %v1883_v2 = vmul.f32 1.442695, %v1797_v20 }
 0x2b0   : > { %4627 = vpow2.f32 %v1845_v53 }
 0x2b1   : > { %4629 = vpow2.f32 %v1859_v47  ;;  %v1885_v47 = vmul.f32 1.442695, %v1798_v26 }
 0x2b2   : > { %v1638_v54 = vpop.permute.xlu1 %1637  ;;  %4631 = vpow2.f32 %v1861_v1 }
 0x2b3   : > { %v1783_v15 = vsub.f32 %v5327_v8, %v1638_v54  ;;  %v1784_v38 = vsub.f32 %v5331_v9, %v1638_v54 }
 0x2b5   : > { %v4626_v45 = vpop.eup %4625  ;;  %v1855_v16 = vmul.f32 1.442695, %v1783_v15  ;;  %v1857_v41 = vmul.f32 1.442695, %v1784_v38 }
 0x2b6   : > { %v4628_v33 = vpop.eup %4627  ;;  %v4275_v34 = vpack.c.bf16 %v4626_v45, %v6442_v50  ;;  %v1969_v8 = vsel %vm5396_vm11, %v4626_v45, 0.0  ;;  %vm9026_vm11 = vcmask 7168  }
 0x2b7   : > { %4633 = vpow2.f32 %v1855_v16  ;;  %v4323_v9 = vpack.c.bf16 %v4628_v33, %v6447_v49  ;;  %v1970_v12 = vsel %vm5402_vm12, %v4628_v33, 0.0  ;;  %v6596_v19 = vpop.eup %4629  ;;  %vm4277_vm12 = vmpackc.low %vm5388_vm9, %vm5355_vm4 }
 0x2b8   : > { %4635 = vpow2.f32 %v1857_v41  ;;  %4276 = vmatmul.msk.bf16.vlgmr.msra.gmra.mxu0 %vm4274_vm6, %v4275_v34  ;;  %v6592_v18 = vadd.f32 %v1970_v12, %v1969_v8  ;;  %v6598_v51 = vpop.eup %4631  ;;  %v1810_v34 = vsub.f32 %v5775_v40, %v6497_v37 }
 0x2b9   : > { %4324 = vmatmul.msk.bf16.vlgmr.msra.gmra.mxu1 %vm4322_vm7, %v4323_v9  ;;  %4637 = vpow2.f32 %v1883_v2 }
 0x2ba   : > { %v6594_v50 = vpop.permute.xlu1 %1652  ;;  %4639 = vpow2.f32 %v1885_v47  ;;  %v1909_v59 = vmul.f32 1.442695, %v1810_v34 }
 0x2bd   : > { %v6600_v31 = vpop.eup %4633 }
 0x2be   : > { %v6604_v49 = vpop.eup %4635 }
 0x2bf   : > { %v6617_v16 = vpop.eup %4637 }
 0x2c0   : > { %v6619_v41 = vpop.eup %4639 }
 0x2c2   : > { %v1668_v1 = vpop.permute.xlu1 %1667 }
 0x2c3   : > { %v1795_v54 = vsub.f32 %v6034_v6, %v1668_v1  ;;  %v1796_v15 = vsub.f32 %v6038_v23, %v1668_v1  ;;  %v1809_v6 = vsub.f32 %v5760_v39, %v6497_v37 }
 0x2c4   : > { %1627 = vperm.xlu2 %4612, %v6130_v21  }
 0x2c5   : > { %v1879_v38 = vmul.f32 1.442695, %v1795_v54  ;;  %v1881_v45 = vmul.f32 1.442695, %v1796_v15  ;;  %v1907_v12 = vmul.f32 1.442695, %v1809_v6 }
 0x2c7   : > { %4641 = vpow2.f32 %v1879_v38 }
 0x2c8   : > { %4643 = vpow2.f32 %v1881_v45 }
 0x2c9   : > { %4645 = vpow2.f32 %v1907_v12 }
 0x2ca   : > { %v6615_v35 = vpop.permute.xlu1 %1682  ;;  %4647 = vpow2.f32 %v1909_v59  ;;  %v9027_v59 = vld [vmem:[#allocation16_spill] sm:$0xff] }
 0x2cc   : > { %1647 = vperm.xlu2 %4612, %v6212_v28  }
 0x2cd   : > { %v6622_v33 = vpop.eup %4641 }
 0x2ce   : > { %v6626_v23 = vpop.eup %4643 }
 0x2cf   : > { %v6637_v40 = vpop.eup %4645 }
 0x2d0   : > { %v6639_v37 = vpop.eup %4647 }
 0x2d2   : > { %v1698_v20 = vpop.permute.xlu1 %1697 }
 0x2d3   : > { %v1807_v0 = vsub.f32 %v6089_v5, %v1698_v20  ;;  %v1808_v26 = vsub.f32 %v6093_v13, %v1698_v20 }
 0x2d4   : > { %1662 = vperm.xlu2 %4612, %v6252_v32  }
 0x2d5   : > { %v1903_v39 = vmul.f32 1.442695, %v1807_v0  ;;  %v1905_v2 = vmul.f32 1.442695, %v1808_v26  ;;  %v9028_v0 = vld [vmem:[#allocation17_spill] sm:$0xff] }
 0x2d7   : > { %4649 = vpow2.f32 %v1903_v39 }
 0x2d8   : > { %4651 = vpow2.f32 %v1905_v2 }
 0x2dc   : > { %1677 = vperm.xlu2 %4612, %v6271_v42  }
 0x2dd   : > { %v4650_v47 = vpop.eup %4649 }
 0x2de   : > { %v4652_v5 = vpop.eup %4651  ;;  %v4299_v13 = vpack.c.bf16 %v6637_v40, %v4650_v47  ;;  %v1999_v54 = vsel %vm6077_vm15, %v4650_v47, 0.0  ;;  %v1789_v47 = vsub.f32 %v6015_v11, %v6594_v50 }
 0x2df   : > { %v4347_v15 = vpack.c.bf16 %v6639_v37, %v4652_v5  ;;  %v2000_v38 = vsel %vm6081_vm13, %v4652_v5, 0.0  ;;  %v1790_v5 = vsub.f32 %v6019_v62, %v6594_v50  ;;  %vm4325_vm13 = vmpackc.low %vm5392_vm10, %vm5359_vm5 }
 0x2e0   : > { %4300 = vmatmul.msk.bf16.vlgmr.msra.gmra.mxu2 %vm4298_vm0, %v4299_v13  ;;  %v6656_v45 = vadd.f32 %v2000_v38, %v1999_v54  ;;  %v9029_v54 = vld [vmem:[#allocation23_spill] sm:$0xff]  ;;  %v9030_v38 = vld [vmem:[#allocation24_spill] sm:$0xff] }
 0x2e1   : > { %4348 = vmatmul.msk.bf16.vlgmr.msra.gmra.mxu3 %vm4346_vm3, %v4347_v15  ;;  %v1869_v11 = vmul.f32 1.442695, %v1790_v5 }
 0x2e4   : > { %1692 = vperm.xlu2 %4612, %v6288_v60  }
 0x2ec   : > { %1707 = vperm.xlu2 %4612, %v6305_v10  }
 0x2f4   : > { %1722 = vperm.xlu2 %4612, %v6322_v48  }
 0x2fc   : > { %1737 = vperm.xlu2 %4612, %v6342_v27   ;;  %v9073_v27 = vld [vmem:[#allocation32_spill] sm:$0xff] }
 0x304   : > { %1752 = vperm.xlu2 %4612, %v6359_v44  }
 0x30c   : > { %1767 = vperm.xlu2 %4612, %v6519_v4   ;;  %v9049_v4 = vld [vmem:[#allocation77_spill] sm:$0xff] }
 0x30d   : > { %vm9050_vm6 = vnez %v9049_v4 }
 0x31f   : > { %v1486_v43 = vpop.xlane.xlu2 %1485 }
 0x320   : > { %v6667_v6 = vmax.f32 %v6664_v24, %v1486_v43 }
 0x322   : > { %9025 = vst [vmem:[#allocation29_spill] sm:$0xff] %v6667_v6  ;;  %1772 = vperm.xlu1 %4611, %v6667_v6  }
 0x323   : > { %2913 = vst.msk [vmem:[#allocation2 + $0xf8] sm:$0xff] %vm9026_vm11, %v6667_v6  ;;  %v9048_v6 = vld [vmem:[#allocation36_spill] sm:$0xff] }
 0x327   : > { %v1628_v12 = vpop.permute.xlu2 %1627 }
 0x328   : > { %v1779_v20 = vsub.f32 %v9027_v59, %v1628_v12  ;;  %v1780_v26 = vsub.f32 %v9028_v0, %v1628_v12  ;;  %v1867_v59 = vmul.f32 1.442695, %v1789_v47  ;;  %v9034_v47 = vld [vmem:[#allocation30_spill] sm:$0xff] }
 0x32a   : > { %v1847_v39 = vmul.f32 1.442695, %v1779_v20  ;;  %v1849_v2 = vmul.f32 1.442695, %v1780_v26 }
 0x32c   : > { %4653 = vpow2.f32 %v1847_v39 }
 0x32d   : > { %4655 = vpow2.f32 %v1849_v2 }
 0x32f   : > { %v1648_v13 = vpop.permute.xlu2 %1647 }
 0x330   : > { %v1787_v15 = vsub.f32 %v9029_v54, %v1648_v13  ;;  %v1788_v43 = vsub.f32 %v9030_v38, %v1648_v13  ;;  %v9038_v54 = vld [vmem:[#allocation9_spill] sm:$0xff]  ;;  %v9040_v38 = vld [vmem:[#allocation18_spill] sm:$0xff] }
 0x331   : > { %vm9039_vm10 = vnez %v9038_v54 }
 0x332   : > { %v6682_v34 = vpop.eup %4653  ;;  %v1863_v9 = vmul.f32 1.442695, %v1787_v15  ;;  %v1865_v12 = vmul.f32 1.442695, %v1788_v43  ;;  %v1791_v43 = vsub.f32 %v9040_v38, %v6488_v7 }
 0x333   : > { %v6688_v0 = vpop.eup %4655  ;;  %v4278_v62 = vpack.c.bf16 %v6460_v30, %v6682_v34 }
 0x334   : > { %4657 = vpow2.f32 %v1863_v9  ;;  %v4326_v26 = vpack.c.bf16 %v6465_v52, %v6688_v0  ;;  %v9036_v9 = vld [vmem:[#allocation8_spill] sm:$0xff] }
 0x335   : > { %4659 = vpow2.f32 %v1865_v12  ;;  %2099 = vadd.xlane.f32.xlu2 %v6592_v18  ;;  %v2649_v55 = vpop.f32.mrf.mxu0  ;;  %4279 = vmatmul.msk.bf16.gmra.mxu0 %vm4277_vm12, %v4278_v62  ;;  %vm9037_vm9 = vnez %v9036_v9  ;;  %v1976_v18 = vsel %vm9039_vm10, %v6604_v49, 0.0  ;;  %v1801_v62 = vsub.f32 %v6061_v22, %v6615_v35 }
 0x336   : > { %4661 = vpow2.f32 %v1867_v59  ;;  %v2738_v39 = vpop.f32.mrf.mxu1  ;;  %4327 = vmatmul.msk.bf16.gmra.mxu1 %vm4325_vm13, %v4326_v26  ;;  %v1975_v52 = vsel %vm9037_vm9, %v6600_v31, 0.0 }
 0x337   : > { %4663 = vpow2.f32 %v1869_v11  ;;  %v6699_v2 = vadd.f32 %v2738_v39, %v2649_v55  ;;  %v1663_v30 = vpop.permute.xlu2 %1662  ;;  %v2107_v26 = vadd.f32 %v1976_v18, %v1975_v52  ;;  %v9041_v55 = vld [vmem:[#allocation20_spill] sm:$0xff]  ;;  %v1871_v52 = vmul.f32 1.442695, %v1791_v43  ;;  %v9046_v18 = vld [vmem:[#allocation83_spill] sm:$0xff]  ;;  %v9053_v43 = vld [vmem:[#allocation38_spill] sm:$0xff] }
 0x338   : > { %v1793_v5 = vsub.f32 %v9034_v47, %v1663_v30  ;;  %v1794_v13 = vsub.f32 %v9035_v56, %v1663_v30  ;;  %vm9042_vm15 = vnez %v9041_v55  ;;  %v9043_v47 = vld [vmem:[#allocation21_spill] sm:$0xff]  ;;  %v1802_v8 = vsub.f32 %v9046_v18, %v6615_v35  ;;  %v9096_v55 = vld [vmem:[#allocation54_spill] sm:$0xff] }
 0x339   : > { %9033 = vst [vmem:[#allocation44_spill] sm:$0xff] %v6699_v2  ;;  %vm9044_vm7 = vnez %v9043_v47  ;;  %v1891_v53 = vmul.f32 1.442695, %v1801_v62  ;;  %v1816_v60 = vsub.f32 %v9096_v55, %v6507_v3 }
 0x33a   : > { %v6709_v15 = vpop.eup %4657  ;;  %v1875_v59 = vmul.f32 1.442695, %v1793_v5  ;;  %v1877_v12 = vmul.f32 1.442695, %v1794_v13  ;;  %v9045_v5 = vld [vmem:[#allocation19_spill] sm:$0xff] }
 0x33b   : > { %v6713_v11 = vpop.eup %4659  ;;  %v1979_v39 = vsel %vm9042_vm15, %v6709_v15, 0.0  ;;  %v1792_v13 = vsub.f32 %v9045_v5, %v6488_v7  ;;  %v9051_v7 = vld [vmem:[#allocation78_spill] sm:$0xff]  ;;  %v1893_v62 = vmul.f32 1.442695, %v1802_v8 }
 0x33c   : > { %v6720_v30 = vpop.eup %4661  ;;  %4665 = vpow2.f32 %v1875_v59  ;;  %v1980_v56 = vsel %vm9044_vm7, %v6713_v11, 0.0  ;;  %v9047_v59 = vld [vmem:[#allocation35_spill] sm:$0xff]  ;;  %vm9052_vm0 = vnez %v9051_v7  ;;  %v9059_v8 = vld [vmem:[#allocation22_spill] sm:$0xff]  ;;  %v9087_v7 = vld [vmem:[#allocation93_spill] sm:$0xff] }
 0x33d   : > { %v6725_v38 = vpop.eup %4663  ;;  %4667 = vpow2.f32 %v1877_v12  ;;  %2108 = vadd.xlane.f32.xlu2 %v2107_v26  ;;  %v2113_v22 = vadd.f32 %v1980_v56, %v1979_v39  ;;  %v1981_v44 = vsel %vm9050_vm6, %v6720_v30, 0.0  ;;  %v1873_v26 = vmul.f32 1.442695, %v1792_v13 }
 0x33e   : > { %v1982_v12 = vsel %vm9052_vm0, %v6725_v38, 0.0  ;;  %v1803_v39 = vsub.f32 %v9053_v43, %v6494_v57  ;;  %4669 = vpow2.f32 %v1871_v52  ;;  %vm9060_vm2 = vnez %v9059_v8  ;;  %v1713_v43 = vpop.permute.xlu1 %1712  ;;  %v9121_v8 = vld [vmem:[#allocation37_spill] sm:$0xff] }
 0x33f   : > { %2114 = vadd.xlane.f32.xlu0 %v2113_v22  ;;  %v1678_v29 = vpop.permute.xlu2 %1677  ;;  %v9056_v22 = vld [vmem:[#allocation39_spill] sm:$0xff]  ;;  %4671 = vpow2.f32 %v1891_v53  ;;  %v2116_v13 = vadd.f32 %v1982_v12, %v1981_v44  ;;  %v9063_v44 = vpack.c.bf16 %v6596_v19, %v6600_v31  ;;  %v9064_v53 = vpack.c.bf16 %v6598_v51, %v6604_v49 }
 0x340   : > { %v1799_v2 = vsub.f32 %v9047_v59, %v1678_v29  ;;  %v1800_v24 = vsub.f32 %v9048_v6, %v1678_v29  ;;  %v9054_v29 = vld [vmem:[#allocation10_spill] sm:$0xff]  ;;  %v1804_v18 = vsub.f32 %v9056_v22, %v6494_v57  ;;  %v9057_v59 = vld [vmem:[#allocation11_spill] sm:$0xff]  ;;  %v1895_v52 = vmul.f32 1.442695, %v1803_v39 }
 0x341   : > { %vm9055_vm3 = vnez %v9054_v29  ;;  %vm9058_vm12 = vnez %v9057_v59  ;;  %v1971_v39 = vsel %vm5355_vm4, %v6682_v34, 0.0  ;;  %v9066_v22 = vld [vmem:[#allocation43_spill] sm:$0xff]  ;;  %vm9074_vm4 = vnez %v9073_v27 }
 0x342   : > { %v6741_v35 = vpop.eup %4665  ;;  %v1887_v56 = vmul.f32 1.442695, %v1799_v2  ;;  %v1889_v5 = vmul.f32 1.442695, %v1800_v24  ;;  %vm4280_vm11 = vmpackc.low %vm9055_vm3, %vm9037_vm9  ;;  %v9061_v2 = vld [vmem:[#allocation25_spill] sm:$0xff]  ;;  %v9067_v49 = vld [vmem:[#allocation79_spill] sm:$0xff]  ;;  %v4332_v4 = vpack.c.bf16 %v6725_v38, %v6713_v11 }
 0x343   : > { %v6747_v6 = vpop.eup %4667  ;;  %vm4328_vm13 = vmpackc.low %vm9058_vm12, %vm9039_vm10  ;;  %v1985_v24 = vsel %vm9060_vm2, %v6741_v35, 0.0  ;;  %vm9062_vm9 = vnez %v9061_v2  ;;  %v1897_v54 = vmul.f32 1.442695, %v1804_v18  ;;  %vm9068_vm10 = vnez %v9067_v49  ;;  %v9069_v18 = vld [vmem:[#allocation80_spill] sm:$0xff]  ;;  %v9081_v29 = vld [vmem:[#allocation47_spill] sm:$0xff] }
 0x344   : > { %4673 = vpow2.f32 %v1887_v56  ;;  %v1986_v9 = vsel %vm9062_vm9, %v6747_v6, 0.0  ;;  %v1972_v56 = vsel %vm5359_vm5, %v6688_v0, 0.0  ;;  %v6773_v31 = vpop.eup %4669  ;;  %v9071_v0 = vld [vmem:[#allocation87_spill] sm:$0xff]  ;;  %v9149_v49 = vld [vmem:[#allocation70_spill] sm:$0xff] }
 0x345   : > { %4675 = vpow2.f32 %v1889_v5  ;;  %2117 = vadd.xlane.f32.xlu2 %v2116_v13  ;;  %4282 = vmatmul.msk.bf16.gmra.mxu0 %vm4280_vm11, %v9063_v44  ;;  %v2122_v57 = vadd.f32 %v1986_v9, %v1985_v24  ;;  %v9065_v5 = vld [vmem:[#allocation42_spill] sm:$0xff]  ;;  %vm9070_vm11 = vnez %v9069_v18  ;;  %v6783_v20 = vpop.eup %4671  ;;  %v1813_v50 = vsub.f32 %v9071_v0, %v1713_v43  ;;  %v9090_v11 = vld [vmem:[#allocation15_spill] sm:$0xff] }
 0x346   : > { %4677 = vpow2.f32 %v1893_v62  ;;  %4330 = vmatmul.msk.bf16.gmra.mxu1 %vm4328_vm13, %v9064_v53  ;;  %v1988_v24 = vsel %vm9070_vm11, %v6626_v23, 0.0  ;;  %v1728_v0 = vpop.permute.xlu1 %1727 }
 0x347   : > { %4679 = vpow2.f32 %v1873_v26  ;;  %2123 = vadd.xlane.f32.xlu0 %v2122_v57  ;;  %v1693_v12 = vpop.permute.xlu2 %1692  ;;  %v1987_v26 = vsel %vm9068_vm10, %v6622_v33, 0.0  ;;  %v2101_v57 = vadd.f32 %v1972_v56, %v1971_v39  ;;  %v1915_v39 = vmul.f32 1.442695, %v1813_v50 }
 0x348   : > { %v1805_v62 = vsub.f32 %v9065_v5, %v1693_v12  ;;  %v1806_v13 = vsub.f32 %v9066_v22, %v1693_v12  ;;  %4681 = vpow2.f32 %v1895_v52  ;;  %v9072_v12 = vld [vmem:[#allocation88_spill] sm:$0xff]  ;;  %v2125_v22 = vadd.f32 %v1988_v24, %v1987_v26  ;;  %v9075_v52 = vld [vmem:[#allocation33_spill] sm:$0xff] }
 0x349   : > { %4683 = vpow2.f32 %v1897_v54  ;;  %v1814_v5 = vsub.f32 %v9072_v12, %v1713_v43  ;;  %vm9076_vm5 = vnez %v9075_v52  ;;  %v1977_v43 = vsel %vm9055_vm3, %v6596_v19, 0.0  ;;  %v9082_v12 = vld [vmem:[#allocation48_spill] sm:$0xff]  ;;  %vm4283_vm3 = vmpackc.low %vm9050_vm6, %vm9042_vm15 }
 0x34a   : > { %v6785_v34 = vpop.eup %4673  ;;  %v1899_v9 = vmul.f32 1.442695, %v1805_v62  ;;  %v1901_v44 = vmul.f32 1.442695, %v1806_v13  ;;  %v1978_v56 = vsel %vm9058_vm12, %v6598_v51, 0.0  ;;  %vm4331_vm12 = vmpackc.low %vm9052_vm0, %vm9044_vm7  ;;  %vm9091_vm6 = vnez %v9090_v11  ;;  %v9124_v11 = vld [vmem:[#allocation71_spill] sm:$0xff] }
 0x34b   : > { %v6788_v53 = vpop.eup %4675  ;;  %v1991_v48 = vsel %vm9074_vm4, %v6785_v34, 0.0  ;;  %v1917_v24 = vmul.f32 1.442695, %v1814_v5  ;;  %v2110_v51 = vadd.f32 %v1978_v56, %v1977_v43  ;;  %v9085_v56 = vld [vmem:[#allocation41_spill] sm:$0xff] }
 0x34c   : > { %v6794_v10 = vpop.eup %4677  ;;  %4685 = vpow2.f32 %v1899_v9  ;;  %2102 = vadd.xlane.f32.xlu1 %v2101_v57  ;;  %v1992_v62 = vsel %vm9076_vm5, %v6788_v53, 0.0  ;;  %v9077_v57 = vld [vmem:[#allocation81_spill] sm:$0xff]  ;;  %vm9086_vm15 = vnez %v9085_v56 }
 0x34d   : > { %v6799_v13 = vpop.eup %4679  ;;  %4687 = vpow2.f32 %v1901_v44  ;;  %2126 = vadd.xlane.f32.xlu2 %v2125_v22  ;;  %v2131_v54 = vadd.f32 %v1992_v62, %v1991_v48  ;;  %vm9078_vm13 = vnez %v9077_v57  ;;  %v9079_v48 = vld [vmem:[#allocation82_spill] sm:$0xff] }
 0x34e   : > { %v6807_v26 = vpop.eup %4681  ;;  %v1993_v44 = vsel %vm9078_vm13, %v6783_v20, 0.0  ;;  %vm9080_vm5 = vnez %v9079_v48  ;;  %4689 = vpow2.f32 %v1915_v39  ;;  %v9083_v39 = vld [vmem:[#allocation40_spill] sm:$0xff]  ;;  %v1984_v38 = vsel %vm9091_vm6, %v6799_v13, 0.0 }
 0x34f   : > { %2132 = vadd.xlane.f32.xlu0 %v2131_v54  ;;  %v1708_v9 = vpop.permute.xlu2 %1707  ;;  %v1994_v50 = vsel %vm9080_vm5, %v6794_v10, 0.0  ;;  %v6817_v59 = vpop.eup %4683  ;;  %4691 = vpow2.f32 %v1917_v24  ;;  %vm9084_vm5 = vnez %v9083_v39  ;;  %v1819_v24 = vsub.f32 %v9087_v7, %v1728_v0 }
 0x350   : > { %v1811_v19 = vsub.f32 %v9081_v29, %v1708_v9  ;;  %v1812_v22 = vsub.f32 %v9082_v12, %v1708_v9  ;;  %v2134_v61 = vadd.f32 %v1994_v50, %v1993_v44  ;;  %v4284_v9 = vpack.c.bf16 %v6720_v30, %v6709_v15  ;;  %v9088_v44 = vld [vmem:[#allocation14_spill] sm:$0xff] }
 0x351   : > { %vm9089_vm7 = vnez %v9088_v44  ;;  %v9092_v29 = vld [vmem:[#allocation94_spill] sm:$0xff]  ;;  %v1927_v42 = vmul.f32 1.442695, %v1819_v24 }
 0x352   : > { %v6819_v62 = vpop.eup %4685  ;;  %v1911_v5 = vmul.f32 1.442695, %v1811_v19  ;;  %v1913_v54 = vmul.f32 1.442695, %v1812_v22  ;;  %v1983_v50 = vsel %vm9089_vm7, %v6773_v31, 0.0  ;;  %v1820_v19 = vsub.f32 %v9092_v29, %v1728_v0  ;;  %v9099_v29 = vld [vmem:[#allocation84_spill] sm:$0xff] }
 0x353   : > { %v6825_v21 = vpop.eup %4687  ;;  %v1997_v43 = vsel %vm9084_vm5, %v6819_v62, 0.0  ;;  %v2119_v7 = vadd.f32 %v1984_v38, %v1983_v50 }
 0x354   : > { %4693 = vpow2.f32 %v1911_v5  ;;  %2111 = vadd.xlane.f32.xlu1 %v2110_v51  ;;  %v1998_v15 = vsel %vm9086_vm15, %v6825_v21, 0.0  ;;  %v4690_v22 = vpop.eup %4689  ;;  %v9093_v51 = vld [vmem:[#allocation55_spill] sm:$0xff]  ;;  %v9094_v5 = vld [vmem:[#allocation56_spill] sm:$0xff]  ;;  %vm9102_vm15 = vnez %v9101_v14 }
 0x355   : > { %4695 = vpow2.f32 %v1913_v54  ;;  %2135 = vadd.xlane.f32.xlu2 %v2134_v61  ;;  %4285 = vmatmul.msk.bf16.gmra.mxu0 %vm4283_vm3, %v4284_v9  ;;  %v2140_v47 = vadd.f32 %v1998_v15, %v1997_v43  ;;  %v4692_v9 = vpop.eup %4691  ;;  %v9095_v43 = vld [vmem:[#allocation51_spill] sm:$0xff]  ;;  %v1743_v15 = vpop.permute.xlu1 %1742  ;;  %vm9100_vm3 = vnez %v9099_v29 }
 0x356   : > { %4333 = vmatmul.msk.bf16.gmra.mxu1 %vm4331_vm12, %v4332_v4  ;;  %v1815_v4 = vsub.f32 %v9095_v43, %v6507_v3  ;;  %v9103_v43 = vld [vmem:[#allocation85_spill] sm:$0xff] }
 0x357   : > { %2141 = vadd.xlane.f32.xlu0 %v2140_v47  ;;  %v1723_v12 = vpop.permute.xlu2 %1722  ;;  %v9097_v47 = vld [vmem:[#allocation45_spill] sm:$0xff]  ;;  %vm9104_vm5 = vnez %v9103_v43  ;;  %v9113_v43 = vld [vmem:[#allocation52_spill] sm:$0xff] }
 0x358   : > { %v1817_v61 = vsub.f32 %v9093_v51, %v1723_v12  ;;  %v1818_v54 = vsub.f32 %v9094_v5, %v1723_v12  ;;  %vm9098_vm0 = vnez %v9097_v47  ;;  %v1929_v12 = vmul.f32 1.442695, %v1820_v19  ;;  %vm4349_vm13 = vmpackc.low %vm9104_vm5, %vm9102_vm15  ;;  %v9105_v19 = vld [vmem:[#allocation26_spill] sm:$0xff]  ;;  %v9107_v47 = vld [vmem:[#allocation100_spill] sm:$0xff] }
 0x359   : > { %vm4301_vm12 = vmpackc.low %vm9100_vm3, %vm9098_vm0  ;;  %v1919_v24 = vmul.f32 1.442695, %v1815_v4  ;;  %vm9106_vm4 = vnez %v9105_v19  ;;  %v9110_v4 = vld [vmem:[#allocation101_spill] sm:$0xff] }
 0x35a   : > { %v4694_v30 = vpop.eup %4693  ;;  %v1923_v46 = vmul.f32 1.442695, %v1817_v61  ;;  %v1925_v0 = vmul.f32 1.442695, %v1818_v54  ;;  %v1989_v61 = vsel %vm9106_vm4, %v6617_v16, 0.0 }
 0x35b   : > { %v4696_v51 = vpop.eup %4695  ;;  %v4302_v5 = vpack.c.bf16 %v4690_v22, %v4694_v30  ;;  %v2003_v50 = vsel %vm9098_vm0, %v4694_v30, 0.0  ;;  %v1921_v54 = vmul.f32 1.442695, %v1816_v60  ;;  %v1825_v30 = vsub.f32 %v9107_v47, %v1743_v15 }
 0x35c   : > { %4697 = vpow2.f32 %v1923_v46  ;;  %2120 = vadd.xlane.f32.xlu1 %v2119_v7  ;;  %v4350_v3 = vpack.c.bf16 %v4692_v9, %v4696_v51  ;;  %v2004_v55 = vsel %vm9102_vm15, %v4696_v51, 0.0  ;;  %v9108_v46 = vld [vmem:[#allocation27_spill] sm:$0xff]  ;;  %v1826_v7 = vsub.f32 %v9110_v4, %v1743_v15 }
 0x35d   : > { %4699 = vpow2.f32 %v1925_v0  ;;  %2144 = vadd.xlane.f32.xlu2 %v6656_v45  ;;  %4303 = vmatmul.msk.bf16.gmra.mxu2 %vm4301_vm12, %v4302_v5  ;;  %v2149_v38 = vadd.f32 %v2004_v55, %v2003_v50  ;;  %vm9109_vm0 = vnez %v9108_v46  ;;  %v9111_v0 = vld [vmem:[#allocation63_spill] sm:$0xff]  ;;  %v9112_v5 = vld [vmem:[#allocation64_spill] sm:$0xff]  ;;  %v2005_v60 = vsel %vm9100_vm3, %v4690_v22, 0.0  ;;  %v1758_v29 = vpop.permute.xlu1 %1757 }
 0x35e   : > { %4701 = vpow2.f32 %v1927_v42  ;;  %4351 = vmatmul.msk.bf16.gmra.mxu3 %vm4349_vm13, %v4350_v3  ;;  %v1990_v14 = vsel %vm9109_vm0, %v6619_v41, 0.0  ;;  %v2006_v42 = vsel %vm9104_vm5, %v4692_v9, 0.0  ;;  %vm4286_vm13 = vmpackc.low %vm9060_vm2, %vm9089_vm7  ;;  %v1941_v4 = vmul.f32 1.442695, %v1826_v7 }
 0x35f   : > { %4703 = vpow2.f32 %v1929_v12  ;;  %2150 = vadd.xlane.f32.xlu0 %v2149_v38  ;;  %v1738_v45 = vpop.permute.xlu2 %1737  ;;  %v2128_v3 = vadd.f32 %v1990_v14, %v1989_v61  ;;  %v1939_v12 = vmul.f32 1.442695, %v1825_v30  ;;  %v4287_v9 = vpack.c.bf16 %v6741_v35, %v6773_v31  ;;  %vm4334_vm5 = vmpackc.low %vm9062_vm9, %vm9091_vm6  ;;  %v9115_v14 = vld [vmem:[#allocation53_spill] sm:$0xff] }
 0x360   : > { %v1823_v51 = vsub.f32 %v9111_v0, %v1738_v45  ;;  %v1824_v50 = vsub.f32 %v9112_v5, %v1738_v45  ;;  %4705 = vpow2.f32 %v1919_v24  ;;  %v2152_v45 = vadd.f32 %v2006_v42, %v2005_v60  ;;  %v9123_v60 = vld [vmem:[#allocation110_spill] sm:$0xff] }
 0x361   : > { %4707 = vpow2.f32 %v1921_v54  ;;  %vm9114_vm15 = vnez %v9113_v43  ;;  %v4335_v30 = vpack.c.bf16 %v6747_v6, %v6799_v13  ;;  %vm9116_vm3 = vnez %v9115_v14  ;;  %v9119_v6 = vld [vmem:[#allocation34_spill] sm:$0xff] }
 0x362   : > { %v6886_v55 = vpop.eup %4697  ;;  %v1935_v47 = vmul.f32 1.442695, %v1823_v51  ;;  %v1937_v15 = vmul.f32 1.442695, %v1824_v50  ;;  %v9118_v51 = vld [vmem:[#allocation109_spill] sm:$0xff]  ;;  %vm9120_vm12 = vnez %v9119_v6  ;;  %vm9122_vm0 = vnez %v9121_v8 }
 0x363   : > { %v4700_v38 = vpop.eup %4699  ;;  %v2689_v22 = vpop.f32.mrf.mxu2  ;;  %v2009_v24 = vsel %vm9114_vm15, %v6886_v55, 0.0  ;;  %v1831_v5 = vsub.f32 %v9118_v51, %v1758_v29  ;;  %v1995_v13 = vsel %vm9120_vm12, %v6807_v26, 0.0  ;;  %v1996_v44 = vsel %vm9122_vm0, %v6817_v59, 0.0 }
 0x364   : > { %v6901_v61 = vpop.eup %4701  ;;  %4709 = vpow2.f32 %v1935_v47  ;;  %v2778_v54 = vpop.f32.mrf.mxu3  ;;  %2129 = vadd.xlane.f32.xlu1 %v2128_v3  ;;  %v2010_v35 = vsel %vm9116_vm3, %v4700_v38, 0.0  ;;  %v1832_v42 = vsub.f32 %v9123_v60, %v1758_v29  ;;  %v9125_v47 = vld [vmem:[#allocation72_spill] sm:$0xff]  ;;  %v2137_v29 = vadd.f32 %v1996_v44, %v1995_v13  ;;  %v9135_v44 = vld [vmem:[#allocation50_spill] sm:$0xff] }
 0x365   : > { %v6907_v31 = vpop.eup %4703  ;;  %4711 = vpow2.f32 %v1937_v15  ;;  %v6909_v7 = vadd.f32 %v2778_v54, %v2689_v22  ;;  %2153 = vadd.xlane.f32.xlu2 %v2152_v45  ;;  %4288 = vmatmul.msk.bf16.gmra.mxu0 %vm4286_vm13, %v4287_v9  ;;  %v2158_v0 = vadd.f32 %v2010_v35, %v2009_v24  ;;  %v9126_v22 = vld [vmem:[#allocation90_spill] sm:$0xff]  ;;  %v9128_v9 = vld [vmem:[#allocation91_spill] sm:$0xff]  ;;  %v1951_v60 = vmul.f32 1.442695, %v1831_v5  ;;  %v9137_v5 = vld [vmem:[#allocation61_spill] sm:$0xff] }
 0x366   : > { %4713 = vpow2.f32 %v1939_v12  ;;  %4336 = vmatmul.msk.bf16.gmra.mxu1 %vm4334_vm5, %v4335_v30  ;;  %v6928_v50 = vpop.eup %4705  ;;  %vm9127_vm2 = vnez %v9126_v22  ;;  %vm9129_vm9 = vnez %v9128_v9  ;;  %v9130_v54 = vld [vmem:[#allocation159_spill] sm:$0xff]  ;;  %v1953_v32 = vmul.f32 1.442695, %v1832_v42  ;;  %v9139_v42 = vld [vmem:[#allocation62_spill] sm:$0xff] }
 0x367   : > { %9117 = vst [vmem:[#allocation16_spill] sm:$0xff] %v6909_v7  ;;  %4715 = vpow2.f32 %v1941_v4  ;;  %2159 = vadd.xlane.f32.xlu0 %v2158_v0  ;;  %v1753_v3 = vpop.permute.xlu2 %1752  ;;  %v6931_v2 = vpop.eup %4707  ;;  %v2011_v45 = vsel %vm9127_vm2, %v6901_v61, 0.0  ;;  %v2012_v24 = vsel %vm9129_vm9, %v6907_v31, 0.0  ;;  %v9131_v4 = vld [vmem:[#allocation59_spill] sm:$0xff]  ;;  %v9132_v0 = vld [vmem:[#allocation60_spill] sm:$0xff]  ;;  %v4305_v13 = vpack.c.bf16 %v6886_v55, %v6928_v50 }
 0x368   : > { %v1829_v12 = vsub.f32 %v9124_v11, %v1753_v3  ;;  %v1830_v15 = vsub.f32 %v9125_v47, %v1753_v3  ;;  %v1821_v30 = vsub.f32 %v9131_v4, %v9130_v54  ;;  %v1822_v51 = vsub.f32 %v9132_v0, %v9130_v54  ;;  %v9133_v47 = vld [vmem:[#allocation49_spill] sm:$0xff]  ;;  %v9141_v0 = vld [vmem:[#allocation147_spill] sm:$0xff] }
 0x369   : > { %vm9134_vm7 = vnez %v9133_v47  ;;  %v2161_v58 = vadd.f32 %v2012_v24, %v2011_v45  ;;  %vm9136_vm13 = vnez %v9135_v44  ;;  %vm9138_vm0 = vnez %v9137_v5 }
 0x36a   : > { %v6943_v35 = vpop.eup %4709  ;;  %v1947_v11 = vmul.f32 1.442695, %v1829_v12  ;;  %v1949_v3 = vmul.f32 1.442695, %v1830_v15  ;;  %vm4304_vm6 = vmpackc.low %vm9114_vm15, %vm9134_vm7  ;;  %v4353_v43 = vpack.c.bf16 %v4700_v38, %v6931_v2  ;;  %vm9140_vm15 = vnez %v9139_v42 }
 0x36b   : > { %v6951_v7 = vpop.eup %4711  ;;  %vm4352_vm5 = vmpackc.low %vm9116_vm3, %vm9136_vm13  ;;  %v2015_v12 = vsel %vm9138_vm0, %v6943_v35, 0.0  ;;  %v1931_v24 = vmul.f32 1.442695, %v1821_v30  ;;  %v1933_v54 = vmul.f32 1.442695, %v1822_v51  ;;  %v2001_v38 = vsel %vm5733_vm14, %v6637_v40, 0.0 }
 0x36c   : > { %v6962_v15 = vpop.eup %4713  ;;  %4717 = vpow2.f32 %v1947_v11  ;;  %2138 = vadd.xlane.f32.xlu1 %v2137_v29  ;;  %v2016_v45 = vsel %vm9140_vm15, %v6951_v7, 0.0  ;;  %v2002_v29 = vsel %vm5748_vm1, %v6639_v37, 0.0  ;;  %vm4289_vm14 = vmpackc.low %vm9106_vm4, %vm9068_vm10  ;;  %vm9146_vm1 = vnez %v9108_v46  ;;  %v9180_v30 = vld [vmem:[#allocation73_spill] sm:$0xff] }
 0x36d   : > { %v6968_v55 = vpop.eup %4715  ;;  %4719 = vpow2.f32 %v1949_v3  ;;  %2162 = vadd.xlane.f32.xlu2 %v2161_v58  ;;  %4306 = vmatmul.msk.bf16.gmra.mxu2 %vm4304_vm6, %v4305_v13  ;;  %v2167_v14 = vadd.f32 %v2016_v45, %v2015_v12  ;;  %v9142_v58 = vld [vmem:[#allocation148_spill] sm:$0xff]  ;;  %v2146_v12 = vadd.f32 %v2002_v29, %v2001_v38  ;;  %vm4337_vm6 = vmpackc.low %vm9146_vm1, %vm9070_vm11  ;;  %vm9150_vm10 = vnez %v9149_v49 }
 0x36e   : > { %4721 = vpow2.f32 %v1951_v60  ;;  %4354 = vmatmul.msk.bf16.gmra.mxu3 %vm4352_vm5, %v4353_v43  ;;  %v2017_v60 = vsel %vm6183_vm8, %v6962_v15, 0.0  ;;  %v9147_v43 = vld [vmem:[#allocation69_spill] sm:$0xff]  ;;  %v9152_v46 = vpack.c.bf16 %v6617_v16, %v6622_v33  ;;  %v9153_v38 = vld [vmem:[#allocation68_spill] sm:$0xff]  ;;  %v4359_v5 = vpack.c.bf16 %v6968_v55, %v6951_v7  ;;  %v9187_v7 = vld [vmem:[#allocation98_spill] sm:$0xff] }
 0x36f   : > { %4723 = vpow2.f32 %v1953_v32  ;;  %2168 = vadd.xlane.f32.xlu0 %v2167_v14  ;;  %v1768_v4 = vpop.permute.xlu2 %1767  ;;  %v9144_v32 = vld [vmem:[#allocation97_spill] sm:$0xff]  ;;  %vm9148_vm5 = vnez %v9147_v43  ;;  %v1828_v29 = vsub.f32 %v9153_v38, %v6523_v63  ;;  %v9188_v6 = vpack.c.bf16 %v6819_v62, %v6807_v26  ;;  %v9193_v62 = vld [vmem:[#allocation104_spill] sm:$0xff] }
 0x370   : > { %v1835_v11 = vsub.f32 %v9141_v0, %v1768_v4  ;;  %v1836_v3 = vsub.f32 %v9142_v58, %v1768_v4  ;;  %vm9145_vm3 = vnez %v9144_v32  ;;  %4725 = vpow2.f32 %v1931_v24  ;;  %v9155_v16 = vld [vmem:[#allocation105_spill] sm:$0xff] }
 0x371   : > { %v2018_v51 = vsel %vm9145_vm3, %v6968_v55, 0.0  ;;  %4727 = vpow2.f32 %v1933_v54  ;;  %v9151_v54 = vld [vmem:[#allocation67_spill] sm:$0xff]  ;;  %v9154_v0 = vpack.c.bf16 %v6619_v41, %v6626_v23  ;;  %v2008_v58 = vsel %vm9136_vm13, %v6931_v2, 0.0 }
 0x372   : > { %v6984_v13 = vpop.eup %4717  ;;  %v1959_v25 = vmul.f32 1.442695, %v1835_v11  ;;  %v1961_v40 = vmul.f32 1.442695, %v1836_v3  ;;  %v2170_v1 = vadd.f32 %v2018_v51, %v2017_v60  ;;  %v1827_v18 = vsub.f32 %v9151_v54, %v6523_v63  ;;  %v9157_v63 = vld [vmem:[#allocation106_spill] sm:$0xff] }
 0x373   : > { %v6990_v37 = vpop.eup %4719  ;;  %v2021_v45 = vsel %vm9148_vm5, %v6984_v13, 0.0  ;;  %v2007_v11 = vsel %vm9134_vm7, %v6928_v50, 0.0  ;;  %vm9156_vm11 = vnez %v9155_v16  ;;  %vm9158_vm4 = vnez %v9157_v63  ;;  %v9159_v50 = vld [vmem:[#allocation57_spill] sm:$0xff] }
 0x374   : > { %v6999_v14 = vpop.eup %4721  ;;  %4729 = vpow2.f32 %v1959_v25  ;;  %2147 = vadd.xlane.f32.xlu1 %v2146_v12  ;;  %v2022_v19 = vsel %vm9150_vm10, %v6990_v37, 0.0  ;;  %v1943_v23 = vmul.f32 1.442695, %v1827_v18  ;;  %v1945_v25 = vmul.f32 1.442695, %v1828_v29  ;;  %v9161_v12 = vld [vmem:[#allocation58_spill] sm:$0xff] }
 0x375   : > { %v7004_v24 = vpop.eup %4723  ;;  %4731 = vpow2.f32 %v1961_v40  ;;  %2171 = vadd.xlane.f32.xlu2 %v2170_v1  ;;  %4291 = vmatmul.msk.bf16.gmra.mxu0 %vm4289_vm14, %v9152_v46  ;;  %v2176_v4 = vadd.f32 %v2022_v19, %v2021_v45  ;;  %v2023_v33 = vsel %vm9156_vm11, %v6999_v14, 0.0  ;;  %v2155_v47 = vadd.f32 %v2008_v58, %v2007_v11  ;;  %v9163_v1 = vld [vmem:[#allocation145_spill] sm:$0xff]  ;;  %v9165_v19 = vld [vmem:[#allocation146_spill] sm:$0xff]  ;;  %v9168_v46 = vld [vmem:[#allocation75_spill] sm:$0xff] }
 0x376   : > { %4339 = vmatmul.msk.bf16.gmra.mxu1 %vm4337_vm6, %v9154_v0  ;;  %v4726_v3 = vpop.eup %4725  ;;  %v2024_v60 = vsel %vm9158_vm4, %v7004_v24, 0.0  ;;  %vm9160_vm7 = vnez %v9159_v50  ;;  %vm9162_vm14 = vnez %v9161_v12  ;;  %vm9164_vm6 = vnez %v9163_v1  ;;  %v9167_v18 = vld [vmem:[#allocation162_spill] sm:$0xff]  ;;  %v9205_v16 = vld [vmem:[#allocation117_spill] sm:$0xff] }
 0x377   : > { %2177 = vadd.xlane.f32.xlu0 %v2176_v4  ;;  %v4728_v41 = vpop.eup %4727  ;;  %vm4307_vm13 = vmpackc.low %vm9160_vm7, %vm9127_vm2  ;;  %v2179_v44 = vadd.f32 %v2024_v60, %v2023_v33  ;;  %v4308_v40 = vpack.c.bf16 %v4726_v3, %v6901_v61  ;;  %vm9166_vm2 = vnez %v9165_v19  ;;  %4733 = vpow2.f32 %v1943_v23  ;;  %v9169_v4 = vld [vmem:[#allocation76_spill] sm:$0xff]  ;;  %v9174_v23 = vld [vmem:[#allocation95_spill] sm:$0xff] }
 0x378   : > { %vm4355_vm1 = vmpackc.low %vm9162_vm14, %vm9129_vm9  ;;  %v4356_v22 = vpack.c.bf16 %v4728_v41, %v6907_v31  ;;  %v1833_v61 = vsub.f32 %v9168_v46, %v9167_v18  ;;  %4735 = vpow2.f32 %v1945_v25  ;;  %v1834_v38 = vsub.f32 %v9169_v4, %v9167_v18  ;;  %v9210_v63 = vld [vmem:[#allocation141_spill] sm:$0xff] }
 0x379   : > { %v2013_v31 = vsel %vm9160_vm7, %v4726_v3, 0.0  ;;  %v2014_v29 = vsel %vm9162_vm14, %v4728_v41, 0.0  ;;  %vm9170_vm9 = vnez %v9073_v27  ;;  %v4293_v60 = vpack.c.bf16 %v6783_v20, %v6785_v34  ;;  %v9175_v41 = vld [vmem:[#allocation92_spill] sm:$0xff]  ;;  %v9178_v34 = vld [vmem:[#allocation66_spill] sm:$0xff] }
 0x37a   : > { %v7028_v51 = vpop.eup %4729  ;;  %v1955_v0 = vmul.f32 1.442695, %v1833_v61  ;;  %v1957_v11 = vmul.f32 1.442695, %v1834_v38  ;;  %v2164_v58 = vadd.f32 %v2014_v29, %v2013_v31  ;;  %v1520_v25 = vsub.f32 %v9175_v41, %v9174_v23  ;;  %v9195_v61 = vld [vmem:[#allocation165_spill] sm:$0xff]  ;;  %v9199_v29 = vld [vmem:[#allocation115_spill] sm:$0xff] }
 0x37b   : > { %v7034_v2 = vpop.eup %4731  ;;  %v2027_v45 = vsel %vm9164_vm6, %v7028_v51, 0.0  ;;  %vm9173_vm6 = vnez %v9079_v48  ;;  %v4341_v27 = vpack.c.bf16 %v6794_v10, %v6788_v53  ;;  %v4311_v10 = vpack.c.bf16 %v6962_v15, %v6943_v35  ;;  %v9182_v35 = vld [vmem:[#allocation74_spill] sm:$0xff] }
 0x37c   : > { %2156 = vadd.xlane.f32.xlu1 %v2155_v47  ;;  %v2028_v54 = vsel %vm9166_vm2, %v7034_v2, 0.0  ;;  %4737 = vpow2.f32 %v1955_v0  ;;  %v1553_v48 = vmul.f32 1.442695, %v1520_v25  ;;  %v1525_v55 = vsub.f32 %v9187_v7, %v6212_v28  ;;  %v9190_v28 = vld [vmem:[#allocation164_spill] sm:$0xff]  ;;  %v9200_v0 = vld [vmem:[#allocation113_spill] sm:$0xff]  ;;  %v9208_v7 = vld [vmem:[#allocation163_spill] sm:$0xff] }
 0x37d   : > { %2180 = vadd.xlane.f32.xlu2 %v2179_v44  ;;  %4309 = vmatmul.msk.bf16.gmra.mxu2 %vm4307_vm13, %v4308_v40  ;;  %v2185_v9 = vadd.f32 %v2028_v54, %v2027_v45  ;;  %vm9171_vm13 = vnez %v9077_v57  ;;  %v4734_v33 = vpop.eup %4733  ;;  %4739 = vpow2.f32 %v1957_v11  ;;  %v9176_v57 = vld [vmem:[#allocation65_spill] sm:$0xff]  ;;  %v9194_v54 = vld [vmem:[#allocation102_spill] sm:$0xff]  ;;  %v1531_v11 = vsub.f32 %v9200_v0, %v9199_v29  ;;  %v9218_v29 = vld [vmem:[#allocation103_spill] sm:$0xff] }
 0x37e   : > { %4357 = vmatmul.msk.bf16.gmra.mxu3 %vm4355_vm1, %v4356_v22  ;;  %vm4292_vm2 = vmpackc.low %vm9171_vm13, %vm9170_vm9  ;;  %vm9172_vm1 = vnez %v9075_v52  ;;  %v4736_v3 = vpop.eup %4735  ;;  %vm9177_vm14 = vnez %v9176_v57  ;;  %vm9179_vm9 = vnez %v9178_v34  ;;  %4741 = vpow2.f32 %v1553_v48  ;;  %v7143_v34 = vpop.f32.mrf.mxu0 }
 0x37f   : > { %2186 = vadd.xlane.f32.xlu0 %v2185_v9  ;;  %vm4340_vm7 = vmpackc.low %vm9173_vm6, %vm9172_vm1  ;;  %v2019_v20 = vsel %vm9177_vm14, %v4734_v33, 0.0  ;;  %v2020_v52 = vsel %vm9179_vm9, %v4736_v3, 0.0  ;;  %vm9185_vm13 = vnez %v9121_v8  ;;  %vm9186_vm1 = vnez %v9085_v56  ;;  %v9197_v9 = vld [vmem:[#allocation166_spill] sm:$0xff] }
 0x380   : > { %v2173_v47 = vadd.f32 %v2020_v52, %v2019_v20  ;;  %vm4310_vm6 = vmpackc.low %vm6183_vm8, %vm9138_vm0  ;;  %vm9181_vm8 = vnez %v9180_v30  ;;  %vm9183_vm0 = vnez %v9182_v35  ;;  %v1563_v22 = vmul.f32 1.442695, %v1525_v55  ;;  %v7149_v52 = vpop.f32.mrf.mxu1  ;;  %v2037_v35 = vld [vmem:[#allocation3 + $0x30] sm:$0xff] }
 0x381   : > { %v1523_v43 = vsub.f32 %v9194_v54, %v9193_v62  ;;  %v1575_v41 = vmul.f32 1.442695, %v1531_v11  ;;  %v2038_v62 = vld [vmem:[#allocation3 + $0x38] sm:$0xff]  ;;  %v9215_v54 = vld [vmem:[#allocation144_spill] sm:$0xff] }
 0x382   : > { %v7078_v50 = vpop.eup %4737 }
 0x383   : > { %v7086_v53 = vpop.eup %4739  ;;  %v2025_v44 = vsel %vm9181_vm8, %v7078_v50, 0.0  ;;  %v4317_v48 = vpack.c.bf16 %v7078_v50, %v6999_v14  ;;  %v9209_v14 = vld [vmem:[#allocation142_spill] sm:$0xff] }
 0x384   : > { %2165 = vadd.xlane.f32.xlu1 %v2164_v58  ;;  %v2026_v15 = vsel %vm9183_vm0, %v7086_v53, 0.0  ;;  %v4742_v42 = vpop.eup %4741  ;;  %v2032_v58 = vld [vmem:[#allocation3 + $0x8] sm:$0xff]  ;;  %v4365_v30 = vpack.c.bf16 %v7086_v53, %v7004_v24  ;;  %v1529_v50 = vsub.f32 %v9210_v63, %v9209_v14  ;;  %v9228_v63 = vld [vmem:[#allocation108_spill] sm:$0xff] }
 0x385   : > { %4294 = vmatmul.msk.bf16.gmra.mxu0 %vm4292_vm2, %v4293_v60  ;;  %vm4358_vm2 = vmpackc.low %vm9145_vm3, %vm9140_vm15  ;;  %v2182_v32 = vadd.f32 %v2026_v15, %v2025_v44  ;;  %vm9184_vm15 = vnez %v9083_v39  ;;  %v9189_v39 = vpack.c.bf16 %v6825_v21, %v6817_v59  ;;  %v9191_v21 = vld [vmem:[#allocation111_spill] sm:$0xff]  ;;  %v4362_v59 = vpack.c.bf16 %v6990_v37, %v4736_v3  ;;  %v2035_v44 = vld [vmem:[#allocation3 + $0x20] sm:$0xff] }
 0x386   : > { %4342 = vmatmul.msk.bf16.gmra.mxu1 %vm4340_vm7, %v4341_v27  ;;  %vm4295_vm3 = vmpackc.low %vm9184_vm15, %vm9120_vm12  ;;  %v1559_v37 = vmul.f32 1.442695, %v1523_v43  ;;  %v9202_v60 = vld [vmem:[#allocation139_spill] sm:$0xff]  ;;  %v2064_v23 = vmul.f32 %v4742_v42, %v2032_v58  ;;  %v9206_v15 = vld [vmem:[#allocation89_spill] sm:$0xff]  ;;  %v1571_v53 = vmul.f32 1.442695, %v1529_v50 }
 0x387   : > { %vm4343_vm7 = vmpackc.low %vm9186_vm1, %vm9185_vm13  ;;  %v9216_v43 = vld [vmem:[#allocation143_spill] sm:$0xff]  ;;  %v9229_v50 = vld [vmem:[#allocation112_spill] sm:$0xff] }
 0x388   : > { %vm4313_vm12 = vmpackc.low %vm9148_vm5, %vm9177_vm14  ;;  %vm9196_vm5 = vnez %v9195_v61  ;;  %v9230_v61 = vsub.f32 %v9228_v63, %v9229_v50  ;;  %v9248_v63 = vld [vmem:[#allocation118_spill] sm:$0xff]  ;;  %v9249_v50 = vld [vmem:[#allocation120_spill] sm:$0xff] }
 0x389   : > { %vm4316_vm14 = vmpackc.low %vm9181_vm8, %vm9156_vm11  ;;  %vm9220_vm8 = vnez %v9163_v1 }
 0x38c   : > { %2174 = vadd.xlane.f32.xlu1 %v2173_v47 }
 0x38d   : > { %4312 = vmatmul.msk.bf16.gmra.mxu2 %vm4310_vm6, %v4311_v10  ;;  %vm4361_vm6 = vmpackc.low %vm9150_vm10, %vm9179_vm9  ;;  %vm9198_vm10 = vnez %v9197_v9  ;;  %vm9203_vm9 = vcmask 7168   ;;  %v9204_v10 = vld [vmem:[#allocation119_spill] sm:$0xff] }
 0x38e   : > { %4360 = vmatmul.msk.bf16.gmra.mxu3 %vm4358_vm2, %v4359_v5  ;;  %vm4364_vm2 = vmpackc.low %vm9183_vm0, %vm9158_vm4  ;;  %v1534_v5 = vsub.f32 %v9205_v16, %v9204_v10  ;;  %v9223_v10 = vld [vmem:[#allocation127_spill] sm:$0xff]  ;;  %v9224_v16 = vld [vmem:[#allocation125_spill] sm:$0xff] }
 0x38f   : > { %vm9211_vm11 = vmmov %vm9203_vm9 }
 0x390   : > { %vm9214_vm4 = vmmov %vm9203_vm9 }
 0x391   : > { %vm4319_vm0 = vmpackc.low %vm9196_vm5, %vm9220_vm8 }
 0x392   : > { %vm9221_vm15 = vmmov %vm9214_vm4 }
 0x393   : > { %2295 = vperm.xlu0 %4610, %v4742_v42   ;;  %v9207_v42 = vld [vmem:[#allocation86_spill] sm:$0xff]  ;;  %vm9225_vm1 = vmmov %vm9214_vm4 }
 0x394   : > { %v1773_v40 = vpop.permute.xlu1 %1772  ;;  %2183 = vadd.xlane.f32.xlu1 %v2182_v32  ;;  %v1521_v32 = vsub.f32 %v9207_v42, %v9206_v15  ;;  %v2041_v15 = vld [vmem:[#allocation3 + $0x50] sm:$0xff]  ;;  %v2043_v42 = vld [vmem:[#allocation3 + $0x60] sm:$0xff]  ;;  %vm9262_vm8 = vmmov %vm9225_vm1 }
 0x395   : > { %v1837_v12 = vsub.f32 %v6561_v17, %v1773_v40  ;;  %v1838_v45 = vsub.f32 %v6565_v36, %v1773_v40  ;;  %4297 = vmatmul.msk.bf16.gmra.mxu0 %vm4295_vm3, %v9188_v6  ;;  %v4314_v17 = vpack.c.bf16 %v6984_v13, %v4734_v33  ;;  %v9192_v36 = vld [vmem:[#allocation107_spill] sm:$0xff]  ;;  %v9201_v33 = vld [vmem:[#allocation140_spill] sm:$0xff]  ;;  %v1581_v40 = vmul.f32 1.442695, %v1534_v5 }
 0x396   : > { %4345 = vmatmul.msk.bf16.gmra.mxu1 %vm4343_vm7, %v9189_v39  ;;  %v1528_v26 = vsub.f32 %v9192_v36, %v9191_v21  ;;  %v1526_v3 = vsub.f32 %v9202_v60, %v9201_v33  ;;  %v9212_v21 = vld [vmem:[#allocation123_spill] sm:$0xff]  ;;  %v9213_v36 = vld [vmem:[#allocation121_spill] sm:$0xff]  ;;  %vm9222_vm3 = vnez %v9165_v19  ;;  %v1540_v5 = vsub.f32 %v9224_v16, %v9223_v10  ;;  %vm9231_vm7 = vmmov %vm9225_vm1 }
 0x397   : > { %v1963_v8 = vmul.f32 1.442695, %v1837_v12  ;;  %v1965_v56 = vmul.f32 1.442695, %v1838_v45  ;;  %v1555_v45 = vmul.f32 1.442695, %v1521_v32  ;;  %vm4367_vm13 = vmpackc.low %vm9198_vm10, %vm9222_vm3 }
 0x398   : > { %v1569_v13 = vmul.f32 1.442695, %v1528_v26  ;;  %v1565_v20 = vmul.f32 1.442695, %v1526_v3  ;;  %v1537_v26 = vsub.f32 %v9213_v36, %v9212_v21  ;;  %v9227_v19 = vld [vmem:[#allocation149_spill] sm:$0xff]  ;;  %v9243_v16 = vld [vmem:[#allocation136_spill] sm:$0xff] }
 0x399   : > { %4743 = vpow2.f32 %v1963_v8  ;;  %v2044_v36 = vld [vmem:[#allocation3 + $0x68] sm:$0xff] }
 0x39a   : > { %4745 = vpow2.f32 %v1965_v56 }
 0x39b   : > { %2305 = vperm.xlu0 %4610, %v9190_v28   ;;  %4747 = vpow2.f32 %v1563_v22 }
 0x39c   : > { %4749 = vpow2.f32 %v1569_v13  ;;  %v1532_v13 = vsub.f32 %v9216_v43, %v9215_v54 }
 0x39d   : > { %4315 = vmatmul.msk.bf16.gmra.mxu2 %vm4313_vm12, %v4314_v17  ;;  %4751 = vpow2.f32 %v1559_v37  ;;  %vm9232_vm12 = vmmov %vm9225_vm1 }
 0x39e   : > { %4363 = vmatmul.msk.bf16.gmra.mxu3 %vm4361_vm6, %v4362_v59  ;;  %4753 = vpow2.f32 %v1575_v41  ;;  %v1577_v3 = vmul.f32 1.442695, %v1532_v13  ;;  %vm9235_vm6 = vmmov %vm9225_vm1  ;;  %v2046_v13 = vld [vmem:[#allocation3 + $0x78] sm:$0xff] }
 0x39f   : > { %v7129_v18 = vpop.eup %4743  ;;  %4755 = vpow2.f32 %v1565_v20 }
 0x3a0   : > { %v7131_v46 = vpop.eup %4745  ;;  %v2029_v49 = vsel %vm9196_vm5, %v7129_v18, 0.0  ;;  %4757 = vpow2.f32 %v1581_v40  ;;  %vm9241_vm5 = vmmov %vm9225_vm1 }
 0x3a1   : > { %v2030_v4 = vsel %vm9198_vm10, %v7131_v46, 0.0  ;;  %v4748_v38 = vpop.eup %4747  ;;  %4759 = vpow2.f32 %v1555_v45  ;;  %vm9242_vm10 = vmmov %vm9225_vm1 }
 0x3a2   : > { %v2188_v31 = vadd.f32 %v2030_v4, %v2029_v49  ;;  %v4750_v57 = vpop.eup %4749  ;;  %v2069_v39 = vmul.f32 %v4748_v38, %v2037_v35  ;;  %4761 = vpow2.f32 %v1571_v53  ;;  %v2040_v49 = vld [vmem:[#allocation3 + $0x48] sm:$0xff]  ;;  %v1567_v35 = vmul.f32 1.442695, %v9230_v61 }
 0x3a3   : > { %2320 = vperm.xlu0 %4610, %v4748_v38   ;;  %v4752_v47 = vpop.eup %4751  ;;  %v1587_v38 = vmul.f32 1.442695, %v1537_v26  ;;  %v2072_v33 = vmul.f32 %v4750_v57, %v2040_v49  ;;  %v9236_v26 = vld [vmem:[#allocation152_spill] sm:$0xff]  ;;  %v9250_v61 = vsub.f32 %v9248_v63, %v9249_v50  ;;  %v9266_v63 = vld [vmem:[#allocation126_spill] sm:$0xff] }
 0x3a4   : > { %2189 = vadd.xlane.f32.xlu2 %v2188_v31  ;;  %v2067_v55 = vmul.f32 %v4752_v47, %v2035_v44  ;;  %v4754_v24 = vpop.eup %4753  ;;  %v9217_v31 = vld [vmem:[#allocation99_spill] sm:$0xff]  ;;  %v4368_v44 = vpack.c.bf16 %v7131_v46, %v7034_v2  ;;  %v1593_v46 = vmul.f32 1.442695, %v1540_v5  ;;  %v9244_v5 = vld [vmem:[#allocation134_spill] sm:$0xff]  ;;  %v9267_v50 = vld [vmem:[#allocation128_spill] sm:$0xff] }
 0x3a5   : > { %v4756_v17 = vpop.eup %4755  ;;  %v9219_v0 = vsub.f32 %v9217_v31, %v9218_v29  ;;  %4763 = vpow2.f32 %v1587_v38  ;;  %v9238_v29 = vld [vmem:[#allocation114_spill] sm:$0xff] }
 0x3a6   : > { %v2070_v4 = vmul.f32 %v4756_v17, %v2038_v62  ;;  %v7178_v60 = vpop.eup %4757  ;;  %v9237_v62 = vld [vmem:[#allocation151_spill] sm:$0xff] }
 0x3a7   : > { %v1561_v11 = vmul.f32 1.442695, %v9219_v0  ;;  %v1538_v54 = vsub.f32 %v9237_v62, %v9236_v26  ;;  %v9239_v0 = vld [vmem:[#allocation116_spill] sm:$0xff]  ;;  %v9257_v62 = vld [vmem:[#allocation155_spill] sm:$0xff] }
 0x3a8   : > { %v2100_v25 = vpop.xlane.xlu2 %2099  ;;  %v9256_v26 = vld [vmem:[#allocation156_spill] sm:$0xff] }
 0x3a9   : > { %v2192_v27 = vadd.f32 %v2100_v25, %v2064_v23  ;;  %v4760_v25 = vpop.eup %4759  ;;  %4765 = vpow2.f32 %v1561_v11  ;;  %v9240_v11 = vsub.f32 %v9238_v29, %v9239_v0  ;;  %v9258_v0 = vld [vmem:[#allocation122_spill] sm:$0xff] }
 0x3aa   : > { %4767 = vpow2.f32 %v1577_v3  ;;  %v2078_v3 = vmul.f32 %v7178_v60, %v2046_v13  ;;  %v2052_v13 = vld [vmem:[#allocation3 + $0xa8] sm:$0xff] }
 0x3ab   : > { %2225 = vst.msk [vmem:[#allocation3 + $0x8] sm:$0xff] %vm9203_vm9, %v2192_v27  ;;  %2335 = vperm.xlu0 %4610, %v4750_v57   ;;  %v4320_v57 = vpack.c.bf16 %v7129_v18, %v7028_v51  ;;  %v9226_v51 = vld [vmem:[#allocation150_spill] sm:$0xff]  ;;  %4769 = vpow2.f32 %v1593_v46  ;;  %vm9251_vm9 = vmmov %vm9225_vm1 }
 0x3ac   : > { %v1535_v18 = vsub.f32 %v9227_v19, %v9226_v51  ;;  %4771 = vpow2.f32 %v1567_v35  ;;  %v9246_v51 = vld [vmem:[#allocation154_spill] sm:$0xff]  ;;  %v9247_v19 = vld [vmem:[#allocation153_spill] sm:$0xff]  ;;  %v1579_v35 = vmul.f32 1.442695, %v9250_v61  ;;  %v9268_v61 = vsub.f32 %v9266_v63, %v9267_v50 }
 0x3ad   : > { %4318 = vmatmul.msk.bf16.gmra.mxu2 %vm4316_vm14, %v4317_v48  ;;  %2290 = vperm.xlu1 %4611, %v9208_v7   ;;  %v2033_v48 = vld [vmem:[#allocation3 + $0x10] sm:$0xff]  ;;  %vm9245_vm14 = vmmov %vm9225_vm1 }
 0x3ae   : > { %4366 = vmatmul.msk.bf16.gmra.mxu3 %vm4364_vm2, %v4365_v30  ;;  %v2065_v9 = vmul.f32 %v4760_v25, %v2033_v48  ;;  %vm9252_vm2 = vmmov %vm9225_vm1 }
 0x3b0   : > { %v2109_v12 = vpop.xlane.xlu2 %2108 }
 0x3b1   : > { %v2195_v6 = vadd.f32 %v2109_v12, %v2067_v55  ;;  %v2075_v55 = vmul.f32 %v4754_v24, %v2043_v42  ;;  %v1583_v12 = vmul.f32 1.442695, %v1535_v18  ;;  %v1541_v18 = vsub.f32 %v9247_v19, %v9246_v51  ;;  %v2049_v42 = vld [vmem:[#allocation3 + $0x90] sm:$0xff]  ;;  %v9265_v19 = vld [vmem:[#allocation157_spill] sm:$0xff] }
 0x3b2   : > { %v2115_v8 = vpop.xlane.xlu0 %2114  ;;  %v2654_v56 = vpop.f32.mrf.mxu0  ;;  %v2053_v51 = vld [vmem:[#allocation3 + $0xb0] sm:$0xff] }
 0x3b3   : > { %2228 = vst.msk [vmem:[#allocation3 + $0x20] sm:$0xff] %vm9211_vm11, %v2195_v6  ;;  %v2197_v22 = vadd.f32 %v2115_v8, %v2069_v39  ;;  %v2743_v28 = vpop.f32.mrf.mxu1  ;;  %2350 = vperm.xlu0 %4610, %v4754_v24   ;;  %4773 = vpow2.f32 %v1583_v12  ;;  %vm9255_vm11 = vmmov %vm9225_vm1 }
 0x3b4   : > { %v7170_v59 = vadd.f32 %v2743_v28, %v2654_v56  ;;  %v2036_v56 = vld [vmem:[#allocation3 + $0x28] sm:$0xff]  ;;  %v9233_v28 = vld [vmem:[#allocation132_spill] sm:$0xff] }
 0x3b5   : > { %2230 = vst.msk [vmem:[#allocation3 + $0x30] sm:$0xff] %vm9214_vm4, %v2197_v22  ;;  %2310 = vperm.xlu1 %4611, %v4752_v47   ;;  %v4762_v47 = vpop.eup %4761  ;;  %vm9261_vm4 = vmmov %vm9225_vm1 }
 0x3b6   : > { %v2073_v2 = vmul.f32 %v4762_v47, %v2041_v15  ;;  %v7209_v40 = vpop.eup %4763  ;;  %v2047_v15 = vld [vmem:[#allocation3 + $0x80] sm:$0xff] }
 0x3b7   : > { %v4766_v39 = vpop.eup %4765 }
 0x3b8   : > { %v2118_v37 = vpop.xlane.xlu2 %2117  ;;  %v4768_v22 = vpop.eup %4767  ;;  %v2068_v43 = vmul.f32 %v4766_v39, %v2036_v56 }
 0x3b9   : > { %v2198_v58 = vadd.f32 %v2118_v37, %v2070_v4  ;;  %v2076_v4 = vmul.f32 %v4768_v22, %v2044_v36  ;;  %v2050_v36 = vld [vmem:[#allocation3 + $0x98] sm:$0xff] }
 0x3ba   : > { %v2124_v23 = vpop.xlane.xlu0 %2123  ;;  %v2656_v41 = vpop.f32.mrf.mxu0 }
 0x3bb   : > { %2231 = vst.msk [vmem:[#allocation3 + $0x38] sm:$0xff] %vm9221_vm15, %v2198_v58  ;;  %v2200_v27 = vadd.f32 %v2124_v23, %v2072_v33  ;;  %v2745_v20 = vpop.f32.mrf.mxu1  ;;  %2365 = vperm.xlu0 %4610, %v7178_v60   ;;  %v1573_v58 = vmul.f32 1.442695, %v9240_v11  ;;  %v7225_v23 = vpop.eup %4769  ;;  %v1546_v60 = vsub.f32 %v9244_v5, %v9243_v16  ;;  %v9259_v11 = vld [vmem:[#allocation124_spill] sm:$0xff]  ;;  %v2045_v5 = vld [vmem:[#allocation3 + $0x70] sm:$0xff] }
 0x3bc   : > { %v7194_v30 = vadd.f32 %v2745_v20, %v2656_v41  ;;  %2300 = vperm.xlu2 %4612, %v4760_v25   ;;  %v1589_v41 = vmul.f32 1.442695, %v1538_v54  ;;  %v4772_v20 = vpop.eup %4771  ;;  %v1544_v54 = vsub.f32 %v9257_v62, %v9256_v26  ;;  %v2056_v26 = vld [vmem:[#allocation3 + $0xc8] sm:$0xff] }
 0x3bd   : > { %2233 = vst.msk [vmem:[#allocation3 + $0x48] sm:$0xff] %vm9225_vm1, %v2200_v27  ;;  %4321 = vmatmul.msk.bf16.gmra.mxu2 %vm4319_vm0, %v4320_v57  ;;  %2325 = vperm.xlu1 %4611, %v4756_v17   ;;  %v9234_v17 = vld [vmem:[#allocation130_spill] sm:$0xff]  ;;  %v4774_v10 = vpop.eup %4773  ;;  %v1605_v46 = vmul.f32 1.442695, %v1546_v60  ;;  %vm9263_vm0 = vmmov %vm9225_vm1 }
 0x3be   : > { %4369 = vmatmul.msk.bf16.gmra.mxu3 %vm4367_vm13, %v4368_v44  ;;  %v1543_v24 = vsub.f32 %v9234_v17, %v9233_v28  ;;  %v9254_v17 = vld [vmem:[#allocation160_spill] sm:$0xff]  ;;  %vm9269_vm15 = vmmov %vm9263_vm0 }
 0x3bf   : > { %v2103_v32 = vpop.xlane.xlu1 %2102  ;;  %vm9270_vm3 = vmmov %vm9263_vm0 }
 0x3c0   : > { %v2193_v7 = vadd.f32 %v2103_v32, %v2065_v9  ;;  %v2127_v14 = vpop.xlane.xlu2 %2126  ;;  %v1599_v38 = vmul.f32 1.442695, %v1543_v24  ;;  %vm9271_vm13 = vmmov %vm9263_vm0 }
 0x3c1   : > { %v2201_v1 = vadd.f32 %v2127_v14, %v2073_v2  ;;  %v2079_v2 = vmul.f32 %v4774_v10, %v2047_v15  ;;  %vm9275_vm1 = vmmov %vm9263_vm0 }
 0x3c2   : > { %2226 = vst.msk [vmem:[#allocation3 + $0x10] sm:$0xff] %vm9231_vm7, %v2193_v7  ;;  %v2133_v45 = vpop.xlane.xlu0 %2132  ;;  %v2659_v6 = vpop.f32.mrf.mxu0  ;;  %4775 = vpow2.f32 %v1599_v38  ;;  %vm9276_vm7 = vmmov %vm9263_vm0 }
 0x3c3   : > { %2234 = vst.msk [vmem:[#allocation3 + $0x50] sm:$0xff] %vm9232_vm12, %v2201_v1  ;;  %v2203_v53 = vadd.f32 %v2133_v45, %v2075_v55  ;;  %2380 = vperm.xlu0 %4610, %v7209_v40   ;;  %v2748_v8 = vpop.f32.mrf.mxu1  ;;  %4777 = vpow2.f32 %v1573_v58  ;;  %v2081_v55 = vmul.f32 %v7209_v40, %v2049_v42  ;;  %v1595_v45 = vmul.f32 1.442695, %v1541_v18  ;;  %v9253_v40 = vld [vmem:[#allocation161_spill] sm:$0xff]  ;;  %v2055_v42 = vld [vmem:[#allocation3 + $0xc0] sm:$0xff]  ;;  %vm9277_vm12 = vmmov %vm9263_vm0 }
 0x3c4   : > { %v7216_v21 = vadd.f32 %v2748_v8, %v2659_v6  ;;  %2315 = vperm.xlu2 %4612, %v4766_v39   ;;  %4779 = vpow2.f32 %v1589_v41  ;;  %v1549_v24 = vsub.f32 %v9254_v17, %v9253_v40  ;;  %v9260_v58 = vsub.f32 %v9258_v0, %v9259_v11 }
 0x3c5   : > { %2236 = vst.msk [vmem:[#allocation3 + $0x60] sm:$0xff] %vm9235_vm6, %v2203_v53  ;;  %2340 = vperm.xlu1 %4611, %v4762_v47   ;;  %v2039_v47 = vld [vmem:[#allocation3 + $0x40] sm:$0xff]  ;;  %4781 = vpow2.f32 %v1605_v46  ;;  %vm9284_vm6 = vmmov %vm9263_vm0 }
 0x3c6   : > { %v2071_v9 = vmul.f32 %v4772_v20, %v2039_v47  ;;  %4783 = vpow2.f32 %v1579_v35  ;;  %v1611_v38 = vmul.f32 1.442695, %v1549_v24  ;;  %v1591_v35 = vmul.f32 1.442695, %v9268_v61  ;;  %v2048_v24 = vld [vmem:[#allocation3 + $0x88] sm:$0xff]  ;;  %v9281_v61 = vld [vmem:[#allocation28_spill] sm:$0xff] }
 0x3c7   : > { %v2112_v49 = vpop.xlane.xlu1 %2111  ;;  %4785 = vpow2.f32 %v1595_v45 }
 0x3c8   : > { %v2196_v37 = vadd.f32 %v2112_v49, %v2068_v43  ;;  %v2136_v31 = vpop.xlane.xlu2 %2135  ;;  %v7241_v12 = vpop.eup %4775  ;;  %4787 = vpow2.f32 %v1611_v38 }
 0x3c9   : > { %v2204_v33 = vadd.f32 %v2136_v31, %v2076_v4  ;;  %v4778_v53 = vpop.eup %4777  ;;  %v2087_v45 = vmul.f32 %v7241_v12, %v2055_v42 }
 0x3ca   : > { %2229 = vst.msk [vmem:[#allocation3 + $0x28] sm:$0xff] %vm9241_vm5, %v2196_v37  ;;  %v2142_v25 = vpop.xlane.xlu0 %2141  ;;  %v2661_v27 = vpop.f32.mrf.mxu0  ;;  %vm9285_vm5 = vmmov %vm9263_vm0 }
 0x3cb   : > { %2237 = vst.msk [vmem:[#allocation3 + $0x68] sm:$0xff] %vm9242_vm10, %v2204_v33  ;;  %v2206_v57 = vadd.f32 %v2142_v25, %v2078_v3  ;;  %2395 = vperm.xlu0 %4610, %v7225_v23   ;;  %v2750_v48 = vpop.f32.mrf.mxu1  ;;  %v4780_v28 = vpop.eup %4779  ;;  %v1585_v33 = vmul.f32 1.442695, %v9260_v58  ;;  %v2084_v25 = vmul.f32 %v7225_v23, %v2052_v13  ;;  %v9264_v23 = vld [vmem:[#allocation158_spill] sm:$0xff]  ;;  %vm9286_vm10 = vmmov %vm9263_vm0 }
 0x3cc   : > { %v7232_v44 = vadd.f32 %v2750_v48, %v2661_v27  ;;  %2330 = vperm.xlu2 %4612, %v4772_v20   ;;  %v2082_v4 = vmul.f32 %v4780_v28, %v2050_v36  ;;  %v7255_v37 = vpop.f32.mrf.mxu2  ;;  %v7260_v3 = vpop.f32.mrf.mxu3  ;;  %v1601_v20 = vmul.f32 1.442695, %v1544_v54  ;;  %v1547_v18 = vsub.f32 %v9265_v19, %v9264_v23  ;;  %v2058_v54 = vld [vmem:[#allocation3 + $0xd8] sm:$0xff] }
 0x3cd   : > { %2239 = vst.msk [vmem:[#allocation3 + $0x78] sm:$0xff] %vm9245_vm14, %v2206_v57  ;;  %2355 = vperm.xlu1 %4611, %v4768_v22   ;;  %v2042_v22 = vld [vmem:[#allocation3 + $0x58] sm:$0xff]  ;;  %v4782_v27 = vpop.eup %4781  ;;  %4789 = vpow2.f32 %v1585_v33  ;;  %vm9290_vm14 = vmmov %vm9263_vm0 }
 0x3ce   : > { %v2074_v43 = vmul.f32 %v4778_v53, %v2042_v22  ;;  %v4784_v47 = vpop.eup %4783  ;;  %4791 = vpow2.f32 %v1601_v20 }
 0x3cf   : > { %v2121_v32 = vpop.xlane.xlu1 %2120  ;;  %v4786_v60 = vpop.eup %4785  ;;  %4793 = vpow2.f32 %v1591_v35  ;;  %v9282_v35 = vld [vmem:[#allocation29_spill] sm:$0xff] }
 0x3d0   : > { %v2199_v7 = vadd.f32 %v2121_v32, %v2071_v9  ;;  %v2145_v14 = vpop.xlane.xlu2 %2144  ;;  %v2077_v9 = vmul.f32 %v4784_v47, %v2045_v5 }
 0x3d1   : > { %v2207_v1 = vadd.f32 %v2145_v14, %v2079_v2  ;;  %v2085_v2 = vmul.f32 %v4786_v60, %v2053_v51 }
 0x3d2   : > { %2232 = vst.msk [vmem:[#allocation3 + $0x40] sm:$0xff] %vm9251_vm9, %v2199_v7  ;;  %v2151_v6 = vpop.xlane.xlu0 %2150  ;;  %v7244_v39 = vpop.f32.mrf.mxu0  ;;  %vm9291_vm9 = vmmov %vm9263_vm0 }
 0x3d3   : > { %2240 = vst.msk [vmem:[#allocation3 + $0x80] sm:$0xff] %vm9252_vm2, %v2207_v1  ;;  %v2209_v8 = vadd.f32 %v2151_v6, %v2081_v55  ;;  %2410 = vperm.xlu0 %4610, %v7241_v12   ;;  %v7248_v56 = vpop.f32.mrf.mxu1  ;;  %v4788_v6 = vpop.eup %4787  ;;  %vm9292_vm2 = vmmov %vm9263_vm0 }
 0x3d4   : > { %2345 = vperm.xlu2 %4612, %v4778_v53   ;;  %v1607_v53 = vmul.f32 1.442695, %v1547_v18 }
 0x3d5   : > { %2242 = vst.msk [vmem:[#allocation3 + $0x90] sm:$0xff] %vm9255_vm11, %v2209_v8  ;;  %2370 = vperm.xlu1 %4611, %v4774_v10   ;;  %vm9293_vm11 = vmmov %vm9263_vm0 }
 0x3d6   : > { %4795 = vpow2.f32 %v1607_v53 }
 0x3d7   : > { %v2130_v49 = vpop.xlane.xlu1 %2129 }
 0x3d8   : > { %v2202_v31 = vadd.f32 %v2130_v49, %v2074_v43  ;;  %v2154_v29 = vpop.xlane.xlu2 %2153 }
 0x3d9   : > { %v2210_v41 = vadd.f32 %v2154_v29, %v2082_v4  ;;  %v9273_v29 = vld [vmem:[#allocation131_spill] sm:$0xff] }
 0x3da   : > { %2235 = vst.msk [vmem:[#allocation3 + $0x58] sm:$0xff] %vm9261_vm4, %v2202_v31  ;;  %v2160_v57 = vpop.xlane.xlu0 %2159  ;;  %v2666_v48 = vpop.f32.mrf.mxu0  ;;  %v9272_v31 = vld [vmem:[#allocation129_spill] sm:$0xff] }
 0x3db   : > { %2243 = vst.msk [vmem:[#allocation3 + $0x98] sm:$0xff] %vm9262_vm8, %v2210_v41  ;;  %v2212_v10 = vadd.f32 %v2160_v57, %v2084_v25  ;;  %2425 = vperm.xlu0 %4610, %v4782_v27   ;;  %v2755_v16 = vpop.f32.mrf.mxu1  ;;  %v9274_v0 = vsub.f32 %v9272_v31, %v9273_v29  ;;  %v2090_v41 = vmul.f32 %v4782_v27, %v2058_v54  ;;  %v9287_v54 = vld [vmem:[#allocation137_spill] sm:$0xff]  ;;  %v2057_v29 = vld [vmem:[#allocation3 + $0xd0] sm:$0xff] }
 0x3dc   : > { %v7265_v15 = vadd.f32 %v2755_v16, %v2666_v48  ;;  %2360 = vperm.xlu2 %4612, %v4784_v47   ;;  %v2051_v47 = vld [vmem:[#allocation3 + $0xa0] sm:$0xff] }
 0x3dd   : > { %2245 = vst.msk [vmem:[#allocation3 + $0xa8] sm:$0xff] %vm9263_vm0, %v2212_v10  ;;  %2385 = vperm.xlu1 %4611, %v4780_v28   ;;  %v4790_v28 = vpop.eup %4789  ;;  %v1597_v11 = vmul.f32 1.442695, %v9274_v0  ;;  %v2059_v16 = vld [vmem:[#allocation3 + $0xe0] sm:$0xff] }
 0x3de   : > { %v4792_v36 = vpop.eup %4791  ;;  %v2080_v62 = vmul.f32 %v4790_v28, %v2048_v24 }
 0x3df   : > { %v2139_v32 = vpop.xlane.xlu1 %2138  ;;  %v2088_v13 = vmul.f32 %v4792_v36, %v2056_v26  ;;  %v4794_v57 = vpop.eup %4793  ;;  %4797 = vpow2.f32 %v1597_v11 }
 0x3e0   : > { %v2205_v46 = vadd.f32 %v2139_v32, %v2077_v9  ;;  %v2163_v7 = vpop.xlane.xlu2 %2162  ;;  %v2694_v14 = vpop.f32.mrf.mxu2  ;;  %v2083_v27 = vmul.f32 %v4794_v57, %v2051_v47  ;;  %v9278_v32 = vld [vmem:[#allocation133_spill] sm:$0xff] }
 0x3e1   : > { %v2213_v1 = vadd.f32 %v2163_v7, %v2085_v2  ;;  %v2783_v55 = vpop.f32.mrf.mxu3  ;;  %v4796_v10 = vpop.eup %4795  ;;  %v9279_v2 = vld [vmem:[#allocation135_spill] sm:$0xff] }
 0x3e2   : > { %2238 = vst.msk [vmem:[#allocation3 + $0x70] sm:$0xff] %vm9269_vm15, %v2205_v46  ;;  %v7275_v8 = vadd.f32 %v2783_v55, %v2694_v14  ;;  %v2169_v22 = vpop.xlane.xlu0 %2168  ;;  %v7278_v17 = vpop.f32.mrf.mxu0  ;;  %v2091_v19 = vmul.f32 %v4796_v10, %v2059_v16  ;;  %v9280_v46 = vsub.f32 %v9278_v32, %v9279_v2  ;;  %v2257_v16 = vld [vmem:[#allocation4] sm:$0xff] }
 0x3e3   : > { %2246 = vst.msk [vmem:[#allocation3 + $0xb0] sm:$0xff] %vm9270_vm3, %v2213_v1  ;;  %v2215_v40 = vadd.f32 %v2169_v22, %v2087_v45  ;;  %2440 = vperm.xlu0 %4610, %v4788_v6   ;;  %v7281_v12 = vpop.f32.mrf.mxu1  ;;  %v9283_v1 = vsub.f32 %v9281_v61, %v9282_v35 }
 0x3e4   : > { %2375 = vperm.xlu2 %4612, %v4790_v28   ;;  %v1603_v7 = vmul.f32 1.442695, %v9280_v46  ;;  %v2259_v46 = vld [vmem:[#allocation4 + $0x18] sm:$0xff] }
 0x3e5   : > { %2248 = vst.msk [vmem:[#allocation3 + $0xc0] sm:$0xff] %vm9271_vm13, %v2215_v40  ;;  %2400 = vperm.xlu1 %4611, %v4786_v60   ;;  %v2061_v60 = vld [vmem:[#allocation3 + $0xf0] sm:$0xff]  ;;  %v1613_v55 = vmul.f32 1.442695, %v9283_v1  ;;  %v4798_v22 = vpop.eup %4797  ;;  %v2054_v40 = vld [vmem:[#allocation3 + $0xb8] sm:$0xff] }
 0x3e6   : > { %v2093_v50 = vmul.f32 %v4788_v6, %v2061_v60  ;;  %4799 = vpow2.f32 %v1603_v7  ;;  %v2086_v6 = vmul.f32 %v4798_v22, %v2054_v40 }
 0x3e7   : > { %v2148_v43 = vpop.xlane.xlu1 %2147  ;;  %4801 = vpow2.f32 %v1613_v55 }
 0x3e8   : > { %v2208_v49 = vadd.f32 %v2148_v43, %v2080_v62  ;;  %v2172_v4 = vpop.xlane.xlu2 %2171  ;;  %v2696_v38 = vpop.f32.mrf.mxu2  ;;  %v9288_v43 = vld [vmem:[#allocation138_spill] sm:$0xff] }
 0x3e9   : > { %v2216_v58 = vadd.f32 %v2172_v4, %v2088_v13  ;;  %v2785_v33 = vpop.f32.mrf.mxu3  ;;  %v9289_v13 = vsub.f32 %v9287_v54, %v9288_v43  ;;  %v2265_v43 = vld [vmem:[#allocation4 + $0x88] sm:$0xff] }
 0x3ea   : > { %2241 = vst.msk [vmem:[#allocation3 + $0x88] sm:$0xff] %vm9275_vm1, %v2208_v49  ;;  %v7287_v25 = vadd.f32 %v2785_v33, %v2696_v38  ;;  %v2178_v20 = vpop.xlane.xlu0 %2177  ;;  %v7291_v5 = vpop.f32.mrf.mxu0 }
 0x3eb   : > { %2249 = vst.msk [vmem:[#allocation3 + $0xc8] sm:$0xff] %vm9276_vm7, %v2216_v58  ;;  %v2218_v48 = vadd.f32 %v2178_v20, %v2090_v41  ;;  %v7293_v51 = vpop.f32.mrf.mxu1  ;;  %v1609_v49 = vmul.f32 1.442695, %v9289_v13 }
 0x3ec   : > { %2390 = vperm.xlu2 %4612, %v4794_v57   ;;  %v4800_v31 = vpop.eup %4799 }
 0x3ed   : > { %2251 = vst.msk [vmem:[#allocation3 + $0xd8] sm:$0xff] %vm9277_vm12, %v2218_v48  ;;  %2415 = vperm.xlu1 %4611, %v4792_v36   ;;  %v4802_v0 = vpop.eup %4801  ;;  %4803 = vpow2.f32 %v1609_v49  ;;  %v2089_v11 = vmul.f32 %v4800_v31, %v2057_v29  ;;  %v2258_v49 = vld [vmem:[#allocation4 + $0xd8] sm:$0xff] }
 0x3ef   : > { %v2157_v23 = vpop.xlane.xlu1 %2156 }
 0x3f0   : > { %v2211_v18 = vadd.f32 %v2157_v23, %v2083_v27  ;;  %v2181_v9 = vpop.xlane.xlu2 %2180  ;;  %v2699_v42 = vpop.f32.mrf.mxu2  ;;  %v2060_v27 = vld [vmem:[#allocation3 + $0xe8] sm:$0xff]  ;;  %v2741_v23 = vadd.f32 %v7149_v52, %v7143_v34  ;;  %v2262_v34 = vld [vmem:[#allocation4 + $0x30] sm:$0xff]  ;;  %v2062_v52 = vld [vmem:[#allocation3 + $0xf8] sm:$0xff] }
 0x3f1   : > { %v2219_v14 = vadd.f32 %v2181_v9, %v2091_v19  ;;  %v2788_v63 = vpop.f32.mrf.mxu3 }
 0x3f2   : > { %2244 = vst.msk [vmem:[#allocation3 + $0xa0] sm:$0xff] %vm9284_vm6, %v2211_v18  ;;  %v7302_v45 = vadd.f32 %v2788_v63, %v2699_v42  ;;  %v2187_v53 = vpop.xlane.xlu0 %2186  ;;  %v7306_v24 = vpop.f32.mrf.mxu0 }
 0x3f3   : > { %2252 = vst.msk [vmem:[#allocation3 + $0xe0] sm:$0xff] %vm9285_vm5, %v2219_v14  ;;  %v2221_v28 = vadd.f32 %v2187_v53, %v2093_v50  ;;  %v7313_v4 = vpop.f32.mrf.mxu1  ;;  %v4804_v47 = vpop.eup %4803  ;;  %v2754_v53 = vadd.f32 %v7248_v56, %v7244_v39  ;;  %v2761_v39 = vadd.f32 %v7293_v51, %v7291_v5  ;;  %v2268_v5 = vld [vmem:[#allocation4 + $0x60] sm:$0xff] }
 0x3f4   : > { %2405 = vperm.xlu2 %4612, %v4798_v22   ;;  %v2092_v18 = vmul.f32 %v4804_v47, %v2060_v27 }
 0x3f5   : > { %2254 = vst.msk [vmem:[#allocation3 + $0xf0] sm:$0xff] %vm9286_vm10, %v2221_v28  ;;  %2430 = vperm.xlu1 %4611, %v4796_v10  }
 0x3f7   : > { %v2166_v36 = vpop.xlane.xlu1 %2165 }
 0x3f8   : > { %v2214_v26 = vadd.f32 %v2166_v36, %v2086_v6  ;;  %v7308_v62 = vpop.f32.mrf.mxu2  ;;  %v2094_v6 = vmul.f32 %v4802_v0, %v2062_v52 }
 0x3f9   : > { %v7315_v38 = vpop.f32.mrf.mxu3 }
 0x3fa   : > { %2247 = vst.msk [vmem:[#allocation3 + $0xb8] sm:$0xff] %vm9290_vm14, %v2214_v26  ;;  %v7318_v20 = vpop.f32.mrf.mxu0 }
 0x3fb   : > { %v7323_v10 = vpop.f32.mrf.mxu1 }
 0x3fc   : > { %2420 = vperm.xlu2 %4612, %v4800_v31   ;;  %v2256_v31 = vld [vmem:[#allocation4 + $0xb0] sm:$0xff] }
 0x3fd   : > { %2445 = vperm.xlu1 %4611, %v4802_v0  }
 0x3ff   : > { %v2175_v58 = vpop.xlane.xlu1 %2174 }
 0x400   : > { %v2217_v33 = vadd.f32 %v2175_v58, %v2089_v11  ;;  %v2704_v41 = vpop.f32.mrf.mxu2 }
 0x401   : > { %v2793_v57 = vpop.f32.mrf.mxu3 }
 0x402   : > { %2250 = vst.msk [vmem:[#allocation3 + $0xd0] sm:$0xff] %vm9291_vm9, %v2217_v33  ;;  %v7321_v48 = vadd.f32 %v2793_v57, %v2704_v41  ;;  %v2679_v2 = vpop.f32.mrf.mxu0 }
 0x403   : > { %v2768_v63 = vpop.f32.mrf.mxu1 }
 0x404   : > { %2435 = vperm.xlu2 %4612, %v4804_v47  }
 0x405   : > { %v2296_v60 = vpop.permute.xlu0 %2295 }
 0x406   : > { %v2449_v19 = vmul.f32 %v2296_v60, %v2257_v16  ;;  %v9294_v60 = vld [vmem:[#allocation44_spill] sm:$0xff] }
 0x407   : > { %v2184_v9 = vpop.xlane.xlu1 %2183 }
 0x408   : > { %v2819_v42 = vadd.f32 %v2741_v23, %v2449_v19  ;;  %v2220_v32 = vadd.f32 %v2184_v9, %v2092_v18  ;;  %v7328_v7 = vpop.f32.mrf.mxu2  ;;  %v2261_v19 = vld [vmem:[#allocation4 + $0x68] sm:$0xff]  ;;  %v2260_v18 = vld [vmem:[#allocation4 + $0x50] sm:$0xff]  ;;  %v2769_v9 = vadd.f32 %v2768_v63, %v2679_v2  ;;  %v2264_v63 = vld [vmem:[#allocation4 + $0x80] sm:$0xff] }
 0x409   : > { %v7330_v14 = vpop.f32.mrf.mxu3 }
 0x40a   : > { %2851 = vst [vmem:[#allocation4] sm:$0xff] %v2819_v42  ;;  %v7333_v1 = vpop.f32.mrf.mxu0 }
 0x40b   : > { %2253 = vst.msk [vmem:[#allocation3 + $0xe8] sm:$0xff] %vm9292_vm2, %v2220_v32  ;;  %v7341_v36 = vpop.f32.mrf.mxu1 }
 0x40d   : > { %v2306_v50 = vpop.permute.xlu0 %2305 }
 0x40e   : > { %v2451_v61 = vmul.f32 %v2306_v50, %v2259_v46 }
 0x410   : > { %v2821_v35 = vadd.f32 %v7194_v30, %v2451_v61  ;;  %v7337_v22 = vpop.f32.mrf.mxu2 }
 0x411   : > { %v7339_v28 = vpop.f32.mrf.mxu3 }
 0x412   : > { %2853 = vst [vmem:[#allocation4 + $0x18] sm:$0xff] %v2821_v35  ;;  %v7350_v47 = vpop.f32.mrf.mxu0 }
 0x413   : > { %v7352_v16 = vpop.f32.mrf.mxu1 }
 0x415   : > { %v2321_v55 = vpop.permute.xlu0 %2320 }
 0x416   : > { %v2454_v40 = vmul.f32 %v2321_v55, %v2262_v34 }
 0x417   : > { %v2190_v26 = vpop.xlane.xlu2 %2189 }
 0x418   : > { %v2824_v54 = vadd.f32 %v2754_v53, %v2454_v40  ;;  %v2222_v30 = vadd.f32 %v2190_v26, %v2094_v6  ;;  %v7346_v58 = vpop.f32.mrf.mxu2  ;;  %v2271_v6 = vld [vmem:[#allocation4 + $0x78] sm:$0xff]  ;;  %v2263_v26 = vld [vmem:[#allocation4 + $0x48] sm:$0xff] }
 0x419   : > { %v7348_v0 = vpop.f32.mrf.mxu3 }
 0x41a   : > { %2856 = vst [vmem:[#allocation4 + $0x30] sm:$0xff] %v2824_v54  ;;  %v2686_v53 = vpop.f32.mrf.mxu0 }
 0x41b   : > { %2255 = vst.msk [vmem:[#allocation3 + $0xf8] sm:$0xff] %vm9293_vm11, %v2222_v30  ;;  %v2775_v40 = vpop.f32.mrf.mxu1 }
 0x41c   : > { %v2776_v54 = vadd.f32 %v2775_v40, %v2686_v53 }
 0x41d   : > { %v2336_v13 = vpop.permute.xlu0 %2335 }
 0x41e   : > { %v2457_v56 = vmul.f32 %v2336_v13, %v2265_v43 }
 0x41f   : > { %v2301_v29 = vpop.permute.xlu2 %2300  ;;  %v2291_v11 = vpop.permute.xlu1 %2290 }
 0x420   : > { %v2827_v33 = vadd.f32 %v2761_v39, %v2457_v56  ;;  %v2450_v41 = vmul.f32 %v2301_v29, %v2258_v49  ;;  %v2448_v57 = vmul.f32 %v2291_v11, %v2256_v31  ;;  %v7356_v34 = vpop.f32.mrf.mxu2  ;;  %v2759_v49 = vadd.f32 %v7281_v12, %v7278_v17  ;;  %v2274_v29 = vld [vmem:[#allocation4 + $0x40] sm:$0xff] }
 0x421   : > { %v7358_v52 = vpop.f32.mrf.mxu3  ;;  %v2764_v17 = vadd.f32 %v7313_v4, %v7306_v24  ;;  %v2791_v24 = vadd.f32 %v7315_v38, %v7308_v62  ;;  %v2280_v62 = vld [vmem:[#allocation4 + $0xa8] sm:$0xff] }
 0x422   : > { %2859 = vst [vmem:[#allocation4 + $0x88] sm:$0xff] %v2827_v33  ;;  %v2820_v27 = vadd.f32 %v7170_v59, %v2450_v41  ;;  %v2818_v23 = vadd.f32 %v9294_v60, %v2448_v57  ;;  %v2267_v57 = vld [vmem:[#allocation4 + $0xb8] sm:$0xff] }
 0x424   : > { %2852 = vst [vmem:[#allocation4 + $0xd8] sm:$0xff] %v2820_v27  ;;  %v2266_v27 = vld [vmem:[#allocation4 + $0xe8] sm:$0xff] }
 0x425   : > { %2850 = vst [vmem:[#allocation4 + $0xb0] sm:$0xff] %v2818_v23  ;;  %v2351_v51 = vpop.permute.xlu0 %2350 }
 0x426   : > { %v2460_v42 = vmul.f32 %v2351_v51, %v2268_v5  ;;  %v2766_v5 = vadd.f32 %v7323_v10, %v7318_v20 }
 0x427   : > { %v2316_v32 = vpop.permute.xlu2 %2315  ;;  %v2311_v46 = vpop.permute.xlu1 %2310 }
 0x428   : > { %v2830_v50 = vadd.f32 %v2769_v9, %v2460_v42  ;;  %v2453_v61 = vmul.f32 %v2316_v32, %v2261_v19  ;;  %v2452_v35 = vmul.f32 %v2311_v46, %v2260_v18  ;;  %v7365_v11 = vpop.f32.mrf.mxu2  ;;  %v2277_v42 = vld [vmem:[#allocation4 + $0x90] sm:$0xff]  ;;  %v2270_v46 = vld [vmem:[#allocation4 + $0x8] sm:$0xff] }
 0x429   : > { %v2805_v33 = vpop.f32.mrf.mxu3 }
 0x42a   : > { %2862 = vst [vmem:[#allocation4 + $0x60] sm:$0xff] %v2830_v50  ;;  %v2823_v59 = vadd.f32 %v7232_v44, %v2453_v61  ;;  %v2822_v55 = vadd.f32 %v7216_v21, %v2452_v35  ;;  %v2269_v50 = vld [vmem:[#allocation4 + $0xf0] sm:$0xff] }
 0x42c   : > { %2855 = vst [vmem:[#allocation4 + $0x68] sm:$0xff] %v2823_v59  ;;  %v2774_v59 = vadd.f32 %v7352_v16, %v7350_v47  ;;  %v2781_v47 = vadd.f32 %v7260_v3, %v7255_v37 }
 0x42d   : > { %2854 = vst [vmem:[#allocation4 + $0x50] sm:$0xff] %v2822_v55  ;;  %v2366_v2 = vpop.permute.xlu0 %2365 }
 0x42e   : > { %v2463_v30 = vmul.f32 %v2366_v2, %v2271_v6 }
 0x42f   : > { %v2331_v43 = vpop.permute.xlu2 %2330  ;;  %v2326_v13 = vpop.permute.xlu1 %2325 }
 0x430   : > { %v2833_v31 = vadd.f32 %v2776_v54, %v2463_v30  ;;  %v2456_v39 = vmul.f32 %v2331_v43, %v2264_v63  ;;  %v2455_v44 = vmul.f32 %v2326_v13, %v2263_v26  ;;  %v7374_v4 = vpop.f32.mrf.mxu2  ;;  %v2273_v63 = vld [vmem:[#allocation4 + $0x58] sm:$0xff] }
 0x431   : > { %v7376_v61 = vpop.f32.mrf.mxu3  ;;  %v2272_v26 = vld [vmem:[#allocation4 + $0x38] sm:$0xff] }
 0x432   : > { %2865 = vst [vmem:[#allocation4 + $0x78] sm:$0xff] %v2833_v31  ;;  %v2826_v21 = vadd.f32 %v2759_v49, %v2456_v39  ;;  %v2825_v56 = vadd.f32 %v7265_v15, %v2455_v44  ;;  %v9295_v44 = vld [vmem:[#allocation16_spill] sm:$0xff] }
 0x434   : > { %2858 = vst [vmem:[#allocation4 + $0x80] sm:$0xff] %v2826_v21 }
 0x435   : > { %2857 = vst [vmem:[#allocation4 + $0x48] sm:$0xff] %v2825_v56  ;;  %v2381_v41 = vpop.permute.xlu0 %2380  ;;  %v2283_v56 = vld [vmem:[#allocation4 + $0x28] sm:$0xff] }
 0x436   : > { %v2466_v60 = vmul.f32 %v2381_v41, %v2274_v29  ;;  %v2806_v41 = vadd.f32 %v2805_v33, %v7365_v11 }
 0x437   : > { %v2346_v12 = vpop.permute.xlu2 %2345  ;;  %v2341_v23 = vpop.permute.xlu1 %2340 }
 0x438   : > { %v2836_v15 = vadd.f32 %v7275_v8, %v2466_v60  ;;  %v2459_v51 = vmul.f32 %v2346_v12, %v2267_v57  ;;  %v2458_v19 = vmul.f32 %v2341_v23, %v2266_v27  ;;  %v2771_v8 = vadd.f32 %v7341_v36, %v7333_v1  ;;  %v2721_v49 = vpop.f32.mrf.mxu2 }
 0x439   : > { %v2799_v1 = vadd.f32 %v7339_v28, %v7337_v22  ;;  %v2810_v31 = vpop.f32.mrf.mxu3  ;;  %v2276_v22 = vld [vmem:[#allocation4 + $0xe0] sm:$0xff]  ;;  %v2275_v28 = vld [vmem:[#allocation4 + $0xc8] sm:$0xff] }
 0x43a   : > { %2868 = vst [vmem:[#allocation4 + $0x40] sm:$0xff] %v2836_v15  ;;  %v2829_v18 = vadd.f32 %v2766_v5, %v2459_v51  ;;  %v2828_v9 = vadd.f32 %v2764_v17, %v2458_v19  ;;  %v2286_v51 = vld [vmem:[#allocation4 + $0x20] sm:$0xff] }
 0x43c   : > { %2861 = vst [vmem:[#allocation4 + $0xb8] sm:$0xff] %v2829_v18  ;;  %v2279_v18 = vld [vmem:[#allocation4 + $0xc0] sm:$0xff] }
 0x43d   : > { %2860 = vst [vmem:[#allocation4 + $0xe8] sm:$0xff] %v2828_v9  ;;  %v2396_v32 = vpop.permute.xlu0 %2395  ;;  %v2278_v9 = vld [vmem:[#allocation4 + $0x70] sm:$0xff] }
 0x43e   : > { %v2469_v20 = vmul.f32 %v2396_v32, %v2277_v42 }
 0x43f   : > { %v2361_v10 = vpop.permute.xlu2 %2360  ;;  %v2356_v35 = vpop.permute.xlu1 %2355 }
 0x440   : > { %v2839_v55 = vadd.f32 %v2791_v24, %v2469_v20  ;;  %v2462_v53 = vmul.f32 %v2361_v10, %v2270_v46  ;;  %v2461_v40 = vmul.f32 %v2356_v35, %v2269_v50  ;;  %v2724_v5 = vpop.f32.mrf.mxu2  ;;  %v2796_v46 = vadd.f32 %v7330_v14, %v7328_v7  ;;  %v2281_v10 = vld [vmem:[#allocation4 + $0xd0] sm:$0xff] }
 0x441   : > { %v2813_v15 = vpop.f32.mrf.mxu3 }
 0x442   : > { %2871 = vst [vmem:[#allocation4 + $0x90] sm:$0xff] %v2839_v55  ;;  %v2832_v6 = vadd.f32 %v2774_v59, %v2462_v53  ;;  %v2831_v2 = vadd.f32 %v2771_v8, %v2461_v40  ;;  %v2814_v11 = vadd.f32 %v2813_v15, %v2724_v5  ;;  %v2282_v8 = vld [vmem:[#allocation4 + $0x10] sm:$0xff]  ;;  %v2801_v55 = vadd.f32 %v7348_v0, %v7346_v58 }
 0x443   : > { %v2804_v53 = vadd.f32 %v7358_v52, %v7356_v34 }
 0x444   : > { %2864 = vst [vmem:[#allocation4 + $0x8] sm:$0xff] %v2832_v6 }
 0x445   : > { %2863 = vst [vmem:[#allocation4 + $0xf0] sm:$0xff] %v2831_v2  ;;  %v2411_v38 = vpop.permute.xlu0 %2410  ;;  %v2285_v2 = vld [vmem:[#allocation4 + $0xf8] sm:$0xff] }
 0x446   : > { %v2472_v36 = vmul.f32 %v2411_v38, %v2280_v62 }
 0x447   : > { %v2376_v54 = vpop.permute.xlu2 %2375  ;;  %v2371_v30 = vpop.permute.xlu1 %2370 }
 0x448   : > { %v2842_v16 = vadd.f32 %v2799_v1, %v2472_v36  ;;  %v2465_v43 = vmul.f32 %v2376_v54, %v2273_v63  ;;  %v2464_v13 = vmul.f32 %v2371_v30, %v2272_v26  ;;  %v2809_v63 = vadd.f32 %v7376_v61, %v7374_v4  ;;  %v2726_v34 = vpop.f32.mrf.mxu2  ;;  %v2287_v54 = vld [vmem:[#allocation4 + $0x98] sm:$0xff] }
 0x449   : > { %v2811_v26 = vadd.f32 %v2810_v31, %v2721_v49  ;;  %v2815_v52 = vpop.f32.mrf.mxu3 }
 0x44a   : > { %2874 = vst [vmem:[#allocation4 + $0xa8] sm:$0xff] %v2842_v16  ;;  %v2835_v39 = vadd.f32 %v2781_v47, %v2465_v43  ;;  %v2834_v21 = vadd.f32 %v9295_v44, %v2464_v13  ;;  %v2816_v47 = vadd.f32 %v2815_v52, %v2726_v34 }
 0x44c   : > { %2867 = vst [vmem:[#allocation4 + $0x58] sm:$0xff] %v2835_v39 }
 0x44d   : > { %2866 = vst [vmem:[#allocation4 + $0x38] sm:$0xff] %v2834_v21  ;;  %v2426_v29 = vpop.permute.xlu0 %2425 }
 0x44e   : > { %v2475_v57 = vmul.f32 %v2426_v29, %v2283_v56 }
 0x44f   : > { %v2391_v27 = vpop.permute.xlu2 %2390  ;;  %v2386_v37 = vpop.permute.xlu1 %2385 }
 0x450   : > { %v2845_v3 = vadd.f32 %v2806_v41, %v2475_v57  ;;  %v2468_v60 = vmul.f32 %v2391_v27, %v2276_v22  ;;  %v2467_v17 = vmul.f32 %v2386_v37, %v2275_v28 }
 0x452   : > { %2877 = vst [vmem:[#allocation4 + $0x28] sm:$0xff] %v2845_v3  ;;  %v2838_v12 = vadd.f32 %v7302_v45, %v2468_v60  ;;  %v2837_v23 = vadd.f32 %v7287_v25, %v2467_v17 }
 0x454   : > { %2870 = vst [vmem:[#allocation4 + $0xe0] sm:$0xff] %v2838_v12 }
 0x455   : > { %2869 = vst [vmem:[#allocation4 + $0xc8] sm:$0xff] %v2837_v23  ;;  %v2441_v19 = vpop.permute.xlu0 %2440 }
 0x456   : > { %v2478_v33 = vmul.f32 %v2441_v19, %v2286_v51 }
 0x457   : > { %v2406_v42 = vpop.permute.xlu2 %2405  ;;  %v2401_v32 = vpop.permute.xlu1 %2400 }
 0x458   : > { %v2848_v50 = vadd.f32 %v2814_v11, %v2478_v33  ;;  %v2471_v24 = vmul.f32 %v2406_v42, %v2279_v18  ;;  %v2470_v45 = vmul.f32 %v2401_v32, %v2278_v9 }
 0x45a   : > { %2880 = vst [vmem:[#allocation4 + $0x20] sm:$0xff] %v2848_v50  ;;  %v2841_v25 = vadd.f32 %v2796_v46, %v2471_v24  ;;  %v2840_v20 = vadd.f32 %v7321_v48, %v2470_v45  ;;  %v2284_v48 = vld [vmem:[#allocation4 + $0xa0] sm:$0xff] }
 0x45c   : > { %2873 = vst [vmem:[#allocation4 + $0xc0] sm:$0xff] %v2841_v25 }
 0x45d   : > { %2872 = vst [vmem:[#allocation4 + $0x70] sm:$0xff] %v2840_v20 }
 0x45f   : > { %v2421_v35 = vpop.permute.xlu2 %2420  ;;  %v2416_v59 = vpop.permute.xlu1 %2415 }
 0x460   : > { %v2474_v7 = vmul.f32 %v2421_v35, %v2282_v8  ;;  %v2473_v14 = vmul.f32 %v2416_v59, %v2281_v10 }
 0x462   : > { %v2844_v40 = vadd.f32 %v2804_v53, %v2474_v7  ;;  %v2843_v6 = vadd.f32 %v2801_v55, %v2473_v14 }
 0x464   : > { %2876 = vst [vmem:[#allocation4 + $0x10] sm:$0xff] %v2844_v40 }
 0x465   : > { %2875 = vst [vmem:[#allocation4 + $0xd0] sm:$0xff] %v2843_v6 }
 0x467   : > { %v2436_v62 = vpop.permute.xlu2 %2435  ;;  %v2431_v38 = vpop.permute.xlu1 %2430 }
 0x468   : > { %v2477_v1 = vmul.f32 %v2436_v62, %v2285_v2  ;;  %v2476_v36 = vmul.f32 %v2431_v38, %v2284_v48 }
 0x46a   : > { %v2847_v58 = vadd.f32 %v2811_v26, %v2477_v1  ;;  %v2846_v0 = vadd.f32 %v2809_v63, %v2476_v36 }
 0x46c   : > { %2879 = vst [vmem:[#allocation4 + $0xf8] sm:$0xff] %v2847_v58 }
 0x46d   : > { %2878 = vst [vmem:[#allocation4 + $0xa0] sm:$0xff] %v2846_v0 }
 0x46f   : > { %v2446_v30 = vpop.permute.xlu1 %2445 }
 0x470   : > { %v2479_v16 = vmul.f32 %v2446_v30, %v2287_v54  ;;  %2917 = sbr.rel (%p4370_p0) target bundleno = 1390 (0x56e), region = 79 }
 0x472   : > { %v2849_v43 = vadd.f32 %v2816_v47, %v2479_v16 }
 0x474   : > { %2881 = vst [vmem:[#allocation4 + $0x98] sm:$0xff] %v2849_v43 }
 0x475   : > { %v4509_v4 = vld [vmem:[%s8376_s5 + $0x38] sm:$0xff]  ;;  %v4932_v61 = vmov 0   ;;  %v7405_v49 = vld [vmem:[#allocation3 + $0x10] sm:$0xff]  ;;  %v4508_v31 = vld [vmem:[%s8376_s5 + $0x30] sm:$0xff] }
 0x476   : > { %4807 = vset.pattern.permute.xlu2 %v4932_v61  ;;  %4806 = vset.pattern.permute.xlu1 %v4932_v61  ;;  %v7403_v13 = vld [vmem:[#allocation3 + $0x20] sm:$0xff]  ;;  %v7416_v56 = vld [vmem:[#allocation3 + $0x28] sm:$0xff]  ;;  %v3306_v29 = vand.u32 2147483647, %v7405_v49  ;;  %v7420_v22 = vld [vmem:[#allocation3 + $0x18] sm:$0xff]  ;;  %v3308_v41 = vand.u32 2147483648, %v7405_v49  ;;  %vm3302_vm0 = vweird.f32 %v7405_v49 }
 0x477   : > { %3114 = vmatpush.bf16.msra.mxu0 %v4509_v4  ;;  %4526 = vmatpush.bf16.msra.mxu1 %v4509_v4  ;;  %4809 = vrcp.f32 %v7403_v13  ;;  %v7411_v39 = vld [vmem:[#allocation3] sm:$0xff]  ;;  %v3336_v44 = vand.u32 2147483647, %v7403_v13  ;;  %v3338_v21 = vand.u32 2147483648, %v7403_v13  ;;  %v4507_v28 = vld [vmem:[%s8376_s5 + $0x28] sm:$0xff]  ;;  %vm3332_vm4 = vweird.f32 %v7403_v13  ;;  %v7442_v17 = vld [vmem:[#allocation3 + $0x8] sm:$0xff] }
 0x478   : > { %4527 = vmatpush.bf16.msra.mxu2 %v4509_v4  ;;  %4528 = vmatpush.bf16.msra.mxu3 %v4509_v4  ;;  %4811 = vrcp.f32 %v7405_v49  ;;  %v3276_v57 = vand.u32 2147483647, %v7411_v39  ;;  %vm3239_vm15 = vcmp.gt.f32.partialorder %v7403_v13, 0.0  ;;  %vm3272_vm3 = vweird.f32 %v7411_v39  ;;  %v4506_v19 = vld [vmem:[%s8376_s5 + $0x20] sm:$0xff]  ;;  %v4505_v7 = vld [vmem:[%s8376_s5 + $0x18] sm:$0xff]  ;;  %v4504_v47 = vld [vmem:[%s8376_s5 + $0x10] sm:$0xff] }
 0x479   : > { %4805 = vset.pattern.permute.xlu0 %v4932_v61  ;;  %4813 = vrcp.f32 %v7411_v39  ;;  %vm7428_vm8 = vcmp.eq.f32.partialorder %v3336_v44, 8.507059e+37  ;;  %v7437_v3 = vor.u32 1.1754944e-38, %v3338_v21  ;;  %v3278_v60 = vand.u32 2147483648, %v7411_v39  ;;  %v7503_v40 = vld [vmem:[#allocation3 + $0x40] sm:$0xff]  ;;  %v4486_v59 = vld [vmem:[%s5076_s17] sm:$0xff] }
 0x47a   : > { %4815 = vrcp.f32 %v7416_v56  ;;  %vm3237_vm13 = vcmp.gt.f32.partialorder %v7405_v49, 0.0  ;;  %vm7449_vm1 = vcmp.eq.f32.partialorder %v3306_v29, 8.507059e+37  ;;  %v3351_v15 = vand.u32 2147483647, %v7416_v56  ;;  %v4494_v2 = vld [vmem:[%s5076_s17 + $0x40] sm:$0xff] }
 0x47b   : > { %3115 = vmatpush.bf16.msra.mxu0 %v4508_v31  ;;  %4529 = vmatpush.bf16.msra.mxu1 %v4508_v31  ;;  %4817 = vrcp.f32 %v7420_v22  ;;  %v3353_v51 = vand.u32 2147483648, %v7416_v56  ;;  %v3309_v9 = vor.u32 1.1754944e-38, %v3308_v41  ;;  %vm7460_vm7 = vcmp.eq.f32.partialorder %v3276_v57, 8.507059e+37  ;;  %v7580_v57 = vld [vmem:[#allocation3 + $0x38] sm:$0xff] }
 0x47c   : > { %4530 = vmatpush.bf16.msra.mxu2 %v4508_v31  ;;  %4531 = vmatpush.bf16.msra.mxu3 %v4508_v31  ;;  %vm3347_vm12 = vweird.f32 %v7416_v56  ;;  %v3321_v32 = vand.u32 2147483647, %v7420_v22  ;;  %4819 = vrcp.f32 %v7442_v17  ;;  %v3279_v24 = vor.u32 1.1754944e-38, %v3278_v60 }
 0x47d   : > { %v7434_v37 = vpop.eup %4809  ;;  %vm7477_vm14 = vcmp.eq.f32.partialorder %v3351_v15, 8.507059e+37  ;;  %v7481_v8 = vor.u32 1.1754944e-38, %v3353_v51  ;;  %vm3317_vm9 = vweird.f32 %v7420_v22  ;;  %v3323_v10 = vand.u32 2147483648, %v7420_v22 }
 0x47e   : > { %v7444_v12 = vpop.eup %4811  ;;  %v3328_v23 = vmul.f32 %v7434_v37, %v7403_v13  ;;  %vm3333_vm6 = vweird.f32 %v7434_v37  ;;  %vm7517_vm5 = vcmp.eq.f32.partialorder %v3321_v32, 8.507059e+37  ;;  %v3291_v38 = vand.u32 2147483647, %v7442_v17 }
 0x47f   : > { %3116 = vmatpush.bf16.msra.mxu0 %v4507_v28  ;;  %4532 = vmatpush.bf16.msra.mxu1 %v4507_v28  ;;  %v3298_v18 = vmul.f32 %v7444_v12, %v7405_v49  ;;  %v7465_v33 = vpop.eup %4813  ;;  %vm3303_vm10 = vweird.f32 %v7444_v12  ;;  %vm7491_vm2 = vmor %vm3332_vm4, %vm3333_vm6  ;;  %4821 = vrcp.f32 %v7503_v40  ;;  %v3293_v16 = vand.u32 2147483648, %v7442_v17 }
 0x480   : > { %4533 = vmatpush.bf16.msra.mxu2 %v4507_v28  ;;  %4534 = vmatpush.bf16.msra.mxu3 %v4507_v28  ;;  %v3329_v42 = vsub.f32 1.0, %v3328_v23  ;;  %v3268_v50 = vmul.f32 %v7465_v33, %v7411_v39  ;;  %v7474_v45 = vpop.eup %4815  ;;  %vm3273_vm11 = vweird.f32 %v7465_v33  ;;  %vm7510_vm4 = vmor %vm3302_vm0, %vm3303_vm10  ;;  %v3324_v28 = vor.u32 1.1754944e-38, %v3323_v10  ;;  %v4503_v23 = vld [vmem:[%s8376_s5 + $0x8] sm:$0xff] }
 0x481   : > { %v3299_v46 = vsub.f32 1.0, %v3298_v18  ;;  %v7485_v35 = vpop.eup %4817  ;;  %v3343_v14 = vmul.f32 %v7474_v45, %v7416_v56  ;;  %vm3348_vm0 = vweird.f32 %v7474_v45  ;;  %vm7534_vm10 = vmor %vm3272_vm3, %vm3273_vm11  ;;  %vm3287_vm3 = vweird.f32 %v7442_v17 }
 0x482   : > { %v3330_v25 = vmul.f32 %v7434_v37, %v3329_v42  ;;  %v3269_v53 = vsub.f32 1.0, %v3268_v50  ;;  %v3313_v48 = vmul.f32 %v7485_v35, %v7420_v22  ;;  %v7525_v36 = vpop.eup %4819  ;;  %vm3318_vm6 = vweird.f32 %v7485_v35 }
 0x483   : > { %3117 = vmatpush.bf16.msra.mxu0 %v4506_v19  ;;  %4535 = vmatpush.bf16.msra.mxu1 %v4506_v19  ;;  %v3300_v55 = vmul.f32 %v7444_v12, %v3299_v46  ;;  %v3344_v1 = vsub.f32 1.0, %v3343_v14  ;;  %v3283_v41 = vmul.f32 %v7525_v36, %v7442_v17  ;;  %v3294_v51 = vor.u32 1.1754944e-38, %v3293_v16  ;;  %v7691_v16 = vld [vmem:[#allocation3 + $0x48] sm:$0xff] }
 0x484   : > { %4536 = vmatpush.bf16.msra.mxu2 %v4506_v19  ;;  %4537 = vmatpush.bf16.msra.mxu3 %v4506_v19  ;;  %v3331_v6 = vadd.f32 %v7434_v37, %v3330_v25  ;;  %v3270_v26 = vmul.f32 %v7465_v33, %v3269_v53  ;;  %v3314_v34 = vsub.f32 1.0, %v3313_v48  ;;  %4823 = vrcp.f32 %v7580_v57 }
 0x485   : > { %v3301_v63 = vadd.f32 %v7444_v12, %v3300_v55  ;;  %v3345_v61 = vmul.f32 %v7474_v45, %v3344_v1  ;;  %v3284_v60 = vsub.f32 1.0, %v3283_v41  ;;  %v7597_v5 = vpop.eup %4821  ;;  %v3396_v46 = vand.u32 2147483647, %v7503_v40  ;;  %v4490_v55 = vld [vmem:[%s5076_s17 + $0x20] sm:$0xff] }
 0x486   : > { %v3335_v58 = vsel %vm7491_vm2, %v7434_v37, %v3331_v6  ;;  %v3271_v30 = vadd.f32 %v7465_v33, %v3270_v26  ;;  %v3315_v44 = vmul.f32 %v7485_v35, %v3314_v34  ;;  %v3388_v11 = vmul.f32 %v7597_v5, %v7503_v40 }
 0x487   : > { %v3340_v52 = vsel %vm7428_vm8, %v7437_v3, %v3335_v58  ;;  %v3305_v54 = vsel %vm7510_vm4, %v7444_v12, %v3301_v63  ;;  %3118 = vmatpush.bf16.msra.mxu0 %v4505_v7  ;;  %4538 = vmatpush.bf16.msra.mxu1 %v4505_v7  ;;  %vm7560_vm8 = vmor %vm3347_vm12, %vm3348_vm0  ;;  %v3346_v27 = vadd.f32 %v7474_v45, %v3345_v61  ;;  %vm7590_vm12 = vcmp.eq.f32.partialorder %v3291_v38, 8.507059e+37  ;;  %v7670_v38 = vld [vmem:[#allocation3 + $0x50] sm:$0xff]  ;;  %v4498_v63 = vld [vmem:[%s5076_s17 + $0x60] sm:$0xff] }
 0x488   : > { %v3751_v43 = vsel %vm3239_vm15, %v3340_v52, 0.0  ;;  %v3310_v4 = vsel %vm7449_vm1, %v3309_v9, %v3305_v54  ;;  %4539 = vmatpush.bf16.msra.mxu2 %v4505_v7  ;;  %4540 = vmatpush.bf16.msra.mxu3 %v4505_v7  ;;  %v3275_v21 = vsel %vm7534_vm10, %v7465_v33, %v3271_v30  ;;  %vm7574_vm15 = vmor %vm3317_vm9, %vm3318_vm6  ;;  %v3316_v37 = vadd.f32 %v7485_v35, %v3315_v44  ;;  %v7614_v33 = vld [vmem:[#allocation3 + $0x30] sm:$0xff] }
 0x489   : > { %3833 = vperm.xlu2 %4807, %v3751_v43   ;;  %v3749_v13 = vsel %vm3237_vm13, %v3310_v4, 0.0  ;;  %v3280_v49 = vsel %vm7460_vm7, %v3279_v24, %v3275_v21  ;;  %vm9316_vm13 = vcmp.gt.f32.partialorder %v7411_v39, 0.0  ;;  %vm3288_vm1 = vweird.f32 %v7525_v36 }
 0x48a   : > { %3823 = vperm.xlu1 %4806, %v3749_v13   ;;  %v3747_v3 = vsel %vm9316_vm13, %v3280_v49, 0.0  ;;  %v3350_v39 = vsel %vm7560_vm8, %v7474_v45, %v3346_v27  ;;  %v3320_v15 = vsel %vm7574_vm15, %v7485_v35, %v3316_v37  ;;  %v3285_v9 = vmul.f32 %v7525_v36, %v3284_v60  ;;  %vm7622_vm9 = vmor %vm3287_vm3, %vm3288_vm1  ;;  %v4502_v45 = vld [vmem:[%s8376_s5] sm:$0xff]  ;;  %v7644_v10 = vpop.eup %4823  ;;  %v7720_v37 = vld [vmem:[#allocation3 + $0x70] sm:$0xff] }
 0x48b   : > { %3119 = vmatpush.bf16.msra.mxu0 %v4504_v47  ;;  %4541 = vmatpush.bf16.msra.mxu1 %v4504_v47  ;;  %v3355_v19 = vsel %vm7477_vm14, %v7481_v8, %v3350_v39  ;;  %v3325_v18 = vsel %vm7517_vm5, %v3324_v28, %v3320_v15  ;;  %vm9319_vm7 = vcmp.gt.f32.partialorder %v7416_v56, 0.0  ;;  %vm3392_vm5 = vweird.f32 %v7503_v40  ;;  %v7642_v8 = vld [vmem:[#allocation3 + $0x58] sm:$0xff] }
 0x48c   : > { %3813 = vperm.xlu0 %4805, %v3747_v3   ;;  %4542 = vmatpush.bf16.msra.mxu2 %v4504_v47  ;;  %v3752_v42 = vsel %vm9319_vm7, %v3355_v19, 0.0  ;;  %v3398_v50 = vand.u32 2147483648, %v7503_v40  ;;  %vm9322_vm14 = vcmp.gt.f32.partialorder %v7420_v22, 0.0  ;;  %v3286_v56 = vadd.f32 %v7525_v36, %v3285_v9 }
 0x48d   : > { %4543 = vmatpush.bf16.msra.mxu3 %v4504_v47  ;;  %v3750_v24 = vsel %vm9322_vm14, %v3325_v18, 0.0  ;;  %v3389_v25 = vsub.f32 1.0, %v3388_v11  ;;  %vm3393_vm2 = vweird.f32 %v7597_v5  ;;  %vm3236_vm11 = vcmp.gt.f32.partialorder %v7442_v17, 0.0 }
 0x48e   : > { %4825 = vrcp.f32 %v7614_v33  ;;  %v3290_v22 = vsel %vm7622_vm9, %v7525_v36, %v3286_v56  ;;  %vm3243_vm4 = vcmp.gt.f32.partialorder %v7503_v40, 0.0  ;;  %vm7655_vm6 = vmor %vm3392_vm5, %vm3393_vm2  ;;  %vm7659_vm0 = vcmp.eq.f32.partialorder %v3396_v46, 8.507059e+37 }
 0x48f   : > { %3120 = vmatpush.bf16.msra.mxu0 %v4503_v23  ;;  %4544 = vmatpush.bf16.msra.mxu1 %v4503_v23  ;;  %v3390_v20 = vmul.f32 %v7597_v5, %v3389_v25  ;;  %v3295_v35 = vsel %vm7590_vm12, %v3294_v51, %v3290_v22  ;;  %v3399_v14 = vor.u32 1.1754944e-38, %v3398_v50  ;;  %v3373_v62 = vmul.f32 %v7644_v10, %v7580_v57 }
 0x490   : > { %4545 = vmatpush.bf16.msra.mxu2 %v4503_v23  ;;  %v3748_v6 = vsel %vm3236_vm11, %v3295_v35, 0.0  ;;  %vm3377_vm10 = vweird.f32 %v7580_v57  ;;  %v3381_v26 = vand.u32 2147483647, %v7580_v57  ;;  %v3383_v17 = vand.u32 2147483648, %v7580_v57 }
 0x491   : > { %3838 = vperm.xlu2 %4807, %v3752_v42   ;;  %4546 = vmatpush.bf16.msra.mxu3 %v4503_v23  ;;  %v3391_v48 = vadd.f32 %v7597_v5, %v3390_v20  ;;  %v3366_v1 = vand.u32 2147483647, %v7614_v33  ;;  %4827 = vrcp.f32 %v7642_v8  ;;  %v3374_v58 = vsub.f32 1.0, %v3373_v62  ;;  %v7744_v42 = vld [vmem:[#allocation3 + $0x68] sm:$0xff] }
 0x492   : > { %3828 = vperm.xlu1 %4806, %v3750_v24   ;;  %vm3378_vm8 = vweird.f32 %v7644_v10  ;;  %v3368_v0 = vand.u32 2147483648, %v7614_v33  ;;  %vm3242_vm15 = vcmp.gt.f32.partialorder %v7580_v57, 0.0  ;;  %4829 = vrcp.f32 %v7670_v38 }
 0x493   : > { %3121 = vmatpush.bf16.msra.mxu0 %v4502_v45  ;;  %4547 = vmatpush.bf16.msra.mxu1 %v4502_v45  ;;  %v3395_v36 = vsel %vm7655_vm6, %v7597_v5, %v3391_v48  ;;  %v3375_v30 = vmul.f32 %v7644_v10, %v3374_v58  ;;  %vm3241_vm3 = vcmp.gt.f32.partialorder %v7614_v33, 0.0  ;;  %vm7697_vm13 = vmor %vm3377_vm10, %vm3378_vm8  ;;  %vm7701_vm1 = vcmp.eq.f32.partialorder %v3381_v26, 8.507059e+37  ;;  %v4499_v26 = vld [vmem:[%s5076_s17 + $0x68] sm:$0xff] }
 0x494   : > { %3818 = vperm.xlu0 %4805, %v3748_v6   ;;  %4548 = vmatpush.bf16.msra.mxu2 %v4502_v45  ;;  %v4826_v34 = vpop.eup %4825  ;;  %v3400_v52 = vsel %vm7659_vm0, %v3399_v14, %v3395_v36  ;;  %v3384_v4 = vor.u32 1.1754944e-38, %v3383_v17  ;;  %vm3362_vm12 = vweird.f32 %v7614_v33  ;;  %vm7706_vm7 = vcmp.eq.f32.partialorder %v3366_v1, 8.507059e+37  ;;  %v4491_v6 = vld [vmem:[%s5076_s17 + $0x28] sm:$0xff]  ;;  %v7786_v36 = vld [vmem:[#allocation3 + $0x60] sm:$0xff] }
 0x495   : > { %4549 = vmatpush.bf16.msra.mxu3 %v4502_v45  ;;  %v3755_v54 = vsel %vm3243_vm4, %v3400_v52, 0.0  ;;  %v3358_v47 = vmul.f32 %v4826_v34, %v7614_v33  ;;  %v3376_v31 = vadd.f32 %v7644_v10, %v3375_v30  ;;  %vm3363_vm9 = vweird.f32 %v4826_v34 }
 0x496   : > { %3122 = vmatmul.bf16.vlgmr.msra.gmra.mxu0 %v4486_v59  ;;  %3142 = vmatmul.bf16.vlgmr.msra.gmra.mxu1 %v4490_v55  ;;  %v3369_v13 = vor.u32 1.1754944e-38, %v3368_v0  ;;  %vm3246_vm5 = vcmp.gt.f32.partialorder %v7642_v8, 0.0  ;;  %vm3437_vm14 = vweird.f32 %v7642_v8  ;;  %v3441_v29 = vand.u32 2147483647, %v7642_v8  ;;  %vm7726_vm2 = vmor %vm3362_vm12, %vm3363_vm9  ;;  %v4487_v55 = vld [vmem:[%s5076_s17 + $0x8] sm:$0xff] }
 0x497   : > { %3162 = vmatmul.bf16.vlgmr.msra.gmra.mxu2 %v4494_v2  ;;  %v3359_v44 = vsub.f32 1.0, %v3358_v47  ;;  %v4828_v21 = vpop.eup %4827  ;;  %4831 = vrcp.f32 %v7691_v16  ;;  %v3380_v28 = vsel %vm7697_vm13, %v7644_v10, %v3376_v31  ;;  %v3443_v27 = vand.u32 2147483648, %v7642_v8  ;;  %v4495_v2 = vld [vmem:[%s5076_s17 + $0x48] sm:$0xff]  ;;  %v7910_v31 = vld [vmem:[#allocation3 + $0x98] sm:$0xff] }
 0x498   : > { %3182 = vmatmul.bf16.vlgmr.msra.gmra.mxu3 %v4498_v63  ;;  %v3433_v49 = vmul.f32 %v4828_v21, %v7642_v8  ;;  %v4830_v3 = vpop.eup %4829  ;;  %v3385_v60 = vsel %vm7701_vm1, %v3384_v4, %v3380_v28  ;;  %vm3438_vm11 = vweird.f32 %v4828_v21  ;;  %vm3245_vm4 = vcmp.gt.f32.partialorder %v7670_v38, 0.0  ;;  %v7806_v4 = vld [vmem:[#allocation3 + $0x88] sm:$0xff]  ;;  %v7818_v28 = vld [vmem:[#allocation3 + $0x80] sm:$0xff] }
 0x499   : > { %3853 = vperm.xlu2 %4807, %v3755_v54   ;;  %v3360_v41 = vmul.f32 %v4826_v34, %v3359_v44  ;;  %v3426_v23 = vand.u32 2147483647, %v7670_v38  ;;  %v3754_v5 = vsel %vm3242_vm15, %v3385_v60, 0.0  ;;  %v3418_v51 = vmul.f32 %v4830_v3, %v7670_v38  ;;  %vm7751_vm8 = vmor %vm3437_vm14, %vm3438_vm11  ;;  %v4497_v63 = vld [vmem:[%s5076_s17 + $0x58] sm:$0xff] }
 0x49a   : > { %v3434_v15 = vsub.f32 1.0, %v3433_v49  ;;  %3848 = vperm.xlu1 %4806, %v3754_v5   ;;  %vm7735_vm6 = vcmp.eq.f32.partialorder %v3441_v29, 8.507059e+37  ;;  %vm3422_vm0 = vweird.f32 %v7670_v38  ;;  %v3428_v18 = vand.u32 2147483648, %v7670_v38 }
 0x49b   : > { %v3361_v39 = vadd.f32 %v4826_v34, %v3360_v41  ;;  %4833 = vrcp.f32 %v7720_v37  ;;  %v3419_v11 = vsub.f32 1.0, %v3418_v51  ;;  %vm3423_vm10 = vweird.f32 %v4830_v3  ;;  %v7839_v51 = vld [vmem:[#allocation3 + $0x78] sm:$0xff] }
 0x49c   : > { %v3435_v57 = vmul.f32 %v4828_v21, %v3434_v15  ;;  %v3444_v24 = vor.u32 1.1754944e-38, %v3443_v27  ;;  %vm7755_vm15 = vcmp.eq.f32.partialorder %v3426_v23, 8.507059e+37  ;;  %v3411_v45 = vand.u32 2147483647, %v7691_v16  ;;  %vm7765_vm13 = vmor %vm3422_vm0, %vm3423_vm10 }
 0x49d   : > { %v3365_v9 = vsel %vm7726_vm2, %v4826_v34, %v3361_v39  ;;  %v4832_v32 = vpop.eup %4831  ;;  %v3420_v20 = vmul.f32 %v4830_v3, %v3419_v11  ;;  %v3429_v59 = vor.u32 1.1754944e-38, %v3428_v18  ;;  %vm3407_vm1 = vweird.f32 %v7691_v16 }
 0x49e   : > { %v3370_v46 = vsel %vm7706_vm7, %v3369_v13, %v3365_v9  ;;  %v3436_v22 = vadd.f32 %v4828_v21, %v3435_v57  ;;  %v3403_v10 = vmul.f32 %v4832_v32, %v7691_v16  ;;  %v3413_v33 = vand.u32 2147483648, %v7691_v16 }
 0x49f   : > { %v3753_v25 = vsel %vm3241_vm3, %v3370_v46, 0.0  ;;  %4835 = vrcp.f32 %v7744_v42  ;;  %v3421_v7 = vadd.f32 %v4830_v3, %v3420_v20  ;;  %vm3408_vm3 = vweird.f32 %v4832_v32 }
 0x4a0   : > { %3843 = vperm.xlu0 %4805, %v3753_v25   ;;  %v3440_v53 = vsel %vm7751_vm8, %v4828_v21, %v3436_v22  ;;  %v3404_v14 = vsub.f32 1.0, %v3403_v10  ;;  %vm7779_vm12 = vcmp.eq.f32.partialorder %v3411_v45, 8.507059e+37  ;;  %v3486_v17 = vand.u32 2147483647, %v7720_v37  ;;  %vm7798_vm7 = vmor %vm3407_vm1, %vm3408_vm3 }
 0x4a1   : > { %v4834_v48 = vpop.eup %4833  ;;  %v3445_v62 = vsel %vm7735_vm6, %v3444_v24, %v3440_v53  ;;  %v3488_v1 = vand.u32 2147483648, %v7720_v37  ;;  %v3425_v0 = vsel %vm7765_vm13, %v4830_v3, %v3421_v7  ;;  %v3414_v47 = vor.u32 1.1754944e-38, %v3413_v33  ;;  %v7871_v53 = vld [vmem:[#allocation3 + $0xa0] sm:$0xff] }
 0x4a2   : > { %v3758_v58 = vsel %vm3246_vm5, %v3445_v62, 0.0  ;;  %v3405_v34 = vmul.f32 %v4832_v32, %v3404_v14  ;;  %v3478_v52 = vmul.f32 %v4834_v48, %v7720_v37  ;;  %v3430_v54 = vsel %vm7755_vm15, %v3429_v59, %v3425_v0 }
 0x4a3   : > { %3868 = vperm.xlu2 %4807, %v3758_v58   ;;  %vm3482_vm9 = vweird.f32 %v7720_v37  ;;  %vm3483_vm5 = vweird.f32 %v4834_v48  ;;  %v3757_v8 = vsel %vm3245_vm4, %v3430_v54, 0.0  ;;  %4837 = vrcp.f32 %v7786_v36 }
 0x4a4   : > { %v3406_v43 = vadd.f32 %v4832_v32, %v3405_v34  ;;  %v3479_v40 = vsub.f32 1.0, %v3478_v52  ;;  %3863 = vperm.xlu1 %4806, %v3757_v8   ;;  %vm3244_vm14 = vcmp.gt.f32.partialorder %v7691_v16, 0.0  ;;  %vm7809_vm2 = vcmp.eq.f32.partialorder %v3486_v17, 8.507059e+37  ;;  %vm7825_vm4 = vmor %vm3482_vm9, %vm3483_vm5  ;;  %v4500_v17 = vld [vmem:[%s5076_s17 + $0x70] sm:$0xff] }
 0x4a5   : > { %v4836_v61 = vpop.eup %4835  ;;  %v3489_v44 = vor.u32 1.1754944e-38, %v3488_v1  ;;  %vm3467_vm11 = vweird.f32 %v7744_v42  ;;  %v3471_v29 = vand.u32 2147483647, %v7744_v42  ;;  %v3473_v49 = vand.u32 2147483648, %v7744_v42 }
 0x4a6   : > { %3127 = vmatmul.bf16.gmra.mxu0 %v4487_v55  ;;  %3147 = vmatmul.bf16.gmra.mxu1 %v4491_v6  ;;  %v3410_v38 = vsel %vm7798_vm7, %v4832_v32, %v3406_v43  ;;  %v3480_v13 = vmul.f32 %v4834_v48, %v3479_v40  ;;  %v3463_v21 = vmul.f32 %v4836_v61, %v7744_v42  ;;  %v3456_v27 = vand.u32 2147483647, %v7786_v36  ;;  %v4488_v55 = vld [vmem:[%s5076_s17 + $0x10] sm:$0xff] }
 0x4a7   : > { %3167 = vmatmul.bf16.gmra.mxu2 %v4495_v2  ;;  %v3415_v16 = vsel %vm7779_vm12, %v3414_v47, %v3410_v38  ;;  %4839 = vrcp.f32 %v7806_v4  ;;  %vm3468_vm6 = vweird.f32 %v4836_v61  ;;  %vm3249_vm0 = vcmp.gt.f32.partialorder %v7720_v37, 0.0  ;;  %v7950_v37 = vld [vmem:[#allocation3 + $0xb8] sm:$0xff] }
 0x4a8   : > { %3187 = vmatmul.bf16.gmra.mxu3 %v4499_v26  ;;  %v3756_v3 = vsel %vm3244_vm14, %v3415_v16, 0.0  ;;  %v3481_v60 = vadd.f32 %v4834_v48, %v3480_v13  ;;  %v3464_v12 = vsub.f32 1.0, %v3463_v21  ;;  %vm3248_vm10 = vcmp.gt.f32.partialorder %v7744_v42, 0.0  ;;  %vm7845_vm15 = vmor %vm3467_vm11, %vm3468_vm6  ;;  %v4496_v26 = vld [vmem:[%s5076_s17 + $0x50] sm:$0xff] }
 0x4a9   : > { %3858 = vperm.xlu0 %4805, %v3756_v3   ;;  %4841 = vrcp.f32 %v7818_v28  ;;  %v4838_v23 = vpop.eup %4837  ;;  %vm3247_vm8 = vcmp.gt.f32.partialorder %v7786_v36, 0.0  ;;  %v3458_v15 = vand.u32 2147483648, %v7786_v36  ;;  %vm7849_vm13 = vcmp.eq.f32.partialorder %v3471_v29, 8.507059e+37 }
 0x4aa   : > { %v3485_v5 = vsel %vm7825_vm4, %v4834_v48, %v3481_v60  ;;  %v3465_v39 = vmul.f32 %v4836_v61, %v3464_v12  ;;  %v3474_v9 = vor.u32 1.1754944e-38, %v3473_v49  ;;  %v3448_v57 = vmul.f32 %v4838_v23, %v7786_v36  ;;  %v4492_v48 = vld [vmem:[%s5076_s17 + $0x30] sm:$0xff] }
 0x4ab   : > { %v3490_v19 = vsel %vm7809_vm2, %v3489_v44, %v3485_v5  ;;  %vm3452_vm1 = vweird.f32 %v7786_v36  ;;  %vm7855_vm3 = vcmp.eq.f32.partialorder %v3456_v27, 8.507059e+37  ;;  %vm3453_vm12 = vweird.f32 %v4838_v23 }
 0x4ac   : > { %v3761_v11 = vsel %vm3249_vm0, %v3490_v19, 0.0  ;;  %v3466_v32 = vadd.f32 %v4836_v61, %v3465_v39  ;;  %v3449_v24 = vsub.f32 1.0, %v3448_v57  ;;  %vm3252_vm7 = vcmp.gt.f32.partialorder %v7806_v4, 0.0  ;;  %vm7878_vm5 = vmor %vm3452_vm1, %vm3453_vm12 }
 0x4ad   : > { %v4840_v50 = vpop.eup %4839  ;;  %3883 = vperm.xlu2 %4807, %v3761_v11   ;;  %v3531_v56 = vand.u32 2147483647, %v7806_v4  ;;  %4843 = vrcp.f32 %v7839_v51  ;;  %v3459_v25 = vor.u32 1.1754944e-38, %v3458_v15  ;;  %vm3527_vm9 = vweird.f32 %v7806_v4 }
 0x4ae   : > { %v3470_v45 = vsel %vm7845_vm15, %v4836_v61, %v3466_v32  ;;  %v3523_v22 = vmul.f32 %v4840_v50, %v7806_v4  ;;  %v3450_v35 = vmul.f32 %v4838_v23, %v3449_v24  ;;  %v3533_v59 = vand.u32 2147483648, %v7806_v4 }
 0x4af   : > { %v4842_v20 = vpop.eup %4841  ;;  %v3475_v10 = vsel %vm7849_vm13, %v3474_v9, %v3470_v45  ;;  %v3516_v33 = vand.u32 2147483647, %v7818_v28  ;;  %vm3528_vm14 = vweird.f32 %v4840_v50  ;;  %vm7884_vm2 = vcmp.eq.f32.partialorder %v3531_v56, 8.507059e+37 }
 0x4b0   : > { %v3760_v7 = vsel %vm3248_vm10, %v3475_v10, 0.0  ;;  %v3524_v6 = vsub.f32 1.0, %v3523_v22  ;;  %v3508_v2 = vmul.f32 %v4842_v20, %v7818_v28  ;;  %v3451_v62 = vadd.f32 %v4838_v23, %v3450_v35  ;;  %vm7898_vm6 = vmor %vm3527_vm9, %vm3528_vm14 }
 0x4b1   : > { %3878 = vperm.xlu1 %4806, %v3760_v7   ;;  %vm3512_vm11 = vweird.f32 %v7818_v28  ;;  %v3518_v42 = vand.u32 2147483648, %v7818_v28  ;;  %vm3513_vm4 = vweird.f32 %v4842_v20  ;;  %4845 = vrcp.f32 %v7871_v53 }
 0x4b2   : > { %v3525_v1 = vmul.f32 %v4840_v50, %v3524_v6  ;;  %v3509_v58 = vsub.f32 1.0, %v3508_v2  ;;  %v3455_v34 = vsel %vm7878_vm5, %v4838_v23, %v3451_v62  ;;  %v3534_v54 = vor.u32 1.1754944e-38, %v3533_v59  ;;  %vm7917_vm10 = vmor %vm3512_vm11, %vm3513_vm4  ;;  %v7938_v23 = vld [vmem:[#allocation3 + $0x90] sm:$0xff]  ;;  %v4493_v6 = vld [vmem:[%s5076_s17 + $0x38] sm:$0xff] }
 0x4b3   : > { %v4844_v0 = vpop.eup %4843  ;;  %vm7902_vm0 = vcmp.eq.f32.partialorder %v3516_v33, 8.507059e+37  ;;  %v3501_v47 = vand.u32 2147483647, %v7839_v51  ;;  %v3460_v8 = vsel %vm7855_vm3, %v3459_v25, %v3455_v34  ;;  %v3519_v13 = vor.u32 1.1754944e-38, %v3518_v42  ;;  %v7969_v25 = vld [vmem:[#allocation3 + $0xb0] sm:$0xff]  ;;  %v4501_v42 = vld [vmem:[%s5076_s17 + $0x78] sm:$0xff] }
 0x4b4   : > { %v3526_v43 = vadd.f32 %v4840_v50, %v3525_v1  ;;  %v3510_v40 = vmul.f32 %v4842_v20, %v3509_v58  ;;  %v3493_v61 = vmul.f32 %v4844_v0, %v7839_v51  ;;  %v3759_v44 = vsel %vm3247_vm8, %v3460_v8, 0.0  ;;  %v8005_v34 = vld [vmem:[#allocation3 + $0xa8] sm:$0xff] }
 0x4b5   : > { %vm3497_vm15 = vweird.f32 %v7839_v51  ;;  %v3503_v21 = vand.u32 2147483648, %v7839_v51  ;;  %3873 = vperm.xlu0 %4805, %v3759_v44   ;;  %vm3498_vm8 = vweird.f32 %v4844_v0  ;;  %vm3251_vm13 = vcmp.gt.f32.partialorder %v7818_v28, 0.0 }
 0x4b6   : > { %3132 = vmatmul.bf16.gmra.mxu0 %v4488_v55  ;;  %3152 = vmatmul.bf16.gmra.mxu1 %v4492_v48  ;;  %v3530_v29 = vsel %vm7898_vm6, %v4840_v50, %v3526_v43  ;;  %v3511_v36 = vadd.f32 %v4842_v20, %v3510_v40  ;;  %v3494_v16 = vsub.f32 1.0, %v3493_v61  ;;  %vm3250_vm1 = vcmp.gt.f32.partialorder %v7839_v51, 0.0  ;;  %vm7944_vm12 = vmor %vm3497_vm15, %vm3498_vm8  ;;  %v4489_v55 = vld [vmem:[%s5076_s17 + $0x18] sm:$0xff] }
 0x4b7   : > { %3172 = vmatmul.bf16.gmra.mxu2 %v4496_v26  ;;  %v3535_v41 = vsel %vm7884_vm2, %v3534_v54, %v3530_v29  ;;  %4847 = vrcp.f32 %v7910_v31  ;;  %v4846_v49 = vpop.eup %4845  ;;  %vm7934_vm3 = vcmp.eq.f32.partialorder %v3501_v47, 8.507059e+37  ;;  %v3504_v4 = vor.u32 1.1754944e-38, %v3503_v21  ;;  %v8025_v29 = vld [vmem:[#allocation3 + $0xd0] sm:$0xff] }
 0x4b8   : > { %3192 = vmatmul.bf16.gmra.mxu3 %v4500_v17  ;;  %v3764_v27 = vsel %vm3252_vm7, %v3535_v41, 0.0  ;;  %v3515_v3 = vsel %vm7917_vm10, %v4842_v20, %v3511_v36  ;;  %v3495_v60 = vmul.f32 %v4844_v0, %v3494_v16  ;;  %v3568_v15 = vmul.f32 %v4846_v49, %v7871_v53 }
 0x4b9   : > { %3898 = vperm.xlu2 %4807, %v3764_v27   ;;  %v3520_v5 = vsel %vm7902_vm0, %v3519_v13, %v3515_v3  ;;  %v3576_v19 = vand.u32 2147483647, %v7871_v53  ;;  %vm3572_vm7 = vweird.f32 %v7871_v53  ;;  %v3578_v57 = vand.u32 2147483648, %v7871_v53 }
 0x4ba   : > { %v3763_v18 = vsel %vm3251_vm13, %v3520_v5, 0.0  ;;  %v3496_v9 = vadd.f32 %v4844_v0, %v3495_v60  ;;  %v3569_v11 = vsub.f32 1.0, %v3568_v15  ;;  %vm3573_vm9 = vweird.f32 %v4846_v49 }
 0x4bb   : > { %3893 = vperm.xlu1 %4806, %v3763_v18   ;;  %v3561_v32 = vand.u32 2147483647, %v7910_v31  ;;  %4849 = vrcp.f32 %v7938_v23  ;;  %v3563_v50 = vand.u32 2147483648, %v7910_v31  ;;  %vm3255_vm5 = vcmp.gt.f32.partialorder %v7871_v53, 0.0  ;;  %vm7975_vm2 = vmor %vm3572_vm7, %vm3573_vm9 }
 0x4bc   : > { %v3500_v46 = vsel %vm7944_vm12, %v4844_v0, %v3496_v9  ;;  %4851 = vrcp.f32 %v7950_v37  ;;  %v3570_v56 = vmul.f32 %v4846_v49, %v3569_v11  ;;  %vm7965_vm14 = vcmp.eq.f32.partialorder %v3576_v19, 8.507059e+37 }
 0x4bd   : > { %v4848_v28 = vpop.eup %4847  ;;  %v3505_v24 = vsel %vm7934_vm3, %v3504_v4, %v3500_v46  ;;  %v3579_v10 = vor.u32 1.1754944e-38, %v3578_v57  ;;  %v3546_v59 = vand.u32 2147483647, %v7938_v23  ;;  %vm3254_vm11 = vcmp.gt.f32.partialorder %v7910_v31, 0.0  ;;  %v8051_v4 = vld [vmem:[#allocation3 + $0xc8] sm:$0xff] }
 0x4be   : > { %v3762_v22 = vsel %vm3250_vm1, %v3505_v24, 0.0  ;;  %v3553_v35 = vmul.f32 %v4848_v28, %v7910_v31  ;;  %v3571_v33 = vadd.f32 %v4846_v49, %v3570_v56  ;;  %vm3557_vm4 = vweird.f32 %v7910_v31 }
 0x4bf   : > { %3888 = vperm.xlu0 %4805, %v3762_v22   ;;  %vm7983_vm6 = vcmp.eq.f32.partialorder %v3561_v32, 8.507059e+37  ;;  %vm3558_vm0 = vweird.f32 %v4848_v28  ;;  %v3564_v14 = vor.u32 1.1754944e-38, %v3563_v50  ;;  %4853 = vrcp.f32 %v7969_v25  ;;  %v8075_v22 = vld [vmem:[#allocation3 + $0xc0] sm:$0xff] }
 0x4c0   : > { %v3554_v7 = vsub.f32 1.0, %v3553_v35  ;;  %v3575_v48 = vsel %vm7975_vm2, %v4846_v49, %v3571_v33  ;;  %vm3253_vm10 = vcmp.gt.f32.partialorder %v7938_v23, 0.0  ;;  %vm3542_vm15 = vweird.f32 %v7938_v23  ;;  %vm8012_vm1 = vmor %vm3557_vm4, %vm3558_vm0 }
 0x4c1   : > { %v4850_v2 = vpop.eup %4849  ;;  %v3548_v62 = vand.u32 2147483648, %v7938_v23  ;;  %v3580_v17 = vsel %vm7965_vm14, %v3579_v10, %v3575_v48  ;;  %vm8000_vm8 = vcmp.eq.f32.partialorder %v3546_v59, 8.507059e+37  ;;  %vm3258_vm13 = vcmp.gt.f32.partialorder %v7950_v37, 0.0 }
 0x4c2   : > { %v4852_v26 = vpop.eup %4851  ;;  %v3555_v1 = vmul.f32 %v4848_v28, %v3554_v7  ;;  %v3538_v58 = vmul.f32 %v4850_v2, %v7938_v23  ;;  %v3767_v52 = vsel %vm3255_vm5, %v3580_v17, 0.0  ;;  %vm3617_vm3 = vweird.f32 %v7950_v37 }
 0x4c3   : > { %v3613_v30 = vmul.f32 %v4852_v26, %v7950_v37  ;;  %v3621_v47 = vand.u32 2147483647, %v7950_v37  ;;  %3913 = vperm.xlu2 %4807, %v3767_v52   ;;  %vm3543_vm12 = vweird.f32 %v4850_v2  ;;  %v3623_v53 = vand.u32 2147483648, %v7950_v37 }
 0x4c4   : > { %v3556_v8 = vadd.f32 %v4848_v28, %v3555_v1  ;;  %v3539_v43 = vsub.f32 1.0, %v3538_v58  ;;  %v3549_v40 = vor.u32 1.1754944e-38, %v3548_v62  ;;  %vm3618_vm7 = vweird.f32 %v4852_v26  ;;  %vm8032_vm5 = vmor %vm3542_vm15, %vm3543_vm12 }
 0x4c5   : > { %v3614_v61 = vsub.f32 1.0, %v3613_v30  ;;  %4855 = vrcp.f32 %v8005_v34  ;;  %v4854_v44 = vpop.eup %4853  ;;  %vm3602_vm9 = vweird.f32 %v7969_v25  ;;  %v3608_v21 = vand.u32 2147483648, %v7969_v25  ;;  %vm8043_vm14 = vmor %vm3617_vm3, %vm3618_vm7 }
 0x4c6   : > { %3137 = vmatmul.bf16.gmra.mxu0 %v4489_v55  ;;  %3157 = vmatmul.bf16.gmra.mxu1 %v4493_v6  ;;  %v3560_v38 = vsel %vm8012_vm1, %v4848_v28, %v3556_v8  ;;  %v3540_v13 = vmul.f32 %v4850_v2, %v3539_v43  ;;  %v3598_v49 = vmul.f32 %v4854_v44, %v7969_v25  ;;  %v3606_v27 = vand.u32 2147483647, %v7969_v25  ;;  %v8091_v6 = vld [vmem:[#allocation3 + $0xe8] sm:$0xff] }
 0x4c7   : > { %3177 = vmatmul.bf16.gmra.mxu2 %v4497_v63  ;;  %v3565_v36 = vsel %vm7983_vm6, %v3564_v14, %v3560_v38  ;;  %v3615_v41 = vmul.f32 %v4852_v26, %v3614_v61  ;;  %vm8047_vm2 = vcmp.eq.f32.partialorder %v3621_v47, 8.507059e+37  ;;  %v3624_v39 = vor.u32 1.1754944e-38, %v3623_v53 }
 0x4c8   : > { %3197 = vmatmul.bf16.gmra.mxu3 %v4501_v42  ;;  %v3766_v3 = vsel %vm3254_vm11, %v3565_v36, 0.0  ;;  %v3541_v60 = vadd.f32 %v4850_v2, %v3540_v13  ;;  %v3599_v19 = vsub.f32 1.0, %v3598_v49  ;;  %vm3603_vm4 = vweird.f32 %v4854_v44 }
 0x4c9   : > { %3908 = vperm.xlu1 %4806, %v3766_v3   ;;  %v3616_v15 = vadd.f32 %v4852_v26, %v3615_v41  ;;  %4857 = vrcp.f32 %v8025_v29  ;;  %vm3257_vm11 = vcmp.gt.f32.partialorder %v7969_v25, 0.0  ;;  %v3609_v18 = vor.u32 1.1754944e-38, %v3608_v21  ;;  %vm8069_vm6 = vmor %vm3602_vm9, %vm3603_vm4 }
 0x4ca   : > { %v3545_v31 = vsel %vm8032_vm5, %v4850_v2, %v3541_v60  ;;  %v3591_v9 = vand.u32 2147483647, %v8005_v34  ;;  %v3600_v46 = vmul.f32 %v4854_v44, %v3599_v19  ;;  %4859 = vrcp.f32 %v8051_v4 }
 0x4cb   : > { %v4856_v57 = vpop.eup %4855  ;;  %v3550_v11 = vsel %vm8000_vm8, %v3549_v40, %v3545_v31  ;;  %v3620_v32 = vsel %vm8043_vm14, %v4852_v26, %v3616_v15  ;;  %v3593_v45 = vand.u32 2147483648, %v8005_v34  ;;  %vm3607_vm0 = vcmp.eq.f32.partialorder %v3606_v27, 8.507059e+37  ;;  %v8122_v40 = vld [vmem:[#allocation3 + $0xe0] sm:$0xff] }
 0x4cc   : > { %v3765_v50 = vsel %vm3253_vm10, %v3550_v11, 0.0  ;;  %v3625_v28 = vsel %vm8047_vm2, %v3624_v39, %v3620_v32  ;;  %v3583_v56 = vmul.f32 %v4856_v57, %v8005_v34  ;;  %v3601_v20 = vadd.f32 %v4854_v44, %v3600_v46  ;;  %v8167_v11 = vld [vmem:[#allocation3 + $0xf8] sm:$0xff] }
 0x4cd   : > { %3903 = vperm.xlu0 %4805, %v3765_v50   ;;  %v3770_v23 = vsel %vm3258_vm13, %v3625_v28, 0.0  ;;  %v3666_v10 = vand.u32 2147483647, %v8025_v29  ;;  %vm3256_vm10 = vcmp.gt.f32.partialorder %v8005_v34, 0.0  ;;  %vm3587_vm15 = vweird.f32 %v8005_v34 }
 0x4ce   : > { %3928 = vperm.xlu2 %4807, %v3770_v23   ;;  %v3584_v35 = vsub.f32 1.0, %v3583_v56  ;;  %vm3588_vm8 = vweird.f32 %v4856_v57  ;;  %v3605_v33 = vsel %vm8069_vm6, %v4854_v44, %v3601_v20  ;;  %vm8084_vm1 = vcmp.eq.f32.partialorder %v3591_v9, 8.507059e+37  ;;  %v3787_v20 = vld [vmem:[#allocation4 + $0x80] sm:$0xff] }
 0x4cf   : > { %v4858_v59 = vpop.eup %4857  ;;  %vm3261_vm13 = vcmp.gt.f32.partialorder %v8025_v29, 0.0  ;;  %4861 = vrcp.f32 %v8075_v22  ;;  %v3610_v37 = vsel %vm3607_vm0, %v3609_v18, %v3605_v33  ;;  %v3594_v7 = vor.u32 1.1754944e-38, %v3593_v45  ;;  %vm8095_vm3 = vmor %vm3587_vm15, %vm3588_vm8  ;;  %v8154_v18 = vld [vmem:[#allocation3 + $0xd8] sm:$0xff] }
 0x4d0   : > { %v3585_v55 = vmul.f32 %v4856_v57, %v3584_v35  ;;  %v3658_v14 = vmul.f32 %v4858_v59, %v8025_v29  ;;  %v4860_v2 = vpop.eup %4859  ;;  %v3769_v48 = vsel %vm3257_vm11, %v3610_v37, 0.0  ;;  %vm3662_vm12 = vweird.f32 %v8025_v29 }
 0x4d1   : > { %vm8100_vm7 = vcmp.eq.f32.partialorder %v3666_v10, 8.507059e+37  ;;  %v3668_v42 = vand.u32 2147483648, %v8025_v29  ;;  %3923 = vperm.xlu1 %4806, %v3769_v48   ;;  %vm3663_vm9 = vweird.f32 %v4858_v59  ;;  %v3643_v1 = vmul.f32 %v4860_v2, %v8051_v4  ;;  %v3780_v48 = vld [vmem:[#allocation4] sm:$0xff] }
 0x4d2   : > { %v3586_v26 = vadd.f32 %v4856_v57, %v3585_v55  ;;  %v3659_v17 = vsub.f32 1.0, %v3658_v14  ;;  %vm3647_vm5 = vweird.f32 %v8051_v4  ;;  %v3651_v25 = vand.u32 2147483647, %v8051_v4  ;;  %vm8116_vm2 = vmor %vm3662_vm12, %vm3663_vm9 }
 0x4d3   : > { %v3653_v58 = vand.u32 2147483648, %v8051_v4  ;;  %4863 = vrcp.f32 %v8091_v6  ;;  %v3644_v54 = vsub.f32 1.0, %v3643_v1  ;;  %vm3648_vm14 = vweird.f32 %v4860_v2 }
 0x4d4   : > { %v3590_v0 = vsel %vm8095_vm3, %v4856_v57, %v3586_v26  ;;  %v3660_v52 = vmul.f32 %v4858_v59, %v3659_v17  ;;  %v3669_v43 = vor.u32 1.1754944e-38, %v3668_v42  ;;  %vm3632_vm4 = vweird.f32 %v8075_v22  ;;  %vm8129_vm11 = vmor %vm3647_vm5, %vm3648_vm14 }
 0x4d5   : > { %v4862_v30 = vpop.eup %4861  ;;  %v3595_v47 = vsel %vm8084_vm1, %v3594_v7, %v3590_v0  ;;  %v3636_v53 = vand.u32 2147483647, %v8075_v22  ;;  %v3645_v38 = vmul.f32 %v4860_v2, %v3644_v54  ;;  %vm8133_vm6 = vcmp.eq.f32.partialorder %v3651_v25, 8.507059e+37 }
 0x4d6   : > { %v3768_v61 = vsel %vm3256_vm10, %v3595_v47, 0.0  ;;  %v3661_v44 = vadd.f32 %v4858_v59, %v3660_v52  ;;  %v3628_v13 = vmul.f32 %v4862_v30, %v8075_v22  ;;  %v3654_v16 = vor.u32 1.1754944e-38, %v3653_v58 }
 0x4d7   : > { %3918 = vperm.xlu0 %4805, %v3768_v61   ;;  %vm3633_vm0 = vweird.f32 %v4862_v30  ;;  %v3638_v34 = vand.u32 2147483648, %v8075_v22  ;;  %v3646_v49 = vadd.f32 %v4860_v2, %v3645_v38  ;;  %4865 = vrcp.f32 %v8122_v40 }
 0x4d8   : > { %v3665_v41 = vsel %vm8116_vm2, %v4858_v59, %v3661_v44  ;;  %v3629_v27 = vsub.f32 1.0, %v3628_v13  ;;  %vm3260_vm10 = vcmp.gt.f32.partialorder %v8051_v4, 0.0  ;;  %vm8144_vm15 = vcmp.eq.f32.partialorder %v3636_v53, 8.507059e+37  ;;  %vm8161_vm8 = vmor %vm3632_vm4, %vm3633_vm0  ;;  %v8185_v59 = vld [vmem:[#allocation3 + $0xf0] sm:$0xff] }
 0x4d9   : > { %v4864_v3 = vpop.eup %4863  ;;  %v3670_v60 = vsel %vm8100_vm7, %v3669_v43, %v3665_v41  ;;  %v3713_v5 = vand.u32 2147483648, %v8091_v6  ;;  %v3650_v15 = vsel %vm8129_vm11, %v4860_v2, %v3646_v49  ;;  %v3639_v29 = vor.u32 1.1754944e-38, %v3638_v34 }
 0x4da   : > { %v3773_v39 = vsel %vm3261_vm13, %v3670_v60, 0.0  ;;  %v3630_v19 = vmul.f32 %v4862_v30, %v3629_v27  ;;  %v3703_v31 = vmul.f32 %v4864_v3, %v8091_v6  ;;  %v3655_v4 = vsel %vm8133_vm6, %v3654_v16, %v3650_v15 }
 0x4db   : > { %3943 = vperm.xlu2 %4807, %v3773_v39   ;;  %vm3707_vm1 = vweird.f32 %v8091_v6  ;;  %v3711_v57 = vand.u32 2147483647, %v8091_v6  ;;  %v3772_v32 = vsel %vm3260_vm10, %v3655_v4, 0.0  ;;  %vm3708_vm13 = vweird.f32 %v4864_v3 }
 0x4dc   : > { %v3631_v46 = vadd.f32 %v4862_v30, %v3630_v19  ;;  %v3704_v50 = vsub.f32 1.0, %v3703_v31  ;;  %3938 = vperm.xlu1 %4806, %v3772_v32   ;;  %vm3259_vm3 = vcmp.gt.f32.partialorder %v8075_v22, 0.0  ;;  %4867 = vrcp.f32 %v8154_v18  ;;  %vm8178_vm12 = vmor %vm3707_vm1, %vm3708_vm13 }
 0x4dd   : > { %v4866_v28 = vpop.eup %4865  ;;  %v3714_v45 = vor.u32 1.1754944e-38, %v3713_v5  ;;  %4869 = vrcp.f32 %v8167_v11  ;;  %v3696_v10 = vand.u32 2147483647, %v8122_v40  ;;  %v3698_v35 = vand.u32 2147483648, %v8122_v40 }
 0x4de   : > { %v3635_v24 = vsel %vm8161_vm8, %v4862_v30, %v3631_v46  ;;  %v3705_v56 = vmul.f32 %v4864_v3, %v3704_v50  ;;  %v3688_v22 = vmul.f32 %v4866_v28, %v8122_v40  ;;  %vm3712_vm7 = vcmp.eq.f32.partialorder %v3711_v57, 8.507059e+37 }
 0x4df   : > { %v3640_v23 = vsel %vm8144_vm15, %v3639_v29, %v3635_v24  ;;  %vm3264_vm9 = vcmp.gt.f32.partialorder %v8091_v6, 0.0  ;;  %vm3692_vm5 = vweird.f32 %v8122_v40  ;;  %vm3693_vm14 = vweird.f32 %v4866_v28 }
 0x4e0   : > { %v3771_v33 = vsel %vm3259_vm3, %v3640_v23, 0.0  ;;  %v3706_v51 = vadd.f32 %v4864_v3, %v3705_v56  ;;  %v3689_v37 = vsub.f32 1.0, %v3688_v22  ;;  %vm3263_vm2 = vcmp.gt.f32.partialorder %v8122_v40, 0.0  ;;  %vm8197_vm11 = vmor %vm3692_vm5, %vm3693_vm14  ;;  %v8253_v23 = vld [vmem:[%s8377_s6] ss:$0 sm:$0xff]  ;;  %v3779_v22 = vld [vmem:[#allocation4 + $0xb0] sm:$0xff] }
 0x4e1   : > { %3933 = vperm.xlu0 %4805, %v3771_v33   ;;  %4871 = vrcp.f32 %v8185_v59  ;;  %vm8193_vm4 = vcmp.eq.f32.partialorder %v3696_v10, 8.507059e+37  ;;  %v3699_v62 = vor.u32 1.1754944e-38, %v3698_v35  ;;  %v3681_v17 = vand.u32 2147483647, %v8154_v18 }
 0x4e2   : > { %v3710_v55 = vsel %vm8178_vm12, %v4864_v3, %v3706_v51  ;;  %v4868_v7 = vpop.eup %4867  ;;  %v3690_v2 = vmul.f32 %v4866_v28, %v3689_v37  ;;  %v3683_v1 = vand.u32 2147483648, %v8154_v18  ;;  %vm3262_vm6 = vcmp.gt.f32.partialorder %v8154_v18, 0.0 }
 0x4e3   : > { %v3715_v14 = vsel %vm3712_vm7, %v3714_v45, %v3710_v55  ;;  %v4870_v6 = vpop.eup %4869  ;;  %v3673_v26 = vmul.f32 %v4868_v7, %v8154_v18  ;;  %vm3677_vm0 = vweird.f32 %v8154_v18  ;;  %v8207_v0 = vpop.permute.xlu2 %3833  ;;  %vm3678_vm10 = vweird.f32 %v4868_v7 }
 0x4e4   : > { %v3776_v63 = vsel %vm3264_vm9, %v3715_v14, 0.0  ;;  %v3691_v25 = vadd.f32 %v4866_v28, %v3690_v2  ;;  %v3733_v58 = vmul.f32 %v4870_v6, %v8167_v11  ;;  %vm3737_vm15 = vweird.f32 %v8167_v11  ;;  %vm8224_vm13 = vmor %vm3677_vm0, %vm3678_vm10 }
 0x4e5   : > { %3958 = vperm.xlu2 %4807, %v3776_v63   ;;  %v3674_v52 = vsub.f32 1.0, %v3673_v26  ;;  %v3743_v54 = vand.u32 2147483648, %v8167_v11  ;;  %vm3738_vm8 = vweird.f32 %v4870_v6  ;;  %v3741_v8 = vand.u32 2147483647, %v8167_v11 }
 0x4e6   : > { %v3695_v30 = vsel %vm8197_vm11, %v4866_v28, %v3691_v25  ;;  %v3734_v47 = vsub.f32 1.0, %v3733_v58  ;;  %vm8216_vm1 = vcmp.eq.f32.partialorder %v3681_v17, 8.507059e+37  ;;  %v3684_v38 = vor.u32 1.1754944e-38, %v3683_v1  ;;  %vm3739_vm12 = vmor %vm3737_vm15, %vm3738_vm8  ;;  %v3788_v1 = vld [vmem:[#allocation4 + $0x88] sm:$0xff] }
 0x4e7   : > { %v4872_v43 = vpop.eup %4871  ;;  %v3700_v53 = vsel %vm8193_vm4, %v3699_v62, %v3695_v30  ;;  %v3675_v61 = vmul.f32 %v4868_v7, %v3674_v52  ;;  %vm3722_vm3 = vweird.f32 %v8185_v59  ;;  %v3744_v41 = vor.u32 1.1754944e-38, %v3743_v54 }
 0x4e8   : > { %v3775_v13 = vsel %vm3263_vm2, %v3700_v53, 0.0  ;;  %v3735_v36 = vmul.f32 %v4870_v6, %v3734_v47  ;;  %v3718_v16 = vmul.f32 %v4872_v43, %v8185_v59  ;;  %v3726_v40 = vand.u32 2147483647, %v8185_v59 }
 0x4e9   : > { %3953 = vperm.xlu1 %4806, %v3775_v13   ;;  %v3676_v34 = vadd.f32 %v4868_v7, %v3675_v61  ;;  %v3728_v49 = vand.u32 2147483648, %v8185_v59  ;;  %vm3742_vm7 = vcmp.eq.f32.partialorder %v3741_v8, 8.507059e+37  ;;  %vm3723_vm9 = vweird.f32 %v4872_v43  ;;  %v3796_v8 = vld [vmem:[#allocation4 + $0x58] sm:$0xff]  ;;  %v3789_v61 = vld [vmem:[#allocation4 + $0xe8] sm:$0xff] }
 0x4ea   : > { %v3736_v27 = vadd.f32 %v4870_v6, %v3735_v36  ;;  %v3719_v3 = vsub.f32 1.0, %v3718_v16  ;;  %vm3266_vm5 = vcmp.gt.f32.partialorder %v8167_v11, 0.0  ;;  %vm3724_vm14 = vmor %vm3722_vm3, %vm3723_vm9  ;;  %vm3727_vm2 = vcmp.eq.f32.partialorder %v3726_v40, 8.507059e+37 }
 0x4eb   : > { %v3680_v60 = vsel %vm8224_vm13, %v4868_v7, %v3676_v34  ;;  %v3729_v31 = vor.u32 1.1754944e-38, %v3728_v49  ;;  %v8243_v29 = vpop.permute.xlu2 %3838  ;;  %vm3265_vm4 = vcmp.gt.f32.partialorder %v8185_v59, 0.0 }
 0x4ec   : > { %v3685_v12 = vsel %vm8216_vm1, %v3684_v38, %v3680_v60  ;;  %v3740_v5 = vsel %vm3739_vm12, %v4870_v6, %v3736_v27  ;;  %v3720_v39 = vmul.f32 %v4872_v43, %v3719_v3 }
 0x4ed   : > { %v3774_v15 = vsel %vm3262_vm6, %v3685_v12, 0.0  ;;  %v3745_v19 = vsel %vm3742_vm7, %v3744_v41, %v3740_v5 }
 0x4ee   : > { %3948 = vperm.xlu0 %4805, %v3774_v15   ;;  %v3778_v4 = vsel %vm3266_vm5, %v3745_v19, 0.0  ;;  %v3721_v9 = vadd.f32 %v4872_v43, %v3720_v39  ;;  %v3782_v39 = vld [vmem:[#allocation4 + $0x18] sm:$0xff] }
 0x4ef   : > { %v3790_v19 = vld [vmem:[#allocation4 + $0xb8] sm:$0xff] }
 0x4f0   : > { %v3725_v57 = vsel %vm3724_vm14, %v4872_v43, %v3721_v9  ;;  %v3781_v43 = vld [vmem:[#allocation4 + $0xd8] sm:$0xff] }
 0x4f1   : > { %3968 = vperm.xlu1 %4806, %v3778_v4   ;;  %v3730_v11 = vsel %vm3727_vm2, %v3729_v31, %v3725_v57 }
 0x4f2   : > { %v3777_v32 = vsel %vm3265_vm4, %v3730_v11, 0.0 }
 0x4f3   : > { %v3854_v18 = vpop.permute.xlu2 %3853 }
 0x4f4   : > { %v3979_v33 = vmul.f32 %v3854_v18, %v3787_v20 }
 0x4f6   : > { %3963 = vperm.xlu0 %4805, %v3777_v32  }
 0x4fc   : > { %v3824_v46 = vpop.permute.xlu1 %3823 }
 0x4fd   : > { %v8246_v28 = vpop.permute.xlu2 %3868  ;;  %v3973_v16 = vmul.f32 %v3824_v46, %v3781_v43 }
 0x4fe   : > { %v3814_v50 = vpop.permute.xlu0 %3813  ;;  %v3982_v32 = vmul.f32 %v8246_v28, %v3790_v19 }
 0x4ff   : > { %v3971_v51 = vmul.f32 %v3814_v50, %v3779_v22  ;;  %v3795_v50 = vld [vmem:[#allocation4 + $0x38] sm:$0xff] }
 0x504   : > { %v3829_v24 = vpop.permute.xlu1 %3828 }
 0x505   : > { %v3974_v9 = vmul.f32 %v3829_v24, %v3782_v39 }
 0x506   : > { %v3819_v56 = vpop.permute.xlu0 %3818 }
 0x507   : > { %v8248_v45 = vpop.permute.xlu2 %3883  ;;  %v3972_v26 = vmul.f32 %v3819_v56, %v3780_v48 }
 0x50c   : > { %v8255_v10 = vpop.permute.xlu1 %3848 }
 0x512   : > { %v8257_v37 = vpop.permute.xlu0 %3843 }
 0x513   : > { %v3123_v35 = vpop.f32.mrf.mxu0  ;;  %v3143_v59 = vpop.f32.mrf.mxu1 }
 0x514   : > { %v3124_v55 = vadd.f32 %v8253_v23, %v3123_v35  ;;  %v3144_v7 = vadd.f32 %v8253_v23, %v3143_v59  ;;  %v3899_v62 = vpop.permute.xlu2 %3898 }
 0x515   : > { %v3988_v38 = vmul.f32 %v3899_v62, %v3796_v8 }
 0x516   : > { %v4003_v14 = vadd.f32 %v3971_v51, %v3124_v55  ;;  %v4011_v2 = vadd.f32 %v3979_v33, %v3144_v7  ;;  %v3864_v17 = vpop.permute.xlu1 %3863  ;;  %v3783_v51 = vld [vmem:[#allocation4 + $0x50] sm:$0xff]  ;;  %v3791_v55 = vld [vmem:[#allocation4 + $0x60] sm:$0xff] }
 0x517   : > { %v3981_v49 = vmul.f32 %v3864_v17, %v3789_v61  ;;  %v3975_v48 = vmul.f32 %v8207_v0, %v3783_v51  ;;  %v3792_v0 = vld [vmem:[#allocation4 + $0xf0] sm:$0xff]  ;;  %v3798_v61 = vld [vmem:[#allocation4 + $0xc8] sm:$0xff] }
 0x518   : > { %4035 = vst [vmem:[%s5081_s1] sm:$0xff] %v4003_v14 }
 0x519   : > { %4043 = vst [vmem:[%s5081_s1 + $0x40] sm:$0xff] %v4011_v2 }
 0x51a   : > { %v3163_v6 = vpop.f32.mrf.mxu2 }
 0x51b   : > { %v8263_v63 = vpop.f32.mrf.mxu3  ;;  %v3125_v42 = vpop.f32.mrf.mxu0  ;;  %v3164_v59 = vadd.f32 %v8253_v23, %v3163_v6 }
 0x51c   : > { %v3126_v25 = vadd.f32 %v8253_v23, %v3125_v42  ;;  %v3145_v58 = vpop.f32.mrf.mxu1  ;;  %v3859_v54 = vpop.permute.xlu0 %3858  ;;  %v3805_v42 = vld [vmem:[#allocation4 + $0x10] sm:$0xff] }
 0x51d   : > { %v3146_v52 = vadd.f32 %v8253_v23, %v3145_v58  ;;  %v3980_v47 = vmul.f32 %v3859_v54, %v3788_v1  ;;  %v3914_v34 = vpop.permute.xlu2 %3913  ;;  %v3799_v54 = vld [vmem:[#allocation4 + $0xe0] sm:$0xff] }
 0x51e   : > { %v4004_v30 = vadd.f32 %v3972_v26, %v3126_v25 }
 0x51f   : > { %v4012_v53 = vadd.f32 %v3980_v47, %v3146_v52  ;;  %v3784_v47 = vld [vmem:[#allocation4 + $0x68] sm:$0xff] }
 0x520   : > { %4036 = vst [vmem:[%s5081_s1 + $0x8] sm:$0xff] %v4004_v30 }
 0x521   : > { %4044 = vst [vmem:[%s5081_s1 + $0x48] sm:$0xff] %v4012_v53  ;;  %v3991_v53 = vmul.f32 %v3914_v34, %v3799_v54 }
 0x522   : > { %v3165_v44 = vpop.f32.mrf.mxu2 }
 0x523   : > { %v3166_v13 = vadd.f32 %v8253_v23, %v3165_v44  ;;  %v8270_v21 = vpop.f32.mrf.mxu3  ;;  %v3128_v36 = vpop.f32.mrf.mxu0 }
 0x524   : > { %v3129_v41 = vadd.f32 %v8253_v23, %v3128_v36  ;;  %v3148_v40 = vpop.f32.mrf.mxu1  ;;  %v3879_v60 = vpop.permute.xlu1 %3878 }
 0x525   : > { %v4020_v27 = vadd.f32 %v3988_v38, %v3166_v13  ;;  %v3149_v3 = vadd.f32 %v8253_v23, %v3148_v40  ;;  %v3976_v13 = vmul.f32 %v8243_v29, %v3784_v47  ;;  %v3984_v40 = vmul.f32 %v3879_v60, %v3792_v0 }
 0x526   : > { %v4005_v12 = vadd.f32 %v3973_v16, %v3129_v41 }
 0x527   : > { %4052 = vst [vmem:[%s5081_s1 + $0x88] sm:$0xff] %v4020_v27  ;;  %v4013_v5 = vadd.f32 %v3981_v49, %v3149_v3  ;;  %v3874_v46 = vpop.permute.xlu0 %3873 }
 0x528   : > { %4037 = vst [vmem:[%s5081_s1 + $0x10] sm:$0xff] %v4005_v12  ;;  %v8281_v18 = vpop.permute.xlu2 %3928  ;;  %v3983_v62 = vmul.f32 %v3874_v46, %v3791_v55 }
 0x529   : > { %4045 = vst [vmem:[%s5081_s1 + $0x50] sm:$0xff] %v4013_v5  ;;  %v3797_v5 = vld [vmem:[#allocation4 + $0x40] sm:$0xff] }
 0x52a   : > { %v8277_v15 = vpop.f32.mrf.mxu2 }
 0x52b   : > { %v3188_v31 = vpop.f32.mrf.mxu3  ;;  %v3130_v4 = vpop.f32.mrf.mxu0  ;;  %v3169_v19 = vadd.f32 %v8253_v23, %v8277_v15 }
 0x52c   : > { %v3131_v57 = vadd.f32 %v8253_v23, %v3130_v4  ;;  %v3150_v11 = vpop.f32.mrf.mxu1  ;;  %v3189_v17 = vadd.f32 %v8253_v23, %v3188_v31  ;;  %v3808_v4 = vld [vmem:[#allocation4 + $0xf8] sm:$0xff] }
 0x52d   : > { %v3151_v56 = vadd.f32 %v8253_v23, %v3150_v11  ;;  %v3894_v22 = vpop.permute.xlu1 %3893  ;;  %v3785_v11 = vld [vmem:[#allocation4 + $0x30] sm:$0xff] }
 0x52e   : > { %v4006_v20 = vadd.f32 %v3974_v9, %v3131_v57  ;;  %v3987_v33 = vmul.f32 %v3894_v22, %v3795_v50  ;;  %v3793_v57 = vld [vmem:[#allocation4 + $0x8] sm:$0xff] }
 0x52f   : > { %v4014_v35 = vadd.f32 %v3982_v32, %v3151_v56 }
 0x530   : > { %4038 = vst [vmem:[%s5081_s1 + $0x18] sm:$0xff] %v4006_v20  ;;  %v4019_v7 = vadd.f32 %v3987_v33, %v3164_v59  ;;  %v3985_v59 = vmul.f32 %v8248_v45, %v3793_v57  ;;  %v3977_v33 = vmul.f32 %v8257_v37, %v3785_v11 }
 0x531   : > { %4046 = vst [vmem:[%s5081_s1 + $0x58] sm:$0xff] %v4014_v35  ;;  %v8294_v25 = vpop.permute.xlu0 %3888 }
 0x532   : > { %v3170_v24 = vpop.f32.mrf.mxu2  ;;  %4051 = vst [vmem:[%s5081_s1 + $0x80] sm:$0xff] %v4019_v7 }
 0x533   : > { %v8287_v28 = vpop.f32.mrf.mxu3  ;;  %v3133_v14 = vpop.f32.mrf.mxu0  ;;  %v3171_v36 = vadd.f32 %v8253_v23, %v3170_v24 }
 0x534   : > { %v3153_v2 = vpop.f32.mrf.mxu1  ;;  %v3134_v6 = vadd.f32 %v8253_v23, %v3133_v14 }
 0x535   : > { %v3154_v26 = vadd.f32 %v8253_v23, %v3153_v2  ;;  %v3944_v1 = vpop.permute.xlu2 %3943 }
 0x536   : > { %v4007_v58 = vadd.f32 %v3975_v48, %v3134_v6  ;;  %v3997_v30 = vmul.f32 %v3944_v1, %v3805_v42  ;;  %v3801_v48 = vld [vmem:[#allocation4 + $0x70] sm:$0xff]  ;;  %v3794_v6 = vld [vmem:[#allocation4 + $0x78] sm:$0xff] }
 0x537   : > { %v4015_v52 = vadd.f32 %v3983_v62, %v3154_v26  ;;  %v3786_v62 = vld [vmem:[#allocation4 + $0x48] sm:$0xff]  ;;  %v3800_v42 = vld [vmem:[#allocation4 + $0x90] sm:$0xff]  ;;  %v3986_v47 = vmul.f32 %v8294_v25, %v3794_v6 }
 0x538   : > { %4039 = vst [vmem:[%s5081_s1 + $0x20] sm:$0xff] %v4007_v58  ;;  %v4029_v8 = vadd.f32 %v3997_v30, %v3189_v17  ;;  %v3978_v58 = vmul.f32 %v8255_v10, %v3786_v62 }
 0x539   : > { %4047 = vst [vmem:[%s5081_s1 + $0x60] sm:$0xff] %v4015_v52 }
 0x53a   : > { %v3173_v43 = vpop.f32.mrf.mxu2  ;;  %4061 = vst [vmem:[%s5081_s1 + $0xd0] sm:$0xff] %v4029_v8 }
 0x53b   : > { %v3174_v44 = vadd.f32 %v8253_v23, %v3173_v43  ;;  %v8299_v38 = vpop.f32.mrf.mxu3  ;;  %v3135_v16 = vpop.f32.mrf.mxu0 }
 0x53c   : > { %v3155_v41 = vpop.f32.mrf.mxu1  ;;  %v3909_v49 = vpop.permute.xlu1 %3908  ;;  %v3136_v3 = vadd.f32 %v8253_v23, %v3135_v16  ;;  %v3186_v16 = vadd.f32 %v8253_v23, %v8270_v21 }
 0x53d   : > { %v4023_v27 = vadd.f32 %v3991_v53, %v3174_v44  ;;  %v3156_v34 = vadd.f32 %v8253_v23, %v3155_v41  ;;  %v3990_v12 = vmul.f32 %v3909_v49, %v3798_v61  ;;  %v3804_v61 = vld [vmem:[#allocation4 + $0xd0] sm:$0xff]  ;;  %v3803_v49 = vld [vmem:[#allocation4 + $0xa8] sm:$0xff] }
 0x53e   : > { %v4008_v39 = vadd.f32 %v3976_v13, %v3136_v3 }
 0x53f   : > { %4055 = vst [vmem:[%s5081_s1 + $0xa0] sm:$0xff] %v4023_v27  ;;  %v4016_v29 = vadd.f32 %v3984_v40, %v3156_v34  ;;  %v4022_v31 = vadd.f32 %v3990_v12, %v3171_v36  ;;  %v3959_v9 = vpop.permute.xlu2 %3958  ;;  %v3904_v60 = vpop.permute.xlu0 %3903  ;;  %v3802_v36 = vld [vmem:[#allocation4 + $0xc0] sm:$0xff] }
 0x540   : > { %4040 = vst [vmem:[%s5081_s1 + $0x28] sm:$0xff] %v4008_v39  ;;  %v3989_v32 = vmul.f32 %v3904_v60, %v3797_v5  ;;  %v4000_v56 = vmul.f32 %v3959_v9, %v3808_v4  ;;  %v3994_v40 = vmul.f32 %v8281_v18, %v3802_v36  ;;  %v3184_v5 = vadd.f32 %v8253_v23, %v8263_v63  ;;  %v3806_v60 = vld [vmem:[#allocation4 + $0x28] sm:$0xff] }
 0x541   : > { %4054 = vst [vmem:[%s5081_s1 + $0x98] sm:$0xff] %v4022_v31  ;;  %v3194_v18 = vadd.f32 %v8253_v23, %v8299_v38  ;;  %v3191_v63 = vadd.f32 %v8253_v23, %v8287_v28  ;;  %v3809_v38 = vld [vmem:[#allocation4 + $0x20] sm:$0xff] }
 0x542   : > { %v3175_v46 = vpop.f32.mrf.mxu2  ;;  %4048 = vst [vmem:[%s5081_s1 + $0x68] sm:$0xff] %v4016_v29  ;;  %v4021_v20 = vadd.f32 %v3989_v32, %v3169_v19  ;;  %v3807_v19 = vld [vmem:[#allocation4 + $0xa0] sm:$0xff] }
 0x543   : > { %v3195_v50 = vpop.f32.mrf.mxu3  ;;  %v3138_v15 = vpop.f32.mrf.mxu0  ;;  %v3176_v45 = vadd.f32 %v8253_v23, %v3175_v46  ;;  %v3810_v46 = vld [vmem:[#allocation4 + $0x98] sm:$0xff] }
 0x544   : > { %v3196_v22 = vadd.f32 %v8253_v23, %v3195_v50  ;;  %v3158_v35 = vpop.f32.mrf.mxu1  ;;  %v3139_v24 = vadd.f32 %v8253_v23, %v3138_v15  ;;  %4053 = vst [vmem:[%s5081_s1 + $0x90] sm:$0xff] %v4021_v20  ;;  %v3924_v7 = vpop.permute.xlu1 %3923 }
 0x545   : > { %v3159_v51 = vadd.f32 %v8253_v23, %v3158_v35  ;;  %v3993_v26 = vmul.f32 %v3924_v7, %v3801_v48 }
 0x546   : > { %v4032_v55 = vadd.f32 %v4000_v56, %v3196_v22  ;;  %v4009_v14 = vadd.f32 %v3977_v33, %v3139_v24 }
 0x547   : > { %v4017_v2 = vadd.f32 %v3985_v59, %v3159_v51 }
 0x548   : > { %4064 = vst [vmem:[%s5081_s1 + $0xe8] sm:$0xff] %v4032_v55 }
 0x549   : > { %4041 = vst [vmem:[%s5081_s1 + $0x30] sm:$0xff] %v4009_v14  ;;  %v3919_v17 = vpop.permute.xlu0 %3918 }
 0x54a   : > { %4049 = vst [vmem:[%s5081_s1 + $0x70] sm:$0xff] %v4017_v2  ;;  %v3178_v37 = vpop.f32.mrf.mxu2  ;;  %v3992_v52 = vmul.f32 %v3919_v17, %v3800_v42 }
 0x54b   : > { %v3179_v1 = vadd.f32 %v8253_v23, %v3178_v37  ;;  %v3140_v54 = vpop.f32.mrf.mxu0  ;;  %v3198_v29 = vpop.f32.mrf.mxu3 }
 0x54c   : > { %v3160_v30 = vpop.f32.mrf.mxu1  ;;  %v3141_v8 = vadd.f32 %v8253_v23, %v3140_v54  ;;  %v4024_v53 = vadd.f32 %v3992_v52, %v3176_v45  ;;  %v3199_v35 = vadd.f32 %v8253_v23, %v3198_v29 }
 0x54d   : > { %v4025_v0 = vadd.f32 %v3993_v26, %v3179_v1  ;;  %v3161_v43 = vadd.f32 %v8253_v23, %v3160_v30 }
 0x54e   : > { %v4010_v44 = vadd.f32 %v3978_v58, %v3141_v8  ;;  %4056 = vst [vmem:[%s5081_s1 + $0xa8] sm:$0xff] %v4024_v53  ;;  %v3939_v10 = vpop.permute.xlu1 %3938 }
 0x54f   : > { %4057 = vst [vmem:[%s5081_s1 + $0xb0] sm:$0xff] %v4025_v0  ;;  %v4018_v13 = vadd.f32 %v3986_v47, %v3161_v43  ;;  %v3996_v25 = vmul.f32 %v3939_v10, %v3804_v61 }
 0x550   : > { %4042 = vst [vmem:[%s5081_s1 + $0x38] sm:$0xff] %v4010_v44 }
 0x551   : > { %4050 = vst [vmem:[%s5081_s1 + $0x78] sm:$0xff] %v4018_v13  ;;  %v4028_v3 = vadd.f32 %v3996_v25, %v3186_v16 }
 0x552   : > { %v3180_v41 = vpop.f32.mrf.mxu2 }
 0x553   : > { %v3181_v27 = vadd.f32 %v8253_v23, %v3180_v41  ;;  %v3934_v34 = vpop.permute.xlu0 %3933  ;;  %4060 = vst [vmem:[%s5081_s1 + $0xc8] sm:$0xff] %v4028_v3  ;;  %v3200_v57 = vpop.f32.mrf.mxu3 }
 0x554   : > { %v3995_v39 = vmul.f32 %v3934_v34, %v3803_v49  ;;  %v3201_v50 = vadd.f32 %v8253_v23, %v3200_v57 }
 0x555   : > { %v4026_v12 = vadd.f32 %v3994_v40, %v3181_v27 }
 0x556   : > { %v4027_v21 = vadd.f32 %v3995_v39, %v3184_v5 }
 0x557   : > { %4058 = vst [vmem:[%s5081_s1 + $0xb8] sm:$0xff] %v4026_v12 }
 0x558   : > { %4059 = vst [vmem:[%s5081_s1 + $0xc0] sm:$0xff] %v4027_v21 }
 0x55b   : > { %v3954_v31 = vpop.permute.xlu1 %3953 }
 0x55c   : > { %v3999_v4 = vmul.f32 %v3954_v31, %v3807_v19 }
 0x55e   : > { %v4031_v9 = vadd.f32 %v3999_v4, %v3194_v18 }
 0x560   : > { %4063 = vst [vmem:[%s5081_s1 + $0xe0] sm:$0xff] %v4031_v9  ;;  %v3949_v11 = vpop.permute.xlu0 %3948 }
 0x561   : > { %v3998_v32 = vmul.f32 %v3949_v11, %v3806_v60 }
 0x563   : > { %v4030_v56 = vadd.f32 %v3998_v32, %v3191_v63  ;;  %v3969_v20 = vpop.permute.xlu1 %3968 }
 0x564   : > { %v4002_v22 = vmul.f32 %v3969_v20, %v3810_v46 }
 0x565   : > { %4062 = vst [vmem:[%s5081_s1 + $0xd8] sm:$0xff] %v4030_v56 }
 0x566   : > { %v4034_v15 = vadd.f32 %v4002_v22, %v3201_v50 }
 0x568   : > { %v3964_v59 = vpop.permute.xlu0 %3963  ;;  %4066 = vst [vmem:[%s5081_s1 + $0xf8] sm:$0xff] %v4034_v15 }
 0x569   : > { %v4001_v33 = vmul.f32 %v3964_v59, %v3809_v38 }
 0x56b   : > { %v4033_v24 = vadd.f32 %v4001_v33, %v3199_v35 }
 0x56d   : > { %4065 = vst [vmem:[%s5081_s1 + $0xf0] sm:$0xff] %v4033_v24 }
 0x56e PF: > { %s17_s30 = sadd.s32 1, %s4927_s30   ;;  %s9415_s9 = sld [smem:[#allocation6_spill]] }
 0x56f   : > { %p14_p1 = scmp.ge.s32.totalorder %s17_s30, 6   ;;  %s9416_s8 = sld [smem:[#allocation7_spill]] }
 0x570   : > { %s9417_s24 = smov %s4907_s25  ;;  %s9418_s25 = smov %s5024_s14 }
 0x571   : > { %s9419_s26 = smov %s4919_s28  ;;  %s9420_s27 = smov %s4923_s29 }
 0x572   :  { %16 = sbr.rel (!%p14_p1) target bundleno = 7 (0x7), region = 126 }
 0x574   : > { %s9421_s28 = smov %s9415_s9 }
 0x575   : > { %s9422_s29 = smov %s9416_s8 }

</bundles_post_ra>
